<compile_context>
chip_gen: v7x
topology: tpu7x:2x2x1
jax: 0.10.0
libtpu: 0.0.40
codegen_flags: <defaults>
</compile_context>

<pallas_src>
import functools

import jax
import jax.numpy as jnp
from jax import lax
from jax.experimental import pallas as pl
from jax.experimental.pallas import tpu as pltpu

LANE = 128


def _largest_divisor_under(n, bytes_per_unit, budget):
    best = 1
    for d in range(1, n + 1):
        if n % d == 0 and d * bytes_per_unit <= budget:
            best = d
    return best


# ---------------------------------------------------------------------------
# Pallas kernels
# ---------------------------------------------------------------------------
def _conv_block_kernel(x_ref, w_ref, b_ref, o_ref, *, kh, kw, TH, Wo, nh, slope,
                       fold_rows):
    """Direct conv as tap-accumulated MXU matmuls over a block of TH output rows.

    x_ref : (1, Hin, Win, Cin) bf16 -- whole padded (possibly s2d) image for batch n
    w_ref : (kh, kw, Cin, tn)  bf16 -- resident: index_map depends only on j (outermost)
    b_ref : (1, tn)            f32
    o_ref : (1, TH, Wo, tn)
    """
    tn = o_ref.shape[-1]
    if nh == 1:
        x = x_ref[0]                                          # (TH+kh-1, Win, Cin)
    else:
        x = x_ref[0, pl.ds(pl.program_id(2) * TH, TH + kh - 1)]

    if fold_rows:
        # Big-M path: merge the TH rows into the matmul M dimension (Wo % 8 == 0,
        # so the collapse is layout preserving).
        m = TH * Wo
        acc = jnp.zeros((m, tn), jnp.float32)
        for di in range(kh):                                  # static unroll: tap reduction
            for dj in range(kw):
                sl = x[di:di + TH, dj:dj + Wo, :].reshape(m, -1)
                acc = acc + jnp.dot(sl, w_ref[di, dj],
                                    preferred_element_type=jnp.float32)
        y = acc + b_ref[...]
        if slope is not None:
            y = jnp.maximum(y, slope * y)                     # fused LeakyReLU
        o_ref[0] = y.reshape(TH, Wo, tn).astype(o_ref.dtype)
    else:
        # Small deep layers (Wo not a multiple of 8): per-row matmuls, still with
        # resident weights and in-kernel tap reduction.
        for t in range(TH):
            acc = jnp.zeros((Wo, tn), jnp.float32)
            for di in range(kh):
                for dj in range(kw):
                    sl = x[t + di, dj:dj + Wo, :]
                    acc = acc + jnp.dot(sl, w_ref[di, dj],
                                        preferred_element_type=jnp.float32)
            y = acc + b_ref[...]
            if slope is not None:
                y = jnp.maximum(y, slope * y)
            o_ref[0, t] = y.astype(o_ref.dtype)


def _bn_stats_kernel(x_ref, s_ref):
    """Per-channel sum / sum-of-squares accumulated over the whole grid."""
    @pl.when(jnp.logical_and(pl.program_id(0) == 0, pl.program_id(1) == 0))
    def _():
        s_ref[...] = jnp.zeros_like(s_ref)

    x = x_ref[0].astype(jnp.float32)                          # (TH, W, C)
    s1 = jnp.sum(x, axis=0)                                   # (W, C)
    s2 = jnp.sum(x * x, axis=0)
    s_ref[...] += jnp.concatenate(
        [jnp.sum(s1, axis=0, keepdims=True),
         jnp.sum(s2, axis=0, keepdims=True)], axis=0)         # (2, C)


def _bn_apply_kernel(x_ref, sc_ref, sh_ref, o_ref, *, slope):
    """y = x*scale + shift, then LeakyReLU; scale/shift precomputed in XLA."""
    x = x_ref[0].astype(jnp.float32)                          # (TH, W, C)
    y = x * sc_ref[...] + sh_ref[...]
    o_ref[0] = jnp.maximum(y, slope * y).astype(o_ref.dtype)


# ---------------------------------------------------------------------------
# Wrappers
# ---------------------------------------------------------------------------
def conv2d_pallas(x, w_oihw, bias, stride, slope, out_dtype):
    """4x4 conv, padding=1, stride in {1,2}, NHWC activations, real channel widths."""
    N, H, W, cin_x = x.shape
    cout, cin, kh0, kw0 = w_oihw.shape
    assert (kh0, kw0) == (4, 4) and cin == cin_x

    # Cout tiling: keep real channel widths (masked stores are cheaper than 8x
    # byte amplification); only the 1-channel head is padded to a lane tile.
    if cout % LANE == 0:
        cout_p, tn = cout, (256 if cout % 256 == 0 else LANE)
    elif cout % 8 == 0:
        cout_p, tn = cout, cout
    else:
        cout_p, tn = LANE, LANE
    nj = cout_p // tn

    w_f = w_oihw.astype(jnp.float32)
    if cout_p != cout:
        w_f = jnp.zeros((cout_p, cin, 4, 4), jnp.float32).at[:cout].set(w_f)

    x_pad = jnp.pad(x, ((0, 0), (1, 1), (1, 1), (0, 0)))
    if stride == 2:
        # Space-to-depth: k4/s2/p1 conv == k2/s1 conv on the 2x2-blocked padded
        # input (channel order (row_parity, col_parity, c)).
        assert H % 2 == 0 and W % 2 == 0
        hp, wp = H + 2, W + 2
        xs = x_pad.reshape(N, hp // 2, 2, wp // 2, 2, cin)
        xs = jnp.transpose(xs, (0, 1, 3, 2, 4, 5)).reshape(N, hp // 2, wp // 2, 4 * cin)
        wk = w_f.reshape(cout_p, cin, 2, 2, 2, 2)             # (co, c, qi, pi, qj, pj)
        wk = jnp.transpose(wk, (2, 4, 3, 5, 1, 0)).reshape(2, 2, 4 * cin, cout_p)
        kh = kw = 2
    else:
        xs = x_pad
        wk = jnp.transpose(w_f, (2, 3, 1, 0))                 # (di, dj, c, co)
        kh = kw = 4

    _, hin, win, cin_k = xs.shape
    ho, wo = hin - kh + 1, win - kw + 1

    b_p = jnp.zeros((1, cout_p), jnp.float32)
    if bias is not None:
        b_p = b_p.at[0, :cout].set(bias.astype(jnp.float32))

    xs = xs.astype(jnp.bfloat16)       # bf16 MXU operands, f32 accumulation
    wk = wk.astype(jnp.bfloat16)

    # Row blocking: biggest divisor of Ho whose per-block working set stays small
    # (also fits v7x's 64 MiB VMEM with double-buffering at realistic sizes).
    row_bytes = wo * tn * 4 + win * cin_k * 2
    TH = _largest_divisor_under(ho, row_bytes, 2 << 20)
    nh = ho // TH
    fold_rows = (wo % 8 == 0)

    grid = (nj, N, nh)
    flops = 2 * N * ho * wo * kh * kw * cin_k * cout_p
    bytes_accessed = (nj * kh * kw * cin_k * tn * 2
                      + nj * N * hin * win * cin_k * 2
                      + N * ho * wo * cout_p * jnp.dtype(out_dtype).itemsize)

    out = pl.pallas_call(
        functools.partial(_conv_block_kernel, kh=kh, kw=kw, TH=TH, Wo=wo,
                          nh=nh, slope=slope, fold_rows=fold_rows),
        out_shape=jax.ShapeDtypeStruct((N, ho, wo, cout_p), out_dtype),
        grid=grid,
        in_specs=[
            # whole padded image per batch item (tiny for this net); halo handled in-kernel
            pl.BlockSpec((1, hin, win, cin_k), lambda j, n, hb: (n, 0, 0, 0)),
            # full-tap weight slab, resident per Cout tile (j outermost)
            pl.BlockSpec((kh, kw, cin_k, tn), lambda j, n, hb: (0, 0, 0, j)),
            pl.BlockSpec((1, tn), lambda j, n, hb: (0, j)),
        ],
        out_specs=pl.BlockSpec((1, TH, wo, tn), lambda j, n, hb: (n, hb, 0, j)),
        compiler_params=pltpu.CompilerParams(
            dimension_semantics=("parallel", "parallel", "parallel")),
        cost_estimate=pl.CostEstimate(flops=int(flops), transcendentals=0,
                                      bytes_accessed=int(bytes_accessed)),
    )(xs, wk, b_p)

    if cout_p != cout:
        out = out[..., :cout]          # drop lane padding of the 1-channel head
    return out


def batchnorm_leaky_pallas(x, gamma, beta, eps=1e-5, slope=0.2):
    """Training-mode BatchNorm2d + LeakyReLU on NHWC activations."""
    N, H, W, C = x.shape
    TH = _largest_divisor_under(H, W * C * 4, 4 << 20)
    nh = H // TH

    # Pass 1: per-channel sum / sumsq over large blocks, accumulated into a
    # resident (2, C) output ("arbitrary" grid).
    stats = pl.pallas_call(
        _bn_stats_kernel,
        out_shape=jax.ShapeDtypeStruct((2, C), jnp.float32),
        grid=(N, nh),
        in_specs=[pl.BlockSpec((1, TH, W, C), lambda n, hb: (n, hb, 0, 0))],
        out_specs=pl.BlockSpec((2, C), lambda n, hb: (0, 0)),
        compiler_params=pltpu.CompilerParams(
            dimension_semantics=("arbitrary", "arbitrary")),
    )(x)

    # Precompute per-channel scale / shift once (tiny XLA ops).
    count = float(N * H * W)
    mean = stats[0] / count
    var = jnp.maximum(stats[1] / count - mean * mean, 0.0)
    inv = lax.rsqrt(var + eps)
    g = gamma.astype(jnp.float32)
    scale = (g * inv).reshape(1, C)
    shift = (beta.astype(jnp.float32) - mean * g * inv).reshape(1, C)

    # Pass 2: single FMA + LeakyReLU, fully parallel.
    return pl.pallas_call(
        functools.partial(_bn_apply_kernel, slope=slope),
        out_shape=jax.ShapeDtypeStruct(x.shape, x.dtype),
        grid=(N, nh),
        in_specs=[
            pl.BlockSpec((1, TH, W, C), lambda n, hb: (n, hb, 0, 0)),
            pl.BlockSpec((1, C), lambda n, hb: (0, 0)),
            pl.BlockSpec((1, C), lambda n, hb: (0, 0)),
        ],
        out_specs=pl.BlockSpec((1, TH, W, C), lambda n, hb: (n, hb, 0, 0)),
        compiler_params=pltpu.CompilerParams(
            dimension_semantics=("parallel", "parallel")),
    )(x, scale, shift)


# ---------------------------------------------------------------------------
# NLayerDiscriminator parameters + forward
# ---------------------------------------------------------------------------
def init_params(key, img_channels=3, start_channels=64, n_layers=3, dtype=jnp.float32):
    keys = iter(jax.random.split(key, 64))

    def nrm(shape, scale=0.05):
        return scale * jax.random.normal(next(keys), shape, dtype)

    params = []
    params.append(dict(kind="conv", w=nrm((start_channels, img_channels, 4, 4)),
                       b=nrm((start_channels,)), stride=2, slope=0.2))
    fm = 1
    for n in range(1, n_layers):
        fm_last, fm = fm, min(2 ** n, 8)
        cin, cout = start_channels * fm_last, start_channels * fm
        params.append(dict(kind="conv_bn", w=nrm((cout, cin, 4, 4)),
                           gamma=1.0 + nrm((cout,)), beta=nrm((cout,)), stride=2))
    fm_last, fm = fm, min(2 ** n_layers, 8)
    cin, cout = start_channels * fm_last, start_channels * fm
    params.append(dict(kind="conv_bn", w=nrm((cout, cin, 4, 4)),
                       gamma=1.0 + nrm((cout,)), beta=nrm((cout,)), stride=1))
    params.append(dict(kind="conv", w=nrm((1, cout, 4, 4)),
                       b=nrm((1,)), stride=1, slope=None))
    return params


def nlayer_discriminator_forward(params, x_nchw):
    h = jnp.transpose(x_nchw, (0, 2, 3, 1)).astype(jnp.bfloat16)   # NCHW -> NHWC, bf16 once
    last = len(params) - 1
    for li, p in enumerate(params):
        if p["kind"] == "conv":
            h = conv2d_pallas(h, p["w"], p["b"], p["stride"], slope=p["slope"],
                              out_dtype=jnp.float32 if li == last else jnp.bfloat16)
        else:  # conv (no bias) + BatchNorm (batch stats) + LeakyReLU
            h = conv2d_pallas(h, p["w"], None, p["stride"], slope=None,
                              out_dtype=jnp.bfloat16)
            h = batchnorm_leaky_pallas(h, p["gamma"], p["beta"], eps=1e-5, slope=0.2)
    return jnp.transpose(h, (0, 3, 1, 2)).astype(jnp.float32)       # NHWC -> NCHW


# Pure-JAX reference with the same dtype flow (bf16 operands, f32 accumulation,
# bf16 intermediate stores) for a numerical check of the Pallas path.
def reference_forward(params, x_nchw):
    h = jnp.transpose(x_nchw, (0, 2, 3, 1)).astype(jnp.bfloat16)
    last = len(params) - 1
    for li, p in enumerate(params):
        s = p["stride"]
        y = lax.conv_general_dilated(
            h, p["w"].astype(jnp.bfloat16), (s, s), ((1, 1), (1, 1)),
            dimension_numbers=("NHWC", "OIHW", "NHWC"),
            preferred_element_type=jnp.float32)
        if p["kind"] == "conv":
            y = y + p["b"].astype(jnp.float32).reshape(1, 1, 1, -1)
            if p["slope"] is not None:
                y = jnp.maximum(y, p["slope"] * y)
            h = y if li == last else y.astype(jnp.bfloat16)
        else:
            xf = y.astype(jnp.bfloat16).astype(jnp.float32)
            mean = jnp.mean(xf, axis=(0, 1, 2))
            var = jnp.maximum(jnp.mean(xf * xf, axis=(0, 1, 2)) - mean * mean, 0.0)
            inv = lax.rsqrt(var + 1e-5)
            g = p["gamma"].astype(jnp.float32)
            z = xf * (g * inv) + (p["beta"].astype(jnp.float32) - mean * g * inv)
            h = jnp.maximum(z, 0.2 * z).astype(jnp.bfloat16)
    return jnp.transpose(h, (0, 3, 1, 2)).astype(jnp.float32)


if __name__ == "__main__":
    key = jax.random.PRNGKey(0)
    k_params, k_x = jax.random.split(key)

    img_channels, start_channels, n_layers = 3, 16, 3
    params = init_params(k_params, img_channels, start_channels, n_layers)

    # 32x32 input so the final k4/s1/p1 convs still have valid spatial extent.
    x = jax.random.normal(k_x, (2, img_channels, 32, 32), jnp.float32)

    fwd = jax.jit(lambda xx: nlayer_discriminator_forward(params, xx))
    out = jax.block_until_ready(fwd(x))

    # 32 -> 16 -> 8 -> 4 -> 3 -> 2  => (N, 1, 2, 2)
    assert out.shape == (2, 1, 2, 2), out.shape
    assert bool(jnp.all(jnp.isfinite(out)))

    # Numerical check against the pure-JAX reference (same bf16/f32 dtype flow).
    ref = jax.block_until_ready(jax.jit(lambda xx: reference_forward(params, xx))(x))
    err = float(jnp.max(jnp.abs(out - ref)))
    scale = float(jnp.max(jnp.abs(ref))) + 1e-6
    assert err <= 0.05 * scale + 0.05, (err, scale)

    print("KERNEL_OK")
</pallas_src>

<mosaic_0001>
module attributes {stable_mosaic.version = 11 : i64} {
  func.func @_conv_block_kernel(%arg0: i32, %arg1: i32, %arg2: i32, %arg3: memref<1x17x17x12xbf16, #tpu.memory_space<vmem>>, %arg4: memref<2x2x12x16xbf16, #tpu.memory_space<vmem>>, %arg5: memref<1x16xf32, #tpu.memory_space<vmem>>, %arg6: memref<1x16x16x16xbf16, #tpu.memory_space<vmem>>) attributes {dimension_semantics = [#tpu.dimension_semantics<parallel>, #tpu.dimension_semantics<parallel>, #tpu.dimension_semantics<parallel>], iteration_bounds = array<i64: 1, 2, 1>, scalar_prefetch = 0 : i64, scratch_operands = 0 : i64, tpu.core_type = #tpu.core_type<tc>, window_params = [{transform_indices = @transform_0, window_bounds = array<i64: 1, 17, 17, 12>}, {transform_indices = @transform_1, window_bounds = array<i64: 2, 2, 12, 16>}, {transform_indices = @transform_2, window_bounds = array<i64: 1, 16>}, {transform_indices = @transform_3, window_bounds = array<i64: 1, 16, 16, 16>}]} {
    %c0 = arith.constant 0 : index
    %c0_0 = arith.constant 0 : index
    %c0_1 = arith.constant 0 : index
    %c0_2 = arith.constant 0 : index
    %0 = vector.load %arg3[%c0, %c0_0, %c0_1, %c0_2] : memref<1x17x17x12xbf16, #tpu.memory_space<vmem>>, vector<1x17x17x12xbf16>
    %1 = vector.shape_cast %0 : vector<1x17x17x12xbf16> to vector<17x17x12xbf16>
    %cst = arith.constant 0.000000e+00 : f32
    %2 = vector.broadcast %cst : f32 to vector<256x16xf32>
    %3 = vector.extract_strided_slice %1 {offsets = [0, 0, 0], sizes = [16, 16, 12], strides = [1, 1, 1]} : vector<17x17x12xbf16> to vector<16x16x12xbf16>
    %4 = vector.shape_cast %3 : vector<16x16x12xbf16> to vector<256x12xbf16>
    %c0_3 = arith.constant 0 : index
    %c0_4 = arith.constant 0 : index
    %c0_5 = arith.constant 0 : index
    %c0_6 = arith.constant 0 : index
    %5 = vector.load %arg4[%c0_3, %c0_4, %c0_5, %c0_6] : memref<2x2x12x16xbf16, #tpu.memory_space<vmem>>, vector<1x1x12x16xbf16>
    %6 = vector.shape_cast %5 : vector<1x1x12x16xbf16> to vector<12x16xbf16>
    %cst_7 = arith.constant dense<0.000000e+00> : vector<256x16xf32>
    %7 = tpu.matmul %4, %6, %cst_7 {dimension_numbers = #tpu.dot_dimension_numbers<[1], [0], [0], [1], [0, 0, 1, 1], [], []>} : vector<256x12xbf16>, vector<12x16xbf16>, vector<256x16xf32> -> vector<256x16xf32>
    %8 = arith.addf %2, %7 : vector<256x16xf32>
    %9 = vector.extract_strided_slice %1 {offsets = [0, 1, 0], sizes = [16, 16, 12], strides = [1, 1, 1]} : vector<17x17x12xbf16> to vector<16x16x12xbf16>
    %10 = vector.shape_cast %9 : vector<16x16x12xbf16> to vector<256x12xbf16>
    %c0_8 = arith.constant 0 : index
    %c1 = arith.constant 1 : index
    %c0_9 = arith.constant 0 : index
    %c0_10 = arith.constant 0 : index
    %11 = vector.load %arg4[%c0_8, %c1, %c0_9, %c0_10] : memref<2x2x12x16xbf16, #tpu.memory_space<vmem>>, vector<1x1x12x16xbf16>
    %12 = vector.shape_cast %11 : vector<1x1x12x16xbf16> to vector<12x16xbf16>
    %cst_11 = arith.constant dense<0.000000e+00> : vector<256x16xf32>
    %13 = tpu.matmul %10, %12, %cst_11 {dimension_numbers = #tpu.dot_dimension_numbers<[1], [0], [0], [1], [0, 0, 1, 1], [], []>} : vector<256x12xbf16>, vector<12x16xbf16>, vector<256x16xf32> -> vector<256x16xf32>
    %14 = arith.addf %8, %13 : vector<256x16xf32>
    %15 = vector.extract_strided_slice %1 {offsets = [1, 0, 0], sizes = [16, 16, 12], strides = [1, 1, 1]} : vector<17x17x12xbf16> to vector<16x16x12xbf16>
    %16 = vector.shape_cast %15 : vector<16x16x12xbf16> to vector<256x12xbf16>
    %c1_12 = arith.constant 1 : index
    %c0_13 = arith.constant 0 : index
    %c0_14 = arith.constant 0 : index
    %c0_15 = arith.constant 0 : index
    %17 = vector.load %arg4[%c1_12, %c0_13, %c0_14, %c0_15] : memref<2x2x12x16xbf16, #tpu.memory_space<vmem>>, vector<1x1x12x16xbf16>
    %18 = vector.shape_cast %17 : vector<1x1x12x16xbf16> to vector<12x16xbf16>
    %cst_16 = arith.constant dense<0.000000e+00> : vector<256x16xf32>
    %19 = tpu.matmul %16, %18, %cst_16 {dimension_numbers = #tpu.dot_dimension_numbers<[1], [0], [0], [1], [0, 0, 1, 1], [], []>} : vector<256x12xbf16>, vector<12x16xbf16>, vector<256x16xf32> -> vector<256x16xf32>
    %20 = arith.addf %14, %19 : vector<256x16xf32>
    %21 = vector.extract_strided_slice %1 {offsets = [1, 1, 0], sizes = [16, 16, 12], strides = [1, 1, 1]} : vector<17x17x12xbf16> to vector<16x16x12xbf16>
    %22 = vector.shape_cast %21 : vector<16x16x12xbf16> to vector<256x12xbf16>
    %c1_17 = arith.constant 1 : index
    %c1_18 = arith.constant 1 : index
    %c0_19 = arith.constant 0 : index
    %c0_20 = arith.constant 0 : index
    %23 = vector.load %arg4[%c1_17, %c1_18, %c0_19, %c0_20] : memref<2x2x12x16xbf16, #tpu.memory_space<vmem>>, vector<1x1x12x16xbf16>
    %24 = vector.shape_cast %23 : vector<1x1x12x16xbf16> to vector<12x16xbf16>
    %cst_21 = arith.constant dense<0.000000e+00> : vector<256x16xf32>
    %25 = tpu.matmul %22, %24, %cst_21 {dimension_numbers = #tpu.dot_dimension_numbers<[1], [0], [0], [1], [0, 0, 1, 1], [], []>} : vector<256x12xbf16>, vector<12x16xbf16>, vector<256x16xf32> -> vector<256x16xf32>
    %26 = arith.addf %20, %25 : vector<256x16xf32>
    %c0_22 = arith.constant 0 : index
    %c0_23 = arith.constant 0 : index
    %27 = vector.load %arg5[%c0_22, %c0_23] : memref<1x16xf32, #tpu.memory_space<vmem>>, vector<1x16xf32>
    %28 = vector.broadcast %27 : vector<1x16xf32> to vector<256x16xf32>
    %29 = arith.addf %26, %28 : vector<256x16xf32>
    %cst_24 = arith.constant 2.000000e-01 : f32
    %30 = vector.broadcast %cst_24 : f32 to vector<256x16xf32>
    %31 = arith.mulf %30, %29 : vector<256x16xf32>
    %32 = arith.maximumf %29, %31 : vector<256x16xf32>
    %33 = vector.shape_cast %32 : vector<256x16xf32> to vector<16x16x16xf32>
    %34 = arith.truncf %33 : vector<16x16x16xf32> to vector<16x16x16xbf16>
    %c0_25 = arith.constant 0 : index
    %c0_26 = arith.constant 0 : index
    %c0_27 = arith.constant 0 : index
    %c0_28 = arith.constant 0 : index
    %35 = vector.load %arg6[%c0_25, %c0_26, %c0_27, %c0_28] : memref<1x16x16x16xbf16, #tpu.memory_space<vmem>>, vector<1x16x16x16xbf16>
    %36 = vector.shape_cast %35 : vector<1x16x16x16xbf16> to vector<16x16x16xbf16>
    %37 = vector.shape_cast %34 : vector<16x16x16xbf16> to vector<1x16x16x16xbf16>
    tpu.vector_store %arg6[%c0_25, %c0_26, %c0_27, %c0_28], %37 {strides = array<i32>} : memref<1x16x16x16xbf16, #tpu.memory_space<vmem>>, vector<1x16x16x16xbf16>,
    return
  }
  func.func @transform_0(%arg0: i32, %arg1: i32, %arg2: i32) -> (i32, i32, i32, i32) {
    %c0_i32 = arith.constant 0 : i32
    %c0_i32_0 = arith.constant 0 : i32
    %c0_i32_1 = arith.constant 0 : i32
    %c0_i32_2 = arith.constant 0 : i32
    return %arg1, %c0_i32, %c0_i32_0, %c0_i32_1 : i32, i32, i32, i32
  }
  func.func @transform_1(%arg0: i32, %arg1: i32, %arg2: i32) -> (i32, i32, i32, i32) {
    %c0_i32 = arith.constant 0 : i32
    %c0_i32_0 = arith.constant 0 : i32
    %c0_i32_1 = arith.constant 0 : i32
    %c0_i32_2 = arith.constant 0 : i32
    return %c0_i32, %c0_i32_0, %c0_i32_1, %arg0 : i32, i32, i32, i32
  }
  func.func @transform_2(%arg0: i32, %arg1: i32, %arg2: i32) -> (i32, i32) {
    %c0_i32 = arith.constant 0 : i32
    %c0_i32_0 = arith.constant 0 : i32
    return %c0_i32, %arg0 : i32, i32
  }
  func.func @transform_3(%arg0: i32, %arg1: i32, %arg2: i32) -> (i32, i32, i32, i32) {
    %c0_i32 = arith.constant 0 : i32
    %c0_i32_0 = arith.constant 0 : i32
    return %arg1, %arg2, %c0_i32, %arg0 : i32, i32, i32, i32
  }
}

module attributes {stable_mosaic.version = 11 : i64} {
  func.func @_bn_stats_kernel(%arg0: i32, %arg1: i32, %arg2: memref<1x8x8x32xbf16, #tpu.memory_space<vmem>>, %arg3: memref<2x32xf32, #tpu.memory_space<vmem>>) attributes {dimension_semantics = [#tpu.dimension_semantics<arbitrary>, #tpu.dimension_semantics<arbitrary>], iteration_bounds = array<i64: 2, 1>, scalar_prefetch = 0 : i64, scratch_operands = 0 : i64, tpu.core_type = #tpu.core_type<tc>, window_params = [{transform_indices = @transform_0, window_bounds = array<i64: 1, 8, 8, 32>}, {pipeline_mode = #tpu.pipeline_mode<synchronous>, transform_indices = @transform_1, window_bounds = array<i64: 2, 32>}]} {
    %c0_i32 = arith.constant 0 : i32
    %0 = arith.cmpi eq, %arg0, %c0_i32 : i32
    %c0_i32_0 = arith.constant 0 : i32
    %1 = arith.cmpi eq, %arg1, %c0_i32_0 : i32
    %2 = arith.andi %0, %1 : i1
    %3 = arith.extui %2 : i1 to i32
    %c0_i32_1 = arith.constant 0 : i32
    %4 = arith.cmpi ne, %3, %c0_i32_1 : i32
    scf.if %4 {
      %cst_12 = arith.constant 0.000000e+00 : f32
      %19 = vector.broadcast %cst_12 : f32 to vector<2x32xf32>
      %c0_13 = arith.constant 0 : index
      %c0_14 = arith.constant 0 : index
      %20 = vector.load %arg3[%c0_13, %c0_14] : memref<2x32xf32, #tpu.memory_space<vmem>>, vector<2x32xf32>
      tpu.vector_store %arg3[%c0_13, %c0_14], %19 {strides = array<i32>} : memref<2x32xf32, #tpu.memory_space<vmem>>, vector<2x32xf32>,
    } else {
    }
    %c0 = arith.constant 0 : index
    %c0_2 = arith.constant 0 : index
    %c0_3 = arith.constant 0 : index
    %c0_4 = arith.constant 0 : index
    %5 = vector.load %arg2[%c0, %c0_2, %c0_3, %c0_4] : memref<1x8x8x32xbf16, #tpu.memory_space<vmem>>, vector<1x8x8x32xbf16>
    %6 = vector.shape_cast %5 : vector<1x8x8x32xbf16> to vector<8x8x32xbf16>
    %7 = arith.extf %6 : vector<8x8x32xbf16> to vector<8x8x32xf32>
    %cst = arith.constant dense<0.000000e+00> : vector<8x32xf32>
    %8 = vector.multi_reduction <add>, %7, %cst [0] : vector<8x8x32xf32> to vector<8x32xf32>
    %9 = arith.mulf %7, %7 : vector<8x8x32xf32>
    %cst_5 = arith.constant dense<0.000000e+00> : vector<8x32xf32>
    %10 = vector.multi_reduction <add>, %9, %cst_5 [0] : vector<8x8x32xf32> to vector<8x32xf32>
    %c0_6 = arith.constant 0 : index
    %c0_7 = arith.constant 0 : index
    %11 = vector.load %arg3[%c0_6, %c0_7] : memref<2x32xf32, #tpu.memory_space<vmem>>, vector<2x32xf32>
    %cst_8 = arith.constant dense<0.000000e+00> : vector<32xf32>
    %12 = vector.multi_reduction <add>, %8, %cst_8 [0] : vector<8x32xf32> to vector<32xf32>
    %13 = vector.shape_cast %12 : vector<32xf32> to vector<1x32xf32>
    %cst_9 = arith.constant dense<0.000000e+00> : vector<32xf32>
    %14 = vector.multi_reduction <add>, %10, %cst_9 [0] : vector<8x32xf32> to vector<32xf32>
    %15 = vector.shape_cast %14 : vector<32xf32> to vector<1x32xf32>
    %16 = tpu.concatenate %13, %15 in 0 : vector<1x32xf32>, vector<1x32xf32> -> vector<2x32xf32>
    %17 = arith.addf %11, %16 : vector<2x32xf32>
    %c0_10 = arith.constant 0 : index
    %c0_11 = arith.constant 0 : index
    %18 = vector.load %arg3[%c0_10, %c0_11] : memref<2x32xf32, #tpu.memory_space<vmem>>, vector<2x32xf32>
    tpu.vector_store %arg3[%c0_10, %c0_11], %17 {strides = array<i32>} : memref<2x32xf32, #tpu.memory_space<vmem>>, vector<2x32xf32>,
    return
  }
  func.func @transform_0(%arg0: i32, %arg1: i32) -> (i32, i32, i32, i32) {
    %c0_i32 = arith.constant 0 : i32
    %c0_i32_0 = arith.constant 0 : i32
    %c0_i32_1 = arith.constant 0 : i32
    return %arg0, %arg1, %c0_i32, %c0_i32_0 : i32, i32, i32, i32
  }
  func.func @transform_1(%arg0: i32, %arg1: i32) -> (i32, i32) {
    %c0_i32 = arith.constant 0 : i32
    %c0_i32_0 = arith.constant 0 : i32
    %c0_i32_1 = arith.constant 0 : i32
    return %c0_i32, %c0_i32_0 : i32, i32
  }
}

module attributes {stable_mosaic.version = 11 : i64} {
  func.func @_conv_block_kernel(%arg0: i32, %arg1: i32, %arg2: i32, %arg3: memref<1x9x9x64xbf16, #tpu.memory_space<vmem>>, %arg4: memref<2x2x64x32xbf16, #tpu.memory_space<vmem>>, %arg5: memref<1x32xf32, #tpu.memory_space<vmem>>, %arg6: memref<1x8x8x32xbf16, #tpu.memory_space<vmem>>) attributes {dimension_semantics = [#tpu.dimension_semantics<parallel>, #tpu.dimension_semantics<parallel>, #tpu.dimension_semantics<parallel>], iteration_bounds = array<i64: 1, 2, 1>, scalar_prefetch = 0 : i64, scratch_operands = 0 : i64, tpu.core_type = #tpu.core_type<tc>, window_params = [{transform_indices = @transform_0, window_bounds = array<i64: 1, 9, 9, 64>}, {transform_indices = @transform_1, window_bounds = array<i64: 2, 2, 64, 32>}, {transform_indices = @transform_2, window_bounds = array<i64: 1, 32>}, {transform_indices = @transform_3, window_bounds = array<i64: 1, 8, 8, 32>}]} {
    %c0 = arith.constant 0 : index
    %c0_0 = arith.constant 0 : index
    %c0_1 = arith.constant 0 : index
    %c0_2 = arith.constant 0 : index
    %0 = vector.load %arg3[%c0, %c0_0, %c0_1, %c0_2] : memref<1x9x9x64xbf16, #tpu.memory_space<vmem>>, vector<1x9x9x64xbf16>
    %1 = vector.shape_cast %0 : vector<1x9x9x64xbf16> to vector<9x9x64xbf16>
    %cst = arith.constant 0.000000e+00 : f32
    %2 = vector.broadcast %cst : f32 to vector<64x32xf32>
    %3 = vector.extract_strided_slice %1 {offsets = [0, 0, 0], sizes = [8, 8, 64], strides = [1, 1, 1]} : vector<9x9x64xbf16> to vector<8x8x64xbf16>
    %4 = vector.shape_cast %3 : vector<8x8x64xbf16> to vector<64x64xbf16>
    %c0_3 = arith.constant 0 : index
    %c0_4 = arith.constant 0 : index
    %c0_5 = arith.constant 0 : index
    %c0_6 = arith.constant 0 : index
    %5 = vector.load %arg4[%c0_3, %c0_4, %c0_5, %c0_6] : memref<2x2x64x32xbf16, #tpu.memory_space<vmem>>, vector<1x1x64x32xbf16>
    %6 = vector.shape_cast %5 : vector<1x1x64x32xbf16> to vector<64x32xbf16>
    %cst_7 = arith.constant dense<0.000000e+00> : vector<64x32xf32>
    %7 = tpu.matmul %4, %6, %cst_7 {dimension_numbers = #tpu.dot_dimension_numbers<[1], [0], [0], [1], [0, 0, 1, 1], [], []>} : vector<64x64xbf16>, vector<64x32xbf16>, vector<64x32xf32> -> vector<64x32xf32>
    %8 = arith.addf %2, %7 : vector<64x32xf32>
    %9 = vector.extract_strided_slice %1 {offsets = [0, 1, 0], sizes = [8, 8, 64], strides = [1, 1, 1]} : vector<9x9x64xbf16> to vector<8x8x64xbf16>
    %10 = vector.shape_cast %9 : vector<8x8x64xbf16> to vector<64x64xbf16>
    %c0_8 = arith.constant 0 : index
    %c1 = arith.constant 1 : index
    %c0_9 = arith.constant 0 : index
    %c0_10 = arith.constant 0 : index
    %11 = vector.load %arg4[%c0_8, %c1, %c0_9, %c0_10] : memref<2x2x64x32xbf16, #tpu.memory_space<vmem>>, vector<1x1x64x32xbf16>
    %12 = vector.shape_cast %11 : vector<1x1x64x32xbf16> to vector<64x32xbf16>
    %cst_11 = arith.constant dense<0.000000e+00> : vector<64x32xf32>
    %13 = tpu.matmul %10, %12, %cst_11 {dimension_numbers = #tpu.dot_dimension_numbers<[1], [0], [0], [1], [0, 0, 1, 1], [], []>} : vector<64x64xbf16>, vector<64x32xbf16>, vector<64x32xf32> -> vector<64x32xf32>
    %14 = arith.addf %8, %13 : vector<64x32xf32>
    %15 = vector.extract_strided_slice %1 {offsets = [1, 0, 0], sizes = [8, 8, 64], strides = [1, 1, 1]} : vector<9x9x64xbf16> to vector<8x8x64xbf16>
    %16 = vector.shape_cast %15 : vector<8x8x64xbf16> to vector<64x64xbf16>
    %c1_12 = arith.constant 1 : index
    %c0_13 = arith.constant 0 : index
    %c0_14 = arith.constant 0 : index
    %c0_15 = arith.constant 0 : index
    %17 = vector.load %arg4[%c1_12, %c0_13, %c0_14, %c0_15] : memref<2x2x64x32xbf16, #tpu.memory_space<vmem>>, vector<1x1x64x32xbf16>
    %18 = vector.shape_cast %17 : vector<1x1x64x32xbf16> to vector<64x32xbf16>
    %cst_16 = arith.constant dense<0.000000e+00> : vector<64x32xf32>
    %19 = tpu.matmul %16, %18, %cst_16 {dimension_numbers = #tpu.dot_dimension_numbers<[1], [0], [0], [1], [0, 0, 1, 1], [], []>} : vector<64x64xbf16>, vector<64x32xbf16>, vector<64x32xf32> -> vector<64x32xf32>
    %20 = arith.addf %14, %19 : vector<64x32xf32>
    %21 = vector.extract_strided_slice %1 {offsets = [1, 1, 0], sizes = [8, 8, 64], strides = [1, 1, 1]} : vector<9x9x64xbf16> to vector<8x8x64xbf16>
    %22 = vector.shape_cast %21 : vector<8x8x64xbf16> to vector<64x64xbf16>
    %c1_17 = arith.constant 1 : index
    %c1_18 = arith.constant 1 : index
    %c0_19 = arith.constant 0 : index
    %c0_20 = arith.constant 0 : index
    %23 = vector.load %arg4[%c1_17, %c1_18, %c0_19, %c0_20] : memref<2x2x64x32xbf16, #tpu.memory_space<vmem>>, vector<1x1x64x32xbf16>
    %24 = vector.shape_cast %23 : vector<1x1x64x32xbf16> to vector<64x32xbf16>
    %cst_21 = arith.constant dense<0.000000e+00> : vector<64x32xf32>
    %25 = tpu.matmul %22, %24, %cst_21 {dimension_numbers = #tpu.dot_dimension_numbers<[1], [0], [0], [1], [0, 0, 1, 1], [], []>} : vector<64x64xbf16>, vector<64x32xbf16>, vector<64x32xf32> -> vector<64x32xf32>
    %26 = arith.addf %20, %25 : vector<64x32xf32>
    %c0_22 = arith.constant 0 : index
    %c0_23 = arith.constant 0 : index
    %27 = vector.load %arg5[%c0_22, %c0_23] : memref<1x32xf32, #tpu.memory_space<vmem>>, vector<1x32xf32>
    %28 = vector.broadcast %27 : vector<1x32xf32> to vector<64x32xf32>
    %29 = arith.addf %26, %28 : vector<64x32xf32>
    %30 = vector.shape_cast %29 : vector<64x32xf32> to vector<8x8x32xf32>
    %31 = arith.truncf %30 : vector<8x8x32xf32> to vector<8x8x32xbf16>
    %c0_24 = arith.constant 0 : index
    %c0_25 = arith.constant 0 : index
    %c0_26 = arith.constant 0 : index
    %c0_27 = arith.constant 0 : index
    %32 = vector.load %arg6[%c0_24, %c0_25, %c0_26, %c0_27] : memref<1x8x8x32xbf16, #tpu.memory_space<vmem>>, vector<1x8x8x32xbf16>
    %33 = vector.shape_cast %32 : vector<1x8x8x32xbf16> to vector<8x8x32xbf16>
    %34 = vector.shape_cast %31 : vector<8x8x32xbf16> to vector<1x8x8x32xbf16>
    tpu.vector_store %arg6[%c0_24, %c0_25, %c0_26, %c0_27], %34 {strides = array<i32>} : memref<1x8x8x32xbf16, #tpu.memory_space<vmem>>, vector<1x8x8x32xbf16>,
    return
  }
  func.func @transform_0(%arg0: i32, %arg1: i32, %arg2: i32) -> (i32, i32, i32, i32) {
    %c0_i32 = arith.constant 0 : i32
    %c0_i32_0 = arith.constant 0 : i32
    %c0_i32_1 = arith.constant 0 : i32
    %c0_i32_2 = arith.constant 0 : i32
    return %arg1, %c0_i32, %c0_i32_0, %c0_i32_1 : i32, i32, i32, i32
  }
  func.func @transform_1(%arg0: i32, %arg1: i32, %arg2: i32) -> (i32, i32, i32, i32) {
    %c0_i32 = arith.constant 0 : i32
    %c0_i32_0 = arith.constant 0 : i32
    %c0_i32_1 = arith.constant 0 : i32
    %c0_i32_2 = arith.constant 0 : i32
    return %c0_i32, %c0_i32_0, %c0_i32_1, %arg0 : i32, i32, i32, i32
  }
  func.func @transform_2(%arg0: i32, %arg1: i32, %arg2: i32) -> (i32, i32) {
    %c0_i32 = arith.constant 0 : i32
    %c0_i32_0 = arith.constant 0 : i32
    return %c0_i32, %arg0 : i32, i32
  }
  func.func @transform_3(%arg0: i32, %arg1: i32, %arg2: i32) -> (i32, i32, i32, i32) {
    %c0_i32 = arith.constant 0 : i32
    %c0_i32_0 = arith.constant 0 : i32
    return %arg1, %arg2, %c0_i32, %arg0 : i32, i32, i32, i32
  }
}

module attributes {stable_mosaic.version = 11 : i64} {
  func.func @_bn_apply_kernel(%arg0: i32, %arg1: i32, %arg2: memref<1x8x8x32xbf16, #tpu.memory_space<vmem>>, %arg3: memref<1x32xf32, #tpu.memory_space<vmem>>, %arg4: memref<1x32xf32, #tpu.memory_space<vmem>>, %arg5: memref<1x8x8x32xbf16, #tpu.memory_space<vmem>>) attributes {dimension_semantics = [#tpu.dimension_semantics<parallel>, #tpu.dimension_semantics<parallel>], iteration_bounds = array<i64: 2, 1>, scalar_prefetch = 0 : i64, scratch_operands = 0 : i64, tpu.core_type = #tpu.core_type<tc>, window_params = [{transform_indices = @transform_0, window_bounds = array<i64: 1, 8, 8, 32>}, {pipeline_mode = #tpu.pipeline_mode<synchronous>, transform_indices = @transform_1, window_bounds = array<i64: 1, 32>}, {pipeline_mode = #tpu.pipeline_mode<synchronous>, transform_indices = @transform_2, window_bounds = array<i64: 1, 32>}, {transform_indices = @transform_3, window_bounds = array<i64: 1, 8, 8, 32>}]} {
    %c0 = arith.constant 0 : index
    %c0_0 = arith.constant 0 : index
    %c0_1 = arith.constant 0 : index
    %c0_2 = arith.constant 0 : index
    %0 = vector.load %arg2[%c0, %c0_0, %c0_1, %c0_2] : memref<1x8x8x32xbf16, #tpu.memory_space<vmem>>, vector<1x8x8x32xbf16>
    %1 = vector.shape_cast %0 : vector<1x8x8x32xbf16> to vector<8x8x32xbf16>
    %2 = arith.extf %1 : vector<8x8x32xbf16> to vector<8x8x32xf32>
    %c0_3 = arith.constant 0 : index
    %c0_4 = arith.constant 0 : index
    %3 = vector.load %arg3[%c0_3, %c0_4] : memref<1x32xf32, #tpu.memory_space<vmem>>, vector<1x32xf32>
    %4 = vector.shape_cast %3 : vector<1x32xf32> to vector<1x1x32xf32>
    %5 = vector.broadcast %4 : vector<1x1x32xf32> to vector<8x8x32xf32>
    %6 = arith.mulf %2, %5 : vector<8x8x32xf32>
    %c0_5 = arith.constant 0 : index
    %c0_6 = arith.constant 0 : index
    %7 = vector.load %arg4[%c0_5, %c0_6] : memref<1x32xf32, #tpu.memory_space<vmem>>, vector<1x32xf32>
    %8 = vector.shape_cast %7 : vector<1x32xf32> to vector<1x1x32xf32>
    %9 = vector.broadcast %8 : vector<1x1x32xf32> to vector<8x8x32xf32>
    %10 = arith.addf %6, %9 : vector<8x8x32xf32>
    %cst = arith.constant 2.000000e-01 : f32
    %11 = vector.broadcast %cst : f32 to vector<8x8x32xf32>
    %12 = arith.mulf %11, %10 : vector<8x8x32xf32>
    %13 = arith.maximumf %10, %12 : vector<8x8x32xf32>
    %14 = arith.truncf %13 : vector<8x8x32xf32> to vector<8x8x32xbf16>
    %c0_7 = arith.constant 0 : index
    %c0_8 = arith.constant 0 : index
    %c0_9 = arith.constant 0 : index
    %c0_10 = arith.constant 0 : index
    %15 = vector.load %arg5[%c0_7, %c0_8, %c0_9, %c0_10] : memref<1x8x8x32xbf16, #tpu.memory_space<vmem>>, vector<1x8x8x32xbf16>
    %16 = vector.shape_cast %15 : vector<1x8x8x32xbf16> to vector<8x8x32xbf16>
    %17 = vector.shape_cast %14 : vector<8x8x32xbf16> to vector<1x8x8x32xbf16>
    tpu.vector_store %arg5[%c0_7, %c0_8, %c0_9, %c0_10], %17 {strides = array<i32>} : memref<1x8x8x32xbf16, #tpu.memory_space<vmem>>, vector<1x8x8x32xbf16>,
    return
  }
  func.func @transform_0(%arg0: i32, %arg1: i32) -> (i32, i32, i32, i32) {
    %c0_i32 = arith.constant 0 : i32
    %c0_i32_0 = arith.constant 0 : i32
    %c0_i32_1 = arith.constant 0 : i32
    return %arg0, %arg1, %c0_i32, %c0_i32_0 : i32, i32, i32, i32
  }
  func.func @transform_1(%arg0: i32, %arg1: i32) -> (i32, i32) {
    %c0_i32 = arith.constant 0 : i32
    %c0_i32_0 = arith.constant 0 : i32
    %c0_i32_1 = arith.constant 0 : i32
    return %c0_i32, %c0_i32_0 : i32, i32
  }
  func.func @transform_2(%arg0: i32, %arg1: i32) -> (i32, i32) {
    %c0_i32 = arith.constant 0 : i32
    %c0_i32_0 = arith.constant 0 : i32
    %c0_i32_1 = arith.constant 0 : i32
    return %c0_i32, %c0_i32_0 : i32, i32
  }
  func.func @transform_3(%arg0: i32, %arg1: i32) -> (i32, i32, i32, i32) {
    %c0_i32 = arith.constant 0 : i32
    %c0_i32_0 = arith.constant 0 : i32
    %c0_i32_1 = arith.constant 0 : i32
    return %arg0, %arg1, %c0_i32, %c0_i32_0 : i32, i32, i32, i32
  }
}

module attributes {stable_mosaic.version = 11 : i64} {
  func.func @_bn_stats_kernel(%arg0: i32, %arg1: i32, %arg2: memref<1x4x4x64xbf16, #tpu.memory_space<vmem>>, %arg3: memref<2x64xf32, #tpu.memory_space<vmem>>) attributes {dimension_semantics = [#tpu.dimension_semantics<arbitrary>, #tpu.dimension_semantics<arbitrary>], iteration_bounds = array<i64: 2, 1>, scalar_prefetch = 0 : i64, scratch_operands = 0 : i64, tpu.core_type = #tpu.core_type<tc>, window_params = [{transform_indices = @transform_0, window_bounds = array<i64: 1, 4, 4, 64>}, {pipeline_mode = #tpu.pipeline_mode<synchronous>, transform_indices = @transform_1, window_bounds = array<i64: 2, 64>}]} {
    %c0_i32 = arith.constant 0 : i32
    %0 = arith.cmpi eq, %arg0, %c0_i32 : i32
    %c0_i32_0 = arith.constant 0 : i32
    %1 = arith.cmpi eq, %arg1, %c0_i32_0 : i32
    %2 = arith.andi %0, %1 : i1
    %3 = arith.extui %2 : i1 to i32
    %c0_i32_1 = arith.constant 0 : i32
    %4 = arith.cmpi ne, %3, %c0_i32_1 : i32
    scf.if %4 {
      %cst_12 = arith.constant 0.000000e+00 : f32
      %19 = vector.broadcast %cst_12 : f32 to vector<2x64xf32>
      %c0_13 = arith.constant 0 : index
      %c0_14 = arith.constant 0 : index
      %20 = vector.load %arg3[%c0_13, %c0_14] : memref<2x64xf32, #tpu.memory_space<vmem>>, vector<2x64xf32>
      tpu.vector_store %arg3[%c0_13, %c0_14], %19 {strides = array<i32>} : memref<2x64xf32, #tpu.memory_space<vmem>>, vector<2x64xf32>,
    } else {
    }
    %c0 = arith.constant 0 : index
    %c0_2 = arith.constant 0 : index
    %c0_3 = arith.constant 0 : index
    %c0_4 = arith.constant 0 : index
    %5 = vector.load %arg2[%c0, %c0_2, %c0_3, %c0_4] : memref<1x4x4x64xbf16, #tpu.memory_space<vmem>>, vector<1x4x4x64xbf16>
    %6 = vector.shape_cast %5 : vector<1x4x4x64xbf16> to vector<4x4x64xbf16>
    %7 = arith.extf %6 : vector<4x4x64xbf16> to vector<4x4x64xf32>
    %cst = arith.constant dense<0.000000e+00> : vector<4x64xf32>
    %8 = vector.multi_reduction <add>, %7, %cst [0] : vector<4x4x64xf32> to vector<4x64xf32>
    %9 = arith.mulf %7, %7 : vector<4x4x64xf32>
    %cst_5 = arith.constant dense<0.000000e+00> : vector<4x64xf32>
    %10 = vector.multi_reduction <add>, %9, %cst_5 [0] : vector<4x4x64xf32> to vector<4x64xf32>
    %c0_6 = arith.constant 0 : index
    %c0_7 = arith.constant 0 : index
    %11 = vector.load %arg3[%c0_6, %c0_7] : memref<2x64xf32, #tpu.memory_space<vmem>>, vector<2x64xf32>
    %cst_8 = arith.constant dense<0.000000e+00> : vector<64xf32>
    %12 = vector.multi_reduction <add>, %8, %cst_8 [0] : vector<4x64xf32> to vector<64xf32>
    %13 = vector.shape_cast %12 : vector<64xf32> to vector<1x64xf32>
    %cst_9 = arith.constant dense<0.000000e+00> : vector<64xf32>
    %14 = vector.multi_reduction <add>, %10, %cst_9 [0] : vector<4x64xf32> to vector<64xf32>
    %15 = vector.shape_cast %14 : vector<64xf32> to vector<1x64xf32>
    %16 = tpu.concatenate %13, %15 in 0 : vector<1x64xf32>, vector<1x64xf32> -> vector<2x64xf32>
    %17 = arith.addf %11, %16 : vector<2x64xf32>
    %c0_10 = arith.constant 0 : index
    %c0_11 = arith.constant 0 : index
    %18 = vector.load %arg3[%c0_10, %c0_11] : memref<2x64xf32, #tpu.memory_space<vmem>>, vector<2x64xf32>
    tpu.vector_store %arg3[%c0_10, %c0_11], %17 {strides = array<i32>} : memref<2x64xf32, #tpu.memory_space<vmem>>, vector<2x64xf32>,
    return
  }
  func.func @transform_0(%arg0: i32, %arg1: i32) -> (i32, i32, i32, i32) {
    %c0_i32 = arith.constant 0 : i32
    %c0_i32_0 = arith.constant 0 : i32
    %c0_i32_1 = arith.constant 0 : i32
    return %arg0, %arg1, %c0_i32, %c0_i32_0 : i32, i32, i32, i32
  }
  func.func @transform_1(%arg0: i32, %arg1: i32) -> (i32, i32) {
    %c0_i32 = arith.constant 0 : i32
    %c0_i32_0 = arith.constant 0 : i32
    %c0_i32_1 = arith.constant 0 : i32
    return %c0_i32, %c0_i32_0 : i32, i32
  }
}

module attributes {stable_mosaic.version = 11 : i64} {
  func.func @_conv_block_kernel(%arg0: i32, %arg1: i32, %arg2: i32, %arg3: memref<1x5x5x128xbf16, #tpu.memory_space<vmem>>, %arg4: memref<2x2x128x64xbf16, #tpu.memory_space<vmem>>, %arg5: memref<1x64xf32, #tpu.memory_space<vmem>>, %arg6: memref<1x4x4x64xbf16, #tpu.memory_space<vmem>>) attributes {dimension_semantics = [#tpu.dimension_semantics<parallel>, #tpu.dimension_semantics<parallel>, #tpu.dimension_semantics<parallel>], iteration_bounds = array<i64: 1, 2, 1>, scalar_prefetch = 0 : i64, scratch_operands = 0 : i64, tpu.core_type = #tpu.core_type<tc>, window_params = [{transform_indices = @transform_0, window_bounds = array<i64: 1, 5, 5, 128>}, {transform_indices = @transform_1, window_bounds = array<i64: 2, 2, 128, 64>}, {transform_indices = @transform_2, window_bounds = array<i64: 1, 64>}, {transform_indices = @transform_3, window_bounds = array<i64: 1, 4, 4, 64>}]} {
    %c0 = arith.constant 0 : index
    %c0_0 = arith.constant 0 : index
    %c0_1 = arith.constant 0 : index
    %c0_2 = arith.constant 0 : index
    %0 = vector.load %arg3[%c0, %c0_0, %c0_1, %c0_2] : memref<1x5x5x128xbf16, #tpu.memory_space<vmem>>, vector<1x5x5x128xbf16>
    %1 = vector.shape_cast %0 : vector<1x5x5x128xbf16> to vector<5x5x128xbf16>
    %cst = arith.constant 0.000000e+00 : f32
    %2 = vector.broadcast %cst : f32 to vector<4x64xf32>
    %3 = vector.extract_strided_slice %1 {offsets = [0, 0, 0], sizes = [1, 4, 128], strides = [1, 1, 1]} : vector<5x5x128xbf16> to vector<1x4x128xbf16>
    %4 = vector.shape_cast %3 : vector<1x4x128xbf16> to vector<4x128xbf16>
    %c0_3 = arith.constant 0 : index
    %c0_4 = arith.constant 0 : index
    %c0_5 = arith.constant 0 : index
    %c0_6 = arith.constant 0 : index
    %5 = vector.load %arg4[%c0_3, %c0_4, %c0_5, %c0_6] : memref<2x2x128x64xbf16, #tpu.memory_space<vmem>>, vector<1x1x128x64xbf16>
    %6 = vector.shape_cast %5 : vector<1x1x128x64xbf16> to vector<128x64xbf16>
    %cst_7 = arith.constant dense<0.000000e+00> : vector<4x64xf32>
    %7 = tpu.matmul %4, %6, %cst_7 {dimension_numbers = #tpu.dot_dimension_numbers<[1], [0], [0], [1], [0, 0, 1, 1], [], []>} : vector<4x128xbf16>, vector<128x64xbf16>, vector<4x64xf32> -> vector<4x64xf32>
    %8 = arith.addf %2, %7 : vector<4x64xf32>
    %9 = vector.extract_strided_slice %1 {offsets = [0, 1, 0], sizes = [1, 4, 128], strides = [1, 1, 1]} : vector<5x5x128xbf16> to vector<1x4x128xbf16>
    %10 = vector.shape_cast %9 : vector<1x4x128xbf16> to vector<4x128xbf16>
    %c0_8 = arith.constant 0 : index
    %c1 = arith.constant 1 : index
    %c0_9 = arith.constant 0 : index
    %c0_10 = arith.constant 0 : index
    %11 = vector.load %arg4[%c0_8, %c1, %c0_9, %c0_10] : memref<2x2x128x64xbf16, #tpu.memory_space<vmem>>, vector<1x1x128x64xbf16>
    %12 = vector.shape_cast %11 : vector<1x1x128x64xbf16> to vector<128x64xbf16>
    %cst_11 = arith.constant dense<0.000000e+00> : vector<4x64xf32>
    %13 = tpu.matmul %10, %12, %cst_11 {dimension_numbers = #tpu.dot_dimension_numbers<[1], [0], [0], [1], [0, 0, 1, 1], [], []>} : vector<4x128xbf16>, vector<128x64xbf16>, vector<4x64xf32> -> vector<4x64xf32>
    %14 = arith.addf %8, %13 : vector<4x64xf32>
    %15 = vector.extract_strided_slice %1 {offsets = [1, 0, 0], sizes = [1, 4, 128], strides = [1, 1, 1]} : vector<5x5x128xbf16> to vector<1x4x128xbf16>
    %16 = vector.shape_cast %15 : vector<1x4x128xbf16> to vector<4x128xbf16>
    %c1_12 = arith.constant 1 : index
    %c0_13 = arith.constant 0 : index
    %c0_14 = arith.constant 0 : index
    %c0_15 = arith.constant 0 : index
    %17 = vector.load %arg4[%c1_12, %c0_13, %c0_14, %c0_15] : memref<2x2x128x64xbf16, #tpu.memory_space<vmem>>, vector<1x1x128x64xbf16>
    %18 = vector.shape_cast %17 : vector<1x1x128x64xbf16> to vector<128x64xbf16>
    %cst_16 = arith.constant dense<0.000000e+00> : vector<4x64xf32>
    %19 = tpu.matmul %16, %18, %cst_16 {dimension_numbers = #tpu.dot_dimension_numbers<[1], [0], [0], [1], [0, 0, 1, 1], [], []>} : vector<4x128xbf16>, vector<128x64xbf16>, vector<4x64xf32> -> vector<4x64xf32>
    %20 = arith.addf %14, %19 : vector<4x64xf32>
    %21 = vector.extract_strided_slice %1 {offsets = [1, 1, 0], sizes = [1, 4, 128], strides = [1, 1, 1]} : vector<5x5x128xbf16> to vector<1x4x128xbf16>
    %22 = vector.shape_cast %21 : vector<1x4x128xbf16> to vector<4x128xbf16>
    %c1_17 = arith.constant 1 : index
    %c1_18 = arith.constant 1 : index
    %c0_19 = arith.constant 0 : index
    %c0_20 = arith.constant 0 : index
    %23 = vector.load %arg4[%c1_17, %c1_18, %c0_19, %c0_20] : memref<2x2x128x64xbf16, #tpu.memory_space<vmem>>, vector<1x1x128x64xbf16>
    %24 = vector.shape_cast %23 : vector<1x1x128x64xbf16> to vector<128x64xbf16>
    %cst_21 = arith.constant dense<0.000000e+00> : vector<4x64xf32>
    %25 = tpu.matmul %22, %24, %cst_21 {dimension_numbers = #tpu.dot_dimension_numbers<[1], [0], [0], [1], [0, 0, 1, 1], [], []>} : vector<4x128xbf16>, vector<128x64xbf16>, vector<4x64xf32> -> vector<4x64xf32>
    %26 = arith.addf %20, %25 : vector<4x64xf32>
    %c0_22 = arith.constant 0 : index
    %c0_23 = arith.constant 0 : index
    %27 = vector.load %arg5[%c0_22, %c0_23] : memref<1x64xf32, #tpu.memory_space<vmem>>, vector<1x64xf32>
    %28 = vector.broadcast %27 : vector<1x64xf32> to vector<4x64xf32>
    %29 = arith.addf %26, %28 : vector<4x64xf32>
    %30 = arith.truncf %29 : vector<4x64xf32> to vector<4x64xbf16>
    %c0_24 = arith.constant 0 : index
    %c0_25 = arith.constant 0 : index
    %c0_26 = arith.constant 0 : index
    %c0_27 = arith.constant 0 : index
    %31 = vector.load %arg6[%c0_24, %c0_25, %c0_26, %c0_27] : memref<1x4x4x64xbf16, #tpu.memory_space<vmem>>, vector<1x1x4x64xbf16>
    %32 = vector.shape_cast %31 : vector<1x1x4x64xbf16> to vector<4x64xbf16>
    %33 = vector.shape_cast %30 : vector<4x64xbf16> to vector<1x1x4x64xbf16>
    tpu.vector_store %arg6[%c0_24, %c0_25, %c0_26, %c0_27], %33 {strides = array<i32>} : memref<1x4x4x64xbf16, #tpu.memory_space<vmem>>, vector<1x1x4x64xbf16>,
    %cst_28 = arith.constant 0.000000e+00 : f32
    %34 = vector.broadcast %cst_28 : f32 to vector<4x64xf32>
    %35 = vector.extract_strided_slice %1 {offsets = [1, 0, 0], sizes = [1, 4, 128], strides = [1, 1, 1]} : vector<5x5x128xbf16> to vector<1x4x128xbf16>
    %36 = vector.shape_cast %35 : vector<1x4x128xbf16> to vector<4x128xbf16>
    %c0_29 = arith.constant 0 : index
    %c0_30 = arith.constant 0 : index
    %c0_31 = arith.constant 0 : index
    %c0_32 = arith.constant 0 : index
    %37 = vector.load %arg4[%c0_29, %c0_30, %c0_31, %c0_32] : memref<2x2x128x64xbf16, #tpu.memory_space<vmem>>, vector<1x1x128x64xbf16>
    %38 = vector.shape_cast %37 : vector<1x1x128x64xbf16> to vector<128x64xbf16>
    %cst_33 = arith.constant dense<0.000000e+00> : vector<4x64xf32>
    %39 = tpu.matmul %36, %38, %cst_33 {dimension_numbers = #tpu.dot_dimension_numbers<[1], [0], [0], [1], [0, 0, 1, 1], [], []>} : vector<4x128xbf16>, vector<128x64xbf16>, vector<4x64xf32> -> vector<4x64xf32>
    %40 = arith.addf %34, %39 : vector<4x64xf32>
    %41 = vector.extract_strided_slice %1 {offsets = [1, 1, 0], sizes = [1, 4, 128], strides = [1, 1, 1]} : vector<5x5x128xbf16> to vector<1x4x128xbf16>
    %42 = vector.shape_cast %41 : vector<1x4x128xbf16> to vector<4x128xbf16>
    %c0_34 = arith.constant 0 : index
    %c1_35 = arith.constant 1 : index
    %c0_36 = arith.constant 0 : index
    %c0_37 = arith.constant 0 : index
    %43 = vector.load %arg4[%c0_34, %c1_35, %c0_36, %c0_37] : memref<2x2x128x64xbf16, #tpu.memory_space<vmem>>, vector<1x1x128x64xbf16>
    %44 = vector.shape_cast %43 : vector<1x1x128x64xbf16> to vector<128x64xbf16>
    %cst_38 = arith.constant dense<0.000000e+00> : vector<4x64xf32>
    %45 = tpu.matmul %42, %44, %cst_38 {dimension_numbers = #tpu.dot_dimension_numbers<[1], [0], [0], [1], [0, 0, 1, 1], [], []>} : vector<4x128xbf16>, vector<128x64xbf16>, vector<4x64xf32> -> vector<4x64xf32>
    %46 = arith.addf %40, %45 : vector<4x64xf32>
    %47 = vector.extract_strided_slice %1 {offsets = [2, 0, 0], sizes = [1, 4, 128], strides = [1, 1, 1]} : vector<5x5x128xbf16> to vector<1x4x128xbf16>
    %48 = vector.shape_cast %47 : vector<1x4x128xbf16> to vector<4x128xbf16>
    %c1_39 = arith.constant 1 : index
    %c0_40 = arith.constant 0 : index
    %c0_41 = arith.constant 0 : index
    %c0_42 = arith.constant 0 : index
    %49 = vector.load %arg4[%c1_39, %c0_40, %c0_41, %c0_42] : memref<2x2x128x64xbf16, #tpu.memory_space<vmem>>, vector<1x1x128x64xbf16>
    %50 = vector.shape_cast %49 : vector<1x1x128x64xbf16> to vector<128x64xbf16>
    %cst_43 = arith.constant dense<0.000000e+00> : vector<4x64xf32>
    %51 = tpu.matmul %48, %50, %cst_43 {dimension_numbers = #tpu.dot_dimension_numbers<[1], [0], [0], [1], [0, 0, 1, 1], [], []>} : vector<4x128xbf16>, vector<128x64xbf16>, vector<4x64xf32> -> vector<4x64xf32>
    %52 = arith.addf %46, %51 : vector<4x64xf32>
    %53 = vector.extract_strided_slice %1 {offsets = [2, 1, 0], sizes = [1, 4, 128], strides = [1, 1, 1]} : vector<5x5x128xbf16> to vector<1x4x128xbf16>
    %54 = vector.shape_cast %53 : vector<1x4x128xbf16> to vector<4x128xbf16>
    %c1_44 = arith.constant 1 : index
    %c1_45 = arith.constant 1 : index
    %c0_46 = arith.constant 0 : index
    %c0_47 = arith.constant 0 : index
    %55 = vector.load %arg4[%c1_44, %c1_45, %c0_46, %c0_47] : memref<2x2x128x64xbf16, #tpu.memory_space<vmem>>, vector<1x1x128x64xbf16>
    %56 = vector.shape_cast %55 : vector<1x1x128x64xbf16> to vector<128x64xbf16>
    %cst_48 = arith.constant dense<0.000000e+00> : vector<4x64xf32>
    %57 = tpu.matmul %54, %56, %cst_48 {dimension_numbers = #tpu.dot_dimension_numbers<[1], [0], [0], [1], [0, 0, 1, 1], [], []>} : vector<4x128xbf16>, vector<128x64xbf16>, vector<4x64xf32> -> vector<4x64xf32>
    %58 = arith.addf %52, %57 : vector<4x64xf32>
    %c0_49 = arith.constant 0 : index
    %c0_50 = arith.constant 0 : index
    %59 = vector.load %arg5[%c0_49, %c0_50] : memref<1x64xf32, #tpu.memory_space<vmem>>, vector<1x64xf32>
    %60 = vector.broadcast %59 : vector<1x64xf32> to vector<4x64xf32>
    %61 = arith.addf %58, %60 : vector<4x64xf32>
    %62 = arith.truncf %61 : vector<4x64xf32> to vector<4x64xbf16>
    %c0_51 = arith.constant 0 : index
    %c1_52 = arith.constant 1 : index
    %c0_53 = arith.constant 0 : index
    %c0_54 = arith.constant 0 : index
    %63 = vector.load %arg6[%c0_51, %c1_52, %c0_53, %c0_54] : memref<1x4x4x64xbf16, #tpu.memory_space<vmem>>, vector<1x1x4x64xbf16>
    %64 = vector.shape_cast %63 : vector<1x1x4x64xbf16> to vector<4x64xbf16>
    %65 = vector.shape_cast %62 : vector<4x64xbf16> to vector<1x1x4x64xbf16>
    tpu.vector_store %arg6[%c0_51, %c1_52, %c0_53, %c0_54], %65 {strides = array<i32>} : memref<1x4x4x64xbf16, #tpu.memory_space<vmem>>, vector<1x1x4x64xbf16>,
    %cst_55 = arith.constant 0.000000e+00 : f32
    %66 = vector.broadcast %cst_55 : f32 to vector<4x64xf32>
    %67 = vector.extract_strided_slice %1 {offsets = [2, 0, 0], sizes = [1, 4, 128], strides = [1, 1, 1]} : vector<5x5x128xbf16> to vector<1x4x128xbf16>
    %68 = vector.shape_cast %67 : vector<1x4x128xbf16> to vector<4x128xbf16>
    %c0_56 = arith.constant 0 : index
    %c0_57 = arith.constant 0 : index
    %c0_58 = arith.constant 0 : index
    %c0_59 = arith.constant 0 : index
    %69 = vector.load %arg4[%c0_56, %c0_57, %c0_58, %c0_59] : memref<2x2x128x64xbf16, #tpu.memory_space<vmem>>, vector<1x1x128x64xbf16>
    %70 = vector.shape_cast %69 : vector<1x1x128x64xbf16> to vector<128x64xbf16>
    %cst_60 = arith.constant dense<0.000000e+00> : vector<4x64xf32>
    %71 = tpu.matmul %68, %70, %cst_60 {dimension_numbers = #tpu.dot_dimension_numbers<[1], [0], [0], [1], [0, 0, 1, 1], [], []>} : vector<4x128xbf16>, vector<128x64xbf16>, vector<4x64xf32> -> vector<4x64xf32>
    %72 = arith.addf %66, %71 : vector<4x64xf32>
    %73 = vector.extract_strided_slice %1 {offsets = [2, 1, 0], sizes = [1, 4, 128], strides = [1, 1, 1]} : vector<5x5x128xbf16> to vector<1x4x128xbf16>
    %74 = vector.shape_cast %73 : vector<1x4x128xbf16> to vector<4x128xbf16>
    %c0_61 = arith.constant 0 : index
    %c1_62 = arith.constant 1 : index
    %c0_63 = arith.constant 0 : index
    %c0_64 = arith.constant 0 : index
    %75 = vector.load %arg4[%c0_61, %c1_62, %c0_63, %c0_64] : memref<2x2x128x64xbf16, #tpu.memory_space<vmem>>, vector<1x1x128x64xbf16>
    %76 = vector.shape_cast %75 : vector<1x1x128x64xbf16> to vector<128x64xbf16>
    %cst_65 = arith.constant dense<0.000000e+00> : vector<4x64xf32>
    %77 = tpu.matmul %74, %76, %cst_65 {dimension_numbers = #tpu.dot_dimension_numbers<[1], [0], [0], [1], [0, 0, 1, 1], [], []>} : vector<4x128xbf16>, vector<128x64xbf16>, vector<4x64xf32> -> vector<4x64xf32>
    %78 = arith.addf %72, %77 : vector<4x64xf32>
    %79 = vector.extract_strided_slice %1 {offsets = [3, 0, 0], sizes = [1, 4, 128], strides = [1, 1, 1]} : vector<5x5x128xbf16> to vector<1x4x128xbf16>
    %80 = vector.shape_cast %79 : vector<1x4x128xbf16> to vector<4x128xbf16>
    %c1_66 = arith.constant 1 : index
    %c0_67 = arith.constant 0 : index
    %c0_68 = arith.constant 0 : index
    %c0_69 = arith.constant 0 : index
    %81 = vector.load %arg4[%c1_66, %c0_67, %c0_68, %c0_69] : memref<2x2x128x64xbf16, #tpu.memory_space<vmem>>, vector<1x1x128x64xbf16>
    %82 = vector.shape_cast %81 : vector<1x1x128x64xbf16> to vector<128x64xbf16>
    %cst_70 = arith.constant dense<0.000000e+00> : vector<4x64xf32>
    %83 = tpu.matmul %80, %82, %cst_70 {dimension_numbers = #tpu.dot_dimension_numbers<[1], [0], [0], [1], [0, 0, 1, 1], [], []>} : vector<4x128xbf16>, vector<128x64xbf16>, vector<4x64xf32> -> vector<4x64xf32>
    %84 = arith.addf %78, %83 : vector<4x64xf32>
    %85 = vector.extract_strided_slice %1 {offsets = [3, 1, 0], sizes = [1, 4, 128], strides = [1, 1, 1]} : vector<5x5x128xbf16> to vector<1x4x128xbf16>
    %86 = vector.shape_cast %85 : vector<1x4x128xbf16> to vector<4x128xbf16>
    %c1_71 = arith.constant 1 : index
    %c1_72 = arith.constant 1 : index
    %c0_73 = arith.constant 0 : index
    %c0_74 = arith.constant 0 : index
    %87 = vector.load %arg4[%c1_71, %c1_72, %c0_73, %c0_74] : memref<2x2x128x64xbf16, #tpu.memory_space<vmem>>, vector<1x1x128x64xbf16>
    %88 = vector.shape_cast %87 : vector<1x1x128x64xbf16> to vector<128x64xbf16>
    %cst_75 = arith.constant dense<0.000000e+00> : vector<4x64xf32>
    %89 = tpu.matmul %86, %88, %cst_75 {dimension_numbers = #tpu.dot_dimension_numbers<[1], [0], [0], [1], [0, 0, 1, 1], [], []>} : vector<4x128xbf16>, vector<128x64xbf16>, vector<4x64xf32> -> vector<4x64xf32>
    %90 = arith.addf %84, %89 : vector<4x64xf32>
    %c0_76 = arith.constant 0 : index
    %c0_77 = arith.constant 0 : index
    %91 = vector.load %arg5[%c0_76, %c0_77] : memref<1x64xf32, #tpu.memory_space<vmem>>, vector<1x64xf32>
    %92 = vector.broadcast %91 : vector<1x64xf32> to vector<4x64xf32>
    %93 = arith.addf %90, %92 : vector<4x64xf32>
    %94 = arith.truncf %93 : vector<4x64xf32> to vector<4x64xbf16>
    %c0_78 = arith.constant 0 : index
    %c2 = arith.constant 2 : index
    %c0_79 = arith.constant 0 : index
    %c0_80 = arith.constant 0 : index
    %95 = vector.load %arg6[%c0_78, %c2, %c0_79, %c0_80] : memref<1x4x4x64xbf16, #tpu.memory_space<vmem>>, vector<1x1x4x64xbf16>
    %96 = vector.shape_cast %95 : vector<1x1x4x64xbf16> to vector<4x64xbf16>
    %97 = vector.shape_cast %94 : vector<4x64xbf16> to vector<1x1x4x64xbf16>
    tpu.vector_store %arg6[%c0_78, %c2, %c0_79, %c0_80], %97 {strides = array<i32>} : memref<1x4x4x64xbf16, #tpu.memory_space<vmem>>, vector<1x1x4x64xbf16>,
    %cst_81 = arith.constant 0.000000e+00 : f32
    %98 = vector.broadcast %cst_81 : f32 to vector<4x64xf32>
    %99 = vector.extract_strided_slice %1 {offsets = [3, 0, 0], sizes = [1, 4, 128], strides = [1, 1, 1]} : vector<5x5x128xbf16> to vector<1x4x128xbf16>
    %100 = vector.shape_cast %99 : vector<1x4x128xbf16> to vector<4x128xbf16>
    %c0_82 = arith.constant 0 : index
    %c0_83 = arith.constant 0 : index
    %c0_84 = arith.constant 0 : index
    %c0_85 = arith.constant 0 : index
    %101 = vector.load %arg4[%c0_82, %c0_83, %c0_84, %c0_85] : memref<2x2x128x64xbf16, #tpu.memory_space<vmem>>, vector<1x1x128x64xbf16>
    %102 = vector.shape_cast %101 : vector<1x1x128x64xbf16> to vector<128x64xbf16>
    %cst_86 = arith.constant dense<0.000000e+00> : vector<4x64xf32>
    %103 = tpu.matmul %100, %102, %cst_86 {dimension_numbers = #tpu.dot_dimension_numbers<[1], [0], [0], [1], [0, 0, 1, 1], [], []>} : vector<4x128xbf16>, vector<128x64xbf16>, vector<4x64xf32> -> vector<4x64xf32>
    %104 = arith.addf %98, %103 : vector<4x64xf32>
    %105 = vector.extract_strided_slice %1 {offsets = [3, 1, 0], sizes = [1, 4, 128], strides = [1, 1, 1]} : vector<5x5x128xbf16> to vector<1x4x128xbf16>
    %106 = vector.shape_cast %105 : vector<1x4x128xbf16> to vector<4x128xbf16>
    %c0_87 = arith.constant 0 : index
    %c1_88 = arith.constant 1 : index
    %c0_89 = arith.constant 0 : index
    %c0_90 = arith.constant 0 : index
    %107 = vector.load %arg4[%c0_87, %c1_88, %c0_89, %c0_90] : memref<2x2x128x64xbf16, #tpu.memory_space<vmem>>, vector<1x1x128x64xbf16>
    %108 = vector.shape_cast %107 : vector<1x1x128x64xbf16> to vector<128x64xbf16>
    %cst_91 = arith.constant dense<0.000000e+00> : vector<4x64xf32>
    %109 = tpu.matmul %106, %108, %cst_91 {dimension_numbers = #tpu.dot_dimension_numbers<[1], [0], [0], [1], [0, 0, 1, 1], [], []>} : vector<4x128xbf16>, vector<128x64xbf16>, vector<4x64xf32> -> vector<4x64xf32>
    %110 = arith.addf %104, %109 : vector<4x64xf32>
    %111 = vector.extract_strided_slice %1 {offsets = [4, 0, 0], sizes = [1, 4, 128], strides = [1, 1, 1]} : vector<5x5x128xbf16> to vector<1x4x128xbf16>
    %112 = vector.shape_cast %111 : vector<1x4x128xbf16> to vector<4x128xbf16>
    %c1_92 = arith.constant 1 : index
    %c0_93 = arith.constant 0 : index
    %c0_94 = arith.constant 0 : index
    %c0_95 = arith.constant 0 : index
    %113 = vector.load %arg4[%c1_92, %c0_93, %c0_94, %c0_95] : memref<2x2x128x64xbf16, #tpu.memory_space<vmem>>, vector<1x1x128x64xbf16>
    %114 = vector.shape_cast %113 : vector<1x1x128x64xbf16> to vector<128x64xbf16>
    %cst_96 = arith.constant dense<0.000000e+00> : vector<4x64xf32>
    %115 = tpu.matmul %112, %114, %cst_96 {dimension_numbers = #tpu.dot_dimension_numbers<[1], [0], [0], [1], [0, 0, 1, 1], [], []>} : vector<4x128xbf16>, vector<128x64xbf16>, vector<4x64xf32> -> vector<4x64xf32>
    %116 = arith.addf %110, %115 : vector<4x64xf32>
    %117 = vector.extract_strided_slice %1 {offsets = [4, 1, 0], sizes = [1, 4, 128], strides = [1, 1, 1]} : vector<5x5x128xbf16> to vector<1x4x128xbf16>
    %118 = vector.shape_cast %117 : vector<1x4x128xbf16> to vector<4x128xbf16>
    %c1_97 = arith.constant 1 : index
    %c1_98 = arith.constant 1 : index
    %c0_99 = arith.constant 0 : index
    %c0_100 = arith.constant 0 : index
    %119 = vector.load %arg4[%c1_97, %c1_98, %c0_99, %c0_100] : memref<2x2x128x64xbf16, #tpu.memory_space<vmem>>, vector<1x1x128x64xbf16>
    %120 = vector.shape_cast %119 : vector<1x1x128x64xbf16> to vector<128x64xbf16>
    %cst_101 = arith.constant dense<0.000000e+00> : vector<4x64xf32>
    %121 = tpu.matmul %118, %120, %cst_101 {dimension_numbers = #tpu.dot_dimension_numbers<[1], [0], [0], [1], [0, 0, 1, 1], [], []>} : vector<4x128xbf16>, vector<128x64xbf16>, vector<4x64xf32> -> vector<4x64xf32>
    %122 = arith.addf %116, %121 : vector<4x64xf32>
    %c0_102 = arith.constant 0 : index
    %c0_103 = arith.constant 0 : index
    %123 = vector.load %arg5[%c0_102, %c0_103] : memref<1x64xf32, #tpu.memory_space<vmem>>, vector<1x64xf32>
    %124 = vector.broadcast %123 : vector<1x64xf32> to vector<4x64xf32>
    %125 = arith.addf %122, %124 : vector<4x64xf32>
    %126 = arith.truncf %125 : vector<4x64xf32> to vector<4x64xbf16>
    %c0_104 = arith.constant 0 : index
    %c3 = arith.constant 3 : index
    %c0_105 = arith.constant 0 : index
    %c0_106 = arith.constant 0 : index
    %127 = vector.load %arg6[%c0_104, %c3, %c0_105, %c0_106] : memref<1x4x4x64xbf16, #tpu.memory_space<vmem>>, vector<1x1x4x64xbf16>
    %128 = vector.shape_cast %127 : vector<1x1x4x64xbf16> to vector<4x64xbf16>
    %129 = vector.shape_cast %126 : vector<4x64xbf16> to vector<1x1x4x64xbf16>
    tpu.vector_store %arg6[%c0_104, %c3, %c0_105, %c0_106], %129 {strides = array<i32>} : memref<1x4x4x64xbf16, #tpu.memory_space<vmem>>, vector<1x1x4x64xbf16>,
    return
  }
  func.func @transform_0(%arg0: i32, %arg1: i32, %arg2: i32) -> (i32, i32, i32, i32) {
    %c0_i32 = arith.constant 0 : i32
    %c0_i32_0 = arith.constant 0 : i32
    %c0_i32_1 = arith.constant 0 : i32
    %c0_i32_2 = arith.constant 0 : i32
    return %arg1, %c0_i32, %c0_i32_0, %c0_i32_1 : i32, i32, i32, i32
  }
  func.func @transform_1(%arg0: i32, %arg1: i32, %arg2: i32) -> (i32, i32, i32, i32) {
    %c0_i32 = arith.constant 0 : i32
    %c0_i32_0 = arith.constant 0 : i32
    %c0_i32_1 = arith.constant 0 : i32
    %c0_i32_2 = arith.constant 0 : i32
    return %c0_i32, %c0_i32_0, %c0_i32_1, %arg0 : i32, i32, i32, i32
  }
  func.func @transform_2(%arg0: i32, %arg1: i32, %arg2: i32) -> (i32, i32) {
    %c0_i32 = arith.constant 0 : i32
    %c0_i32_0 = arith.constant 0 : i32
    return %c0_i32, %arg0 : i32, i32
  }
  func.func @transform_3(%arg0: i32, %arg1: i32, %arg2: i32) -> (i32, i32, i32, i32) {
    %c0_i32 = arith.constant 0 : i32
    %c0_i32_0 = arith.constant 0 : i32
    return %arg1, %arg2, %c0_i32, %arg0 : i32, i32, i32, i32
  }
}

module attributes {stable_mosaic.version = 11 : i64} {
  func.func @_bn_apply_kernel(%arg0: i32, %arg1: i32, %arg2: memref<1x4x4x64xbf16, #tpu.memory_space<vmem>>, %arg3: memref<1x64xf32, #tpu.memory_space<vmem>>, %arg4: memref<1x64xf32, #tpu.memory_space<vmem>>, %arg5: memref<1x4x4x64xbf16, #tpu.memory_space<vmem>>) attributes {dimension_semantics = [#tpu.dimension_semantics<parallel>, #tpu.dimension_semantics<parallel>], iteration_bounds = array<i64: 2, 1>, scalar_prefetch = 0 : i64, scratch_operands = 0 : i64, tpu.core_type = #tpu.core_type<tc>, window_params = [{transform_indices = @transform_0, window_bounds = array<i64: 1, 4, 4, 64>}, {pipeline_mode = #tpu.pipeline_mode<synchronous>, transform_indices = @transform_1, window_bounds = array<i64: 1, 64>}, {pipeline_mode = #tpu.pipeline_mode<synchronous>, transform_indices = @transform_2, window_bounds = array<i64: 1, 64>}, {transform_indices = @transform_3, window_bounds = array<i64: 1, 4, 4, 64>}]} {
    %c0 = arith.constant 0 : index
    %c0_0 = arith.constant 0 : index
    %c0_1 = arith.constant 0 : index
    %c0_2 = arith.constant 0 : index
    %0 = vector.load %arg2[%c0, %c0_0, %c0_1, %c0_2] : memref<1x4x4x64xbf16, #tpu.memory_space<vmem>>, vector<1x4x4x64xbf16>
    %1 = vector.shape_cast %0 : vector<1x4x4x64xbf16> to vector<4x4x64xbf16>
    %2 = arith.extf %1 : vector<4x4x64xbf16> to vector<4x4x64xf32>
    %c0_3 = arith.constant 0 : index
    %c0_4 = arith.constant 0 : index
    %3 = vector.load %arg3[%c0_3, %c0_4] : memref<1x64xf32, #tpu.memory_space<vmem>>, vector<1x64xf32>
    %4 = vector.shape_cast %3 : vector<1x64xf32> to vector<1x1x64xf32>
    %5 = vector.broadcast %4 : vector<1x1x64xf32> to vector<4x4x64xf32>
    %6 = arith.mulf %2, %5 : vector<4x4x64xf32>
    %c0_5 = arith.constant 0 : index
    %c0_6 = arith.constant 0 : index
    %7 = vector.load %arg4[%c0_5, %c0_6] : memref<1x64xf32, #tpu.memory_space<vmem>>, vector<1x64xf32>
    %8 = vector.shape_cast %7 : vector<1x64xf32> to vector<1x1x64xf32>
    %9 = vector.broadcast %8 : vector<1x1x64xf32> to vector<4x4x64xf32>
    %10 = arith.addf %6, %9 : vector<4x4x64xf32>
    %cst = arith.constant 2.000000e-01 : f32
    %11 = vector.broadcast %cst : f32 to vector<4x4x64xf32>
    %12 = arith.mulf %11, %10 : vector<4x4x64xf32>
    %13 = arith.maximumf %10, %12 : vector<4x4x64xf32>
    %14 = arith.truncf %13 : vector<4x4x64xf32> to vector<4x4x64xbf16>
    %c0_7 = arith.constant 0 : index
    %c0_8 = arith.constant 0 : index
    %c0_9 = arith.constant 0 : index
    %c0_10 = arith.constant 0 : index
    %15 = vector.load %arg5[%c0_7, %c0_8, %c0_9, %c0_10] : memref<1x4x4x64xbf16, #tpu.memory_space<vmem>>, vector<1x4x4x64xbf16>
    %16 = vector.shape_cast %15 : vector<1x4x4x64xbf16> to vector<4x4x64xbf16>
    %17 = vector.shape_cast %14 : vector<4x4x64xbf16> to vector<1x4x4x64xbf16>
    tpu.vector_store %arg5[%c0_7, %c0_8, %c0_9, %c0_10], %17 {strides = array<i32>} : memref<1x4x4x64xbf16, #tpu.memory_space<vmem>>, vector<1x4x4x64xbf16>,
    return
  }
  func.func @transform_0(%arg0: i32, %arg1: i32) -> (i32, i32, i32, i32) {
    %c0_i32 = arith.constant 0 : i32
    %c0_i32_0 = arith.constant 0 : i32
    %c0_i32_1 = arith.constant 0 : i32
    return %arg0, %arg1, %c0_i32, %c0_i32_0 : i32, i32, i32, i32
  }
  func.func @transform_1(%arg0: i32, %arg1: i32) -> (i32, i32) {
    %c0_i32 = arith.constant 0 : i32
    %c0_i32_0 = arith.constant 0 : i32
    %c0_i32_1 = arith.constant 0 : i32
    return %c0_i32, %c0_i32_0 : i32, i32
  }
  func.func @transform_2(%arg0: i32, %arg1: i32) -> (i32, i32) {
    %c0_i32 = arith.constant 0 : i32
    %c0_i32_0 = arith.constant 0 : i32
    %c0_i32_1 = arith.constant 0 : i32
    return %c0_i32, %c0_i32_0 : i32, i32
  }
  func.func @transform_3(%arg0: i32, %arg1: i32) -> (i32, i32, i32, i32) {
    %c0_i32 = arith.constant 0 : i32
    %c0_i32_0 = arith.constant 0 : i32
    %c0_i32_1 = arith.constant 0 : i32
    return %arg0, %arg1, %c0_i32, %c0_i32_0 : i32, i32, i32, i32
  }
}

module attributes {stable_mosaic.version = 11 : i64} {
  func.func @_conv_block_kernel(%arg0: i32, %arg1: i32, %arg2: i32, %arg3: memref<1x6x6x64xbf16, #tpu.memory_space<vmem>>, %arg4: memref<4x4x64x128xbf16, #tpu.memory_space<vmem>>, %arg5: memref<1x128xf32, #tpu.memory_space<vmem>>, %arg6: memref<1x3x3x128xbf16, #tpu.memory_space<vmem>>) attributes {dimension_semantics = [#tpu.dimension_semantics<parallel>, #tpu.dimension_semantics<parallel>, #tpu.dimension_semantics<parallel>], iteration_bounds = array<i64: 1, 2, 1>, scalar_prefetch = 0 : i64, scratch_operands = 0 : i64, tpu.core_type = #tpu.core_type<tc>, window_params = [{transform_indices = @transform_0, window_bounds = array<i64: 1, 6, 6, 64>}, {transform_indices = @transform_1, window_bounds = array<i64: 4, 4, 64, 128>}, {transform_indices = @transform_2, window_bounds = array<i64: 1, 128>}, {transform_indices = @transform_3, window_bounds = array<i64: 1, 3, 3, 128>}]} {
    %c0 = arith.constant 0 : index
    %c0_0 = arith.constant 0 : index
    %c0_1 = arith.constant 0 : index
    %c0_2 = arith.constant 0 : index
    %0 = vector.load %arg3[%c0, %c0_0, %c0_1, %c0_2] : memref<1x6x6x64xbf16, #tpu.memory_space<vmem>>, vector<1x6x6x64xbf16>
    %1 = vector.shape_cast %0 : vector<1x6x6x64xbf16> to vector<6x6x64xbf16>
    %cst = arith.constant 0.000000e+00 : f32
    %2 = vector.broadcast %cst : f32 to vector<3x128xf32>
    %3 = vector.extract_strided_slice %1 {offsets = [0, 0, 0], sizes = [1, 3, 64], strides = [1, 1, 1]} : vector<6x6x64xbf16> to vector<1x3x64xbf16>
    %4 = vector.shape_cast %3 : vector<1x3x64xbf16> to vector<3x64xbf16>
    %c0_3 = arith.constant 0 : index
    %c0_4 = arith.constant 0 : index
    %c0_5 = arith.constant 0 : index
    %c0_6 = arith.constant 0 : index
    %5 = vector.load %arg4[%c0_3, %c0_4, %c0_5, %c0_6] : memref<4x4x64x128xbf16, #tpu.memory_space<vmem>>, vector<1x1x64x128xbf16>
    %6 = vector.shape_cast %5 : vector<1x1x64x128xbf16> to vector<64x128xbf16>
    %cst_7 = arith.constant dense<0.000000e+00> : vector<3x128xf32>
    %7 = tpu.matmul %4, %6, %cst_7 {dimension_numbers = #tpu.dot_dimension_numbers<[1], [0], [0], [1], [0, 0, 1, 1], [], []>} : vector<3x64xbf16>, vector<64x128xbf16>, vector<3x128xf32> -> vector<3x128xf32>
    %8 = arith.addf %2, %7 : vector<3x128xf32>
    %9 = vector.extract_strided_slice %1 {offsets = [0, 1, 0], sizes = [1, 3, 64], strides = [1, 1, 1]} : vector<6x6x64xbf16> to vector<1x3x64xbf16>
    %10 = vector.shape_cast %9 : vector<1x3x64xbf16> to vector<3x64xbf16>
    %c0_8 = arith.constant 0 : index
    %c1 = arith.constant 1 : index
    %c0_9 = arith.constant 0 : index
    %c0_10 = arith.constant 0 : index
    %11 = vector.load %arg4[%c0_8, %c1, %c0_9, %c0_10] : memref<4x4x64x128xbf16, #tpu.memory_space<vmem>>, vector<1x1x64x128xbf16>
    %12 = vector.shape_cast %11 : vector<1x1x64x128xbf16> to vector<64x128xbf16>
    %cst_11 = arith.constant dense<0.000000e+00> : vector<3x128xf32>
    %13 = tpu.matmul %10, %12, %cst_11 {dimension_numbers = #tpu.dot_dimension_numbers<[1], [0], [0], [1], [0, 0, 1, 1], [], []>} : vector<3x64xbf16>, vector<64x128xbf16>, vector<3x128xf32> -> vector<3x128xf32>
    %14 = arith.addf %8, %13 : vector<3x128xf32>
    %15 = vector.extract_strided_slice %1 {offsets = [0, 2, 0], sizes = [1, 3, 64], strides = [1, 1, 1]} : vector<6x6x64xbf16> to vector<1x3x64xbf16>
    %16 = vector.shape_cast %15 : vector<1x3x64xbf16> to vector<3x64xbf16>
    %c0_12 = arith.constant 0 : index
    %c2 = arith.constant 2 : index
    %c0_13 = arith.constant 0 : index
    %c0_14 = arith.constant 0 : index
    %17 = vector.load %arg4[%c0_12, %c2, %c0_13, %c0_14] : memref<4x4x64x128xbf16, #tpu.memory_space<vmem>>, vector<1x1x64x128xbf16>
    %18 = vector.shape_cast %17 : vector<1x1x64x128xbf16> to vector<64x128xbf16>
    %cst_15 = arith.constant dense<0.000000e+00> : vector<3x128xf32>
    %19 = tpu.matmul %16, %18, %cst_15 {dimension_numbers = #tpu.dot_dimension_numbers<[1], [0], [0], [1], [0, 0, 1, 1], [], []>} : vector<3x64xbf16>, vector<64x128xbf16>, vector<3x128xf32> -> vector<3x128xf32>
    %20 = arith.addf %14, %19 : vector<3x128xf32>
    %21 = vector.extract_strided_slice %1 {offsets = [0, 3, 0], sizes = [1, 3, 64], strides = [1, 1, 1]} : vector<6x6x64xbf16> to vector<1x3x64xbf16>
    %22 = vector.shape_cast %21 : vector<1x3x64xbf16> to vector<3x64xbf16>
    %c0_16 = arith.constant 0 : index
    %c3 = arith.constant 3 : index
    %c0_17 = arith.constant 0 : index
    %c0_18 = arith.constant 0 : index
    %23 = vector.load %arg4[%c0_16, %c3, %c0_17, %c0_18] : memref<4x4x64x128xbf16, #tpu.memory_space<vmem>>, vector<1x1x64x128xbf16>
    %24 = vector.shape_cast %23 : vector<1x1x64x128xbf16> to vector<64x128xbf16>
    %cst_19 = arith.constant dense<0.000000e+00> : vector<3x128xf32>
    %25 = tpu.matmul %22, %24, %cst_19 {dimension_numbers = #tpu.dot_dimension_numbers<[1], [0], [0], [1], [0, 0, 1, 1], [], []>} : vector<3x64xbf16>, vector<64x128xbf16>, vector<3x128xf32> -> vector<3x128xf32>
    %26 = arith.addf %20, %25 : vector<3x128xf32>
    %27 = vector.extract_strided_slice %1 {offsets = [1, 0, 0], sizes = [1, 3, 64], strides = [1, 1, 1]} : vector<6x6x64xbf16> to vector<1x3x64xbf16>
    %28 = vector.shape_cast %27 : vector<1x3x64xbf16> to vector<3x64xbf16>
    %c1_20 = arith.constant 1 : index
    %c0_21 = arith.constant 0 : index
    %c0_22 = arith.constant 0 : index
    %c0_23 = arith.constant 0 : index
    %29 = vector.load %arg4[%c1_20, %c0_21, %c0_22, %c0_23] : memref<4x4x64x128xbf16, #tpu.memory_space<vmem>>, vector<1x1x64x128xbf16>
    %30 = vector.shape_cast %29 : vector<1x1x64x128xbf16> to vector<64x128xbf16>
    %cst_24 = arith.constant dense<0.000000e+00> : vector<3x128xf32>
    %31 = tpu.matmul %28, %30, %cst_24 {dimension_numbers = #tpu.dot_dimension_numbers<[1], [0], [0], [1], [0, 0, 1, 1], [], []>} : vector<3x64xbf16>, vector<64x128xbf16>, vector<3x128xf32> -> vector<3x128xf32>
    %32 = arith.addf %26, %31 : vector<3x128xf32>
    %33 = vector.extract_strided_slice %1 {offsets = [1, 1, 0], sizes = [1, 3, 64], strides = [1, 1, 1]} : vector<6x6x64xbf16> to vector<1x3x64xbf16>
    %34 = vector.shape_cast %33 : vector<1x3x64xbf16> to vector<3x64xbf16>
    %c1_25 = arith.constant 1 : index
    %c1_26 = arith.constant 1 : index
    %c0_27 = arith.constant 0 : index
    %c0_28 = arith.constant 0 : index
    %35 = vector.load %arg4[%c1_25, %c1_26, %c0_27, %c0_28] : memref<4x4x64x128xbf16, #tpu.memory_space<vmem>>, vector<1x1x64x128xbf16>
    %36 = vector.shape_cast %35 : vector<1x1x64x128xbf16> to vector<64x128xbf16>
    %cst_29 = arith.constant dense<0.000000e+00> : vector<3x128xf32>
    %37 = tpu.matmul %34, %36, %cst_29 {dimension_numbers = #tpu.dot_dimension_numbers<[1], [0], [0], [1], [0, 0, 1, 1], [], []>} : vector<3x64xbf16>, vector<64x128xbf16>, vector<3x128xf32> -> vector<3x128xf32>
    %38 = arith.addf %32, %37 : vector<3x128xf32>
    %39 = vector.extract_strided_slice %1 {offsets = [1, 2, 0], sizes = [1, 3, 64], strides = [1, 1, 1]} : vector<6x6x64xbf16> to vector<1x3x64xbf16>
    %40 = vector.shape_cast %39 : vector<1x3x64xbf16> to vector<3x64xbf16>
    %c1_30 = arith.constant 1 : index
    %c2_31 = arith.constant 2 : index
    %c0_32 = arith.constant 0 : index
    %c0_33 = arith.constant 0 : index
    %41 = vector.load %arg4[%c1_30, %c2_31, %c0_32, %c0_33] : memref<4x4x64x128xbf16, #tpu.memory_space<vmem>>, vector<1x1x64x128xbf16>
    %42 = vector.shape_cast %41 : vector<1x1x64x128xbf16> to vector<64x128xbf16>
    %cst_34 = arith.constant dense<0.000000e+00> : vector<3x128xf32>
    %43 = tpu.matmul %40, %42, %cst_34 {dimension_numbers = #tpu.dot_dimension_numbers<[1], [0], [0], [1], [0, 0, 1, 1], [], []>} : vector<3x64xbf16>, vector<64x128xbf16>, vector<3x128xf32> -> vector<3x128xf32>
    %44 = arith.addf %38, %43 : vector<3x128xf32>
    %45 = vector.extract_strided_slice %1 {offsets = [1, 3, 0], sizes = [1, 3, 64], strides = [1, 1, 1]} : vector<6x6x64xbf16> to vector<1x3x64xbf16>
    %46 = vector.shape_cast %45 : vector<1x3x64xbf16> to vector<3x64xbf16>
    %c1_35 = arith.constant 1 : index
    %c3_36 = arith.constant 3 : index
    %c0_37 = arith.constant 0 : index
    %c0_38 = arith.constant 0 : index
    %47 = vector.load %arg4[%c1_35, %c3_36, %c0_37, %c0_38] : memref<4x4x64x128xbf16, #tpu.memory_space<vmem>>, vector<1x1x64x128xbf16>
    %48 = vector.shape_cast %47 : vector<1x1x64x128xbf16> to vector<64x128xbf16>
    %cst_39 = arith.constant dense<0.000000e+00> : vector<3x128xf32>
    %49 = tpu.matmul %46, %48, %cst_39 {dimension_numbers = #tpu.dot_dimension_numbers<[1], [0], [0], [1], [0, 0, 1, 1], [], []>} : vector<3x64xbf16>, vector<64x128xbf16>, vector<3x128xf32> -> vector<3x128xf32>
    %50 = arith.addf %44, %49 : vector<3x128xf32>
    %51 = vector.extract_strided_slice %1 {offsets = [2, 0, 0], sizes = [1, 3, 64], strides = [1, 1, 1]} : vector<6x6x64xbf16> to vector<1x3x64xbf16>
    %52 = vector.shape_cast %51 : vector<1x3x64xbf16> to vector<3x64xbf16>
    %c2_40 = arith.constant 2 : index
    %c0_41 = arith.constant 0 : index
    %c0_42 = arith.constant 0 : index
    %c0_43 = arith.constant 0 : index
    %53 = vector.load %arg4[%c2_40, %c0_41, %c0_42, %c0_43] : memref<4x4x64x128xbf16, #tpu.memory_space<vmem>>, vector<1x1x64x128xbf16>
    %54 = vector.shape_cast %53 : vector<1x1x64x128xbf16> to vector<64x128xbf16>
    %cst_44 = arith.constant dense<0.000000e+00> : vector<3x128xf32>
    %55 = tpu.matmul %52, %54, %cst_44 {dimension_numbers = #tpu.dot_dimension_numbers<[1], [0], [0], [1], [0, 0, 1, 1], [], []>} : vector<3x64xbf16>, vector<64x128xbf16>, vector<3x128xf32> -> vector<3x128xf32>
    %56 = arith.addf %50, %55 : vector<3x128xf32>
    %57 = vector.extract_strided_slice %1 {offsets = [2, 1, 0], sizes = [1, 3, 64], strides = [1, 1, 1]} : vector<6x6x64xbf16> to vector<1x3x64xbf16>
    %58 = vector.shape_cast %57 : vector<1x3x64xbf16> to vector<3x64xbf16>
    %c2_45 = arith.constant 2 : index
    %c1_46 = arith.constant 1 : index
    %c0_47 = arith.constant 0 : index
    %c0_48 = arith.constant 0 : index
    %59 = vector.load %arg4[%c2_45, %c1_46, %c0_47, %c0_48] : memref<4x4x64x128xbf16, #tpu.memory_space<vmem>>, vector<1x1x64x128xbf16>
    %60 = vector.shape_cast %59 : vector<1x1x64x128xbf16> to vector<64x128xbf16>
    %cst_49 = arith.constant dense<0.000000e+00> : vector<3x128xf32>
    %61 = tpu.matmul %58, %60, %cst_49 {dimension_numbers = #tpu.dot_dimension_numbers<[1], [0], [0], [1], [0, 0, 1, 1], [], []>} : vector<3x64xbf16>, vector<64x128xbf16>, vector<3x128xf32> -> vector<3x128xf32>
    %62 = arith.addf %56, %61 : vector<3x128xf32>
    %63 = vector.extract_strided_slice %1 {offsets = [2, 2, 0], sizes = [1, 3, 64], strides = [1, 1, 1]} : vector<6x6x64xbf16> to vector<1x3x64xbf16>
    %64 = vector.shape_cast %63 : vector<1x3x64xbf16> to vector<3x64xbf16>
    %c2_50 = arith.constant 2 : index
    %c2_51 = arith.constant 2 : index
    %c0_52 = arith.constant 0 : index
    %c0_53 = arith.constant 0 : index
    %65 = vector.load %arg4[%c2_50, %c2_51, %c0_52, %c0_53] : memref<4x4x64x128xbf16, #tpu.memory_space<vmem>>, vector<1x1x64x128xbf16>
    %66 = vector.shape_cast %65 : vector<1x1x64x128xbf16> to vector<64x128xbf16>
    %cst_54 = arith.constant dense<0.000000e+00> : vector<3x128xf32>
    %67 = tpu.matmul %64, %66, %cst_54 {dimension_numbers = #tpu.dot_dimension_numbers<[1], [0], [0], [1], [0, 0, 1, 1], [], []>} : vector<3x64xbf16>, vector<64x128xbf16>, vector<3x128xf32> -> vector<3x128xf32>
    %68 = arith.addf %62, %67 : vector<3x128xf32>
    %69 = vector.extract_strided_slice %1 {offsets = [2, 3, 0], sizes = [1, 3, 64], strides = [1, 1, 1]} : vector<6x6x64xbf16> to vector<1x3x64xbf16>
    %70 = vector.shape_cast %69 : vector<1x3x64xbf16> to vector<3x64xbf16>
    %c2_55 = arith.constant 2 : index
    %c3_56 = arith.constant 3 : index
    %c0_57 = arith.constant 0 : index
    %c0_58 = arith.constant 0 : index
    %71 = vector.load %arg4[%c2_55, %c3_56, %c0_57, %c0_58] : memref<4x4x64x128xbf16, #tpu.memory_space<vmem>>, vector<1x1x64x128xbf16>
    %72 = vector.shape_cast %71 : vector<1x1x64x128xbf16> to vector<64x128xbf16>
    %cst_59 = arith.constant dense<0.000000e+00> : vector<3x128xf32>
    %73 = tpu.matmul %70, %72, %cst_59 {dimension_numbers = #tpu.dot_dimension_numbers<[1], [0], [0], [1], [0, 0, 1, 1], [], []>} : vector<3x64xbf16>, vector<64x128xbf16>, vector<3x128xf32> -> vector<3x128xf32>
    %74 = arith.addf %68, %73 : vector<3x128xf32>
    %75 = vector.extract_strided_slice %1 {offsets = [3, 0, 0], sizes = [1, 3, 64], strides = [1, 1, 1]} : vector<6x6x64xbf16> to vector<1x3x64xbf16>
    %76 = vector.shape_cast %75 : vector<1x3x64xbf16> to vector<3x64xbf16>
    %c3_60 = arith.constant 3 : index
    %c0_61 = arith.constant 0 : index
    %c0_62 = arith.constant 0 : index
    %c0_63 = arith.constant 0 : index
    %77 = vector.load %arg4[%c3_60, %c0_61, %c0_62, %c0_63] : memref<4x4x64x128xbf16, #tpu.memory_space<vmem>>, vector<1x1x64x128xbf16>
    %78 = vector.shape_cast %77 : vector<1x1x64x128xbf16> to vector<64x128xbf16>
    %cst_64 = arith.constant dense<0.000000e+00> : vector<3x128xf32>
    %79 = tpu.matmul %76, %78, %cst_64 {dimension_numbers = #tpu.dot_dimension_numbers<[1], [0], [0], [1], [0, 0, 1, 1], [], []>} : vector<3x64xbf16>, vector<64x128xbf16>, vector<3x128xf32> -> vector<3x128xf32>
    %80 = arith.addf %74, %79 : vector<3x128xf32>
    %81 = vector.extract_strided_slice %1 {offsets = [3, 1, 0], sizes = [1, 3, 64], strides = [1, 1, 1]} : vector<6x6x64xbf16> to vector<1x3x64xbf16>
    %82 = vector.shape_cast %81 : vector<1x3x64xbf16> to vector<3x64xbf16>
    %c3_65 = arith.constant 3 : index
    %c1_66 = arith.constant 1 : index
    %c0_67 = arith.constant 0 : index
    %c0_68 = arith.constant 0 : index
    %83 = vector.load %arg4[%c3_65, %c1_66, %c0_67, %c0_68] : memref<4x4x64x128xbf16, #tpu.memory_space<vmem>>, vector<1x1x64x128xbf16>
    %84 = vector.shape_cast %83 : vector<1x1x64x128xbf16> to vector<64x128xbf16>
    %cst_69 = arith.constant dense<0.000000e+00> : vector<3x128xf32>
    %85 = tpu.matmul %82, %84, %cst_69 {dimension_numbers = #tpu.dot_dimension_numbers<[1], [0], [0], [1], [0, 0, 1, 1], [], []>} : vector<3x64xbf16>, vector<64x128xbf16>, vector<3x128xf32> -> vector<3x128xf32>
    %86 = arith.addf %80, %85 : vector<3x128xf32>
    %87 = vector.extract_strided_slice %1 {offsets = [3, 2, 0], sizes = [1, 3, 64], strides = [1, 1, 1]} : vector<6x6x64xbf16> to vector<1x3x64xbf16>
    %88 = vector.shape_cast %87 : vector<1x3x64xbf16> to vector<3x64xbf16>
    %c3_70 = arith.constant 3 : index
    %c2_71 = arith.constant 2 : index
    %c0_72 = arith.constant 0 : index
    %c0_73 = arith.constant 0 : index
    %89 = vector.load %arg4[%c3_70, %c2_71, %c0_72, %c0_73] : memref<4x4x64x128xbf16, #tpu.memory_space<vmem>>, vector<1x1x64x128xbf16>
    %90 = vector.shape_cast %89 : vector<1x1x64x128xbf16> to vector<64x128xbf16>
    %cst_74 = arith.constant dense<0.000000e+00> : vector<3x128xf32>
    %91 = tpu.matmul %88, %90, %cst_74 {dimension_numbers = #tpu.dot_dimension_numbers<[1], [0], [0], [1], [0, 0, 1, 1], [], []>} : vector<3x64xbf16>, vector<64x128xbf16>, vector<3x128xf32> -> vector<3x128xf32>
    %92 = arith.addf %86, %91 : vector<3x128xf32>
    %93 = vector.extract_strided_slice %1 {offsets = [3, 3, 0], sizes = [1, 3, 64], strides = [1, 1, 1]} : vector<6x6x64xbf16> to vector<1x3x64xbf16>
    %94 = vector.shape_cast %93 : vector<1x3x64xbf16> to vector<3x64xbf16>
    %c3_75 = arith.constant 3 : index
    %c3_76 = arith.constant 3 : index
    %c0_77 = arith.constant 0 : index
    %c0_78 = arith.constant 0 : index
    %95 = vector.load %arg4[%c3_75, %c3_76, %c0_77, %c0_78] : memref<4x4x64x128xbf16, #tpu.memory_space<vmem>>, vector<1x1x64x128xbf16>
    %96 = vector.shape_cast %95 : vector<1x1x64x128xbf16> to vector<64x128xbf16>
    %cst_79 = arith.constant dense<0.000000e+00> : vector<3x128xf32>
    %97 = tpu.matmul %94, %96, %cst_79 {dimension_numbers = #tpu.dot_dimension_numbers<[1], [0], [0], [1], [0, 0, 1, 1], [], []>} : vector<3x64xbf16>, vector<64x128xbf16>, vector<3x128xf32> -> vector<3x128xf32>
    %98 = arith.addf %92, %97 : vector<3x128xf32>
    %c0_80 = arith.constant 0 : index
    %c0_81 = arith.constant 0 : index
    %99 = vector.load %arg5[%c0_80, %c0_81] : memref<1x128xf32, #tpu.memory_space<vmem>>, vector<1x128xf32>
    %100 = vector.broadcast %99 : vector<1x128xf32> to vector<3x128xf32>
    %101 = arith.addf %98, %100 : vector<3x128xf32>
    %102 = arith.truncf %101 : vector<3x128xf32> to vector<3x128xbf16>
    %c0_82 = arith.constant 0 : index
    %c0_83 = arith.constant 0 : index
    %c0_84 = arith.constant 0 : index
    %c0_85 = arith.constant 0 : index
    %103 = vector.load %arg6[%c0_82, %c0_83, %c0_84, %c0_85] : memref<1x3x3x128xbf16, #tpu.memory_space<vmem>>, vector<1x1x3x128xbf16>
    %104 = vector.shape_cast %103 : vector<1x1x3x128xbf16> to vector<3x128xbf16>
    %105 = vector.shape_cast %102 : vector<3x128xbf16> to vector<1x1x3x128xbf16>
    tpu.vector_store %arg6[%c0_82, %c0_83, %c0_84, %c0_85], %105 {strides = array<i32>} : memref<1x3x3x128xbf16, #tpu.memory_space<vmem>>, vector<1x1x3x128xbf16>,
    %cst_86 = arith.constant 0.000000e+00 : f32
    %106 = vector.broadcast %cst_86 : f32 to vector<3x128xf32>
    %107 = vector.extract_strided_slice %1 {offsets = [1, 0, 0], sizes = [1, 3, 64], strides = [1, 1, 1]} : vector<6x6x64xbf16> to vector<1x3x64xbf16>
    %108 = vector.shape_cast %107 : vector<1x3x64xbf16> to vector<3x64xbf16>
    %c0_87 = arith.constant 0 : index
    %c0_88 = arith.constant 0 : index
    %c0_89 = arith.constant 0 : index
    %c0_90 = arith.constant 0 : index
    %109 = vector.load %arg4[%c0_87, %c0_88, %c0_89, %c0_90] : memref<4x4x64x128xbf16, #tpu.memory_space<vmem>>, vector<1x1x64x128xbf16>
    %110 = vector.shape_cast %109 : vector<1x1x64x128xbf16> to vector<64x128xbf16>
    %cst_91 = arith.constant dense<0.000000e+00> : vector<3x128xf32>
    %111 = tpu.matmul %108, %110, %cst_91 {dimension_numbers = #tpu.dot_dimension_numbers<[1], [0], [0], [1], [0, 0, 1, 1], [], []>} : vector<3x64xbf16>, vector<64x128xbf16>, vector<3x128xf32> -> vector<3x128xf32>
    %112 = arith.addf %106, %111 : vector<3x128xf32>
    %113 = vector.extract_strided_slice %1 {offsets = [1, 1, 0], sizes = [1, 3, 64], strides = [1, 1, 1]} : vector<6x6x64xbf16> to vector<1x3x64xbf16>
    %114 = vector.shape_cast %113 : vector<1x3x64xbf16> to vector<3x64xbf16>
    %c0_92 = arith.constant 0 : index
    %c1_93 = arith.constant 1 : index
    %c0_94 = arith.constant 0 : index
    %c0_95 = arith.constant 0 : index
    %115 = vector.load %arg4[%c0_92, %c1_93, %c0_94, %c0_95] : memref<4x4x64x128xbf16, #tpu.memory_space<vmem>>, vector<1x1x64x128xbf16>
    %116 = vector.shape_cast %115 : vector<1x1x64x128xbf16> to vector<64x128xbf16>
    %cst_96 = arith.constant dense<0.000000e+00> : vector<3x128xf32>
    %117 = tpu.matmul %114, %116, %cst_96 {dimension_numbers = #tpu.dot_dimension_numbers<[1], [0], [0], [1], [0, 0, 1, 1], [], []>} : vector<3x64xbf16>, vector<64x128xbf16>, vector<3x128xf32> -> vector<3x128xf32>
    %118 = arith.addf %112, %117 : vector<3x128xf32>
    %119 = vector.extract_strided_slice %1 {offsets = [1, 2, 0], sizes = [1, 3, 64], strides = [1, 1, 1]} : vector<6x6x64xbf16> to vector<1x3x64xbf16>
    %120 = vector.shape_cast %119 : vector<1x3x64xbf16> to vector<3x64xbf16>
    %c0_97 = arith.constant 0 : index
    %c2_98 = arith.constant 2 : index
    %c0_99 = arith.constant 0 : index
    %c0_100 = arith.constant 0 : index
    %121 = vector.load %arg4[%c0_97, %c2_98, %c0_99, %c0_100] : memref<4x4x64x128xbf16, #tpu.memory_space<vmem>>, vector<1x1x64x128xbf16>
    %122 = vector.shape_cast %121 : vector<1x1x64x128xbf16> to vector<64x128xbf16>
    %cst_101 = arith.constant dense<0.000000e+00> : vector<3x128xf32>
    %123 = tpu.matmul %120, %122, %cst_101 {dimension_numbers = #tpu.dot_dimension_numbers<[1], [0], [0], [1], [0, 0, 1, 1], [], []>} : vector<3x64xbf16>, vector<64x128xbf16>, vector<3x128xf32> -> vector<3x128xf32>
    %124 = arith.addf %118, %123 : vector<3x128xf32>
    %125 = vector.extract_strided_slice %1 {offsets = [1, 3, 0], sizes = [1, 3, 64], strides = [1, 1, 1]} : vector<6x6x64xbf16> to vector<1x3x64xbf16>
    %126 = vector.shape_cast %125 : vector<1x3x64xbf16> to vector<3x64xbf16>
    %c0_102 = arith.constant 0 : index
    %c3_103 = arith.constant 3 : index
    %c0_104 = arith.constant 0 : index
    %c0_105 = arith.constant 0 : index
    %127 = vector.load %arg4[%c0_102, %c3_103, %c0_104, %c0_105] : memref<4x4x64x128xbf16, #tpu.memory_space<vmem>>, vector<1x1x64x128xbf16>
    %128 = vector.shape_cast %127 : vector<1x1x64x128xbf16> to vector<64x128xbf16>
    %cst_106 = arith.constant dense<0.000000e+00> : vector<3x128xf32>
    %129 = tpu.matmul %126, %128, %cst_106 {dimension_numbers = #tpu.dot_dimension_numbers<[1], [0], [0], [1], [0, 0, 1, 1], [], []>} : vector<3x64xbf16>, vector<64x128xbf16>, vector<3x128xf32> -> vector<3x128xf32>
    %130 = arith.addf %124, %129 : vector<3x128xf32>
    %131 = vector.extract_strided_slice %1 {offsets = [2, 0, 0], sizes = [1, 3, 64], strides = [1, 1, 1]} : vector<6x6x64xbf16> to vector<1x3x64xbf16>
    %132 = vector.shape_cast %131 : vector<1x3x64xbf16> to vector<3x64xbf16>
    %c1_107 = arith.constant 1 : index
    %c0_108 = arith.constant 0 : index
    %c0_109 = arith.constant 0 : index
    %c0_110 = arith.constant 0 : index
    %133 = vector.load %arg4[%c1_107, %c0_108, %c0_109, %c0_110] : memref<4x4x64x128xbf16, #tpu.memory_space<vmem>>, vector<1x1x64x128xbf16>
    %134 = vector.shape_cast %133 : vector<1x1x64x128xbf16> to vector<64x128xbf16>
    %cst_111 = arith.constant dense<0.000000e+00> : vector<3x128xf32>
    %135 = tpu.matmul %132, %134, %cst_111 {dimension_numbers = #tpu.dot_dimension_numbers<[1], [0], [0], [1], [0, 0, 1, 1], [], []>} : vector<3x64xbf16>, vector<64x128xbf16>, vector<3x128xf32> -> vector<3x128xf32>
    %136 = arith.addf %130, %135 : vector<3x128xf32>
    %137 = vector.extract_strided_slice %1 {offsets = [2, 1, 0], sizes = [1, 3, 64], strides = [1, 1, 1]} : vector<6x6x64xbf16> to vector<1x3x64xbf16>
    %138 = vector.shape_cast %137 : vector<1x3x64xbf16> to vector<3x64xbf16>
    %c1_112 = arith.constant 1 : index
    %c1_113 = arith.constant 1 : index
    %c0_114 = arith.constant 0 : index
    %c0_115 = arith.constant 0 : index
    %139 = vector.load %arg4[%c1_112, %c1_113, %c0_114, %c0_115] : memref<4x4x64x128xbf16, #tpu.memory_space<vmem>>, vector<1x1x64x128xbf16>
    %140 = vector.shape_cast %139 : vector<1x1x64x128xbf16> to vector<64x128xbf16>
    %cst_116 = arith.constant dense<0.000000e+00> : vector<3x128xf32>
    %141 = tpu.matmul %138, %140, %cst_116 {dimension_numbers = #tpu.dot_dimension_numbers<[1], [0], [0], [1], [0, 0, 1, 1], [], []>} : vector<3x64xbf16>, vector<64x128xbf16>, vector<3x128xf32> -> vector<3x128xf32>
    %142 = arith.addf %136, %141 : vector<3x128xf32>
    %143 = vector.extract_strided_slice %1 {offsets = [2, 2, 0], sizes = [1, 3, 64], strides = [1, 1, 1]} : vector<6x6x64xbf16> to vector<1x3x64xbf16>
    %144 = vector.shape_cast %143 : vector<1x3x64xbf16> to vector<3x64xbf16>
    %c1_117 = arith.constant 1 : index
    %c2_118 = arith.constant 2 : index
    %c0_119 = arith.constant 0 : index
    %c0_120 = arith.constant 0 : index
    %145 = vector.load %arg4[%c1_117, %c2_118, %c0_119, %c0_120] : memref<4x4x64x128xbf16, #tpu.memory_space<vmem>>, vector<1x1x64x128xbf16>
    %146 = vector.shape_cast %145 : vector<1x1x64x128xbf16> to vector<64x128xbf16>
    %cst_121 = arith.constant dense<0.000000e+00> : vector<3x128xf32>
    %147 = tpu.matmul %144, %146, %cst_121 {dimension_numbers = #tpu.dot_dimension_numbers<[1], [0], [0], [1], [0, 0, 1, 1], [], []>} : vector<3x64xbf16>, vector<64x128xbf16>, vector<3x128xf32> -> vector<3x128xf32>
    %148 = arith.addf %142, %147 : vector<3x128xf32>
    %149 = vector.extract_strided_slice %1 {offsets = [2, 3, 0], sizes = [1, 3, 64], strides = [1, 1, 1]} : vector<6x6x64xbf16> to vector<1x3x64xbf16>
    %150 = vector.shape_cast %149 : vector<1x3x64xbf16> to vector<3x64xbf16>
    %c1_122 = arith.constant 1 : index
    %c3_123 = arith.constant 3 : index
    %c0_124 = arith.constant 0 : index
    %c0_125 = arith.constant 0 : index
    %151 = vector.load %arg4[%c1_122, %c3_123, %c0_124, %c0_125] : memref<4x4x64x128xbf16, #tpu.memory_space<vmem>>, vector<1x1x64x128xbf16>
    %152 = vector.shape_cast %151 : vector<1x1x64x128xbf16> to vector<64x128xbf16>
    %cst_126 = arith.constant dense<0.000000e+00> : vector<3x128xf32>
    %153 = tpu.matmul %150, %152, %cst_126 {dimension_numbers = #tpu.dot_dimension_numbers<[1], [0], [0], [1], [0, 0, 1, 1], [], []>} : vector<3x64xbf16>, vector<64x128xbf16>, vector<3x128xf32> -> vector<3x128xf32>
    %154 = arith.addf %148, %153 : vector<3x128xf32>
    %155 = vector.extract_strided_slice %1 {offsets = [3, 0, 0], sizes = [1, 3, 64], strides = [1, 1, 1]} : vector<6x6x64xbf16> to vector<1x3x64xbf16>
    %156 = vector.shape_cast %155 : vector<1x3x64xbf16> to vector<3x64xbf16>
    %c2_127 = arith.constant 2 : index
    %c0_128 = arith.constant 0 : index
    %c0_129 = arith.constant 0 : index
    %c0_130 = arith.constant 0 : index
    %157 = vector.load %arg4[%c2_127, %c0_128, %c0_129, %c0_130] : memref<4x4x64x128xbf16, #tpu.memory_space<vmem>>, vector<1x1x64x128xbf16>
    %158 = vector.shape_cast %157 : vector<1x1x64x128xbf16> to vector<64x128xbf16>
    %cst_131 = arith.constant dense<0.000000e+00> : vector<3x128xf32>
    %159 = tpu.matmul %156, %158, %cst_131 {dimension_numbers = #tpu.dot_dimension_numbers<[1], [0], [0], [1], [0, 0, 1, 1], [], []>} : vector<3x64xbf16>, vector<64x128xbf16>, vector<3x128xf32> -> vector<3x128xf32>
    %160 = arith.addf %154, %159 : vector<3x128xf32>
    %161 = vector.extract_strided_slice %1 {offsets = [3, 1, 0], sizes = [1, 3, 64], strides = [1, 1, 1]} : vector<6x6x64xbf16> to vector<1x3x64xbf16>
    %162 = vector.shape_cast %161 : vector<1x3x64xbf16> to vector<3x64xbf16>
    %c2_132 = arith.constant 2 : index
    %c1_133 = arith.constant 1 : index
    %c0_134 = arith.constant 0 : index
    %c0_135 = arith.constant 0 : index
    %163 = vector.load %arg4[%c2_132, %c1_133, %c0_134, %c0_135] : memref<4x4x64x128xbf16, #tpu.memory_space<vmem>>, vector<1x1x64x128xbf16>
    %164 = vector.shape_cast %163 : vector<1x1x64x128xbf16> to vector<64x128xbf16>
    %cst_136 = arith.constant dense<0.000000e+00> : vector<3x128xf32>
    %165 = tpu.matmul %162, %164, %cst_136 {dimension_numbers = #tpu.dot_dimension_numbers<[1], [0], [0], [1], [0, 0, 1, 1], [], []>} : vector<3x64xbf16>, vector<64x128xbf16>, vector<3x128xf32> -> vector<3x128xf32>
    %166 = arith.addf %160, %165 : vector<3x128xf32>
    %167 = vector.extract_strided_slice %1 {offsets = [3, 2, 0], sizes = [1, 3, 64], strides = [1, 1, 1]} : vector<6x6x64xbf16> to vector<1x3x64xbf16>
    %168 = vector.shape_cast %167 : vector<1x3x64xbf16> to vector<3x64xbf16>
    %c2_137 = arith.constant 2 : index
    %c2_138 = arith.constant 2 : index
    %c0_139 = arith.constant 0 : index
    %c0_140 = arith.constant 0 : index
    %169 = vector.load %arg4[%c2_137, %c2_138, %c0_139, %c0_140] : memref<4x4x64x128xbf16, #tpu.memory_space<vmem>>, vector<1x1x64x128xbf16>
    %170 = vector.shape_cast %169 : vector<1x1x64x128xbf16> to vector<64x128xbf16>
    %cst_141 = arith.constant dense<0.000000e+00> : vector<3x128xf32>
    %171 = tpu.matmul %168, %170, %cst_141 {dimension_numbers = #tpu.dot_dimension_numbers<[1], [0], [0], [1], [0, 0, 1, 1], [], []>} : vector<3x64xbf16>, vector<64x128xbf16>, vector<3x128xf32> -> vector<3x128xf32>
    %172 = arith.addf %166, %171 : vector<3x128xf32>
    %173 = vector.extract_strided_slice %1 {offsets = [3, 3, 0], sizes = [1, 3, 64], strides = [1, 1, 1]} : vector<6x6x64xbf16> to vector<1x3x64xbf16>
    %174 = vector.shape_cast %173 : vector<1x3x64xbf16> to vector<3x64xbf16>
    %c2_142 = arith.constant 2 : index
    %c3_143 = arith.constant 3 : index
    %c0_144 = arith.constant 0 : index
    %c0_145 = arith.constant 0 : index
    %175 = vector.load %arg4[%c2_142, %c3_143, %c0_144, %c0_145] : memref<4x4x64x128xbf16, #tpu.memory_space<vmem>>, vector<1x1x64x128xbf16>
    %176 = vector.shape_cast %175 : vector<1x1x64x128xbf16> to vector<64x128xbf16>
    %cst_146 = arith.constant dense<0.000000e+00> : vector<3x128xf32>
    %177 = tpu.matmul %174, %176, %cst_146 {dimension_numbers = #tpu.dot_dimension_numbers<[1], [0], [0], [1], [0, 0, 1, 1], [], []>} : vector<3x64xbf16>, vector<64x128xbf16>, vector<3x128xf32> -> vector<3x128xf32>
    %178 = arith.addf %172, %177 : vector<3x128xf32>
    %179 = vector.extract_strided_slice %1 {offsets = [4, 0, 0], sizes = [1, 3, 64], strides = [1, 1, 1]} : vector<6x6x64xbf16> to vector<1x3x64xbf16>
    %180 = vector.shape_cast %179 : vector<1x3x64xbf16> to vector<3x64xbf16>
    %c3_147 = arith.constant 3 : index
    %c0_148 = arith.constant 0 : index
    %c0_149 = arith.constant 0 : index
    %c0_150 = arith.constant 0 : index
    %181 = vector.load %arg4[%c3_147, %c0_148, %c0_149, %c0_150] : memref<4x4x64x128xbf16, #tpu.memory_space<vmem>>, vector<1x1x64x128xbf16>
    %182 = vector.shape_cast %181 : vector<1x1x64x128xbf16> to vector<64x128xbf16>
    %cst_151 = arith.constant dense<0.000000e+00> : vector<3x128xf32>
    %183 = tpu.matmul %180, %182, %cst_151 {dimension_numbers = #tpu.dot_dimension_numbers<[1], [0], [0], [1], [0, 0, 1, 1], [], []>} : vector<3x64xbf16>, vector<64x128xbf16>, vector<3x128xf32> -> vector<3x128xf32>
    %184 = arith.addf %178, %183 : vector<3x128xf32>
    %185 = vector.extract_strided_slice %1 {offsets = [4, 1, 0], sizes = [1, 3, 64], strides = [1, 1, 1]} : vector<6x6x64xbf16> to vector<1x3x64xbf16>
    %186 = vector.shape_cast %185 : vector<1x3x64xbf16> to vector<3x64xbf16>
    %c3_152 = arith.constant 3 : index
    %c1_153 = arith.constant 1 : index
    %c0_154 = arith.constant 0 : index
    %c0_155 = arith.constant 0 : index
    %187 = vector.load %arg4[%c3_152, %c1_153, %c0_154, %c0_155] : memref<4x4x64x128xbf16, #tpu.memory_space<vmem>>, vector<1x1x64x128xbf16>
    %188 = vector.shape_cast %187 : vector<1x1x64x128xbf16> to vector<64x128xbf16>
    %cst_156 = arith.constant dense<0.000000e+00> : vector<3x128xf32>
    %189 = tpu.matmul %186, %188, %cst_156 {dimension_numbers = #tpu.dot_dimension_numbers<[1], [0], [0], [1], [0, 0, 1, 1], [], []>} : vector<3x64xbf16>, vector<64x128xbf16>, vector<3x128xf32> -> vector<3x128xf32>
    %190 = arith.addf %184, %189 : vector<3x128xf32>
    %191 = vector.extract_strided_slice %1 {offsets = [4, 2, 0], sizes = [1, 3, 64], strides = [1, 1, 1]} : vector<6x6x64xbf16> to vector<1x3x64xbf16>
    %192 = vector.shape_cast %191 : vector<1x3x64xbf16> to vector<3x64xbf16>
    %c3_157 = arith.constant 3 : index
    %c2_158 = arith.constant 2 : index
    %c0_159 = arith.constant 0 : index
    %c0_160 = arith.constant 0 : index
    %193 = vector.load %arg4[%c3_157, %c2_158, %c0_159, %c0_160] : memref<4x4x64x128xbf16, #tpu.memory_space<vmem>>, vector<1x1x64x128xbf16>
    %194 = vector.shape_cast %193 : vector<1x1x64x128xbf16> to vector<64x128xbf16>
    %cst_161 = arith.constant dense<0.000000e+00> : vector<3x128xf32>
    %195 = tpu.matmul %192, %194, %cst_161 {dimension_numbers = #tpu.dot_dimension_numbers<[1], [0], [0], [1], [0, 0, 1, 1], [], []>} : vector<3x64xbf16>, vector<64x128xbf16>, vector<3x128xf32> -> vector<3x128xf32>
    %196 = arith.addf %190, %195 : vector<3x128xf32>
    %197 = vector.extract_strided_slice %1 {offsets = [4, 3, 0], sizes = [1, 3, 64], strides = [1, 1, 1]} : vector<6x6x64xbf16> to vector<1x3x64xbf16>
    %198 = vector.shape_cast %197 : vector<1x3x64xbf16> to vector<3x64xbf16>
    %c3_162 = arith.constant 3 : index
    %c3_163 = arith.constant 3 : index
    %c0_164 = arith.constant 0 : index
    %c0_165 = arith.constant 0 : index
    %199 = vector.load %arg4[%c3_162, %c3_163, %c0_164, %c0_165] : memref<4x4x64x128xbf16, #tpu.memory_space<vmem>>, vector<1x1x64x128xbf16>
    %200 = vector.shape_cast %199 : vector<1x1x64x128xbf16> to vector<64x128xbf16>
    %cst_166 = arith.constant dense<0.000000e+00> : vector<3x128xf32>
    %201 = tpu.matmul %198, %200, %cst_166 {dimension_numbers = #tpu.dot_dimension_numbers<[1], [0], [0], [1], [0, 0, 1, 1], [], []>} : vector<3x64xbf16>, vector<64x128xbf16>, vector<3x128xf32> -> vector<3x128xf32>
    %202 = arith.addf %196, %201 : vector<3x128xf32>
    %c0_167 = arith.constant 0 : index
    %c0_168 = arith.constant 0 : index
    %203 = vector.load %arg5[%c0_167, %c0_168] : memref<1x128xf32, #tpu.memory_space<vmem>>, vector<1x128xf32>
    %204 = vector.broadcast %203 : vector<1x128xf32> to vector<3x128xf32>
    %205 = arith.addf %202, %204 : vector<3x128xf32>
    %206 = arith.truncf %205 : vector<3x128xf32> to vector<3x128xbf16>
    %c0_169 = arith.constant 0 : index
    %c1_170 = arith.constant 1 : index
    %c0_171 = arith.constant 0 : index
    %c0_172 = arith.constant 0 : index
    %207 = vector.load %arg6[%c0_169, %c1_170, %c0_171, %c0_172] : memref<1x3x3x128xbf16, #tpu.memory_space<vmem>>, vector<1x1x3x128xbf16>
    %208 = vector.shape_cast %207 : vector<1x1x3x128xbf16> to vector<3x128xbf16>
    %209 = vector.shape_cast %206 : vector<3x128xbf16> to vector<1x1x3x128xbf16>
    tpu.vector_store %arg6[%c0_169, %c1_170, %c0_171, %c0_172], %209 {strides = array<i32>} : memref<1x3x3x128xbf16, #tpu.memory_space<vmem>>, vector<1x1x3x128xbf16>,
    %cst_173 = arith.constant 0.000000e+00 : f32
    %210 = vector.broadcast %cst_173 : f32 to vector<3x128xf32>
    %211 = vector.extract_strided_slice %1 {offsets = [2, 0, 0], sizes = [1, 3, 64], strides = [1, 1, 1]} : vector<6x6x64xbf16> to vector<1x3x64xbf16>
    %212 = vector.shape_cast %211 : vector<1x3x64xbf16> to vector<3x64xbf16>
    %c0_174 = arith.constant 0 : index
    %c0_175 = arith.constant 0 : index
    %c0_176 = arith.constant 0 : index
    %c0_177 = arith.constant 0 : index
    %213 = vector.load %arg4[%c0_174, %c0_175, %c0_176, %c0_177] : memref<4x4x64x128xbf16, #tpu.memory_space<vmem>>, vector<1x1x64x128xbf16>
    %214 = vector.shape_cast %213 : vector<1x1x64x128xbf16> to vector<64x128xbf16>
    %cst_178 = arith.constant dense<0.000000e+00> : vector<3x128xf32>
    %215 = tpu.matmul %212, %214, %cst_178 {dimension_numbers = #tpu.dot_dimension_numbers<[1], [0], [0], [1], [0, 0, 1, 1], [], []>} : vector<3x64xbf16>, vector<64x128xbf16>, vector<3x128xf32> -> vector<3x128xf32>
    %216 = arith.addf %210, %215 : vector<3x128xf32>
    %217 = vector.extract_strided_slice %1 {offsets = [2, 1, 0], sizes = [1, 3, 64], strides = [1, 1, 1]} : vector<6x6x64xbf16> to vector<1x3x64xbf16>
    %218 = vector.shape_cast %217 : vector<1x3x64xbf16> to vector<3x64xbf16>
    %c0_179 = arith.constant 0 : index
    %c1_180 = arith.constant 1 : index
    %c0_181 = arith.constant 0 : index
    %c0_182 = arith.constant 0 : index
    %219 = vector.load %arg4[%c0_179, %c1_180, %c0_181, %c0_182] : memref<4x4x64x128xbf16, #tpu.memory_space<vmem>>, vector<1x1x64x128xbf16>
    %220 = vector.shape_cast %219 : vector<1x1x64x128xbf16> to vector<64x128xbf16>
    %cst_183 = arith.constant dense<0.000000e+00> : vector<3x128xf32>
    %221 = tpu.matmul %218, %220, %cst_183 {dimension_numbers = #tpu.dot_dimension_numbers<[1], [0], [0], [1], [0, 0, 1, 1], [], []>} : vector<3x64xbf16>, vector<64x128xbf16>, vector<3x128xf32> -> vector<3x128xf32>
    %222 = arith.addf %216, %221 : vector<3x128xf32>
    %223 = vector.extract_strided_slice %1 {offsets = [2, 2, 0], sizes = [1, 3, 64], strides = [1, 1, 1]} : vector<6x6x64xbf16> to vector<1x3x64xbf16>
    %224 = vector.shape_cast %223 : vector<1x3x64xbf16> to vector<3x64xbf16>
    %c0_184 = arith.constant 0 : index
    %c2_185 = arith.constant 2 : index
    %c0_186 = arith.constant 0 : index
    %c0_187 = arith.constant 0 : index
    %225 = vector.load %arg4[%c0_184, %c2_185, %c0_186, %c0_187] : memref<4x4x64x128xbf16, #tpu.memory_space<vmem>>, vector<1x1x64x128xbf16>
    %226 = vector.shape_cast %225 : vector<1x1x64x128xbf16> to vector<64x128xbf16>
    %cst_188 = arith.constant dense<0.000000e+00> : vector<3x128xf32>
    %227 = tpu.matmul %224, %226, %cst_188 {dimension_numbers = #tpu.dot_dimension_numbers<[1], [0], [0], [1], [0, 0, 1, 1], [], []>} : vector<3x64xbf16>, vector<64x128xbf16>, vector<3x128xf32> -> vector<3x128xf32>
    %228 = arith.addf %222, %227 : vector<3x128xf32>
    %229 = vector.extract_strided_slice %1 {offsets = [2, 3, 0], sizes = [1, 3, 64], strides = [1, 1, 1]} : vector<6x6x64xbf16> to vector<1x3x64xbf16>
    %230 = vector.shape_cast %229 : vector<1x3x64xbf16> to vector<3x64xbf16>
    %c0_189 = arith.constant 0 : index
    %c3_190 = arith.constant 3 : index
    %c0_191 = arith.constant 0 : index
    %c0_192 = arith.constant 0 : index
    %231 = vector.load %arg4[%c0_189, %c3_190, %c0_191, %c0_192] : memref<4x4x64x128xbf16, #tpu.memory_space<vmem>>, vector<1x1x64x128xbf16>
    %232 = vector.shape_cast %231 : vector<1x1x64x128xbf16> to vector<64x128xbf16>
    %cst_193 = arith.constant dense<0.000000e+00> : vector<3x128xf32>
    %233 = tpu.matmul %230, %232, %cst_193 {dimension_numbers = #tpu.dot_dimension_numbers<[1], [0], [0], [1], [0, 0, 1, 1], [], []>} : vector<3x64xbf16>, vector<64x128xbf16>, vector<3x128xf32> -> vector<3x128xf32>
    %234 = arith.addf %228, %233 : vector<3x128xf32>
    %235 = vector.extract_strided_slice %1 {offsets = [3, 0, 0], sizes = [1, 3, 64], strides = [1, 1, 1]} : vector<6x6x64xbf16> to vector<1x3x64xbf16>
    %236 = vector.shape_cast %235 : vector<1x3x64xbf16> to vector<3x64xbf16>
    %c1_194 = arith.constant 1 : index
    %c0_195 = arith.constant 0 : index
    %c0_196 = arith.constant 0 : index
    %c0_197 = arith.constant 0 : index
    %237 = vector.load %arg4[%c1_194, %c0_195, %c0_196, %c0_197] : memref<4x4x64x128xbf16, #tpu.memory_space<vmem>>, vector<1x1x64x128xbf16>
    %238 = vector.shape_cast %237 : vector<1x1x64x128xbf16> to vector<64x128xbf16>
    %cst_198 = arith.constant dense<0.000000e+00> : vector<3x128xf32>
    %239 = tpu.matmul %236, %238, %cst_198 {dimension_numbers = #tpu.dot_dimension_numbers<[1], [0], [0], [1], [0, 0, 1, 1], [], []>} : vector<3x64xbf16>, vector<64x128xbf16>, vector<3x128xf32> -> vector<3x128xf32>
    %240 = arith.addf %234, %239 : vector<3x128xf32>
    %241 = vector.extract_strided_slice %1 {offsets = [3, 1, 0], sizes = [1, 3, 64], strides = [1, 1, 1]} : vector<6x6x64xbf16> to vector<1x3x64xbf16>
    %242 = vector.shape_cast %241 : vector<1x3x64xbf16> to vector<3x64xbf16>
    %c1_199 = arith.constant 1 : index
    %c1_200 = arith.constant 1 : index
    %c0_201 = arith.constant 0 : index
    %c0_202 = arith.constant 0 : index
    %243 = vector.load %arg4[%c1_199, %c1_200, %c0_201, %c0_202] : memref<4x4x64x128xbf16, #tpu.memory_space<vmem>>, vector<1x1x64x128xbf16>
    %244 = vector.shape_cast %243 : vector<1x1x64x128xbf16> to vector<64x128xbf16>
    %cst_203 = arith.constant dense<0.000000e+00> : vector<3x128xf32>
    %245 = tpu.matmul %242, %244, %cst_203 {dimension_numbers = #tpu.dot_dimension_numbers<[1], [0], [0], [1], [0, 0, 1, 1], [], []>} : vector<3x64xbf16>, vector<64x128xbf16>, vector<3x128xf32> -> vector<3x128xf32>
    %246 = arith.addf %240, %245 : vector<3x128xf32>
    %247 = vector.extract_strided_slice %1 {offsets = [3, 2, 0], sizes = [1, 3, 64], strides = [1, 1, 1]} : vector<6x6x64xbf16> to vector<1x3x64xbf16>
    %248 = vector.shape_cast %247 : vector<1x3x64xbf16> to vector<3x64xbf16>
    %c1_204 = arith.constant 1 : index
    %c2_205 = arith.constant 2 : index
    %c0_206 = arith.constant 0 : index
    %c0_207 = arith.constant 0 : index
    %249 = vector.load %arg4[%c1_204, %c2_205, %c0_206, %c0_207] : memref<4x4x64x128xbf16, #tpu.memory_space<vmem>>, vector<1x1x64x128xbf16>
    %250 = vector.shape_cast %249 : vector<1x1x64x128xbf16> to vector<64x128xbf16>
    %cst_208 = arith.constant dense<0.000000e+00> : vector<3x128xf32>
    %251 = tpu.matmul %248, %250, %cst_208 {dimension_numbers = #tpu.dot_dimension_numbers<[1], [0], [0], [1], [0, 0, 1, 1], [], []>} : vector<3x64xbf16>, vector<64x128xbf16>, vector<3x128xf32> -> vector<3x128xf32>
    %252 = arith.addf %246, %251 : vector<3x128xf32>
    %253 = vector.extract_strided_slice %1 {offsets = [3, 3, 0], sizes = [1, 3, 64], strides = [1, 1, 1]} : vector<6x6x64xbf16> to vector<1x3x64xbf16>
    %254 = vector.shape_cast %253 : vector<1x3x64xbf16> to vector<3x64xbf16>
    %c1_209 = arith.constant 1 : index
    %c3_210 = arith.constant 3 : index
    %c0_211 = arith.constant 0 : index
    %c0_212 = arith.constant 0 : index
    %255 = vector.load %arg4[%c1_209, %c3_210, %c0_211, %c0_212] : memref<4x4x64x128xbf16, #tpu.memory_space<vmem>>, vector<1x1x64x128xbf16>
    %256 = vector.shape_cast %255 : vector<1x1x64x128xbf16> to vector<64x128xbf16>
    %cst_213 = arith.constant dense<0.000000e+00> : vector<3x128xf32>
    %257 = tpu.matmul %254, %256, %cst_213 {dimension_numbers = #tpu.dot_dimension_numbers<[1], [0], [0], [1], [0, 0, 1, 1], [], []>} : vector<3x64xbf16>, vector<64x128xbf16>, vector<3x128xf32> -> vector<3x128xf32>
    %258 = arith.addf %252, %257 : vector<3x128xf32>
    %259 = vector.extract_strided_slice %1 {offsets = [4, 0, 0], sizes = [1, 3, 64], strides = [1, 1, 1]} : vector<6x6x64xbf16> to vector<1x3x64xbf16>
    %260 = vector.shape_cast %259 : vector<1x3x64xbf16> to vector<3x64xbf16>
    %c2_214 = arith.constant 2 : index
    %c0_215 = arith.constant 0 : index
    %c0_216 = arith.constant 0 : index
    %c0_217 = arith.constant 0 : index
    %261 = vector.load %arg4[%c2_214, %c0_215, %c0_216, %c0_217] : memref<4x4x64x128xbf16, #tpu.memory_space<vmem>>, vector<1x1x64x128xbf16>
    %262 = vector.shape_cast %261 : vector<1x1x64x128xbf16> to vector<64x128xbf16>
    %cst_218 = arith.constant dense<0.000000e+00> : vector<3x128xf32>
    %263 = tpu.matmul %260, %262, %cst_218 {dimension_numbers = #tpu.dot_dimension_numbers<[1], [0], [0], [1], [0, 0, 1, 1], [], []>} : vector<3x64xbf16>, vector<64x128xbf16>, vector<3x128xf32> -> vector<3x128xf32>
    %264 = arith.addf %258, %263 : vector<3x128xf32>
    %265 = vector.extract_strided_slice %1 {offsets = [4, 1, 0], sizes = [1, 3, 64], strides = [1, 1, 1]} : vector<6x6x64xbf16> to vector<1x3x64xbf16>
    %266 = vector.shape_cast %265 : vector<1x3x64xbf16> to vector<3x64xbf16>
    %c2_219 = arith.constant 2 : index
    %c1_220 = arith.constant 1 : index
    %c0_221 = arith.constant 0 : index
    %c0_222 = arith.constant 0 : index
    %267 = vector.load %arg4[%c2_219, %c1_220, %c0_221, %c0_222] : memref<4x4x64x128xbf16, #tpu.memory_space<vmem>>, vector<1x1x64x128xbf16>
    %268 = vector.shape_cast %267 : vector<1x1x64x128xbf16> to vector<64x128xbf16>
    %cst_223 = arith.constant dense<0.000000e+00> : vector<3x128xf32>
    %269 = tpu.matmul %266, %268, %cst_223 {dimension_numbers = #tpu.dot_dimension_numbers<[1], [0], [0], [1], [0, 0, 1, 1], [], []>} : vector<3x64xbf16>, vector<64x128xbf16>, vector<3x128xf32> -> vector<3x128xf32>
    %270 = arith.addf %264, %269 : vector<3x128xf32>
    %271 = vector.extract_strided_slice %1 {offsets = [4, 2, 0], sizes = [1, 3, 64], strides = [1, 1, 1]} : vector<6x6x64xbf16> to vector<1x3x64xbf16>
    %272 = vector.shape_cast %271 : vector<1x3x64xbf16> to vector<3x64xbf16>
    %c2_224 = arith.constant 2 : index
    %c2_225 = arith.constant 2 : index
    %c0_226 = arith.constant 0 : index
    %c0_227 = arith.constant 0 : index
    %273 = vector.load %arg4[%c2_224, %c2_225, %c0_226, %c0_227] : memref<4x4x64x128xbf16, #tpu.memory_space<vmem>>, vector<1x1x64x128xbf16>
    %274 = vector.shape_cast %273 : vector<1x1x64x128xbf16> to vector<64x128xbf16>
    %cst_228 = arith.constant dense<0.000000e+00> : vector<3x128xf32>
    %275 = tpu.matmul %272, %274, %cst_228 {dimension_numbers = #tpu.dot_dimension_numbers<[1], [0], [0], [1], [0, 0, 1, 1], [], []>} : vector<3x64xbf16>, vector<64x128xbf16>, vector<3x128xf32> -> vector<3x128xf32>
    %276 = arith.addf %270, %275 : vector<3x128xf32>
    %277 = vector.extract_strided_slice %1 {offsets = [4, 3, 0], sizes = [1, 3, 64], strides = [1, 1, 1]} : vector<6x6x64xbf16> to vector<1x3x64xbf16>
    %278 = vector.shape_cast %277 : vector<1x3x64xbf16> to vector<3x64xbf16>
    %c2_229 = arith.constant 2 : index
    %c3_230 = arith.constant 3 : index
    %c0_231 = arith.constant 0 : index
    %c0_232 = arith.constant 0 : index
    %279 = vector.load %arg4[%c2_229, %c3_230, %c0_231, %c0_232] : memref<4x4x64x128xbf16, #tpu.memory_space<vmem>>, vector<1x1x64x128xbf16>
    %280 = vector.shape_cast %279 : vector<1x1x64x128xbf16> to vector<64x128xbf16>
    %cst_233 = arith.constant dense<0.000000e+00> : vector<3x128xf32>
    %281 = tpu.matmul %278, %280, %cst_233 {dimension_numbers = #tpu.dot_dimension_numbers<[1], [0], [0], [1], [0, 0, 1, 1], [], []>} : vector<3x64xbf16>, vector<64x128xbf16>, vector<3x128xf32> -> vector<3x128xf32>
    %282 = arith.addf %276, %281 : vector<3x128xf32>
    %283 = vector.extract_strided_slice %1 {offsets = [5, 0, 0], sizes = [1, 3, 64], strides = [1, 1, 1]} : vector<6x6x64xbf16> to vector<1x3x64xbf16>
    %284 = vector.shape_cast %283 : vector<1x3x64xbf16> to vector<3x64xbf16>
    %c3_234 = arith.constant 3 : index
    %c0_235 = arith.constant 0 : index
    %c0_236 = arith.constant 0 : index
    %c0_237 = arith.constant 0 : index
    %285 = vector.load %arg4[%c3_234, %c0_235, %c0_236, %c0_237] : memref<4x4x64x128xbf16, #tpu.memory_space<vmem>>, vector<1x1x64x128xbf16>
    %286 = vector.shape_cast %285 : vector<1x1x64x128xbf16> to vector<64x128xbf16>
    %cst_238 = arith.constant dense<0.000000e+00> : vector<3x128xf32>
    %287 = tpu.matmul %284, %286, %cst_238 {dimension_numbers = #tpu.dot_dimension_numbers<[1], [0], [0], [1], [0, 0, 1, 1], [], []>} : vector<3x64xbf16>, vector<64x128xbf16>, vector<3x128xf32> -> vector<3x128xf32>
    %288 = arith.addf %282, %287 : vector<3x128xf32>
    %289 = vector.extract_strided_slice %1 {offsets = [5, 1, 0], sizes = [1, 3, 64], strides = [1, 1, 1]} : vector<6x6x64xbf16> to vector<1x3x64xbf16>
    %290 = vector.shape_cast %289 : vector<1x3x64xbf16> to vector<3x64xbf16>
    %c3_239 = arith.constant 3 : index
    %c1_240 = arith.constant 1 : index
    %c0_241 = arith.constant 0 : index
    %c0_242 = arith.constant 0 : index
    %291 = vector.load %arg4[%c3_239, %c1_240, %c0_241, %c0_242] : memref<4x4x64x128xbf16, #tpu.memory_space<vmem>>, vector<1x1x64x128xbf16>
    %292 = vector.shape_cast %291 : vector<1x1x64x128xbf16> to vector<64x128xbf16>
    %cst_243 = arith.constant dense<0.000000e+00> : vector<3x128xf32>
    %293 = tpu.matmul %290, %292, %cst_243 {dimension_numbers = #tpu.dot_dimension_numbers<[1], [0], [0], [1], [0, 0, 1, 1], [], []>} : vector<3x64xbf16>, vector<64x128xbf16>, vector<3x128xf32> -> vector<3x128xf32>
    %294 = arith.addf %288, %293 : vector<3x128xf32>
    %295 = vector.extract_strided_slice %1 {offsets = [5, 2, 0], sizes = [1, 3, 64], strides = [1, 1, 1]} : vector<6x6x64xbf16> to vector<1x3x64xbf16>
    %296 = vector.shape_cast %295 : vector<1x3x64xbf16> to vector<3x64xbf16>
    %c3_244 = arith.constant 3 : index
    %c2_245 = arith.constant 2 : index
    %c0_246 = arith.constant 0 : index
    %c0_247 = arith.constant 0 : index
    %297 = vector.load %arg4[%c3_244, %c2_245, %c0_246, %c0_247] : memref<4x4x64x128xbf16, #tpu.memory_space<vmem>>, vector<1x1x64x128xbf16>
    %298 = vector.shape_cast %297 : vector<1x1x64x128xbf16> to vector<64x128xbf16>
    %cst_248 = arith.constant dense<0.000000e+00> : vector<3x128xf32>
    %299 = tpu.matmul %296, %298, %cst_248 {dimension_numbers = #tpu.dot_dimension_numbers<[1], [0], [0], [1], [0, 0, 1, 1], [], []>} : vector<3x64xbf16>, vector<64x128xbf16>, vector<3x128xf32> -> vector<3x128xf32>
    %300 = arith.addf %294, %299 : vector<3x128xf32>
    %301 = vector.extract_strided_slice %1 {offsets = [5, 3, 0], sizes = [1, 3, 64], strides = [1, 1, 1]} : vector<6x6x64xbf16> to vector<1x3x64xbf16>
    %302 = vector.shape_cast %301 : vector<1x3x64xbf16> to vector<3x64xbf16>
    %c3_249 = arith.constant 3 : index
    %c3_250 = arith.constant 3 : index
    %c0_251 = arith.constant 0 : index
    %c0_252 = arith.constant 0 : index
    %303 = vector.load %arg4[%c3_249, %c3_250, %c0_251, %c0_252] : memref<4x4x64x128xbf16, #tpu.memory_space<vmem>>, vector<1x1x64x128xbf16>
    %304 = vector.shape_cast %303 : vector<1x1x64x128xbf16> to vector<64x128xbf16>
    %cst_253 = arith.constant dense<0.000000e+00> : vector<3x128xf32>
    %305 = tpu.matmul %302, %304, %cst_253 {dimension_numbers = #tpu.dot_dimension_numbers<[1], [0], [0], [1], [0, 0, 1, 1], [], []>} : vector<3x64xbf16>, vector<64x128xbf16>, vector<3x128xf32> -> vector<3x128xf32>
    %306 = arith.addf %300, %305 : vector<3x128xf32>
    %c0_254 = arith.constant 0 : index
    %c0_255 = arith.constant 0 : index
    %307 = vector.load %arg5[%c0_254, %c0_255] : memref<1x128xf32, #tpu.memory_space<vmem>>, vector<1x128xf32>
    %308 = vector.broadcast %307 : vector<1x128xf32> to vector<3x128xf32>
    %309 = arith.addf %306, %308 : vector<3x128xf32>
    %310 = arith.truncf %309 : vector<3x128xf32> to vector<3x128xbf16>
    %c0_256 = arith.constant 0 : index
    %c2_257 = arith.constant 2 : index
    %c0_258 = arith.constant 0 : index
    %c0_259 = arith.constant 0 : index
    %311 = vector.load %arg6[%c0_256, %c2_257, %c0_258, %c0_259] : memref<1x3x3x128xbf16, #tpu.memory_space<vmem>>, vector<1x1x3x128xbf16>
    %312 = vector.shape_cast %311 : vector<1x1x3x128xbf16> to vector<3x128xbf16>
    %313 = vector.shape_cast %310 : vector<3x128xbf16> to vector<1x1x3x128xbf16>
    tpu.vector_store %arg6[%c0_256, %c2_257, %c0_258, %c0_259], %313 {strides = array<i32>} : memref<1x3x3x128xbf16, #tpu.memory_space<vmem>>, vector<1x1x3x128xbf16>,
    return
  }
  func.func @transform_0(%arg0: i32, %arg1: i32, %arg2: i32) -> (i32, i32, i32, i32) {
    %c0_i32 = arith.constant 0 : i32
    %c0_i32_0 = arith.constant 0 : i32
    %c0_i32_1 = arith.constant 0 : i32
    %c0_i32_2 = arith.constant 0 : i32
    return %arg1, %c0_i32, %c0_i32_0, %c0_i32_1 : i32, i32, i32, i32
  }
  func.func @transform_1(%arg0: i32, %arg1: i32, %arg2: i32) -> (i32, i32, i32, i32) {
    %c0_i32 = arith.constant 0 : i32
    %c0_i32_0 = arith.constant 0 : i32
    %c0_i32_1 = arith.constant 0 : i32
    %c0_i32_2 = arith.constant 0 : i32
    return %c0_i32, %c0_i32_0, %c0_i32_1, %arg0 : i32, i32, i32, i32
  }
  func.func @transform_2(%arg0: i32, %arg1: i32, %arg2: i32) -> (i32, i32) {
    %c0_i32 = arith.constant 0 : i32
    %c0_i32_0 = arith.constant 0 : i32
    return %c0_i32, %arg0 : i32, i32
  }
  func.func @transform_3(%arg0: i32, %arg1: i32, %arg2: i32) -> (i32, i32, i32, i32) {
    %c0_i32 = arith.constant 0 : i32
    %c0_i32_0 = arith.constant 0 : i32
    return %arg1, %arg2, %c0_i32, %arg0 : i32, i32, i32, i32
  }
}

module attributes {stable_mosaic.version = 11 : i64} {
  func.func @_bn_stats_kernel(%arg0: i32, %arg1: i32, %arg2: memref<1x3x3x128xbf16, #tpu.memory_space<vmem>>, %arg3: memref<2x128xf32, #tpu.memory_space<vmem>>) attributes {dimension_semantics = [#tpu.dimension_semantics<arbitrary>, #tpu.dimension_semantics<arbitrary>], iteration_bounds = array<i64: 2, 1>, scalar_prefetch = 0 : i64, scratch_operands = 0 : i64, tpu.core_type = #tpu.core_type<tc>, window_params = [{transform_indices = @transform_0, window_bounds = array<i64: 1, 3, 3, 128>}, {pipeline_mode = #tpu.pipeline_mode<synchronous>, transform_indices = @transform_1, window_bounds = array<i64: 2, 128>}]} {
    %c0_i32 = arith.constant 0 : i32
    %0 = arith.cmpi eq, %arg0, %c0_i32 : i32
    %c0_i32_0 = arith.constant 0 : i32
    %1 = arith.cmpi eq, %arg1, %c0_i32_0 : i32
    %2 = arith.andi %0, %1 : i1
    %3 = arith.extui %2 : i1 to i32
    %c0_i32_1 = arith.constant 0 : i32
    %4 = arith.cmpi ne, %3, %c0_i32_1 : i32
    scf.if %4 {
      %cst_12 = arith.constant 0.000000e+00 : f32
      %19 = vector.broadcast %cst_12 : f32 to vector<2x128xf32>
      %c0_13 = arith.constant 0 : index
      %c0_14 = arith.constant 0 : index
      %20 = vector.load %arg3[%c0_13, %c0_14] : memref<2x128xf32, #tpu.memory_space<vmem>>, vector<2x128xf32>
      tpu.vector_store %arg3[%c0_13, %c0_14], %19 {strides = array<i32>} : memref<2x128xf32, #tpu.memory_space<vmem>>, vector<2x128xf32>,
    } else {
    }
    %c0 = arith.constant 0 : index
    %c0_2 = arith.constant 0 : index
    %c0_3 = arith.constant 0 : index
    %c0_4 = arith.constant 0 : index
    %5 = vector.load %arg2[%c0, %c0_2, %c0_3, %c0_4] : memref<1x3x3x128xbf16, #tpu.memory_space<vmem>>, vector<1x3x3x128xbf16>
    %6 = vector.shape_cast %5 : vector<1x3x3x128xbf16> to vector<3x3x128xbf16>
    %7 = arith.extf %6 : vector<3x3x128xbf16> to vector<3x3x128xf32>
    %cst = arith.constant dense<0.000000e+00> : vector<3x128xf32>
    %8 = vector.multi_reduction <add>, %7, %cst [0] : vector<3x3x128xf32> to vector<3x128xf32>
    %9 = arith.mulf %7, %7 : vector<3x3x128xf32>
    %cst_5 = arith.constant dense<0.000000e+00> : vector<3x128xf32>
    %10 = vector.multi_reduction <add>, %9, %cst_5 [0] : vector<3x3x128xf32> to vector<3x128xf32>
    %c0_6 = arith.constant 0 : index
    %c0_7 = arith.constant 0 : index
    %11 = vector.load %arg3[%c0_6, %c0_7] : memref<2x128xf32, #tpu.memory_space<vmem>>, vector<2x128xf32>
    %cst_8 = arith.constant dense<0.000000e+00> : vector<128xf32>
    %12 = vector.multi_reduction <add>, %8, %cst_8 [0] : vector<3x128xf32> to vector<128xf32>
    %13 = vector.shape_cast %12 : vector<128xf32> to vector<1x128xf32>
    %cst_9 = arith.constant dense<0.000000e+00> : vector<128xf32>
    %14 = vector.multi_reduction <add>, %10, %cst_9 [0] : vector<3x128xf32> to vector<128xf32>
    %15 = vector.shape_cast %14 : vector<128xf32> to vector<1x128xf32>
    %16 = tpu.concatenate %13, %15 in 0 : vector<1x128xf32>, vector<1x128xf32> -> vector<2x128xf32>
    %17 = arith.addf %11, %16 : vector<2x128xf32>
    %c0_10 = arith.constant 0 : index
    %c0_11 = arith.constant 0 : index
    %18 = vector.load %arg3[%c0_10, %c0_11] : memref<2x128xf32, #tpu.memory_space<vmem>>, vector<2x128xf32>
    tpu.vector_store %arg3[%c0_10, %c0_11], %17 {strides = array<i32>} : memref<2x128xf32, #tpu.memory_space<vmem>>, vector<2x128xf32>,
    return
  }
  func.func @transform_0(%arg0: i32, %arg1: i32) -> (i32, i32, i32, i32) {
    %c0_i32 = arith.constant 0 : i32
    %c0_i32_0 = arith.constant 0 : i32
    %c0_i32_1 = arith.constant 0 : i32
    return %arg0, %arg1, %c0_i32, %c0_i32_0 : i32, i32, i32, i32
  }
  func.func @transform_1(%arg0: i32, %arg1: i32) -> (i32, i32) {
    %c0_i32 = arith.constant 0 : i32
    %c0_i32_0 = arith.constant 0 : i32
    %c0_i32_1 = arith.constant 0 : i32
    return %c0_i32, %c0_i32_0 : i32, i32
  }
}

module attributes {stable_mosaic.version = 11 : i64} {
  func.func @_bn_apply_kernel(%arg0: i32, %arg1: i32, %arg2: memref<1x3x3x128xbf16, #tpu.memory_space<vmem>>, %arg3: memref<1x128xf32, #tpu.memory_space<vmem>>, %arg4: memref<1x128xf32, #tpu.memory_space<vmem>>, %arg5: memref<1x3x3x128xbf16, #tpu.memory_space<vmem>>) attributes {dimension_semantics = [#tpu.dimension_semantics<parallel>, #tpu.dimension_semantics<parallel>], iteration_bounds = array<i64: 2, 1>, scalar_prefetch = 0 : i64, scratch_operands = 0 : i64, tpu.core_type = #tpu.core_type<tc>, window_params = [{transform_indices = @transform_0, window_bounds = array<i64: 1, 3, 3, 128>}, {pipeline_mode = #tpu.pipeline_mode<synchronous>, transform_indices = @transform_1, window_bounds = array<i64: 1, 128>}, {pipeline_mode = #tpu.pipeline_mode<synchronous>, transform_indices = @transform_2, window_bounds = array<i64: 1, 128>}, {transform_indices = @transform_3, window_bounds = array<i64: 1, 3, 3, 128>}]} {
    %c0 = arith.constant 0 : index
    %c0_0 = arith.constant 0 : index
    %c0_1 = arith.constant 0 : index
    %c0_2 = arith.constant 0 : index
    %0 = vector.load %arg2[%c0, %c0_0, %c0_1, %c0_2] : memref<1x3x3x128xbf16, #tpu.memory_space<vmem>>, vector<1x3x3x128xbf16>
    %1 = vector.shape_cast %0 : vector<1x3x3x128xbf16> to vector<3x3x128xbf16>
    %2 = arith.extf %1 : vector<3x3x128xbf16> to vector<3x3x128xf32>
    %c0_3 = arith.constant 0 : index
    %c0_4 = arith.constant 0 : index
    %3 = vector.load %arg3[%c0_3, %c0_4] : memref<1x128xf32, #tpu.memory_space<vmem>>, vector<1x128xf32>
    %4 = vector.shape_cast %3 : vector<1x128xf32> to vector<1x1x128xf32>
    %5 = vector.broadcast %4 : vector<1x1x128xf32> to vector<3x3x128xf32>
    %6 = arith.mulf %2, %5 : vector<3x3x128xf32>
    %c0_5 = arith.constant 0 : index
    %c0_6 = arith.constant 0 : index
    %7 = vector.load %arg4[%c0_5, %c0_6] : memref<1x128xf32, #tpu.memory_space<vmem>>, vector<1x128xf32>
    %8 = vector.shape_cast %7 : vector<1x128xf32> to vector<1x1x128xf32>
    %9 = vector.broadcast %8 : vector<1x1x128xf32> to vector<3x3x128xf32>
    %10 = arith.addf %6, %9 : vector<3x3x128xf32>
    %cst = arith.constant 2.000000e-01 : f32
    %11 = vector.broadcast %cst : f32 to vector<3x3x128xf32>
    %12 = arith.mulf %11, %10 : vector<3x3x128xf32>
    %13 = arith.maximumf %10, %12 : vector<3x3x128xf32>
    %14 = arith.truncf %13 : vector<3x3x128xf32> to vector<3x3x128xbf16>
    %c0_7 = arith.constant 0 : index
    %c0_8 = arith.constant 0 : index
    %c0_9 = arith.constant 0 : index
    %c0_10 = arith.constant 0 : index
    %15 = vector.load %arg5[%c0_7, %c0_8, %c0_9, %c0_10] : memref<1x3x3x128xbf16, #tpu.memory_space<vmem>>, vector<1x3x3x128xbf16>
    %16 = vector.shape_cast %15 : vector<1x3x3x128xbf16> to vector<3x3x128xbf16>
    %17 = vector.shape_cast %14 : vector<3x3x128xbf16> to vector<1x3x3x128xbf16>
    tpu.vector_store %arg5[%c0_7, %c0_8, %c0_9, %c0_10], %17 {strides = array<i32>} : memref<1x3x3x128xbf16, #tpu.memory_space<vmem>>, vector<1x3x3x128xbf16>,
    return
  }
  func.func @transform_0(%arg0: i32, %arg1: i32) -> (i32, i32, i32, i32) {
    %c0_i32 = arith.constant 0 : i32
    %c0_i32_0 = arith.constant 0 : i32
    %c0_i32_1 = arith.constant 0 : i32
    return %arg0, %arg1, %c0_i32, %c0_i32_0 : i32, i32, i32, i32
  }
  func.func @transform_1(%arg0: i32, %arg1: i32) -> (i32, i32) {
    %c0_i32 = arith.constant 0 : i32
    %c0_i32_0 = arith.constant 0 : i32
    %c0_i32_1 = arith.constant 0 : i32
    return %c0_i32, %c0_i32_0 : i32, i32
  }
  func.func @transform_2(%arg0: i32, %arg1: i32) -> (i32, i32) {
    %c0_i32 = arith.constant 0 : i32
    %c0_i32_0 = arith.constant 0 : i32
    %c0_i32_1 = arith.constant 0 : i32
    return %c0_i32, %c0_i32_0 : i32, i32
  }
  func.func @transform_3(%arg0: i32, %arg1: i32) -> (i32, i32, i32, i32) {
    %c0_i32 = arith.constant 0 : i32
    %c0_i32_0 = arith.constant 0 : i32
    %c0_i32_1 = arith.constant 0 : i32
    return %arg0, %arg1, %c0_i32, %c0_i32_0 : i32, i32, i32, i32
  }
}

module attributes {stable_mosaic.version = 11 : i64} {
  func.func @_conv_block_kernel(%arg0: i32, %arg1: i32, %arg2: i32, %arg3: memref<1x5x5x128xbf16, #tpu.memory_space<vmem>>, %arg4: memref<4x4x128x128xbf16, #tpu.memory_space<vmem>>, %arg5: memref<1x128xf32, #tpu.memory_space<vmem>>, %arg6: memref<1x2x2x128xf32, #tpu.memory_space<vmem>>) attributes {dimension_semantics = [#tpu.dimension_semantics<parallel>, #tpu.dimension_semantics<parallel>, #tpu.dimension_semantics<parallel>], iteration_bounds = array<i64: 1, 2, 1>, scalar_prefetch = 0 : i64, scratch_operands = 0 : i64, tpu.core_type = #tpu.core_type<tc>, window_params = [{transform_indices = @transform_0, window_bounds = array<i64: 1, 5, 5, 128>}, {transform_indices = @transform_1, window_bounds = array<i64: 4, 4, 128, 128>}, {transform_indices = @transform_2, window_bounds = array<i64: 1, 128>}, {transform_indices = @transform_3, window_bounds = array<i64: 1, 2, 2, 128>}]} {
    %c0 = arith.constant 0 : index
    %c0_0 = arith.constant 0 : index
    %c0_1 = arith.constant 0 : index
    %c0_2 = arith.constant 0 : index
    %0 = vector.load %arg3[%c0, %c0_0, %c0_1, %c0_2] : memref<1x5x5x128xbf16, #tpu.memory_space<vmem>>, vector<1x5x5x128xbf16>
    %1 = vector.shape_cast %0 : vector<1x5x5x128xbf16> to vector<5x5x128xbf16>
    %cst = arith.constant 0.000000e+00 : f32
    %2 = vector.broadcast %cst : f32 to vector<2x128xf32>
    %3 = vector.extract_strided_slice %1 {offsets = [0, 0, 0], sizes = [1, 2, 128], strides = [1, 1, 1]} : vector<5x5x128xbf16> to vector<1x2x128xbf16>
    %4 = vector.shape_cast %3 : vector<1x2x128xbf16> to vector<2x128xbf16>
    %c0_3 = arith.constant 0 : index
    %c0_4 = arith.constant 0 : index
    %c0_5 = arith.constant 0 : index
    %c0_6 = arith.constant 0 : index
    %5 = vector.load %arg4[%c0_3, %c0_4, %c0_5, %c0_6] : memref<4x4x128x128xbf16, #tpu.memory_space<vmem>>, vector<1x1x128x128xbf16>
    %6 = vector.shape_cast %5 : vector<1x1x128x128xbf16> to vector<128x128xbf16>
    %cst_7 = arith.constant dense<0.000000e+00> : vector<2x128xf32>
    %7 = tpu.matmul %4, %6, %cst_7 {dimension_numbers = #tpu.dot_dimension_numbers<[1], [0], [0], [1], [0, 0, 1, 1], [], []>} : vector<2x128xbf16>, vector<128x128xbf16>, vector<2x128xf32> -> vector<2x128xf32>
    %8 = arith.addf %2, %7 : vector<2x128xf32>
    %9 = vector.extract_strided_slice %1 {offsets = [0, 1, 0], sizes = [1, 2, 128], strides = [1, 1, 1]} : vector<5x5x128xbf16> to vector<1x2x128xbf16>
    %10 = vector.shape_cast %9 : vector<1x2x128xbf16> to vector<2x128xbf16>
    %c0_8 = arith.constant 0 : index
    %c1 = arith.constant 1 : index
    %c0_9 = arith.constant 0 : index
    %c0_10 = arith.constant 0 : index
    %11 = vector.load %arg4[%c0_8, %c1, %c0_9, %c0_10] : memref<4x4x128x128xbf16, #tpu.memory_space<vmem>>, vector<1x1x128x128xbf16>
    %12 = vector.shape_cast %11 : vector<1x1x128x128xbf16> to vector<128x128xbf16>
    %cst_11 = arith.constant dense<0.000000e+00> : vector<2x128xf32>
    %13 = tpu.matmul %10, %12, %cst_11 {dimension_numbers = #tpu.dot_dimension_numbers<[1], [0], [0], [1], [0, 0, 1, 1], [], []>} : vector<2x128xbf16>, vector<128x128xbf16>, vector<2x128xf32> -> vector<2x128xf32>
    %14 = arith.addf %8, %13 : vector<2x128xf32>
    %15 = vector.extract_strided_slice %1 {offsets = [0, 2, 0], sizes = [1, 2, 128], strides = [1, 1, 1]} : vector<5x5x128xbf16> to vector<1x2x128xbf16>
    %16 = vector.shape_cast %15 : vector<1x2x128xbf16> to vector<2x128xbf16>
    %c0_12 = arith.constant 0 : index
    %c2 = arith.constant 2 : index
    %c0_13 = arith.constant 0 : index
    %c0_14 = arith.constant 0 : index
    %17 = vector.load %arg4[%c0_12, %c2, %c0_13, %c0_14] : memref<4x4x128x128xbf16, #tpu.memory_space<vmem>>, vector<1x1x128x128xbf16>
    %18 = vector.shape_cast %17 : vector<1x1x128x128xbf16> to vector<128x128xbf16>
    %cst_15 = arith.constant dense<0.000000e+00> : vector<2x128xf32>
    %19 = tpu.matmul %16, %18, %cst_15 {dimension_numbers = #tpu.dot_dimension_numbers<[1], [0], [0], [1], [0, 0, 1, 1], [], []>} : vector<2x128xbf16>, vector<128x128xbf16>, vector<2x128xf32> -> vector<2x128xf32>
    %20 = arith.addf %14, %19 : vector<2x128xf32>
    %21 = vector.extract_strided_slice %1 {offsets = [0, 3, 0], sizes = [1, 2, 128], strides = [1, 1, 1]} : vector<5x5x128xbf16> to vector<1x2x128xbf16>
    %22 = vector.shape_cast %21 : vector<1x2x128xbf16> to vector<2x128xbf16>
    %c0_16 = arith.constant 0 : index
    %c3 = arith.constant 3 : index
    %c0_17 = arith.constant 0 : index
    %c0_18 = arith.constant 0 : index
    %23 = vector.load %arg4[%c0_16, %c3, %c0_17, %c0_18] : memref<4x4x128x128xbf16, #tpu.memory_space<vmem>>, vector<1x1x128x128xbf16>
    %24 = vector.shape_cast %23 : vector<1x1x128x128xbf16> to vector<128x128xbf16>
    %cst_19 = arith.constant dense<0.000000e+00> : vector<2x128xf32>
    %25 = tpu.matmul %22, %24, %cst_19 {dimension_numbers = #tpu.dot_dimension_numbers<[1], [0], [0], [1], [0, 0, 1, 1], [], []>} : vector<2x128xbf16>, vector<128x128xbf16>, vector<2x128xf32> -> vector<2x128xf32>
    %26 = arith.addf %20, %25 : vector<2x128xf32>
    %27 = vector.extract_strided_slice %1 {offsets = [1, 0, 0], sizes = [1, 2, 128], strides = [1, 1, 1]} : vector<5x5x128xbf16> to vector<1x2x128xbf16>
    %28 = vector.shape_cast %27 : vector<1x2x128xbf16> to vector<2x128xbf16>
    %c1_20 = arith.constant 1 : index
    %c0_21 = arith.constant 0 : index
    %c0_22 = arith.constant 0 : index
    %c0_23 = arith.constant 0 : index
    %29 = vector.load %arg4[%c1_20, %c0_21, %c0_22, %c0_23] : memref<4x4x128x128xbf16, #tpu.memory_space<vmem>>, vector<1x1x128x128xbf16>
    %30 = vector.shape_cast %29 : vector<1x1x128x128xbf16> to vector<128x128xbf16>
    %cst_24 = arith.constant dense<0.000000e+00> : vector<2x128xf32>
    %31 = tpu.matmul %28, %30, %cst_24 {dimension_numbers = #tpu.dot_dimension_numbers<[1], [0], [0], [1], [0, 0, 1, 1], [], []>} : vector<2x128xbf16>, vector<128x128xbf16>, vector<2x128xf32> -> vector<2x128xf32>
    %32 = arith.addf %26, %31 : vector<2x128xf32>
    %33 = vector.extract_strided_slice %1 {offsets = [1, 1, 0], sizes = [1, 2, 128], strides = [1, 1, 1]} : vector<5x5x128xbf16> to vector<1x2x128xbf16>
    %34 = vector.shape_cast %33 : vector<1x2x128xbf16> to vector<2x128xbf16>
    %c1_25 = arith.constant 1 : index
    %c1_26 = arith.constant 1 : index
    %c0_27 = arith.constant 0 : index
    %c0_28 = arith.constant 0 : index
    %35 = vector.load %arg4[%c1_25, %c1_26, %c0_27, %c0_28] : memref<4x4x128x128xbf16, #tpu.memory_space<vmem>>, vector<1x1x128x128xbf16>
    %36 = vector.shape_cast %35 : vector<1x1x128x128xbf16> to vector<128x128xbf16>
    %cst_29 = arith.constant dense<0.000000e+00> : vector<2x128xf32>
    %37 = tpu.matmul %34, %36, %cst_29 {dimension_numbers = #tpu.dot_dimension_numbers<[1], [0], [0], [1], [0, 0, 1, 1], [], []>} : vector<2x128xbf16>, vector<128x128xbf16>, vector<2x128xf32> -> vector<2x128xf32>
    %38 = arith.addf %32, %37 : vector<2x128xf32>
    %39 = vector.extract_strided_slice %1 {offsets = [1, 2, 0], sizes = [1, 2, 128], strides = [1, 1, 1]} : vector<5x5x128xbf16> to vector<1x2x128xbf16>
    %40 = vector.shape_cast %39 : vector<1x2x128xbf16> to vector<2x128xbf16>
    %c1_30 = arith.constant 1 : index
    %c2_31 = arith.constant 2 : index
    %c0_32 = arith.constant 0 : index
    %c0_33 = arith.constant 0 : index
    %41 = vector.load %arg4[%c1_30, %c2_31, %c0_32, %c0_33] : memref<4x4x128x128xbf16, #tpu.memory_space<vmem>>, vector<1x1x128x128xbf16>
    %42 = vector.shape_cast %41 : vector<1x1x128x128xbf16> to vector<128x128xbf16>
    %cst_34 = arith.constant dense<0.000000e+00> : vector<2x128xf32>
    %43 = tpu.matmul %40, %42, %cst_34 {dimension_numbers = #tpu.dot_dimension_numbers<[1], [0], [0], [1], [0, 0, 1, 1], [], []>} : vector<2x128xbf16>, vector<128x128xbf16>, vector<2x128xf32> -> vector<2x128xf32>
    %44 = arith.addf %38, %43 : vector<2x128xf32>
    %45 = vector.extract_strided_slice %1 {offsets = [1, 3, 0], sizes = [1, 2, 128], strides = [1, 1, 1]} : vector<5x5x128xbf16> to vector<1x2x128xbf16>
    %46 = vector.shape_cast %45 : vector<1x2x128xbf16> to vector<2x128xbf16>
    %c1_35 = arith.constant 1 : index
    %c3_36 = arith.constant 3 : index
    %c0_37 = arith.constant 0 : index
    %c0_38 = arith.constant 0 : index
    %47 = vector.load %arg4[%c1_35, %c3_36, %c0_37, %c0_38] : memref<4x4x128x128xbf16, #tpu.memory_space<vmem>>, vector<1x1x128x128xbf16>
    %48 = vector.shape_cast %47 : vector<1x1x128x128xbf16> to vector<128x128xbf16>
    %cst_39 = arith.constant dense<0.000000e+00> : vector<2x128xf32>
    %49 = tpu.matmul %46, %48, %cst_39 {dimension_numbers = #tpu.dot_dimension_numbers<[1], [0], [0], [1], [0, 0, 1, 1], [], []>} : vector<2x128xbf16>, vector<128x128xbf16>, vector<2x128xf32> -> vector<2x128xf32>
    %50 = arith.addf %44, %49 : vector<2x128xf32>
    %51 = vector.extract_strided_slice %1 {offsets = [2, 0, 0], sizes = [1, 2, 128], strides = [1, 1, 1]} : vector<5x5x128xbf16> to vector<1x2x128xbf16>
    %52 = vector.shape_cast %51 : vector<1x2x128xbf16> to vector<2x128xbf16>
    %c2_40 = arith.constant 2 : index
    %c0_41 = arith.constant 0 : index
    %c0_42 = arith.constant 0 : index
    %c0_43 = arith.constant 0 : index
    %53 = vector.load %arg4[%c2_40, %c0_41, %c0_42, %c0_43] : memref<4x4x128x128xbf16, #tpu.memory_space<vmem>>, vector<1x1x128x128xbf16>
    %54 = vector.shape_cast %53 : vector<1x1x128x128xbf16> to vector<128x128xbf16>
    %cst_44 = arith.constant dense<0.000000e+00> : vector<2x128xf32>
    %55 = tpu.matmul %52, %54, %cst_44 {dimension_numbers = #tpu.dot_dimension_numbers<[1], [0], [0], [1], [0, 0, 1, 1], [], []>} : vector<2x128xbf16>, vector<128x128xbf16>, vector<2x128xf32> -> vector<2x128xf32>
    %56 = arith.addf %50, %55 : vector<2x128xf32>
    %57 = vector.extract_strided_slice %1 {offsets = [2, 1, 0], sizes = [1, 2, 128], strides = [1, 1, 1]} : vector<5x5x128xbf16> to vector<1x2x128xbf16>
    %58 = vector.shape_cast %57 : vector<1x2x128xbf16> to vector<2x128xbf16>
    %c2_45 = arith.constant 2 : index
    %c1_46 = arith.constant 1 : index
    %c0_47 = arith.constant 0 : index
    %c0_48 = arith.constant 0 : index
    %59 = vector.load %arg4[%c2_45, %c1_46, %c0_47, %c0_48] : memref<4x4x128x128xbf16, #tpu.memory_space<vmem>>, vector<1x1x128x128xbf16>
    %60 = vector.shape_cast %59 : vector<1x1x128x128xbf16> to vector<128x128xbf16>
    %cst_49 = arith.constant dense<0.000000e+00> : vector<2x128xf32>
    %61 = tpu.matmul %58, %60, %cst_49 {dimension_numbers = #tpu.dot_dimension_numbers<[1], [0], [0], [1], [0, 0, 1, 1], [], []>} : vector<2x128xbf16>, vector<128x128xbf16>, vector<2x128xf32> -> vector<2x128xf32>
    %62 = arith.addf %56, %61 : vector<2x128xf32>
    %63 = vector.extract_strided_slice %1 {offsets = [2, 2, 0], sizes = [1, 2, 128], strides = [1, 1, 1]} : vector<5x5x128xbf16> to vector<1x2x128xbf16>
    %64 = vector.shape_cast %63 : vector<1x2x128xbf16> to vector<2x128xbf16>
    %c2_50 = arith.constant 2 : index
    %c2_51 = arith.constant 2 : index
    %c0_52 = arith.constant 0 : index
    %c0_53 = arith.constant 0 : index
    %65 = vector.load %arg4[%c2_50, %c2_51, %c0_52, %c0_53] : memref<4x4x128x128xbf16, #tpu.memory_space<vmem>>, vector<1x1x128x128xbf16>
    %66 = vector.shape_cast %65 : vector<1x1x128x128xbf16> to vector<128x128xbf16>
    %cst_54 = arith.constant dense<0.000000e+00> : vector<2x128xf32>
    %67 = tpu.matmul %64, %66, %cst_54 {dimension_numbers = #tpu.dot_dimension_numbers<[1], [0], [0], [1], [0, 0, 1, 1], [], []>} : vector<2x128xbf16>, vector<128x128xbf16>, vector<2x128xf32> -> vector<2x128xf32>
    %68 = arith.addf %62, %67 : vector<2x128xf32>
    %69 = vector.extract_strided_slice %1 {offsets = [2, 3, 0], sizes = [1, 2, 128], strides = [1, 1, 1]} : vector<5x5x128xbf16> to vector<1x2x128xbf16>
    %70 = vector.shape_cast %69 : vector<1x2x128xbf16> to vector<2x128xbf16>
    %c2_55 = arith.constant 2 : index
    %c3_56 = arith.constant 3 : index
    %c0_57 = arith.constant 0 : index
    %c0_58 = arith.constant 0 : index
    %71 = vector.load %arg4[%c2_55, %c3_56, %c0_57, %c0_58] : memref<4x4x128x128xbf16, #tpu.memory_space<vmem>>, vector<1x1x128x128xbf16>
    %72 = vector.shape_cast %71 : vector<1x1x128x128xbf16> to vector<128x128xbf16>
    %cst_59 = arith.constant dense<0.000000e+00> : vector<2x128xf32>
    %73 = tpu.matmul %70, %72, %cst_59 {dimension_numbers = #tpu.dot_dimension_numbers<[1], [0], [0], [1], [0, 0, 1, 1], [], []>} : vector<2x128xbf16>, vector<128x128xbf16>, vector<2x128xf32> -> vector<2x128xf32>
    %74 = arith.addf %68, %73 : vector<2x128xf32>
    %75 = vector.extract_strided_slice %1 {offsets = [3, 0, 0], sizes = [1, 2, 128], strides = [1, 1, 1]} : vector<5x5x128xbf16> to vector<1x2x128xbf16>
    %76 = vector.shape_cast %75 : vector<1x2x128xbf16> to vector<2x128xbf16>
    %c3_60 = arith.constant 3 : index
    %c0_61 = arith.constant 0 : index
    %c0_62 = arith.constant 0 : index
    %c0_63 = arith.constant 0 : index
    %77 = vector.load %arg4[%c3_60, %c0_61, %c0_62, %c0_63] : memref<4x4x128x128xbf16, #tpu.memory_space<vmem>>, vector<1x1x128x128xbf16>
    %78 = vector.shape_cast %77 : vector<1x1x128x128xbf16> to vector<128x128xbf16>
    %cst_64 = arith.constant dense<0.000000e+00> : vector<2x128xf32>
    %79 = tpu.matmul %76, %78, %cst_64 {dimension_numbers = #tpu.dot_dimension_numbers<[1], [0], [0], [1], [0, 0, 1, 1], [], []>} : vector<2x128xbf16>, vector<128x128xbf16>, vector<2x128xf32> -> vector<2x128xf32>
    %80 = arith.addf %74, %79 : vector<2x128xf32>
    %81 = vector.extract_strided_slice %1 {offsets = [3, 1, 0], sizes = [1, 2, 128], strides = [1, 1, 1]} : vector<5x5x128xbf16> to vector<1x2x128xbf16>
    %82 = vector.shape_cast %81 : vector<1x2x128xbf16> to vector<2x128xbf16>
    %c3_65 = arith.constant 3 : index
    %c1_66 = arith.constant 1 : index
    %c0_67 = arith.constant 0 : index
    %c0_68 = arith.constant 0 : index
    %83 = vector.load %arg4[%c3_65, %c1_66, %c0_67, %c0_68] : memref<4x4x128x128xbf16, #tpu.memory_space<vmem>>, vector<1x1x128x128xbf16>
    %84 = vector.shape_cast %83 : vector<1x1x128x128xbf16> to vector<128x128xbf16>
    %cst_69 = arith.constant dense<0.000000e+00> : vector<2x128xf32>
    %85 = tpu.matmul %82, %84, %cst_69 {dimension_numbers = #tpu.dot_dimension_numbers<[1], [0], [0], [1], [0, 0, 1, 1], [], []>} : vector<2x128xbf16>, vector<128x128xbf16>, vector<2x128xf32> -> vector<2x128xf32>
    %86 = arith.addf %80, %85 : vector<2x128xf32>
    %87 = vector.extract_strided_slice %1 {offsets = [3, 2, 0], sizes = [1, 2, 128], strides = [1, 1, 1]} : vector<5x5x128xbf16> to vector<1x2x128xbf16>
    %88 = vector.shape_cast %87 : vector<1x2x128xbf16> to vector<2x128xbf16>
    %c3_70 = arith.constant 3 : index
    %c2_71 = arith.constant 2 : index
    %c0_72 = arith.constant 0 : index
    %c0_73 = arith.constant 0 : index
    %89 = vector.load %arg4[%c3_70, %c2_71, %c0_72, %c0_73] : memref<4x4x128x128xbf16, #tpu.memory_space<vmem>>, vector<1x1x128x128xbf16>
    %90 = vector.shape_cast %89 : vector<1x1x128x128xbf16> to vector<128x128xbf16>
    %cst_74 = arith.constant dense<0.000000e+00> : vector<2x128xf32>
    %91 = tpu.matmul %88, %90, %cst_74 {dimension_numbers = #tpu.dot_dimension_numbers<[1], [0], [0], [1], [0, 0, 1, 1], [], []>} : vector<2x128xbf16>, vector<128x128xbf16>, vector<2x128xf32> -> vector<2x128xf32>
    %92 = arith.addf %86, %91 : vector<2x128xf32>
    %93 = vector.extract_strided_slice %1 {offsets = [3, 3, 0], sizes = [1, 2, 128], strides = [1, 1, 1]} : vector<5x5x128xbf16> to vector<1x2x128xbf16>
    %94 = vector.shape_cast %93 : vector<1x2x128xbf16> to vector<2x128xbf16>
    %c3_75 = arith.constant 3 : index
    %c3_76 = arith.constant 3 : index
    %c0_77 = arith.constant 0 : index
    %c0_78 = arith.constant 0 : index
    %95 = vector.load %arg4[%c3_75, %c3_76, %c0_77, %c0_78] : memref<4x4x128x128xbf16, #tpu.memory_space<vmem>>, vector<1x1x128x128xbf16>
    %96 = vector.shape_cast %95 : vector<1x1x128x128xbf16> to vector<128x128xbf16>
    %cst_79 = arith.constant dense<0.000000e+00> : vector<2x128xf32>
    %97 = tpu.matmul %94, %96, %cst_79 {dimension_numbers = #tpu.dot_dimension_numbers<[1], [0], [0], [1], [0, 0, 1, 1], [], []>} : vector<2x128xbf16>, vector<128x128xbf16>, vector<2x128xf32> -> vector<2x128xf32>
    %98 = arith.addf %92, %97 : vector<2x128xf32>
    %c0_80 = arith.constant 0 : index
    %c0_81 = arith.constant 0 : index
    %99 = vector.load %arg5[%c0_80, %c0_81] : memref<1x128xf32, #tpu.memory_space<vmem>>, vector<1x128xf32>
    %100 = vector.broadcast %99 : vector<1x128xf32> to vector<2x128xf32>
    %101 = arith.addf %98, %100 : vector<2x128xf32>
    %c0_82 = arith.constant 0 : index
    %c0_83 = arith.constant 0 : index
    %c0_84 = arith.constant 0 : index
    %c0_85 = arith.constant 0 : index
    %102 = vector.load %arg6[%c0_82, %c0_83, %c0_84, %c0_85] : memref<1x2x2x128xf32, #tpu.memory_space<vmem>>, vector<1x1x2x128xf32>
    %103 = vector.shape_cast %102 : vector<1x1x2x128xf32> to vector<2x128xf32>
    %104 = vector.shape_cast %101 : vector<2x128xf32> to vector<1x1x2x128xf32>
    tpu.vector_store %arg6[%c0_82, %c0_83, %c0_84, %c0_85], %104 {strides = array<i32>} : memref<1x2x2x128xf32, #tpu.memory_space<vmem>>, vector<1x1x2x128xf32>,
    %cst_86 = arith.constant 0.000000e+00 : f32
    %105 = vector.broadcast %cst_86 : f32 to vector<2x128xf32>
    %106 = vector.extract_strided_slice %1 {offsets = [1, 0, 0], sizes = [1, 2, 128], strides = [1, 1, 1]} : vector<5x5x128xbf16> to vector<1x2x128xbf16>
    %107 = vector.shape_cast %106 : vector<1x2x128xbf16> to vector<2x128xbf16>
    %c0_87 = arith.constant 0 : index
    %c0_88 = arith.constant 0 : index
    %c0_89 = arith.constant 0 : index
    %c0_90 = arith.constant 0 : index
    %108 = vector.load %arg4[%c0_87, %c0_88, %c0_89, %c0_90] : memref<4x4x128x128xbf16, #tpu.memory_space<vmem>>, vector<1x1x128x128xbf16>
    %109 = vector.shape_cast %108 : vector<1x1x128x128xbf16> to vector<128x128xbf16>
    %cst_91 = arith.constant dense<0.000000e+00> : vector<2x128xf32>
    %110 = tpu.matmul %107, %109, %cst_91 {dimension_numbers = #tpu.dot_dimension_numbers<[1], [0], [0], [1], [0, 0, 1, 1], [], []>} : vector<2x128xbf16>, vector<128x128xbf16>, vector<2x128xf32> -> vector<2x128xf32>
    %111 = arith.addf %105, %110 : vector<2x128xf32>
    %112 = vector.extract_strided_slice %1 {offsets = [1, 1, 0], sizes = [1, 2, 128], strides = [1, 1, 1]} : vector<5x5x128xbf16> to vector<1x2x128xbf16>
    %113 = vector.shape_cast %112 : vector<1x2x128xbf16> to vector<2x128xbf16>
    %c0_92 = arith.constant 0 : index
    %c1_93 = arith.constant 1 : index
    %c0_94 = arith.constant 0 : index
    %c0_95 = arith.constant 0 : index
    %114 = vector.load %arg4[%c0_92, %c1_93, %c0_94, %c0_95] : memref<4x4x128x128xbf16, #tpu.memory_space<vmem>>, vector<1x1x128x128xbf16>
    %115 = vector.shape_cast %114 : vector<1x1x128x128xbf16> to vector<128x128xbf16>
    %cst_96 = arith.constant dense<0.000000e+00> : vector<2x128xf32>
    %116 = tpu.matmul %113, %115, %cst_96 {dimension_numbers = #tpu.dot_dimension_numbers<[1], [0], [0], [1], [0, 0, 1, 1], [], []>} : vector<2x128xbf16>, vector<128x128xbf16>, vector<2x128xf32> -> vector<2x128xf32>
    %117 = arith.addf %111, %116 : vector<2x128xf32>
    %118 = vector.extract_strided_slice %1 {offsets = [1, 2, 0], sizes = [1, 2, 128], strides = [1, 1, 1]} : vector<5x5x128xbf16> to vector<1x2x128xbf16>
    %119 = vector.shape_cast %118 : vector<1x2x128xbf16> to vector<2x128xbf16>
    %c0_97 = arith.constant 0 : index
    %c2_98 = arith.constant 2 : index
    %c0_99 = arith.constant 0 : index
    %c0_100 = arith.constant 0 : index
    %120 = vector.load %arg4[%c0_97, %c2_98, %c0_99, %c0_100] : memref<4x4x128x128xbf16, #tpu.memory_space<vmem>>, vector<1x1x128x128xbf16>
    %121 = vector.shape_cast %120 : vector<1x1x128x128xbf16> to vector<128x128xbf16>
    %cst_101 = arith.constant dense<0.000000e+00> : vector<2x128xf32>
    %122 = tpu.matmul %119, %121, %cst_101 {dimension_numbers = #tpu.dot_dimension_numbers<[1], [0], [0], [1], [0, 0, 1, 1], [], []>} : vector<2x128xbf16>, vector<128x128xbf16>, vector<2x128xf32> -> vector<2x128xf32>
    %123 = arith.addf %117, %122 : vector<2x128xf32>
    %124 = vector.extract_strided_slice %1 {offsets = [1, 3, 0], sizes = [1, 2, 128], strides = [1, 1, 1]} : vector<5x5x128xbf16> to vector<1x2x128xbf16>
    %125 = vector.shape_cast %124 : vector<1x2x128xbf16> to vector<2x128xbf16>
    %c0_102 = arith.constant 0 : index
    %c3_103 = arith.constant 3 : index
    %c0_104 = arith.constant 0 : index
    %c0_105 = arith.constant 0 : index
    %126 = vector.load %arg4[%c0_102, %c3_103, %c0_104, %c0_105] : memref<4x4x128x128xbf16, #tpu.memory_space<vmem>>, vector<1x1x128x128xbf16>
    %127 = vector.shape_cast %126 : vector<1x1x128x128xbf16> to vector<128x128xbf16>
    %cst_106 = arith.constant dense<0.000000e+00> : vector<2x128xf32>
    %128 = tpu.matmul %125, %127, %cst_106 {dimension_numbers = #tpu.dot_dimension_numbers<[1], [0], [0], [1], [0, 0, 1, 1], [], []>} : vector<2x128xbf16>, vector<128x128xbf16>, vector<2x128xf32> -> vector<2x128xf32>
    %129 = arith.addf %123, %128 : vector<2x128xf32>
    %130 = vector.extract_strided_slice %1 {offsets = [2, 0, 0], sizes = [1, 2, 128], strides = [1, 1, 1]} : vector<5x5x128xbf16> to vector<1x2x128xbf16>
    %131 = vector.shape_cast %130 : vector<1x2x128xbf16> to vector<2x128xbf16>
    %c1_107 = arith.constant 1 : index
    %c0_108 = arith.constant 0 : index
    %c0_109 = arith.constant 0 : index
    %c0_110 = arith.constant 0 : index
    %132 = vector.load %arg4[%c1_107, %c0_108, %c0_109, %c0_110] : memref<4x4x128x128xbf16, #tpu.memory_space<vmem>>, vector<1x1x128x128xbf16>
    %133 = vector.shape_cast %132 : vector<1x1x128x128xbf16> to vector<128x128xbf16>
    %cst_111 = arith.constant dense<0.000000e+00> : vector<2x128xf32>
    %134 = tpu.matmul %131, %133, %cst_111 {dimension_numbers = #tpu.dot_dimension_numbers<[1], [0], [0], [1], [0, 0, 1, 1], [], []>} : vector<2x128xbf16>, vector<128x128xbf16>, vector<2x128xf32> -> vector<2x128xf32>
    %135 = arith.addf %129, %134 : vector<2x128xf32>
    %136 = vector.extract_strided_slice %1 {offsets = [2, 1, 0], sizes = [1, 2, 128], strides = [1, 1, 1]} : vector<5x5x128xbf16> to vector<1x2x128xbf16>
    %137 = vector.shape_cast %136 : vector<1x2x128xbf16> to vector<2x128xbf16>
    %c1_112 = arith.constant 1 : index
    %c1_113 = arith.constant 1 : index
    %c0_114 = arith.constant 0 : index
    %c0_115 = arith.constant 0 : index
    %138 = vector.load %arg4[%c1_112, %c1_113, %c0_114, %c0_115] : memref<4x4x128x128xbf16, #tpu.memory_space<vmem>>, vector<1x1x128x128xbf16>
    %139 = vector.shape_cast %138 : vector<1x1x128x128xbf16> to vector<128x128xbf16>
    %cst_116 = arith.constant dense<0.000000e+00> : vector<2x128xf32>
    %140 = tpu.matmul %137, %139, %cst_116 {dimension_numbers = #tpu.dot_dimension_numbers<[1], [0], [0], [1], [0, 0, 1, 1], [], []>} : vector<2x128xbf16>, vector<128x128xbf16>, vector<2x128xf32> -> vector<2x128xf32>
    %141 = arith.addf %135, %140 : vector<2x128xf32>
    %142 = vector.extract_strided_slice %1 {offsets = [2, 2, 0], sizes = [1, 2, 128], strides = [1, 1, 1]} : vector<5x5x128xbf16> to vector<1x2x128xbf16>
    %143 = vector.shape_cast %142 : vector<1x2x128xbf16> to vector<2x128xbf16>
    %c1_117 = arith.constant 1 : index
    %c2_118 = arith.constant 2 : index
    %c0_119 = arith.constant 0 : index
    %c0_120 = arith.constant 0 : index
    %144 = vector.load %arg4[%c1_117, %c2_118, %c0_119, %c0_120] : memref<4x4x128x128xbf16, #tpu.memory_space<vmem>>, vector<1x1x128x128xbf16>
    %145 = vector.shape_cast %144 : vector<1x1x128x128xbf16> to vector<128x128xbf16>
    %cst_121 = arith.constant dense<0.000000e+00> : vector<2x128xf32>
    %146 = tpu.matmul %143, %145, %cst_121 {dimension_numbers = #tpu.dot_dimension_numbers<[1], [0], [0], [1], [0, 0, 1, 1], [], []>} : vector<2x128xbf16>, vector<128x128xbf16>, vector<2x128xf32> -> vector<2x128xf32>
    %147 = arith.addf %141, %146 : vector<2x128xf32>
    %148 = vector.extract_strided_slice %1 {offsets = [2, 3, 0], sizes = [1, 2, 128], strides = [1, 1, 1]} : vector<5x5x128xbf16> to vector<1x2x128xbf16>
    %149 = vector.shape_cast %148 : vector<1x2x128xbf16> to vector<2x128xbf16>
    %c1_122 = arith.constant 1 : index
    %c3_123 = arith.constant 3 : index
    %c0_124 = arith.constant 0 : index
    %c0_125 = arith.constant 0 : index
    %150 = vector.load %arg4[%c1_122, %c3_123, %c0_124, %c0_125] : memref<4x4x128x128xbf16, #tpu.memory_space<vmem>>, vector<1x1x128x128xbf16>
    %151 = vector.shape_cast %150 : vector<1x1x128x128xbf16> to vector<128x128xbf16>
    %cst_126 = arith.constant dense<0.000000e+00> : vector<2x128xf32>
    %152 = tpu.matmul %149, %151, %cst_126 {dimension_numbers = #tpu.dot_dimension_numbers<[1], [0], [0], [1], [0, 0, 1, 1], [], []>} : vector<2x128xbf16>, vector<128x128xbf16>, vector<2x128xf32> -> vector<2x128xf32>
    %153 = arith.addf %147, %152 : vector<2x128xf32>
    %154 = vector.extract_strided_slice %1 {offsets = [3, 0, 0], sizes = [1, 2, 128], strides = [1, 1, 1]} : vector<5x5x128xbf16> to vector<1x2x128xbf16>
    %155 = vector.shape_cast %154 : vector<1x2x128xbf16> to vector<2x128xbf16>
    %c2_127 = arith.constant 2 : index
    %c0_128 = arith.constant 0 : index
    %c0_129 = arith.constant 0 : index
    %c0_130 = arith.constant 0 : index
    %156 = vector.load %arg4[%c2_127, %c0_128, %c0_129, %c0_130] : memref<4x4x128x128xbf16, #tpu.memory_space<vmem>>, vector<1x1x128x128xbf16>
    %157 = vector.shape_cast %156 : vector<1x1x128x128xbf16> to vector<128x128xbf16>
    %cst_131 = arith.constant dense<0.000000e+00> : vector<2x128xf32>
    %158 = tpu.matmul %155, %157, %cst_131 {dimension_numbers = #tpu.dot_dimension_numbers<[1], [0], [0], [1], [0, 0, 1, 1], [], []>} : vector<2x128xbf16>, vector<128x128xbf16>, vector<2x128xf32> -> vector<2x128xf32>
    %159 = arith.addf %153, %158 : vector<2x128xf32>
    %160 = vector.extract_strided_slice %1 {offsets = [3, 1, 0], sizes = [1, 2, 128], strides = [1, 1, 1]} : vector<5x5x128xbf16> to vector<1x2x128xbf16>
    %161 = vector.shape_cast %160 : vector<1x2x128xbf16> to vector<2x128xbf16>
    %c2_132 = arith.constant 2 : index
    %c1_133 = arith.constant 1 : index
    %c0_134 = arith.constant 0 : index
    %c0_135 = arith.constant 0 : index
    %162 = vector.load %arg4[%c2_132, %c1_133, %c0_134, %c0_135] : memref<4x4x128x128xbf16, #tpu.memory_space<vmem>>, vector<1x1x128x128xbf16>
    %163 = vector.shape_cast %162 : vector<1x1x128x128xbf16> to vector<128x128xbf16>
    %cst_136 = arith.constant dense<0.000000e+00> : vector<2x128xf32>
    %164 = tpu.matmul %161, %163, %cst_136 {dimension_numbers = #tpu.dot_dimension_numbers<[1], [0], [0], [1], [0, 0, 1, 1], [], []>} : vector<2x128xbf16>, vector<128x128xbf16>, vector<2x128xf32> -> vector<2x128xf32>
    %165 = arith.addf %159, %164 : vector<2x128xf32>
    %166 = vector.extract_strided_slice %1 {offsets = [3, 2, 0], sizes = [1, 2, 128], strides = [1, 1, 1]} : vector<5x5x128xbf16> to vector<1x2x128xbf16>
    %167 = vector.shape_cast %166 : vector<1x2x128xbf16> to vector<2x128xbf16>
    %c2_137 = arith.constant 2 : index
    %c2_138 = arith.constant 2 : index
    %c0_139 = arith.constant 0 : index
    %c0_140 = arith.constant 0 : index
    %168 = vector.load %arg4[%c2_137, %c2_138, %c0_139, %c0_140] : memref<4x4x128x128xbf16, #tpu.memory_space<vmem>>, vector<1x1x128x128xbf16>
    %169 = vector.shape_cast %168 : vector<1x1x128x128xbf16> to vector<128x128xbf16>
    %cst_141 = arith.constant dense<0.000000e+00> : vector<2x128xf32>
    %170 = tpu.matmul %167, %169, %cst_141 {dimension_numbers = #tpu.dot_dimension_numbers<[1], [0], [0], [1], [0, 0, 1, 1], [], []>} : vector<2x128xbf16>, vector<128x128xbf16>, vector<2x128xf32> -> vector<2x128xf32>
    %171 = arith.addf %165, %170 : vector<2x128xf32>
    %172 = vector.extract_strided_slice %1 {offsets = [3, 3, 0], sizes = [1, 2, 128], strides = [1, 1, 1]} : vector<5x5x128xbf16> to vector<1x2x128xbf16>
    %173 = vector.shape_cast %172 : vector<1x2x128xbf16> to vector<2x128xbf16>
    %c2_142 = arith.constant 2 : index
    %c3_143 = arith.constant 3 : index
    %c0_144 = arith.constant 0 : index
    %c0_145 = arith.constant 0 : index
    %174 = vector.load %arg4[%c2_142, %c3_143, %c0_144, %c0_145] : memref<4x4x128x128xbf16, #tpu.memory_space<vmem>>, vector<1x1x128x128xbf16>
    %175 = vector.shape_cast %174 : vector<1x1x128x128xbf16> to vector<128x128xbf16>
    %cst_146 = arith.constant dense<0.000000e+00> : vector<2x128xf32>
    %176 = tpu.matmul %173, %175, %cst_146 {dimension_numbers = #tpu.dot_dimension_numbers<[1], [0], [0], [1], [0, 0, 1, 1], [], []>} : vector<2x128xbf16>, vector<128x128xbf16>, vector<2x128xf32> -> vector<2x128xf32>
    %177 = arith.addf %171, %176 : vector<2x128xf32>
    %178 = vector.extract_strided_slice %1 {offsets = [4, 0, 0], sizes = [1, 2, 128], strides = [1, 1, 1]} : vector<5x5x128xbf16> to vector<1x2x128xbf16>
    %179 = vector.shape_cast %178 : vector<1x2x128xbf16> to vector<2x128xbf16>
    %c3_147 = arith.constant 3 : index
    %c0_148 = arith.constant 0 : index
    %c0_149 = arith.constant 0 : index
    %c0_150 = arith.constant 0 : index
    %180 = vector.load %arg4[%c3_147, %c0_148, %c0_149, %c0_150] : memref<4x4x128x128xbf16, #tpu.memory_space<vmem>>, vector<1x1x128x128xbf16>
    %181 = vector.shape_cast %180 : vector<1x1x128x128xbf16> to vector<128x128xbf16>
    %cst_151 = arith.constant dense<0.000000e+00> : vector<2x128xf32>
    %182 = tpu.matmul %179, %181, %cst_151 {dimension_numbers = #tpu.dot_dimension_numbers<[1], [0], [0], [1], [0, 0, 1, 1], [], []>} : vector<2x128xbf16>, vector<128x128xbf16>, vector<2x128xf32> -> vector<2x128xf32>
    %183 = arith.addf %177, %182 : vector<2x128xf32>
    %184 = vector.extract_strided_slice %1 {offsets = [4, 1, 0], sizes = [1, 2, 128], strides = [1, 1, 1]} : vector<5x5x128xbf16> to vector<1x2x128xbf16>
    %185 = vector.shape_cast %184 : vector<1x2x128xbf16> to vector<2x128xbf16>
    %c3_152 = arith.constant 3 : index
    %c1_153 = arith.constant 1 : index
    %c0_154 = arith.constant 0 : index
    %c0_155 = arith.constant 0 : index
    %186 = vector.load %arg4[%c3_152, %c1_153, %c0_154, %c0_155] : memref<4x4x128x128xbf16, #tpu.memory_space<vmem>>, vector<1x1x128x128xbf16>
    %187 = vector.shape_cast %186 : vector<1x1x128x128xbf16> to vector<128x128xbf16>
    %cst_156 = arith.constant dense<0.000000e+00> : vector<2x128xf32>
    %188 = tpu.matmul %185, %187, %cst_156 {dimension_numbers = #tpu.dot_dimension_numbers<[1], [0], [0], [1], [0, 0, 1, 1], [], []>} : vector<2x128xbf16>, vector<128x128xbf16>, vector<2x128xf32> -> vector<2x128xf32>
    %189 = arith.addf %183, %188 : vector<2x128xf32>
    %190 = vector.extract_strided_slice %1 {offsets = [4, 2, 0], sizes = [1, 2, 128], strides = [1, 1, 1]} : vector<5x5x128xbf16> to vector<1x2x128xbf16>
    %191 = vector.shape_cast %190 : vector<1x2x128xbf16> to vector<2x128xbf16>
    %c3_157 = arith.constant 3 : index
    %c2_158 = arith.constant 2 : index
    %c0_159 = arith.constant 0 : index
    %c0_160 = arith.constant 0 : index
    %192 = vector.load %arg4[%c3_157, %c2_158, %c0_159, %c0_160] : memref<4x4x128x128xbf16, #tpu.memory_space<vmem>>, vector<1x1x128x128xbf16>
    %193 = vector.shape_cast %192 : vector<1x1x128x128xbf16> to vector<128x128xbf16>
    %cst_161 = arith.constant dense<0.000000e+00> : vector<2x128xf32>
    %194 = tpu.matmul %191, %193, %cst_161 {dimension_numbers = #tpu.dot_dimension_numbers<[1], [0], [0], [1], [0, 0, 1, 1], [], []>} : vector<2x128xbf16>, vector<128x128xbf16>, vector<2x128xf32> -> vector<2x128xf32>
    %195 = arith.addf %189, %194 : vector<2x128xf32>
    %196 = vector.extract_strided_slice %1 {offsets = [4, 3, 0], sizes = [1, 2, 128], strides = [1, 1, 1]} : vector<5x5x128xbf16> to vector<1x2x128xbf16>
    %197 = vector.shape_cast %196 : vector<1x2x128xbf16> to vector<2x128xbf16>
    %c3_162 = arith.constant 3 : index
    %c3_163 = arith.constant 3 : index
    %c0_164 = arith.constant 0 : index
    %c0_165 = arith.constant 0 : index
    %198 = vector.load %arg4[%c3_162, %c3_163, %c0_164, %c0_165] : memref<4x4x128x128xbf16, #tpu.memory_space<vmem>>, vector<1x1x128x128xbf16>
    %199 = vector.shape_cast %198 : vector<1x1x128x128xbf16> to vector<128x128xbf16>
    %cst_166 = arith.constant dense<0.000000e+00> : vector<2x128xf32>
    %200 = tpu.matmul %197, %199, %cst_166 {dimension_numbers = #tpu.dot_dimension_numbers<[1], [0], [0], [1], [0, 0, 1, 1], [], []>} : vector<2x128xbf16>, vector<128x128xbf16>, vector<2x128xf32> -> vector<2x128xf32>
    %201 = arith.addf %195, %200 : vector<2x128xf32>
    %c0_167 = arith.constant 0 : index
    %c0_168 = arith.constant 0 : index
    %202 = vector.load %arg5[%c0_167, %c0_168] : memref<1x128xf32, #tpu.memory_space<vmem>>, vector<1x128xf32>
    %203 = vector.broadcast %202 : vector<1x128xf32> to vector<2x128xf32>
    %204 = arith.addf %201, %203 : vector<2x128xf32>
    %c0_169 = arith.constant 0 : index
    %c1_170 = arith.constant 1 : index
    %c0_171 = arith.constant 0 : index
    %c0_172 = arith.constant 0 : index
    %205 = vector.load %arg6[%c0_169, %c1_170, %c0_171, %c0_172] : memref<1x2x2x128xf32, #tpu.memory_space<vmem>>, vector<1x1x2x128xf32>
    %206 = vector.shape_cast %205 : vector<1x1x2x128xf32> to vector<2x128xf32>
    %207 = vector.shape_cast %204 : vector<2x128xf32> to vector<1x1x2x128xf32>
    tpu.vector_store %arg6[%c0_169, %c1_170, %c0_171, %c0_172], %207 {strides = array<i32>} : memref<1x2x2x128xf32, #tpu.memory_space<vmem>>, vector<1x1x2x128xf32>,
    return
  }
  func.func @transform_0(%arg0: i32, %arg1: i32, %arg2: i32) -> (i32, i32, i32, i32) {
    %c0_i32 = arith.constant 0 : i32
    %c0_i32_0 = arith.constant 0 : i32
    %c0_i32_1 = arith.constant 0 : i32
    %c0_i32_2 = arith.constant 0 : i32
    return %arg1, %c0_i32, %c0_i32_0, %c0_i32_1 : i32, i32, i32, i32
  }
  func.func @transform_1(%arg0: i32, %arg1: i32, %arg2: i32) -> (i32, i32, i32, i32) {
    %c0_i32 = arith.constant 0 : i32
    %c0_i32_0 = arith.constant 0 : i32
    %c0_i32_1 = arith.constant 0 : i32
    %c0_i32_2 = arith.constant 0 : i32
    return %c0_i32, %c0_i32_0, %c0_i32_1, %arg0 : i32, i32, i32, i32
  }
  func.func @transform_2(%arg0: i32, %arg1: i32, %arg2: i32) -> (i32, i32) {
    %c0_i32 = arith.constant 0 : i32
    %c0_i32_0 = arith.constant 0 : i32
    return %c0_i32, %arg0 : i32, i32
  }
  func.func @transform_3(%arg0: i32, %arg1: i32, %arg2: i32) -> (i32, i32, i32, i32) {
    %c0_i32 = arith.constant 0 : i32
    %c0_i32_0 = arith.constant 0 : i32
    return %arg1, %arg2, %c0_i32, %arg0 : i32, i32, i32, i32
  }
}

</mosaic_0001>

<bundles_post_ra>
// kernel: _lambda_.11
= control target key start
LH: loop header
LB: loop body
LE: loop exit
PB: predicated region body
PF: predicated region fallthrough
CT: control target
= control target key end

     0   :  { %s2667_s12 = smov 0   ;;  %s2669_s13 = smov 0   ;;  %s3325_s0 = inlined_call_operand.vmem [shape: bf16[2,17,17,12], index: 0, kind: input, shape index: {}]   ;;  %s3326_s1 = inlined_call_operand.vmem [shape: bf16[2,2,12,16], index: 1, kind: input, shape index: {}]   ;;  %s3327_s2 = inlined_call_operand.vmem [shape: f32[1,16], index: 2, kind: input, shape index: {}]   ;;  %s3328_s3 = inlined_call_operand.vmem [shape: bf16[2,16,16,16], index: 3, kind: output, shape index: {}]  }
   0x1   :  { %s2671_s14 = smov 0  }
   0x2 LB: > { %s28_s15 = sadd.s32 1, %s2641_s13  ;;  %p2093_p0 = scmp.ge.s32.totalorder %s2645_s14, 1  ;;  %s2645_s14 = sphi %s2671_s14, %s13_s14   ;;  %s2641_s13 = sphi %s2669_s13, %s3332_s13   ;;  %s2637_s12 = sphi %s2667_s12, %s3331_s12  }
   0x3   : > { %p30_p1 = scmp.ge.s32.totalorder %s28_s15, 2  ;;  %p177_p2 = scmp.lt.s32.totalorder %s2645_s14, 3 }
   0x5   : > { %s3334_s15 = smov (%p30_p1, %s28_s15), 0  ;;  %p178_p3 = pnand %p2093_p0, %p177_p2 }
   0x6   : > { %vm788_vm0 = vcmask (!%p178_p3), 1045504   ;;  %p216_p4 = scmp.lt.s32.totalorder (!%p178_p3), %s2637_s12, 1  ;;  %v2602_v0 = vld [vmem:[%s3326_s1 + $0x10] sm:$0x3f] (!%p178_p3)   ;;  %v2605_v1 = vld [vmem:[%s3326_s1 + $0x8] sm:$0x3f] (!%p178_p3)  }
   0x7   : > { %181 = sbr.rel (%p178_p3) target bundleno = 390 (0x186), region = 32  ;;  %2575 = vmatprep.subr.msk.bf16.mxu0 (!%p178_p3), %vm788_vm0, %v2602_v0  ;;  %v1267_v2 = vsel (!%p178_p3), %vm788_vm0, %v2602_v0, 0  ;;  %2573 = vmatprep.subr.msk.bf16.mxu1 (!%p178_p3), %vm788_vm0, %v2605_v1  ;;  %v790_v3 = vsel (!%p178_p3), %vm788_vm0, %v2605_v1, 0  ;;  %v2701_v4 = vld [vmem:[%s3326_s1] sm:$0x3f] (!%p178_p3)   ;;  %vm739_vm1 = vcmask (!%p178_p3), 97280  }
   0x8   : > { %2410 = vmatpush3.bf16.msra.mxu0 (!%p178_p3), %v1267_v2  ;;  %2342 = vmatpush3.bf16.msra.mxu1 (!%p178_p3), %v790_v3  ;;  %v2711_v5 = vld [vmem:[%s3326_s1 + $0x18] sm:$0x3f] (!%p178_p3)   ;;  %vm296_vm2 = vsmask.f32 (!%p178_p3), 3328  ;;  %vm297_vm3 = vsmask.f32 (!%p178_p3), 7440 }
   0x9   : > { %2574 = vmatprep.subr.msk.bf16.mxu1 (!%p178_p3), %vm788_vm0, %v2701_v4  ;;  %2576 = vmatprep.subr.msk.bf16.mxu0 (!%p178_p3), %vm788_vm0, %v2711_v5  ;;  %vm2766_vm4 = vmor (!%p178_p3), %vm296_vm2, %vm297_vm3  ;;  %vm1927_vm5 = vcmask (!%p178_p3), 125952  }
   0xe   : > { %s3336_s12 = smov (!%p216_p4, %s2637_s12), 1 }
   0xf   : > { %s2577_s20 = smul.u32 204, %s3336_s12  ;;  %s2240_s30 = sshll.u32 %s3336_s12, 7 }
  0x10   : > { %s3172_s6 = scalar_lea.vmem %s3328_s3, %s2240_s30 }
  0x11   : > { %s2706_s25 = scalar_lea.vmem %s3325_s0, %s2577_s20 }
  0x12   : > { %v246_v6 = vld [vmem:[%s2706_s25 + $0xc] sm:$0xf]  ;;  %v247_v7 = vld [vmem:[%s2706_s25 + $0x10] sm:$0xf]  ;;  %v249_v8 = vld [vmem:[%s2706_s25 + $0x18] sm:$0xf] }
  0x13   : > { %v324_v9 = vshrl.u32 %v246_v6, 16  ;;  %v327_v10 = vshll.u32 %v246_v6, 16  ;;  %v333_v11 = vshll.u32 %v247_v7, 16  ;;  %v337_v12 = vshrl.u32 %v247_v7, 16  ;;  %v250_v13 = vld [vmem:[%s2706_s25 + $0x1c] sm:$0xf] }
  0x14   : > { %v2721_v14 = vcombine.low %v246_v6, %v247_v7  ;;  %v348_v15 = vshrl.u32 %v249_v8, 16  ;;  %v351_v16 = vshll.u32 %v249_v8, 16  ;;  %v357_v17 = vshll.u32 %v250_v13, 16  ;;  %v252_v23 = vld [vmem:[%s2706_s25 + $0x24] sm:$0xf] }
  0x15   : > { %v326_v18 = vrot.slane %v324_v9, 4  ;;  %v329_v19 = vrot.slane %v327_v10, 5  ;;  %v2723_v20 = vrot.slane %v333_v11, 5  ;;  %v339_v21 = vrot.slane %v337_v12, 4  ;;  %v253_v24 = vld [vmem:[%s2706_s25 + $0x28] sm:$0xf] }
  0x16   : > { %2411 = vmatprep.mubr.msk.bf16.mxu0 %vm739_vm1, %v2721_v14  ;;  %v361_v22 = vshrl.u32 %v250_v13, 16  ;;  %v2729_v25 = vcombine.low %v249_v8, %v250_v13  ;;  %v2732_v26 = vld [vmem:[%s2706_s25] sm:$0xf]  ;;  %v2735_v29 = vrot.slane %v348_v15, 4  ;;  %v2737_v30 = vrot.slane %v351_v16, 5 }
  0x17   : > { %v330_v27 = vor.u32 %v329_v19, %v326_v18  ;;  %v340_v28 = vor.u32 %v339_v21, %v2723_v20  ;;  %v2740_v31 = vld [vmem:[%s2706_s25 + $0x4] sm:$0xf]  ;;  %v245_v32 = vld [vmem:[%s2706_s25 + $0x8] sm:$0x1]  ;;  %v2743_v33 = vrot.slane %v357_v17, 5  ;;  %v372_v35 = vshrl.u32 %v252_v23, 16 }
  0x18   : > { %v2745_v34 = vrot.slane %v361_v22, 4  ;;  %2412 = vmatmul.mubr.msk.bf16.vlgmr.msra.gmra.mrb[0].mxu0 %vm739_vm1, %v2729_v25  ;;  %v2749_v36 = vcombine.low %v252_v23, %v253_v24  ;;  %v375_v37 = vshll.u32 %v252_v23, 16  ;;  %v381_v38 = vshll.u32 %v253_v24, 16  ;;  %v255_v45 = vld [vmem:[%s2706_s25 + $0x30] sm:$0xf] }
  0x19   : > { %v385_v39 = vshrl.u32 %v253_v24, 16  ;;  %v300_v40 = vshrl.u32 %v2732_v26, 16  ;;  %v303_v41 = vshll.u32 %v2732_v26, 16  ;;  %v309_v42 = vshll.u32 %v2740_v31, 16  ;;  %v256_v49 = vld [vmem:[%s2706_s25 + $0x34] sm:$0xf] }
  0x1a   : > { %2415 = vmatprep.mubr.msk.bf16.mxu0 %vm739_vm1, %v2749_v36  ;;  %v313_v43 = vshrl.u32 %v2740_v31, 16  ;;  %v319_v44 = vshll.u32 %v245_v32, 16  ;;  %v331_v46 = vrot.slane %v330_v27, 4  ;;  %v341_v47 = vrot.slane %v340_v28, 4  ;;  %v248_v55 = vld [vmem:[%s2706_s25 + $0x14] sm:$0x1] }
  0x1b   : > { %v302_v48 = vrot.slane %v300_v40, 4  ;;  %v396_v50 = vshrl.u32 %v255_v45, 16  ;;  %v305_v51 = vrot.slane %v303_v41, 5  ;;  %v311_v52 = vrot.slane %v309_v42, 5  ;;  %v258_v1 = vld [vmem:[%s2706_s25 + $0x3c] sm:$0xf] }
  0x1c   : > { %v315_v53 = vrot.slane %v313_v43, 4  ;;  %v399_v54 = vshll.u32 %v255_v45, 16  ;;  %v2760_v56 = vrot.slane %v372_v35, 4  ;;  %v2762_v57 = vrot.slane %v375_v37, 5  ;;  %v259_v2 = vld [vmem:[%s2706_s25 + $0x40] sm:$0xf] }
  0x1d   : > { %v321_v58 = vrot.slane %v319_v44, 5  ;;  %v405_v59 = vshll.u32 %v256_v49, 16  ;;  %v306_v61 = vor.u32 %v305_v51, %v302_v48  ;;  %v409_v63 = vshrl.u32 %v256_v49, 16  ;;  %v261_v28 = vld [vmem:[%s2706_s25 + $0x48] sm:$0xf] }
  0x1e   : > { %v316_v62 = vor.u32 %v315_v53, %v311_v52  ;;  %v2770_v0 = vcombine.low %v255_v45, %v256_v49  ;;  %v2774_v3 = vrot.slane %v381_v38, 5  ;;  %v387_v6 = vrot.slane %v385_v39, 4  ;;  %v262_v32 = vld [vmem:[%s2706_s25 + $0x4c] sm:$0xf]  ;;  %v264_v49 = vld [vmem:[%s2706_s25 + $0x54] sm:$0xf] }
  0x1f   : > { %v343_v7 = vshll.u32 %v248_v55, 16  ;;  %v1501_v8 = vsel %vm788_vm0, %v2711_v5, 0  ;;  %v307_v9 = vrot.slane %v306_v61, 4  ;;  %v2778_v11 = vrot.slane %v396_v50, 4  ;;  %v251_v5 = vld [vmem:[%s2706_s25 + $0x20] sm:$0x1] }
  0x20   : > { %v317_v10 = vrot.slane %v316_v62, 4  ;;  %v2780_v12 = vrot.slane %v399_v54, 5  ;;  %2416 = vmatmul.mubr.msk.bf16.gmra.mrb[4].mxu0 %vm739_vm1, %v2770_v0  ;;  %v336_v13 = vsel %vm2766_vm4, %v331_v46, %v2723_v20  ;;  %v420_v16 = vshrl.u32 %v258_v1, 16  ;;  %v265_v54 = vld [vmem:[%s2706_s25 + $0x58] sm:$0xf] }
  0x21   : > { %v345_v15 = vrot.slane %v343_v7, 5  ;;  %2444 = vmatpush3.bf16.msra.mxu0 %v1501_v8  ;;  %v2787_v17 = vcombine.low %v258_v1, %v259_v2  ;;  %v312_v18 = vsel %vm2766_vm4, %v307_v9, %v311_v52  ;;  %v2794_v21 = vrot.slane %v405_v59, 5 }
  0x22   : > { %v322_v19 = vsel %vm2766_vm4, %v317_v10, %v321_v58  ;;  %v2796_v22 = vrot.slane %v409_v63, 4  ;;  %v1087_v24 = vsel %vm788_vm0, %v2701_v4, 0  ;;  %v423_v27 = vshll.u32 %v258_v1, 16 }
  0x23   : > { %v2099_v23 = vcombine.low %v312_v18, %v322_v19  ;;  %v346_v20 = vsel %vm2766_vm4, %v341_v47, %v345_v15  ;;  %2419 = vmatprep.mubr.msk.bf16.mxu0 %vm739_vm1, %v2787_v17  ;;  %v354_v37 = vor.u32 %v2737_v30, %v2735_v29  ;;  %v364_v38 = vor.u32 %v2745_v34, %v2743_v33  ;;  %v254_v30 = vld [vmem:[%s2706_s25 + $0x2c] sm:$0x1]  ;;  %v267_v19 = vld [vmem:[%s2706_s25 + $0x60] sm:$0xf] }
  0x24   : > { %v2806_v35 = vcombine.low %v336_v13, %v346_v20  ;;  %v367_v39 = vshll.u32 %v251_v5, 16  ;;  %v2813_v4 = vrot.slane %v420_v16, 4  ;;  %v429_v40 = vshll.u32 %v259_v2, 16 }
  0x25   : > { %2343 = vmatprep.mubr.msk.bf16.mxu1 %vm739_vm1, %v2099_v23  ;;  %v433_v41 = vshrl.u32 %v259_v2, 16  ;;  %v444_v42 = vshrl.u32 %v261_v28, 16  ;;  %v355_v43 = vrot.slane %v354_v37, 4  ;;  %v365_v44 = vrot.slane %v364_v38, 4  ;;  %v257_v2 = vld [vmem:[%s2706_s25 + $0x38] sm:$0x1] }
  0x26   : > { %2344 = vmatmul.mubr.msk.bf16.vlgmr.msra.gmra.mrb[0].mxu1 %vm739_vm1, %v2806_v35  ;;  %v369_v45 = vrot.slane %v367_v39, 5  ;;  %v2817_v29 = vcombine.low %v261_v28, %v262_v32  ;;  %v425_v34 = vrot.slane %v423_v27, 5  ;;  %v447_v46 = vshll.u32 %v261_v28, 16  ;;  %v268_v23 = vld [vmem:[%s2706_s25 + $0x64] sm:$0xf] }
  0x27   : > { %2376 = vmatpush3.bf16.msra.mxu1 %v1087_v24  ;;  %v453_v47 = vshll.u32 %v262_v32, 16  ;;  %v457_v48 = vshrl.u32 %v262_v32, 16  ;;  %v360_v50 = vsel %vm2766_vm4, %v355_v43, %v2743_v33  ;;  %v378_v52 = vor.u32 %v2762_v57, %v2760_v56  ;;  %v260_v37 = vld [vmem:[%s2706_s25 + $0x44] sm:$0x1] }
  0x28   : > { %v370_v51 = vsel %vm2766_vm4, %v365_v44, %v369_v45  ;;  %2420 = vmatmul.mubr.msk.bf16.gmra.mrb[8].mxu0 %vm739_vm1, %v2817_v29  ;;  %v388_v53 = vor.u32 %v387_v6, %v2774_v3  ;;  %v2832_v55 = vrot.slane %v429_v40, 5  ;;  %v435_v58 = vrot.slane %v433_v41, 4  ;;  %v270_v41 = vld [vmem:[%s2706_s25 + $0x6c] sm:$0xf] }
  0x29   : > { %v2834_v59 = vcombine.low %v360_v50, %v370_v51  ;;  %v391_v61 = vshll.u32 %v254_v30, 16  ;;  %v2836_v62 = vrot.slane %v444_v42, 4  ;;  %v379_v33 = vrot.slane %v378_v52, 4  ;;  %v271_v30 = vld [vmem:[%s2706_s25 + $0x70] sm:$0xf] }
  0x2a   : > { %v389_v63 = vrot.slane %v388_v53, 4  ;;  %v468_v1 = vshrl.u32 %v264_v49, 16  ;;  %v2841_v56 = vrot.slane %v447_v46, 5  ;;  %v471_v6 = vshll.u32 %v264_v49, 16  ;;  %v263_v53 = vld [vmem:[%s2706_s25 + $0x50] sm:$0x1] }
  0x2b   : > { %2347 = vmatprep.mubr.msk.bf16.mxu1 %vm739_vm1, %v2834_v59  ;;  %v393_v57 = vrot.slane %v391_v61, 5  ;;  %v2843_v7 = vcombine.low %v264_v49, %v265_v54  ;;  %v2845_v8 = vrot.slane %v453_v47, 5  ;;  %v459_v9 = vrot.slane %v457_v48, 4 }
  0x2c   : > { %v384_v10 = vsel %vm2766_vm4, %v379_v33, %v2774_v3  ;;  %v402_v13 = vor.u32 %v2780_v12, %v2778_v11  ;;  %v477_v16 = vshll.u32 %v265_v54, 16  ;;  %v412_v5 = vor.u32 %v2796_v22, %v2794_v21 }
  0x2d   : > { %v394_v15 = vsel %vm2766_vm4, %v389_v63, %v393_v57  ;;  %2423 = vmatprep.mubr.msk.bf16.mxu0 %vm739_vm1, %v2843_v7  ;;  %v415_v18 = vshll.u32 %v257_v2, 16  ;;  %v2862_v3 = vrot.slane %v468_v1, 4  ;;  %v481_v11 = vshrl.u32 %v265_v54, 16 }
  0x2e   : > { %v2860_v20 = vcombine.low %v384_v10, %v394_v15  ;;  %v403_v12 = vrot.slane %v402_v13, 4  ;;  %v2864_v24 = vrot.slane %v471_v6, 5  ;;  %v413_v27 = vrot.slane %v412_v5, 4  ;;  %v273_v13 = vld [vmem:[%s2706_s25 + $0x78] sm:$0xf] }
  0x2f   : > { %v417_v28 = vrot.slane %v415_v18, 5  ;;  %v492_v32 = vshrl.u32 %v267_v19, 16  ;;  %v495_v38 = vshll.u32 %v267_v19, 16  ;;  %v501_v39 = vshll.u32 %v268_v23, 16  ;;  %v274_v15 = vld [vmem:[%s2706_s25 + $0x7c] sm:$0xf] }
  0x30   : > { %2348 = vmatmul.mubr.msk.bf16.gmra.mrb[4].mxu1 %vm739_vm1, %v2860_v20  ;;  %v408_v22 = vsel %vm2766_vm4, %v403_v12, %v2794_v21  ;;  %v2872_v40 = vcombine.low %v267_v19, %v268_v23  ;;  %v505_v43 = vshrl.u32 %v268_v23, 16  ;;  %v426_v44 = vor.u32 %v425_v34, %v2813_v4 }
  0x31   : > { %v418_v42 = vsel %vm2766_vm4, %v413_v27, %v417_v28  ;;  %v436_v45 = vor.u32 %v435_v58, %v2832_v55  ;;  %v2880_v46 = vrot.slane %v477_v16, 5  ;;  %v483_v47 = vrot.slane %v481_v11, 4  ;;  %v266_v11 = vld [vmem:[%s2706_s25 + $0x5c] sm:$0x1] }
  0x32   : > { %v2882_v48 = vcombine.low %v408_v22, %v418_v42  ;;  %2424 = vmatmul.mubr.msk.bf16.gmra.mrb[12].mxu0 %vm739_vm1, %v2872_v40  ;;  %v439_v21 = vshll.u32 %v260_v37, 16  ;;  %v2886_v49 = vrot.slane %v492_v32, 4  ;;  %v427_v50 = vrot.slane %v426_v44, 4 }
  0x33   : > { %v437_v51 = vrot.slane %v436_v45, 4  ;;  %v516_v52 = vshrl.u32 %v270_v41, 16  ;;  %v2891_v4 = vrot.slane %v495_v38, 5  ;;  %v2893_v34 = vrot.slane %v501_v39, 5  ;;  %v276_v39 = vld [vmem:[%s2706_s25 + $0x84] sm:$0xf] }
  0x34   : > { %2351 = vmatprep.mubr.msk.bf16.mxu1 %vm739_vm1, %v2882_v48  ;;  %v441_v54 = vrot.slane %v439_v21, 5  ;;  %v2895_v58 = vcombine.low %v270_v41, %v271_v30  ;;  %v507_v61 = vrot.slane %v505_v43, 4  ;;  %v432_v33 = vsel %vm2766_vm4, %v427_v50, %v2832_v55 }
  0x35   : > { %v519_v63 = vshll.u32 %v270_v41, 16  ;;  %v450_v1 = vor.u32 %v2841_v56, %v2836_v62  ;;  %v525_v57 = vshll.u32 %v271_v30, 16  ;;  %v460_v6 = vor.u32 %v459_v9, %v2845_v8  ;;  %v277_v41 = vld [vmem:[%s2706_s25 + $0x88] sm:$0xf] }
  0x36   : > { %v442_v2 = vsel %vm2766_vm4, %v437_v51, %v441_v54  ;;  %2427 = vmatprep.mubr.msk.bf16.mxu0 %vm739_vm1, %v2895_v58  ;;  %v463_v10 = vshll.u32 %v263_v53, 16  ;;  %v2911_v55 = vrot.slane %v516_v52, 4  ;;  %v529_v5 = vshrl.u32 %v271_v30, 16 }
  0x37   : > { %v2909_v16 = vcombine.low %v432_v33, %v442_v2  ;;  %v451_v62 = vrot.slane %v450_v1, 4  ;;  %v461_v56 = vrot.slane %v460_v6, 4  ;;  %v540_v19 = vshrl.u32 %v273_v13, 16 }
  0x38   : > { %v465_v18 = vrot.slane %v463_v10, 5  ;;  %v543_v23 = vshll.u32 %v273_v13, 16  ;;  %v2916_v9 = vrot.slane %v519_v63, 5  ;;  %v549_v27 = vshll.u32 %v274_v15, 16  ;;  %v279_v10 = vld [vmem:[%s2706_s25 + $0x90] sm:$0xf] }
  0x39   : > { %2352 = vmatmul.mubr.msk.bf16.gmra.mrb[8].mxu1 %vm739_vm1, %v2909_v16  ;;  %v456_v12 = vsel %vm2766_vm4, %v451_v62, %v2845_v8  ;;  %v2921_v28 = vcombine.low %v273_v13, %v274_v15  ;;  %v553_v37 = vshrl.u32 %v274_v15, 16  ;;  %v474_v22 = vor.u32 %v2864_v24, %v2862_v3  ;;  %v269_v3 = vld [vmem:[%s2706_s25 + $0x68] sm:$0x1]  ;;  %v280_v13 = vld [vmem:[%s2706_s25 + $0x94] sm:$0xf] }
  0x3a   : > { %v466_v32 = vsel %vm2766_vm4, %v461_v56, %v465_v18  ;;  %v484_v38 = vor.u32 %v483_v47, %v2880_v46  ;;  %v2930_v42 = vrot.slane %v525_v57, 5  ;;  %v531_v43 = vrot.slane %v529_v5, 4 }
  0x3b   : > { %v2932_v44 = vcombine.low %v456_v12, %v466_v32  ;;  %2428 = vmatmul.mubr.msk.bf16.gmra.mrb[16].mxu0 %vm739_vm1, %v2921_v28  ;;  %v487_v8 = vshll.u32 %v266_v11, 16  ;;  %v2936_v45 = vrot.slane %v540_v19, 4  ;;  %v2938_v30 = vrot.slane %v543_v23, 5  ;;  %v272_v19 = vld [vmem:[%s2706_s25 + $0x74] sm:$0x1] }
  0x3c   : > { %v475_v21 = vrot.slane %v474_v22, 4  ;;  %v485_v50 = vrot.slane %v484_v38, 4  ;;  %v2943_v24 = vrot.slane %v549_v27, 5  ;;  %v564_v51 = vshrl.u32 %v276_v39, 16  ;;  %v282_v38 = vld [vmem:[%s2706_s25 + $0x9c] sm:$0xf] }
  0x3d   : > { %2355 = vmatprep.mubr.msk.bf16.mxu1 %vm739_vm1, %v2932_v44  ;;  %v489_v47 = vrot.slane %v487_v8, 5  ;;  %v2945_v52 = vcombine.low %v276_v39, %v277_v41  ;;  %v555_v53 = vrot.slane %v553_v37, 4  ;;  %v567_v33 = vshll.u32 %v276_v39, 16  ;;  %v283_v39 = vld [vmem:[%s2706_s25 + $0xa0] sm:$0xf] }
  0x3e   : > { %v480_v54 = vsel %vm2766_vm4, %v475_v21, %v2880_v46  ;;  %v498_v63 = vor.u32 %v2891_v4, %v2886_v49  ;;  %v573_v2 = vshll.u32 %v277_v41, 16  ;;  %v508_v57 = vor.u32 %v507_v61, %v2893_v34 }
  0x3f   : > { %v490_v1 = vsel %vm2766_vm4, %v485_v50, %v489_v47  ;;  %2431 = vmatprep.mubr.msk.bf16.mxu0 %vm739_vm1, %v2945_v52  ;;  %v511_v6 = vshll.u32 %v269_v3, 16  ;;  %v577_v46 = vshrl.u32 %v277_v41, 16  ;;  %v588_v62 = vshrl.u32 %v279_v10, 16 }
  0x40   : > { %v2959_v15 = vcombine.low %v480_v54, %v490_v1  ;;  %v499_v5 = vrot.slane %v498_v63, 4  ;;  %v2961_v49 = vrot.slane %v564_v51, 4  ;;  %v509_v4 = vrot.slane %v508_v57, 4 }
  0x41   : > { %v513_v56 = vrot.slane %v511_v6, 5  ;;  %v591_v18 = vshll.u32 %v279_v10, 16  ;;  %v2966_v61 = vrot.slane %v567_v33, 5  ;;  %v597_v11 = vshll.u32 %v280_v13, 16 }
  0x42   : > { %2356 = vmatmul.mubr.msk.bf16.gmra.mrb[12].mxu1 %vm739_vm1, %v2959_v15  ;;  %v504_v23 = vsel %vm2766_vm4, %v499_v5, %v2893_v34  ;;  %v2971_v12 = vcombine.low %v279_v10, %v280_v13  ;;  %v2973_v27 = vrot.slane %v573_v2, 5  ;;  %v522_v37 = vor.u32 %v2916_v9, %v2911_v55  ;;  %v275_v55 = vld [vmem:[%s2706_s25 + $0x80] sm:$0x1]  ;;  %v285_v5 = vld [vmem:[%s2706_s25 + $0xa8] sm:$0xf] }
  0x43   : > { %v514_v32 = vsel %vm2766_vm4, %v509_v4, %v513_v56  ;;  %v532_v22 = vor.u32 %v531_v43, %v2930_v42  ;;  %v579_v41 = vrot.slane %v577_v46, 4  ;;  %v2984_v34 = vrot.slane %v588_v62, 4  ;;  %v286_v62 = vld [vmem:[%s2706_s25 + $0xac] sm:$0xf] }
  0x44   : > { %v2982_v8 = vcombine.low %v504_v23, %v514_v32  ;;  %2432 = vmatmul.mubr.msk.bf16.gmra.mrb[20].mxu0 %vm739_vm1, %v2971_v12  ;;  %v535_v21 = vshll.u32 %v272_v19, 16  ;;  %v2988_v50 = vrot.slane %v591_v18, 5  ;;  %v601_v3 = vshrl.u32 %v280_v13, 16 }
  0x45   : > { %v523_v47 = vrot.slane %v522_v37, 4  ;;  %v533_v51 = vrot.slane %v532_v22, 4  ;;  %v2993_v9 = vrot.slane %v597_v11, 5  ;;  %v612_v54 = vshrl.u32 %v282_v38, 16  ;;  %v278_v11 = vld [vmem:[%s2706_s25 + $0x8c] sm:$0x1] }
  0x46   : > { %2359 = vmatprep.mubr.msk.bf16.mxu1 %vm739_vm1, %v2982_v8  ;;  %v537_v43 = vrot.slane %v535_v21, 5  ;;  %v2995_v33 = vcombine.low %v282_v38, %v283_v39  ;;  %v615_v1 = vshll.u32 %v282_v38, 16  ;;  %v621_v2 = vshll.u32 %v283_v39, 16  ;;  %v288_v38 = vld [vmem:[%s2706_s25 + $0xb4] sm:$0xf] }
  0x47   : > { %v528_v63 = vsel %vm2766_vm4, %v523_v47, %v2930_v42  ;;  %v546_v57 = vor.u32 %v2938_v30, %v2936_v45  ;;  %v625_v10 = vshrl.u32 %v283_v39, 16  ;;  %v556_v13 = vor.u32 %v555_v53, %v2943_v24 }
  0x48   : > { %v538_v6 = vsel %vm2766_vm4, %v533_v51, %v537_v43  ;;  %2435 = vmatprep.mubr.msk.bf16.mxu0 %vm739_vm1, %v2995_v33  ;;  %v559_v46 = vshll.u32 %v275_v55, 16  ;;  %v603_v42 = vrot.slane %v601_v3, 4  ;;  %v636_v18 = vshrl.u32 %v285_v5, 16  ;;  %v289_v51 = vld [vmem:[%s2706_s25 + $0xb8] sm:$0xf] }
  0x49   : > { %v3009_v4 = vcombine.low %v528_v63, %v538_v6  ;;  %v547_v56 = vrot.slane %v546_v57, 4  ;;  %v614_v45 = vrot.slane %v612_v54, 4  ;;  %v557_v30 = vrot.slane %v556_v13, 4  ;;  %v281_v55 = vld [vmem:[%s2706_s25 + $0x98] sm:$0x1] }
  0x4a   : > { %v561_v19 = vrot.slane %v559_v46, 5  ;;  %v639_v23 = vshll.u32 %v285_v5, 16  ;;  %v617_v53 = vrot.slane %v615_v1, 5  ;;  %v3014_v32 = vrot.slane %v621_v2, 5  ;;  %v3034_v1 = vld [vmem:[%s2706_s25 + $0xc0] sm:$0xf] }
  0x4b   : > { %2360 = vmatmul.mubr.msk.bf16.gmra.mrb[16].mxu1 %vm739_vm1, %v3009_v4  ;;  %v552_v37 = vsel %vm2766_vm4, %v547_v56, %v2943_v24  ;;  %v3019_v22 = vcombine.low %v285_v5, %v286_v62  ;;  %v627_v39 = vrot.slane %v625_v10, 4  ;;  %v570_v3 = vor.u32 %v2966_v61, %v2961_v49  ;;  %v3037_v13 = vld [vmem:[%s2706_s25 + $0xc4] sm:$0xf] }
  0x4c   : > { %v562_v21 = vsel %vm2766_vm4, %v557_v30, %v561_v19  ;;  %v580_v47 = vor.u32 %v579_v41, %v2973_v27  ;;  %v638_v54 = vrot.slane %v636_v18, 4  ;;  %v645_v63 = vshll.u32 %v286_v62, 16 }
  0x4d   : > { %v3029_v43 = vcombine.low %v552_v37, %v562_v21  ;;  %2436 = vmatmul.mubr.msk.bf16.gmra.mrb[24].mxu0 %vm739_vm1, %v3019_v22  ;;  %v583_v24 = vshll.u32 %v278_v11, 16  ;;  %v641_v2 = vrot.slane %v639_v23, 5  ;;  %v649_v57 = vshrl.u32 %v286_v62, 16 }
  0x4e   : > { %v571_v6 = vrot.slane %v570_v3, 4  ;;  %v581_v10 = vrot.slane %v580_v47, 4  ;;  %v660_v61 = vshrl.u32 %v288_v38, 16  ;;  %v663_v41 = vshll.u32 %v288_v38, 16 }
  0x4f   : > { %2363 = vmatprep.mubr.msk.bf16.mxu1 %vm739_vm1, %v3029_v43  ;;  %v585_v49 = vrot.slane %v583_v24, 5  ;;  %v3041_v46 = vcombine.low %v288_v38, %v289_v51  ;;  %v669_v56 = vshll.u32 %v289_v51, 16  ;;  %v673_v18 = vshrl.u32 %v289_v51, 16  ;;  %v284_v51 = vld [vmem:[%s2706_s25 + $0xa4] sm:$0x1] }
  0x50   : > { %v576_v5 = vsel %vm2766_vm4, %v571_v6, %v2973_v27  ;;  %v594_v62 = vor.u32 %v2988_v50, %v2984_v34  ;;  %v604_v19 = vor.u32 %v603_v42, %v2993_v9  ;;  %v607_v23 = vshll.u32 %v281_v55, 16 }
  0x51   : > { %v586_v30 = vsel %vm2766_vm4, %v581_v10, %v585_v49  ;;  %2439 = vmatprep.mubr.msk.bf16.mxu0 %vm739_vm1, %v3041_v46  ;;  %v2167_v11 = vcombine.low %v3034_v1, %v3037_v13  ;;  %v647_v27 = vrot.slane %v645_v63, 5  ;;  %v651_v37 = vrot.slane %v649_v57, 4  ;;  %v287_v57 = vld [vmem:[%s2706_s25 + $0xb0] sm:$0x1] }
  0x52   : > { %v3055_v38 = vcombine.low %v576_v5, %v586_v30  ;;  %v595_v21 = vrot.slane %v594_v62, 4  ;;  %v662_v3 = vrot.slane %v660_v61, 4  ;;  %v665_v34 = vrot.slane %v663_v41, 5 }
  0x53   : > { %v605_v50 = vrot.slane %v604_v19, 4  ;;  %v609_v47 = vrot.slane %v607_v23, 5  ;;  %v671_v42 = vrot.slane %v669_v56, 5  ;;  %v675_v55 = vrot.slane %v673_v18, 4  ;;  %v290_v56 = vld [vmem:[%s2706_s25 + $0xbc] sm:$0x1] }
  0x54   : > { %2364 = vmatmul.mubr.msk.bf16.gmra.mrb[20].mxu1 %vm739_vm1, %v3055_v38  ;;  %v600_v24 = vsel %vm2766_vm4, %v595_v21, %v2993_v9  ;;  %v618_v63 = vor.u32 %v617_v53, %v614_v45  ;;  %v628_v10 = vor.u32 %v627_v39, %v3014_v32  ;;  %v631_v41 = vshll.u32 %v284_v51, 16 }
  0x55   : > { %v610_v6 = vsel %vm2766_vm4, %v605_v50, %v609_v47  ;;  %2440 = vmatmul.mubr.msk.bf16.gmra.mrb[28].mxu0 %vm739_vm1, %v2167_v11  ;;  %v642_v5 = vor.u32 %v641_v2, %v638_v54  ;;  %v652_v62 = vor.u32 %v651_v37, %v647_v27  ;;  %v655_v9 = vshll.u32 %v287_v57, 16 }
  0x56   : > { %v2111_v49 = vcombine.low %v600_v24, %v610_v6  ;;  %v619_v61 = vrot.slane %v618_v63, 4  ;;  %2445 = vmatprep.mubr.msk.bf16.mxu0 %vm739_vm1, %v2806_v35  ;;  %v629_v18 = vrot.slane %v628_v10, 4  ;;  %v666_v45 = vor.u32 %v665_v34, %v662_v3 }
  0x57   : > { %v633_v30 = vrot.slane %v631_v41, 5  ;;  %v643_v39 = vrot.slane %v642_v5, 4  ;;  %v676_v19 = vor.u32 %v675_v55, %v671_v42  ;;  %v653_v23 = vrot.slane %v652_v62, 4 }
  0x58   : > { %2367 = vmatprep.mubr.msk.bf16.mxu1 %vm739_vm1, %v2111_v49  ;;  %v624_v53 = vsel %vm2766_vm4, %v619_v61, %v3014_v32  ;;  %v657_v11 = vrot.slane %v655_v9, 5  ;;  %v679_v21 = vshll.u32 %v290_v56, 16  ;;  %v667_v2 = vrot.slane %v666_v45, 4 }
  0x59   : > { %v634_v35 = vsel %vm2766_vm4, %v629_v18, %v633_v30  ;;  %v648_v54 = vsel %vm2766_vm4, %v643_v39, %v647_v27  ;;  %v677_v37 = vrot.slane %v676_v19, 4  ;;  %v2132_v55 = vcombine.low %v2732_v26, %v2740_v31 }
  0x5a   : > { %v2112_v3 = vcombine.low %v624_v53, %v634_v35  ;;  %v658_v34 = vsel %vm2766_vm4, %v653_v23, %v657_v11  ;;  %v681_v50 = vrot.slane %v679_v21, 5  ;;  %v672_v47 = vsel %vm2766_vm4, %v667_v2, %v671_v42 }
  0x5b   : > { %v2113_v32 = vcombine.low %v648_v54, %v658_v34  ;;  %v1472_v26 = vshll.u32 %v3037_v13, 16  ;;  %v1476_v31 = vshrl.u32 %v3037_v13, 16 }
  0x5c   : > { %2368 = vmatmul.mubr.msk.bf16.gmra.mrb[24].mxu1 %vm739_vm1, %v2112_v3  ;;  %v682_v27 = vsel %vm2766_vm4, %v677_v37, %v681_v50 }
  0x5d   : > { %2446 = vmatmul.mubr.msk.bf16.vlgmr.msra.gmra.mrb[0].mxu0 %vm739_vm1, %v2834_v59  ;;  %2371 = vmatprep.mubr.msk.bf16.mxu1 %vm739_vm1, %v2113_v32  ;;  %v2114_v51 = vcombine.low %v672_v47, %v682_v27  ;;  %v1478_v59 = vrot.slane %v1476_v31, 4 }
  0x5e   : > { %2449 = vmatprep.mubr.msk.bf16.mxu0 %vm739_vm1, %v2860_v20  ;;  %v293_v20 = vld [vmem:[%s2706_s25 + $0xc8] sm:$0x1] }
  0x64   : > { %2372 = vmatmul.mubr.msk.bf16.gmra.mrb[28].mxu1 %vm739_vm1, %v2114_v51 }
  0x65   : > { %2450 = vmatmul.mubr.msk.bf16.gmra.mrb[4].mxu0 %vm739_vm1, %v2882_v48  ;;  %2377 = vmatprep.mubr.msk.bf16.mxu1 %vm739_vm1, %v2132_v55 }
  0x66   : > { %2453 = vmatprep.mubr.msk.bf16.mxu0 %vm739_vm1, %v2909_v16  ;;  %v1482_v16 = vshll.u32 %v293_v20, 16 }
  0x6c   : > { %2378 = vmatmul.mubr.msk.bf16.vlgmr.msra.gmra.mrb[0].mxu1 %vm739_vm1, %v2721_v14  ;;  %v1463_v14 = vshrl.u32 %v3034_v1, 16 }
  0x6d   : > { %2454 = vmatmul.mubr.msk.bf16.gmra.mrb[8].mxu0 %vm739_vm1, %v2932_v44  ;;  %2381 = vmatprep.mubr.msk.bf16.mxu1 %vm739_vm1, %v2729_v25  ;;  %v1466_v25 = vshll.u32 %v3034_v1, 16 }
  0x6e   : > { %2457 = vmatprep.mubr.msk.bf16.mxu0 %vm739_vm1, %v2959_v15 }
  0x74   : > { %2382 = vmatmul.mubr.msk.bf16.gmra.mrb[4].mxu1 %vm739_vm1, %v2749_v36  ;;  %v1465_v36 = vrot.slane %v1463_v14, 4 }
  0x75   : > { %2458 = vmatmul.mubr.msk.bf16.gmra.mrb[12].mxu0 %vm739_vm1, %v2982_v8  ;;  %2385 = vmatprep.mubr.msk.bf16.mxu1 %vm739_vm1, %v2770_v0  ;;  %v1468_v0 = vrot.slane %v1466_v25, 5  ;;  %v1484_v8 = vrot.slane %v1482_v16, 5 }
  0x76   : > { %2461 = vmatprep.mubr.msk.bf16.mxu0 %vm739_vm1, %v3009_v4 }
  0x77   : > { %v1469_v48 = vor.u32 %v1468_v0, %v1465_v36 }
  0x79   : > { %v1470_v44 = vrot.slane %v1469_v48, 4 }
  0x7c   : > { %2386 = vmatmul.mubr.msk.bf16.gmra.mrb[8].mxu1 %vm739_vm1, %v2787_v17  ;;  %v1474_v17 = vrot.slane %v1472_v26, 5 }
  0x7d   : > { %2462 = vmatmul.mubr.msk.bf16.gmra.mrb[16].mxu0 %vm739_vm1, %v3029_v43  ;;  %2389 = vmatprep.mubr.msk.bf16.mxu1 %vm739_vm1, %v2817_v29 }
  0x7e   : > { %2465 = vmatprep.mubr.msk.bf16.mxu0 %vm739_vm1, %v3055_v38  ;;  %v1479_v29 = vor.u32 %v1478_v59, %v1474_v17 }
  0x80   : > { %v1480_v15 = vrot.slane %v1479_v29, 4 }
  0x84   : > { %2390 = vmatmul.mubr.msk.bf16.gmra.mrb[12].mxu1 %vm739_vm1, %v2843_v7  ;;  %v1475_v7 = vsel %vm2766_vm4, %v1470_v44, %v1474_v17 }
  0x85   : > { %2466 = vmatmul.mubr.msk.bf16.gmra.mrb[20].mxu0 %vm739_vm1, %v2111_v49  ;;  %2393 = vmatprep.mubr.msk.bf16.mxu1 %vm739_vm1, %v2872_v40  ;;  %v1485_v40 = vsel %vm2766_vm4, %v1480_v15, %v1484_v8 }
  0x86   : > { %2469 = vmatprep.mubr.msk.bf16.mxu0 %vm739_vm1, %v2112_v3  ;;  %v2187_v4 = vcombine.low %v1475_v7, %v1485_v40 }
  0x8c   : > { %2394 = vmatmul.mubr.msk.bf16.gmra.mrb[16].mxu1 %vm739_vm1, %v2895_v58 }
  0x8d   : > { %2470 = vmatmul.mubr.msk.bf16.gmra.mrb[24].mxu0 %vm739_vm1, %v2113_v32  ;;  %2397 = vmatprep.mubr.msk.bf16.mxu1 %vm739_vm1, %v2921_v28 }
  0x8e   : > { %2473 = vmatprep.mubr.msk.bf16.mxu0 %vm739_vm1, %v2114_v51 }
  0x94   : > { %2398 = vmatmul.mubr.msk.bf16.gmra.mrb[20].mxu1 %vm739_vm1, %v2945_v52 }
  0x95   : > { %2474 = vmatmul.mubr.msk.bf16.gmra.mrb[28].mxu0 %vm739_vm1, %v2187_v4  ;;  %2401 = vmatprep.mubr.msk.bf16.mxu1 %vm739_vm1, %v2971_v12  ;;  %v3158_v12 = vld [vmem:[%s3327_s2] ss:$0 sm:$0xff] }
  0x9c   : > { %2402 = vmatmul.mubr.msk.bf16.gmra.mrb[24].mxu1 %vm739_vm1, %v2995_v33 }
  0x9d   : > { %2405 = vmatprep.mubr.msk.bf16.mxu1 %vm739_vm1, %v3019_v22 }
  0xa4   : > { %2406 = vmatmul.mubr.msk.bf16.gmra.mrb[28].mxu1 %vm739_vm1, %v3041_v46 }
 0x130   : > { %v2447_v60 = vpop.f32.mrb[0].mxu0 }
 0x131   : > { %v1537_v58 = vpop.f32.mrb[1].mxu0 }
 0x132   : > { %v2448_v28 = vpop.f32.mrb[2].mxu0 }
 0x133   : > { %v1540_v43 = vpop.f32.mrb[3].mxu0 }
 0x138   : > { %v2451_v1 = vpop.f32.mrb[4].mxu0 }
 0x139   : > { %v1553_v52 = vpop.f32.mrb[5].mxu0 }
 0x13a   : > { %v2452_v13 = vpop.f32.mrb[6].mxu0 }
 0x13b   : > { %v1556_v38 = vpop.f32.mrb[7].mxu0 }
 0x13f   : > { %v2379_v42 = vpop.f32.mrb[0].mxu1 }
 0x140   : > { %v2455_v33 = vpop.f32.mrb[8].mxu0  ;;  %v2477_v22 = vadd.f32 %v2447_v60, %v2379_v42  ;;  %v1123_v24 = vpop.f32.mrb[1].mxu1 }
 0x141   : > { %v1569_v63 = vpop.f32.mrb[9].mxu0  ;;  %v2478_v46 = vadd.f32 %v1537_v58, %v1123_v24  ;;  %v2380_v57 = vpop.f32.mrb[2].mxu1 }
 0x142   : > { %v3160_v6 = vpop.f32.mrb[10].mxu0  ;;  %v1705_v10 = vadd.f32 %v2477_v22, %v3158_v12  ;;  %v2479_v49 = vadd.f32 %v2448_v28, %v2380_v57  ;;  %v1126_v61 = vpop.f32.mrb[3].mxu1 }
 0x143   : > { %v3163_v41 = vpop.f32.mrb[11].mxu0  ;;  %v1703_v5 = vadd.f32 %v2478_v46, %v3158_v12  ;;  %v2480_v56 = vadd.f32 %v1540_v43, %v1126_v61 }
 0x144   : > { %v1737_v18 = vmul.f32 0.2, %v1705_v10  ;;  %v1706_v62 = vadd.f32 %v2479_v49, %v3158_v12 }
 0x145   : > { %v1735_v9 = vmul.f32 0.2, %v1703_v5  ;;  %v1704_v45 = vadd.f32 %v2480_v56, %v3158_v12 }
 0x146   : > { %v1769_v53 = vmax.f32 %v1705_v10, %v1737_v18  ;;  %v1738_v30 = vmul.f32 0.2, %v1706_v62 }
 0x147   : > { %v1767_v39 = vmax.f32 %v1703_v5, %v1735_v9  ;;  %v1736_v19 = vmul.f32 0.2, %v1704_v45  ;;  %v2383_v23 = vpop.f32.mrb[4].mxu1 }
 0x148   : > { %v3174_v11 = vpop.f32.mrb[12].mxu0  ;;  %v2243_v21 = vpack.c.bf16 %v1769_v53, %v1769_v53  ;;  %v1770_v35 = vmax.f32 %v1706_v62, %v1738_v30  ;;  %v2481_v54 = vadd.f32 %v2451_v1, %v2383_v23  ;;  %v1139_v2 = vpop.f32.mrb[5].mxu1 }
 0x149   : > { %v3176_v37 = vpop.f32.mrb[13].mxu0  ;;  %v2241_v3 = vpack.c.bf16 %v1767_v39, %v1767_v39  ;;  %v1768_v34 = vmax.f32 %v1704_v45, %v1736_v19  ;;  %v2482_v50 = vadd.f32 %v1553_v52, %v1139_v2  ;;  %v2384_v32 = vpop.f32.mrb[6].mxu1 }
 0x14a   : > { %v3178_v47 = vpop.f32.mrb[14].mxu0  ;;  %1930 = vst.msk [vmem:[%s3172_s6 + $0x8] sm:$0xf] %vm1927_vm5, %v2243_v21  ;;  %v2244_v27 = vpack.c.bf16 %v1770_v35, %v1770_v35  ;;  %v1709_v51 = vadd.f32 %v2481_v54, %v3158_v12  ;;  %v2483_v55 = vadd.f32 %v2452_v13, %v2384_v32  ;;  %v1142_v14 = vpop.f32.mrb[7].mxu1 }
 0x14b   : > { %v3183_v25 = vpop.f32.mrb[15].mxu0  ;;  %1928 = vst.msk [vmem:[%s3172_s6] sm:$0xf] %vm1927_vm5, %v2241_v3  ;;  %v2242_v26 = vpack.c.bf16 %v1768_v34, %v1768_v34  ;;  %v1707_v31 = vadd.f32 %v2482_v50, %v3158_v12  ;;  %v2484_v36 = vadd.f32 %v1556_v38, %v1142_v14 }
 0x14c   : > { %1931 = vst.msk [vmem:[%s3172_s6 + $0xc] sm:$0xf] %vm1927_vm5, %v2244_v27  ;;  %v1741_v0 = vmul.f32 0.2, %v1709_v51  ;;  %v1710_v17 = vadd.f32 %v2483_v55, %v3158_v12 }
 0x14d   : > { %1929 = vst.msk [vmem:[%s3172_s6 + $0x4] sm:$0xf] %vm1927_vm5, %v2242_v26  ;;  %v1739_v59 = vmul.f32 0.2, %v1707_v31  ;;  %v1708_v20 = vadd.f32 %v2484_v36, %v3158_v12 }
 0x14e   : > { %v1773_v48 = vmax.f32 %v1709_v51, %v1741_v0  ;;  %v1742_v29 = vmul.f32 0.2, %v1710_v17 }
 0x14f   : > { %v1771_v16 = vmax.f32 %v1707_v31, %v1739_v59  ;;  %v1740_v44 = vmul.f32 0.2, %v1708_v20  ;;  %v2387_v15 = vpop.f32.mrb[8].mxu1 }
 0x150   : > { %v3194_v8 = vpop.f32.mrb[16].mxu0  ;;  %v2247_v7 = vpack.c.bf16 %v1773_v48, %v1773_v48  ;;  %v1774_v40 = vmax.f32 %v1710_v17, %v1742_v29  ;;  %v2485_v4 = vadd.f32 %v2455_v33, %v2387_v15  ;;  %v1155_v60 = vpop.f32.mrb[9].mxu1 }
 0x151   : > { %v3196_v58 = vpop.f32.mrb[17].mxu0  ;;  %v2245_v28 = vpack.c.bf16 %v1771_v16, %v1771_v16  ;;  %v1772_v43 = vmax.f32 %v1708_v20, %v1740_v44  ;;  %v2486_v1 = vadd.f32 %v1569_v63, %v1155_v60  ;;  %v2388_v52 = vpop.f32.mrb[10].mxu1 }
 0x152   : > { %v3198_v13 = vpop.f32.mrb[18].mxu0  ;;  %1934 = vst.msk [vmem:[%s3172_s6 + $0x18] sm:$0xf] %vm1927_vm5, %v2247_v7  ;;  %v2248_v38 = vpack.c.bf16 %v1774_v40, %v1774_v40  ;;  %v1713_v42 = vadd.f32 %v2485_v4, %v3158_v12  ;;  %v2487_v22 = vadd.f32 %v3160_v6, %v2388_v52  ;;  %v1158_v24 = vpop.f32.mrb[11].mxu1 }
 0x153   : > { %v3204_v33 = vpop.f32.mrb[19].mxu0  ;;  %1932 = vst.msk [vmem:[%s3172_s6 + $0x10] sm:$0xf] %vm1927_vm5, %v2245_v28  ;;  %v2246_v46 = vpack.c.bf16 %v1772_v43, %v1772_v43  ;;  %v1711_v57 = vadd.f32 %v2486_v1, %v3158_v12  ;;  %v2488_v63 = vadd.f32 %v3163_v41, %v1158_v24 }
 0x154   : > { %1935 = vst.msk [vmem:[%s3172_s6 + $0x1c] sm:$0xf] %vm1927_vm5, %v2248_v38  ;;  %v1745_v10 = vmul.f32 0.2, %v1713_v42  ;;  %v1714_v49 = vadd.f32 %v2487_v22, %v3158_v12 }
 0x155   : > { %1933 = vst.msk [vmem:[%s3172_s6 + $0x14] sm:$0xf] %vm1927_vm5, %v2246_v46  ;;  %v1743_v61 = vmul.f32 0.2, %v1711_v57  ;;  %v1712_v6 = vadd.f32 %v2488_v63, %v3158_v12 }
 0x156   : > { %v1777_v5 = vmax.f32 %v1713_v42, %v1745_v10  ;;  %v1746_v56 = vmul.f32 0.2, %v1714_v49 }
 0x157   : > { %v1775_v18 = vmax.f32 %v1711_v57, %v1743_v61  ;;  %v1744_v62 = vmul.f32 0.2, %v1712_v6  ;;  %v2391_v9 = vpop.f32.mrb[12].mxu1 }
 0x158   : > { %v3216_v45 = vpop.f32.mrb[20].mxu0  ;;  %v2251_v53 = vpack.c.bf16 %v1777_v5, %v1777_v5  ;;  %v1778_v41 = vmax.f32 %v1714_v49, %v1746_v56  ;;  %v2489_v30 = vadd.f32 %v3174_v11, %v2391_v9  ;;  %v1171_v39 = vpop.f32.mrb[13].mxu1 }
 0x159   : > { %v3219_v19 = vpop.f32.mrb[21].mxu0  ;;  %v2249_v23 = vpack.c.bf16 %v1775_v18, %v1775_v18  ;;  %v1776_v21 = vmax.f32 %v1712_v6, %v1744_v62  ;;  %v2490_v35 = vadd.f32 %v3176_v37, %v1171_v39  ;;  %v2392_v54 = vpop.f32.mrb[14].mxu1 }
 0x15a   : > { %v3222_v2 = vpop.f32.mrb[22].mxu0  ;;  %1938 = vst.msk [vmem:[%s3172_s6 + $0x28] sm:$0xf] %vm1927_vm5, %v2251_v53  ;;  %v2252_v3 = vpack.c.bf16 %v1778_v41, %v1778_v41  ;;  %v1717_v34 = vadd.f32 %v2489_v30, %v3158_v12  ;;  %v2491_v50 = vadd.f32 %v3178_v47, %v2392_v54  ;;  %v1174_v11 = vpop.f32.mrb[15].mxu1 }
 0x15b   : > { %v3228_v32 = vpop.f32.mrb[23].mxu0  ;;  %1936 = vst.msk [vmem:[%s3172_s6 + $0x20] sm:$0xf] %vm1927_vm5, %v2249_v23  ;;  %v2250_v27 = vpack.c.bf16 %v1776_v21, %v1776_v21  ;;  %v1715_v51 = vadd.f32 %v2490_v35, %v3158_v12  ;;  %v2492_v37 = vadd.f32 %v3183_v25, %v1174_v11 }
 0x15c   : > { %1939 = vst.msk [vmem:[%s3172_s6 + $0x2c] sm:$0xf] %vm1927_vm5, %v2252_v3  ;;  %v1749_v55 = vmul.f32 0.2, %v1717_v34  ;;  %v1718_v14 = vadd.f32 %v2491_v50, %v3158_v12 }
 0x15d   : > { %1937 = vst.msk [vmem:[%s3172_s6 + $0x24] sm:$0xf] %vm1927_vm5, %v2250_v27  ;;  %v1747_v26 = vmul.f32 0.2, %v1715_v51  ;;  %v1716_v47 = vadd.f32 %v2492_v37, %v3158_v12 }
 0x15e   : > { %v1781_v31 = vmax.f32 %v1717_v34, %v1749_v55  ;;  %v1750_v36 = vmul.f32 0.2, %v1718_v14 }
 0x15f   : > { %v1779_v0 = vmax.f32 %v1715_v51, %v1747_v26  ;;  %v1748_v17 = vmul.f32 0.2, %v1716_v47  ;;  %v2395_v59 = vpop.f32.mrb[16].mxu1 }
 0x160   : > { %v3240_v20 = vpop.f32.mrb[24].mxu0  ;;  %v2255_v48 = vpack.c.bf16 %v1781_v31, %v1781_v31  ;;  %v1782_v25 = vmax.f32 %v1718_v14, %v1750_v36  ;;  %v2493_v29 = vadd.f32 %v3194_v8, %v2395_v59  ;;  %v1187_v16 = vpop.f32.mrb[17].mxu1 }
 0x161   : > { %v3243_v44 = vpop.f32.mrb[25].mxu0  ;;  %v2253_v15 = vpack.c.bf16 %v1779_v0, %v1779_v0  ;;  %v1780_v7 = vmax.f32 %v1716_v47, %v1748_v17  ;;  %v2494_v40 = vadd.f32 %v3196_v58, %v1187_v16  ;;  %v2396_v4 = vpop.f32.mrb[18].mxu1 }
 0x162   : > { %v3246_v60 = vpop.f32.mrb[26].mxu0  ;;  %1942 = vst.msk [vmem:[%s3172_s6 + $0x38] sm:$0xf] %vm1927_vm5, %v2255_v48  ;;  %v2256_v28 = vpack.c.bf16 %v1782_v25, %v1782_v25  ;;  %v1721_v43 = vadd.f32 %v2493_v29, %v3158_v12  ;;  %v2495_v1 = vadd.f32 %v3198_v13, %v2396_v4  ;;  %v1190_v8 = vpop.f32.mrb[19].mxu1 }
 0x163   : > { %v3252_v52 = vpop.f32.mrb[27].mxu0  ;;  %1940 = vst.msk [vmem:[%s3172_s6 + $0x30] sm:$0xf] %vm1927_vm5, %v2253_v15  ;;  %v2254_v38 = vpack.c.bf16 %v1780_v7, %v1780_v7  ;;  %v1719_v42 = vadd.f32 %v2494_v40, %v3158_v12  ;;  %v2496_v58 = vadd.f32 %v3204_v33, %v1190_v8 }
 0x164   : > { %1943 = vst.msk [vmem:[%s3172_s6 + $0x3c] sm:$0xf] %vm1927_vm5, %v2256_v28  ;;  %v1753_v22 = vmul.f32 0.2, %v1721_v43  ;;  %v1722_v24 = vadd.f32 %v2495_v1, %v3158_v12 }
 0x165   : > { %1941 = vst.msk [vmem:[%s3172_s6 + $0x34] sm:$0xf] %vm1927_vm5, %v2254_v38  ;;  %v1751_v46 = vmul.f32 0.2, %v1719_v42  ;;  %v1720_v13 = vadd.f32 %v2496_v58, %v3158_v12 }
 0x166   : > { %v1785_v57 = vmax.f32 %v1721_v43, %v1753_v22  ;;  %v1754_v63 = vmul.f32 0.2, %v1722_v24 }
 0x167   : > { %v1783_v10 = vmax.f32 %v1719_v42, %v1751_v46  ;;  %v1752_v49 = vmul.f32 0.2, %v1720_v13  ;;  %v2399_v61 = vpop.f32.mrb[20].mxu1 }
 0x168   : > { %v2475_v6 = vpop.f32.mrb[28].mxu0  ;;  %v2259_v5 = vpack.c.bf16 %v1785_v57, %v1785_v57  ;;  %v1786_v33 = vmax.f32 %v1722_v24, %v1754_v63  ;;  %v2497_v56 = vadd.f32 %v3216_v45, %v2399_v61  ;;  %v1203_v18 = vpop.f32.mrb[21].mxu1 }
 0x169   : > { %v1649_v62 = vpop.f32.mrb[29].mxu0  ;;  %v2257_v9 = vpack.c.bf16 %v1783_v10, %v1783_v10  ;;  %v1784_v53 = vmax.f32 %v1720_v13, %v1752_v49  ;;  %v2498_v41 = vadd.f32 %v3219_v19, %v1203_v18  ;;  %v2400_v30 = vpop.f32.mrb[22].mxu1 }
 0x16a   : > { %v2476_v39 = vpop.f32.mrb[30].mxu0  ;;  %1946 = vst.msk [vmem:[%s3172_s6 + $0x48] sm:$0xf] %vm1927_vm5, %v2259_v5  ;;  %v2260_v23 = vpack.c.bf16 %v1786_v33, %v1786_v33  ;;  %v1725_v21 = vadd.f32 %v2497_v56, %v3158_v12  ;;  %v2499_v35 = vadd.f32 %v3222_v2, %v2400_v30  ;;  %v1206_v54 = vpop.f32.mrb[23].mxu1 }
 0x16b   : > { %v1652_v3 = vpop.f32.mrb[31].mxu0  ;;  %1944 = vst.msk [vmem:[%s3172_s6 + $0x40] sm:$0xf] %vm1927_vm5, %v2257_v9  ;;  %v2258_v45 = vpack.c.bf16 %v1784_v53, %v1784_v53  ;;  %v1723_v34 = vadd.f32 %v2498_v41, %v3158_v12  ;;  %v2500_v50 = vadd.f32 %v3228_v32, %v1206_v54 }
 0x16c   : > { %1947 = vst.msk [vmem:[%s3172_s6 + $0x4c] sm:$0xf] %vm1927_vm5, %v2260_v23  ;;  %v1757_v19 = vmul.f32 0.2, %v1725_v21  ;;  %v1726_v11 = vadd.f32 %v2499_v35, %v3158_v12 }
 0x16d   : > { %1945 = vst.msk [vmem:[%s3172_s6 + $0x44] sm:$0xf] %vm1927_vm5, %v2258_v45  ;;  %v1755_v27 = vmul.f32 0.2, %v1723_v34  ;;  %v1724_v2 = vadd.f32 %v2500_v50, %v3158_v12 }
 0x16e   : > { %v1789_v51 = vmax.f32 %v1725_v21, %v1757_v19  ;;  %v1758_v37 = vmul.f32 0.2, %v1726_v11 }
 0x16f   : > { %v1787_v55 = vmax.f32 %v1723_v34, %v1755_v27  ;;  %v1756_v14 = vmul.f32 0.2, %v1724_v2  ;;  %v2403_v26 = vpop.f32.mrb[24].mxu1 }
 0x170   : > { %v2263_v47 = vpack.c.bf16 %v1789_v51, %v1789_v51  ;;  %v1790_v31 = vmax.f32 %v1726_v11, %v1758_v37  ;;  %v2501_v32 = vadd.f32 %v3240_v20, %v2403_v26  ;;  %v1219_v36 = vpop.f32.mrb[25].mxu1 }
 0x171   : > { %v2261_v0 = vpack.c.bf16 %v1787_v55, %v1787_v55  ;;  %v1788_v17 = vmax.f32 %v1724_v2, %v1756_v14  ;;  %v2502_v59 = vadd.f32 %v3243_v44, %v1219_v36  ;;  %v2404_v48 = vpop.f32.mrb[26].mxu1 }
 0x172   : > { %1950 = vst.msk [vmem:[%s3172_s6 + $0x58] sm:$0xf] %vm1927_vm5, %v2263_v47  ;;  %v2264_v25 = vpack.c.bf16 %v1790_v31, %v1790_v31  ;;  %v1729_v29 = vadd.f32 %v2501_v32, %v3158_v12  ;;  %v2503_v16 = vadd.f32 %v3246_v60, %v2404_v48  ;;  %v1222_v15 = vpop.f32.mrb[27].mxu1 }
 0x173   : > { %1948 = vst.msk [vmem:[%s3172_s6 + $0x50] sm:$0xf] %vm1927_vm5, %v2261_v0  ;;  %v2262_v7 = vpack.c.bf16 %v1788_v17, %v1788_v17  ;;  %v1727_v20 = vadd.f32 %v2502_v59, %v3158_v12  ;;  %v2504_v40 = vadd.f32 %v3252_v52, %v1222_v15 }
 0x174   : > { %1951 = vst.msk [vmem:[%s3172_s6 + $0x5c] sm:$0xf] %vm1927_vm5, %v2264_v25  ;;  %v1761_v4 = vmul.f32 0.2, %v1729_v29  ;;  %v1730_v44 = vadd.f32 %v2503_v16, %v3158_v12 }
 0x175   : > { %1949 = vst.msk [vmem:[%s3172_s6 + $0x54] sm:$0xf] %vm1927_vm5, %v2262_v7  ;;  %v1759_v28 = vmul.f32 0.2, %v1727_v20  ;;  %v1728_v43 = vadd.f32 %v2504_v40, %v3158_v12 }
 0x176   : > { %v1793_v60 = vmax.f32 %v1729_v29, %v1761_v4  ;;  %v1762_v1 = vmul.f32 0.2, %v1730_v44 }
 0x177   : > { %v1791_v8 = vmax.f32 %v1727_v20, %v1759_v28  ;;  %v1760_v38 = vmul.f32 0.2, %v1728_v43  ;;  %v2407_v42 = vpop.f32.mrb[28].mxu1 }
 0x178   : > { %v2267_v58 = vpack.c.bf16 %v1793_v60, %v1793_v60  ;;  %v1794_v22 = vmax.f32 %v1730_v44, %v1762_v1  ;;  %v2505_v52 = vadd.f32 %v2475_v6, %v2407_v42  ;;  %v1235_v24 = vpop.f32.mrb[29].mxu1 }
 0x179   : > { %v2265_v46 = vpack.c.bf16 %v1791_v8, %v1791_v8  ;;  %v1792_v13 = vmax.f32 %v1728_v43, %v1760_v38  ;;  %v2506_v57 = vadd.f32 %v1649_v62, %v1235_v24  ;;  %v2408_v63 = vpop.f32.mrb[30].mxu1 }
 0x17a   : > { %1954 = vst.msk [vmem:[%s3172_s6 + $0x68] sm:$0xf] %vm1927_vm5, %v2267_v58  ;;  %v2268_v10 = vpack.c.bf16 %v1794_v22, %v1794_v22  ;;  %v1733_v49 = vadd.f32 %v2505_v52, %v3158_v12  ;;  %v2507_v61 = vadd.f32 %v2476_v39, %v2408_v63  ;;  %v1238_v5 = vpop.f32.mrb[31].mxu1 }
 0x17b   : > { %1952 = vst.msk [vmem:[%s3172_s6 + $0x60] sm:$0xf] %vm1927_vm5, %v2265_v46  ;;  %v2266_v33 = vpack.c.bf16 %v1792_v13, %v1792_v13  ;;  %v1731_v56 = vadd.f32 %v2506_v57, %v3158_v12  ;;  %v2508_v6 = vadd.f32 %v1652_v3, %v1238_v5 }
 0x17c   : > { %1955 = vst.msk [vmem:[%s3172_s6 + $0x6c] sm:$0xf] %vm1927_vm5, %v2268_v10  ;;  %v1765_v18 = vmul.f32 0.2, %v1733_v49  ;;  %v1734_v62 = vadd.f32 %v2507_v61, %v3158_v12 }
 0x17d   : > { %1953 = vst.msk [vmem:[%s3172_s6 + $0x64] sm:$0xf] %vm1927_vm5, %v2266_v33  ;;  %v1763_v9 = vmul.f32 0.2, %v1731_v56  ;;  %v1732_v53 = vadd.f32 %v2508_v6, %v3158_v12 }
 0x17e   : > { %v1797_v41 = vmax.f32 %v1733_v49, %v1765_v18  ;;  %v1766_v30 = vmul.f32 0.2, %v1734_v62 }
 0x17f   : > { %v1795_v39 = vmax.f32 %v1731_v56, %v1763_v9  ;;  %v1764_v23 = vmul.f32 0.2, %v1732_v53 }
 0x180   : > { %v2271_v21 = vpack.c.bf16 %v1797_v41, %v1797_v41  ;;  %v1798_v35 = vmax.f32 %v1734_v62, %v1766_v30 }
 0x181   : > { %v2269_v54 = vpack.c.bf16 %v1795_v39, %v1795_v39  ;;  %v1796_v3 = vmax.f32 %v1732_v53, %v1764_v23 }
 0x182   : > { %1958 = vst.msk [vmem:[%s3172_s6 + $0x78] sm:$0xf] %vm1927_vm5, %v2271_v21  ;;  %v2272_v45 = vpack.c.bf16 %v1798_v35, %v1798_v35 }
 0x183   : > { %1956 = vst.msk [vmem:[%s3172_s6 + $0x70] sm:$0xf] %vm1927_vm5, %v2269_v54  ;;  %v2270_v34 = vpack.c.bf16 %v1796_v3, %v1796_v3 }
 0x184   : > { %1959 = vst.msk [vmem:[%s3172_s6 + $0x7c] sm:$0xf] %vm1927_vm5, %v2272_v45 }
 0x185   : > { %1957 = vst.msk [vmem:[%s3172_s6 + $0x74] sm:$0xf] %vm1927_vm5, %v2270_v34 }
 0x186 PF: > { %s13_s14 = sadd.s32 1, %s2645_s14   ;;  %s3331_s12 = smov %s2641_s13 }
 0x187   : > { %p10_p5 = scmp.ge.s32.totalorder %s13_s14, 4   ;;  %s3332_s13 = smov %s3334_s15 }
 0x189   :  { %12 = sbr.rel (!%p10_p5) target bundleno = 2 (0x2), region = 71 }

// kernel: _lambda_.13
= control target key start
LH: loop header
LB: loop body
LE: loop exit
PB: predicated region body
PF: predicated region fallthrough
CT: control target
= control target key end

     0   :  { %s345_s6 = smov 0   ;;  %s347_s7 = smov 0   ;;  %s402_s0 = inlined_call_operand.vmem [shape: bf16[2,8,8,32], index: 0, kind: input, shape index: {}]   ;;  %s403_s1 = inlined_call_operand.vmem [shape: f32[2,32], index: 1, kind: output, shape index: {}]  }
   0x1   :  { %s349_s8 = smov 0  }
   0x2 LB: > { %s23_s9 = sadd.s32 1, %s328_s7  ;;  %p258_p0 = scmp.ge.s32.totalorder %s332_s8, 1  ;;  %s332_s8 = sphi %s349_s8, %s11_s8   ;;  %s328_s7 = sphi %s347_s7, %s405_s7   ;;  %s324_s6 = sphi %s345_s6, %s404_s6  }
   0x3   : > { %p25_p1 = scmp.ge.s32.totalorder %s23_s9, 2  ;;  %p101_p2 = scmp.lt.s32.totalorder %s332_s8, 3 }
   0x5   : > { %s407_s9 = smov (%p25_p1, %s23_s9), 0  ;;  %p102_p3 = pnand %p258_p0, %p101_p2 }
   0x6   : > { %p121_p4 = scmp.lt.s32.totalorder (!%p102_p3), %s324_s6, 1  ;;  %p130_p5 = scmp.eq.s32.totalorder (!%p102_p3), %s324_s6, 0 }
   0x7   : > { %105 = sbr.rel (%p102_p3) target bundleno = 59 (0x3b), region = 24 }
   0xe   : > { %s409_s6 = smov (!%p121_p4, %s324_s6), 1  ;;  %135 = sbr.rel (!%p130_p5) target bundleno = 21 (0x15), region = 28 }
   0xf   : > { %s264_s10 = sshll.u32 %s409_s6, 5  ;;  %vm136_vm0 = vcmask (%p130_p5), 254976   ;;  %v334_v0 = vmov (%p130_p5), 0.0  }
  0x10   : > { %s128_s13 = scalar_lea.vmem %s402_s0, %s264_s10  ;;  %137 = vst.msk [vmem:[%s403_s1] sm:$0x3] (%p130_p5), %vm136_vm0, %v334_v0 }
  0x15 PF: > { %v267_v1 = vld [vmem:[%s128_s13] sm:$0xff]   ;;  %v282_v2 = vld [vmem:[%s128_s13 + $0x8] sm:$0xff]   ;;  %v283_v3 = vld [vmem:[%s128_s13 + $0x10] sm:$0xff]   ;;  %vm154_vm1 = vcmask 261120   ;;  %vm208_vm2 = vcmask 1040384   ;;  %vm211_vm3 = vcmask 254976  }
  0x16   : > { %v268_v4 = vunpack.c.l.bf16 %v267_v1  ;;  %v269_v5 = vunpack.c.h.bf16 %v267_v1  ;;  %v272_v6 = vunpack.c.l.bf16 %v282_v2  ;;  %v273_v7 = vunpack.c.h.bf16 %v282_v2  ;;  %v284_v9 = vld [vmem:[%s128_s13 + $0x18] sm:$0xff]  }
  0x17   : > { %v276_v8 = vunpack.c.l.bf16 %v283_v3  ;;  %v277_v13 = vunpack.c.h.bf16 %v283_v3  ;;  %v280_v19 = vunpack.c.l.bf16 %v284_v9  ;;  %v281_v29 = vunpack.c.h.bf16 %v284_v9  ;;  %v193_v0 = vld [vmem:[%s403_s1] sm:$0x3] }
  0x18   : > { %v155_v10 = vsel %vm154_vm1, %v268_v4, 0.0  ;;  %v156_v11 = vsel %vm154_vm1, %v269_v5, 0.0  ;;  %v158_v12 = vsel %vm154_vm1, %v272_v6, 0.0  ;;  %v160_v15 = vsel %vm154_vm1, %v273_v7, 0.0 }
  0x19   : > { %v157_v14 = vadd.f32 %v156_v11, %v155_v10  ;;  %v170_v16 = vmul.f32 %v268_v4, %v268_v4  ;;  %v171_v17 = vmul.f32 %v269_v5, %v269_v5  ;;  %v172_v18 = vmul.f32 %v272_v6, %v272_v6 }
  0x1a   : > { %v173_v21 = vmul.f32 %v273_v7, %v273_v7  ;;  %v162_v22 = vsel %vm154_vm1, %v276_v8, 0.0  ;;  %v174_v23 = vmul.f32 %v276_v8, %v276_v8  ;;  %v164_v30 = vsel %vm154_vm1, %v277_v13, 0.0 }
  0x1b   : > { %v159_v20 = vadd.f32 %v158_v12, %v157_v14  ;;  %v178_v24 = vsel %vm154_vm1, %v170_v16, 0.0  ;;  %v179_v25 = vsel %vm154_vm1, %v171_v17, 0.0  ;;  %v181_v28 = vsel %vm154_vm1, %v172_v18, 0.0 }
  0x1c   : > { %v180_v27 = vadd.f32 %v179_v25, %v178_v24  ;;  %v175_v31 = vmul.f32 %v277_v13, %v277_v13  ;;  %v183_v32 = vsel %vm154_vm1, %v173_v21, 0.0  ;;  %v166_v35 = vsel %vm154_vm1, %v280_v19, 0.0 }
  0x1d   : > { %v161_v26 = vadd.f32 %v160_v15, %v159_v20  ;;  %v176_v36 = vmul.f32 %v280_v19, %v280_v19  ;;  %v185_v37 = vsel %vm154_vm1, %v174_v23, 0.0  ;;  %v168_v40 = vsel %vm154_vm1, %v281_v29, 0.0 }
  0x1e   : > { %v182_v34 = vadd.f32 %v181_v28, %v180_v27  ;;  %v177_v41 = vmul.f32 %v281_v29, %v281_v29  ;;  %v187_v42 = vsel %vm154_vm1, %v175_v31, 0.0 }
  0x1f   : > { %v163_v33 = vadd.f32 %v162_v22, %v161_v26  ;;  %v189_v45 = vsel %vm154_vm1, %v176_v36, 0.0 }
  0x20   : > { %v184_v39 = vadd.f32 %v183_v32, %v182_v34  ;;  %v191_v48 = vsel %vm154_vm1, %v177_v41, 0.0 }
  0x21   : > { %v165_v38 = vadd.f32 %v164_v30, %v163_v33 }
  0x22   : > { %v186_v44 = vadd.f32 %v185_v37, %v184_v39 }
  0x23   : > { %v167_v43 = vadd.f32 %v166_v35, %v165_v38 }
  0x24   : > { %v188_v47 = vadd.f32 %v187_v42, %v186_v44 }
  0x25   : > { %v169_v46 = vadd.f32 %v168_v40, %v167_v43 }
  0x26   : > { %v190_v49 = vadd.f32 %v189_v45, %v188_v47 }
  0x27   : > { %v194_v50 = vsel %vm154_vm1, %v169_v46, 0.0 }
  0x28   : > { %v195_v51 = vrot.slane %v194_v50, 4  ;;  %v192_v52 = vadd.f32 %v191_v48, %v190_v49 }
  0x2a   : > { %v196_v53 = vadd.f32 %v195_v51, %v194_v50  ;;  %v201_v54 = vsel %vm154_vm1, %v192_v52, 0.0 }
  0x2b   : > { %v202_v56 = vrot.slane %v201_v54, 4 }
  0x2c   : > { %v197_v55 = vrot.slane %v196_v53, 2 }
  0x2d   : > { %v203_v58 = vadd.f32 %v202_v56, %v201_v54 }
  0x2e   : > { %v198_v57 = vadd.f32 %v197_v55, %v196_v53 }
  0x2f   : > { %v204_v60 = vrot.slane %v203_v58, 2 }
  0x30   : > { %v199_v59 = vrot.slane %v198_v57, 1 }
  0x31   : > { %v205_v61 = vadd.f32 %v204_v60, %v203_v58 }
  0x32   : > { %v200_v62 = vadd.f32 %v199_v59, %v198_v57 }
  0x33   : > { %v206_v63 = vrot.slane %v205_v61, 1 }
  0x35   : > { %v207_v1 = vadd.f32 %v206_v63, %v205_v61 }
  0x37   : > { %v209_v2 = vsel %vm208_vm2, %v200_v62, %v207_v1 }
  0x38   : > { %v210_v3 = vadd.f32 %v209_v2, %v193_v0 }
  0x3a   : > { %212 = vst.msk [vmem:[%s403_s1] sm:$0x3] %vm211_vm3, %v210_v3 }
  0x3b PF: > { %s11_s8 = sadd.s32 1, %s332_s8   ;;  %s404_s6 = smov %s328_s7 }
  0x3c   : > { %p8_p6 = scmp.ge.s32.totalorder %s11_s8, 4   ;;  %s405_s7 = smov %s407_s9 }
  0x3e   :  { %10 = sbr.rel (!%p8_p6) target bundleno = 2 (0x2), region = 54 }

// kernel: mul.1
= control target key start
LH: loop header
LB: loop body
LE: loop exit
PB: predicated region body
PF: predicated region fallthrough
CT: control target
= control target key end

     0   :  { %s34_s0 = inlined_call_operand.vmem [shape: f32[1,32], index: 0, kind: input, shape index: {}]   ;;  %s35_s1 = inlined_call_operand.vmem [shape: f32[1,32], index: 1, kind: input, shape index: {}]   ;;  %s36_s2 = inlined_call_operand.vmem [shape: f32[1,32], index: 2, kind: output, shape index: {}]  }
   0x1   :  { %v3_v0 = vld [vmem:[%s34_s0] sm:$0x1] }
   0x2   :  { %v4_v1 = vld [vmem:[%s35_s1] sm:$0x1] }
   0x3   :  { %v7_v2 = vmul.f32 %v4_v1, %v3_v0 }
   0x5   :  { %9 = vst [vmem:[%s36_s2] sm:$0x1] %v7_v2 }

// kernel: _lambda_.12
= control target key start
LH: loop header
LB: loop body
LE: loop exit
PB: predicated region body
PF: predicated region fallthrough
CT: control target
= control target key end

     0   :  { %s1339_s12 = smov 0   ;;  %s1341_s13 = smov 0   ;;  %s1564_s0 = inlined_call_operand.vmem [shape: bf16[2,9,9,64], index: 0, kind: input, shape index: {}]   ;;  %s1565_s1 = inlined_call_operand.vmem [shape: bf16[2,2,64,32], index: 1, kind: input, shape index: {}]   ;;  %s1566_s2 = inlined_call_operand.vmem [shape: f32[1,32], index: 2, kind: input, shape index: {}]   ;;  %s1567_s3 = inlined_call_operand.vmem [shape: bf16[2,8,8,32], index: 3, kind: output, shape index: {}]  }
   0x1   :  { %s1343_s14 = smov 0  }
   0x2 LB: > { %s28_s15 = sadd.s32 1, %s1313_s13  ;;  %p1046_p0 = scmp.ge.s32.totalorder %s1317_s14, 1  ;;  %s1317_s14 = sphi %s1343_s14, %s13_s14   ;;  %s1313_s13 = sphi %s1341_s13, %s1571_s13   ;;  %s1309_s12 = sphi %s1339_s12, %s1570_s12  }
   0x3   : > { %p30_p1 = scmp.ge.s32.totalorder %s28_s15, 2  ;;  %p177_p2 = scmp.lt.s32.totalorder %s1317_s14, 3 }
   0x5   : > { %s1573_s15 = smov (%p30_p1, %s28_s15), 0  ;;  %p178_p3 = pnand %p1046_p0, %p177_p2 }
   0x6   : > { %v1271_v0 = vld [vmem:[%s1565_s1 + $0x20] sm:$0xff] (!%p178_p3)   ;;  %p215_p4 = scmp.lt.s32.totalorder (!%p178_p3), %s1309_s12, 1  ;;  %v1273_v2 = vld [vmem:[%s1565_s1 + $0x28] sm:$0xff] (!%p178_p3)   ;;  %v1275_v4 = vld [vmem:[%s1565_s1 + $0x30] sm:$0xff] (!%p178_p3)   ;;  %vm427_vm0 = vcmask (!%p178_p3), 523264   ;;  %vm910_vm4 = vcmask (!%p178_p3), 257024  }
   0x7   : > { %181 = sbr.rel (%p178_p3) target bundleno = 285 (0x11d), region = 32  ;;  %v1272_v1 = vld [vmem:[%s1565_s1 + $0x40] sm:$0xff] (!%p178_p3)   ;;  %1158 = vmatprep.subr.bf16.mxu1 (!%p178_p3), %v1271_v0  ;;  %v1274_v3 = vld [vmem:[%s1565_s1 + $0x48] sm:$0xff] (!%p178_p3)   ;;  %v1276_v5 = vld [vmem:[%s1565_s1 + $0x50] sm:$0xff] (!%p178_p3)   ;;  %vm267_vm1 = vsmask.f32 (!%p178_p3), 3328 }
   0x8   : > { %1190 = vmatprep.subr.bf16.mxu0 (!%p178_p3), %v1272_v1  ;;  %1159 = vmatpush3.bf16.msra.mxu1 (!%p178_p3), %v1271_v0  ;;  %v1277_v6 = vld [vmem:[%s1565_s1 + $0x38] sm:$0xff] (!%p178_p3)   ;;  %vm268_vm2 = vsmask.f32 (!%p178_p3), 7440  ;;  %v1423_v34 = vld [vmem:[%s1565_s1] sm:$0xff] (!%p178_p3)   ;;  %v1285_v52 = vld [vmem:[%s1565_s1 + $0x68] sm:$0xff] (!%p178_p3)  }
   0x9   : > { %1191 = vmatpush3.bf16.msra.mxu0 (!%p178_p3), %v1272_v1  ;;  %1160 = vmatprep.subr.bf16.mxu1 (!%p178_p3), %v1273_v2  ;;  %v1278_v7 = vld [vmem:[%s1565_s1 + $0x58] sm:$0xff] (!%p178_p3)   ;;  %v1283_v43 = vld [vmem:[%s1565_s1 + $0x60] sm:$0xff] (!%p178_p3)   ;;  %vm1432_vm3 = vmor (!%p178_p3), %vm267_vm1, %vm268_vm2 }
   0xa   : > { %1192 = vmatprep.subr.bf16.mxu0 (!%p178_p3), %v1274_v3 }
   0xc   : > { %1161 = vmatpush3.bf16.msra.mxu1 (!%p178_p3), %v1273_v2 }
   0xd   : > { %1193 = vmatpush3.bf16.msra.mxu0 (!%p178_p3), %v1274_v3  ;;  %1162 = vmatprep.subr.bf16.mxu1 (!%p178_p3), %v1275_v4 }
   0xe   : > { %s1575_s12 = smov (!%p215_p4, %s1309_s12), 1  ;;  %1194 = vmatprep.subr.bf16.mxu0 %v1276_v5 }
   0xf   : > { %s1246_s26 = smul.u32 72, %s1575_s12 }
  0x10   : > { %1163 = vmatpush3.bf16.msra.mxu1 %v1275_v4 }
  0x11   : > { %s1381_s4 = scalar_lea.vmem %s1564_s0, %s1246_s26  ;;  %1195 = vmatpush3.bf16.msra.mxu0 %v1276_v5  ;;  %1164 = vmatprep.subr.bf16.mxu1 %v1277_v6 }
  0x12   : > { %v1390_v8 = vld [vmem:[%s1381_s4 + $0x8] sm:$0xf]  ;;  %v1393_v9 = vld [vmem:[%s1381_s4 + $0x10] sm:$0xf]  ;;  %v1396_v10 = vld [vmem:[%s1381_s4 + $0x18] sm:$0xf]  ;;  %1196 = vmatprep.subr.bf16.mxu0 %v1278_v7 }
  0x13   : > { %v285_v11 = vshrl.u32 %v1390_v8, 16  ;;  %v288_v12 = vshll.u32 %v1390_v8, 16  ;;  %v299_v13 = vshrl.u32 %v1393_v9, 16  ;;  %v302_v14 = vshll.u32 %v1393_v9, 16  ;;  %v1405_v16 = vld [vmem:[%s1381_s4] sm:$0xf] }
  0x14   : > { %v1090_v15 = vcombine.low %v1390_v8, %v1393_v9  ;;  %v242_v17 = vld [vmem:[%s1381_s4 + $0x4] sm:$0x1]  ;;  %v244_v18 = vld [vmem:[%s1381_s4 + $0xc] sm:$0x1]  ;;  %v246_v21 = vld [vmem:[%s1381_s4 + $0x14] sm:$0x1]  ;;  %1165 = vmatpush3.bf16.msra.mxu1 %v1277_v6 }
  0x15   : > { %v301_v19 = vrot.slane %v299_v13, 4  ;;  %v304_v20 = vrot.slane %v302_v14, 5  ;;  %v1411_v22 = vld [vmem:[%s1381_s4 + $0x20] sm:$0xf]  ;;  %v248_v23 = vld [vmem:[%s1381_s4 + $0x1c] sm:$0x1]  ;;  %1197 = vmatpush3.bf16.msra.mxu0 %v1278_v7  ;;  %1174 = vmatprep.subr.bf16.mxu1 %v1423_v34 }
  0x16   : > { %v1091_v24 = vcombine.low %v1396_v10, %v1411_v22  ;;  %1198 = vmatprep.mubr.msk.bf16.mxu0 %vm427_vm0, %v1090_v15  ;;  %v271_v25 = vshrl.u32 %v1405_v16, 16  ;;  %v274_v26 = vshll.u32 %v1405_v16, 16  ;;  %v280_v27 = vshll.u32 %v242_v17, 16  ;;  %v250_v29 = vld [vmem:[%s1381_s4 + $0x24] sm:$0x1]  ;;  %1206 = vmatprep.subr.bf16.mxu0 %v1283_v43  ;;  %v1289_v15 = vld [vmem:[%s1565_s1 + $0x70] sm:$0xff]  }
  0x17   : > { %v287_v28 = vrot.slane %v285_v11, 4  ;;  %v290_v30 = vrot.slane %v288_v12, 5  ;;  %v294_v31 = vshll.u32 %v244_v18, 16  ;;  %v305_v32 = vor.u32 %v304_v20, %v301_v19  ;;  %v1452_v60 = vld [vmem:[%s1381_s4 + $0x28] sm:$0xf] }
  0x18   : > { %v308_v33 = vshll.u32 %v246_v21, 16  ;;  %v273_v35 = vrot.slane %v271_v25, 4  ;;  %v276_v36 = vrot.slane %v274_v26, 5  ;;  %v282_v37 = vrot.slane %v280_v27, 5  ;;  %1199 = vmatmul.mubr.msk.bf16.vlgmr.msra.gmra.mrb[0].mxu0 %vm427_vm0, %v1091_v24  ;;  %v1457_v1 = vld [vmem:[%s1381_s4 + $0x30] sm:$0xf] }
  0x19   : > { %v313_v38 = vshrl.u32 %v1396_v10, 16  ;;  %v291_v39 = vor.u32 %v290_v30, %v287_v28  ;;  %v296_v40 = vrot.slane %v294_v31, 5  ;;  %v306_v41 = vrot.slane %v305_v32, 4  ;;  %1207 = vmatpush3.bf16.msra.mxu0 %v1283_v43  ;;  %v252_v2 = vld [vmem:[%s1381_s4 + $0x2c] sm:$0x1] }
  0x1a   : > { %v310_v42 = vrot.slane %v308_v33, 5  ;;  %v277_v45 = vor.u32 %v276_v36, %v273_v35  ;;  %v316_v47 = vshll.u32 %v1396_v10, 16  ;;  %v322_v48 = vshll.u32 %v248_v23, 16  ;;  %1208 = vmatprep.subr.bf16.mxu0 %v1285_v52  ;;  %v1468_v14 = vld [vmem:[%s1381_s4 + $0x38] sm:$0xf] }
  0x1b   : > { %v315_v46 = vrot.slane %v313_v38, 4  ;;  %v292_v49 = vrot.slane %v291_v39, 4  ;;  %v327_v50 = vshrl.u32 %v1411_v22, 16  ;;  %v330_v51 = vshll.u32 %v1411_v22, 16  ;;  %v257_v21 = vld [vmem:[%s1381_s4 + $0x40] sm:$0xf] }
  0x1c   : > { %v278_v53 = vrot.slane %v277_v45, 4  ;;  %v318_v54 = vrot.slane %v316_v47, 5  ;;  %v336_v55 = vshll.u32 %v250_v29, 16  ;;  %v1449_v57 = vsel %vm1432_vm3, %v306_v41, %v310_v42  ;;  %v1284_v29 = vld [vmem:[%s1565_s1 + $0x8] sm:$0xff]   ;;  %v254_v32 = vld [vmem:[%s1381_s4 + $0x34] sm:$0x1] }
  0x1d   : > { %v1445_v56 = vsel %vm1432_vm3, %v292_v49, %v296_v40  ;;  %v329_v58 = vrot.slane %v327_v50, 4  ;;  %v332_v59 = vrot.slane %v330_v51, 5  ;;  %v324_v63 = vrot.slane %v322_v48, 5  ;;  %1209 = vmatpush3.bf16.msra.mxu0 %v1285_v52  ;;  %v256_v33 = vld [vmem:[%s1381_s4 + $0x3c] sm:$0x1]  ;;  %v1287_v51 = vld [vmem:[%s1565_s1 + $0x10] sm:$0xff]  }
  0x1e   : > { %v283_v61 = vsel %vm1432_vm3, %v278_v53, %v282_v37  ;;  %v319_v62 = vor.u32 %v318_v54, %v315_v46  ;;  %v338_v0 = vrot.slane %v336_v55, 5  ;;  %v341_v5 = vshrl.u32 %v1452_v60, 16  ;;  %1210 = vmatprep.subr.bf16.mxu0 %v1289_v15  ;;  %v1291_v39 = vld [vmem:[%s1565_s1 + $0x78] sm:$0xff]   ;;  %v258_v54 = vld [vmem:[%s1381_s4 + $0x44] sm:$0x1]  ;;  %s1125_s4 = sshll.u32 %s1575_s12, 5 }
  0x1f   : > { %v333_v3 = vor.u32 %v332_v59, %v329_v58  ;;  %v1058_v4 = vcombine.low %v283_v61, %v1445_v56  ;;  %v344_v6 = vshll.u32 %v1452_v60, 16  ;;  %v355_v11 = vshrl.u32 %v1457_v1, 16  ;;  %s1537_s7 = scalar_lea.vmem %s1567_s3, %s1125_s4 }
  0x20   : > { %v320_v7 = vrot.slane %v319_v62, 4  ;;  %v358_v12 = vshll.u32 %v1457_v1, 16  ;;  %v1092_v13 = vcombine.low %v1452_v60, %v1457_v1  ;;  %v343_v18 = vrot.slane %v341_v5, 4 }
  0x21   : > { %v334_v17 = vrot.slane %v333_v3, 4  ;;  %1166 = vmatprep.mubr.msk.bf16.mxu1 %vm427_vm0, %v1058_v4  ;;  %v346_v19 = vrot.slane %v344_v6, 5  ;;  %v350_v20 = vshll.u32 %v252_v2, 16  ;;  %v369_v24 = vshrl.u32 %v1468_v14, 16  ;;  %1211 = vmatpush3.bf16.msra.mxu0 %v1289_v15 }
  0x22   : > { %v325_v23 = vsel %vm1432_vm3, %v320_v7, %v324_v63  ;;  %1202 = vmatprep.mubr.msk.bf16.mxu0 %vm427_vm0, %v1092_v13  ;;  %v372_v25 = vshll.u32 %v1468_v14, 16  ;;  %v1093_v26 = vcombine.low %v1468_v14, %v257_v21  ;;  %v1110_v28 = vcombine.low %v1445_v56, %v1449_v57  ;;  %1212 = vmatprep.subr.bf16.mxu0 %v1291_v39 }
  0x23   : > { %v1059_v27 = vcombine.low %v1449_v57, %v325_v23  ;;  %v347_v30 = vor.u32 %v346_v19, %v343_v18  ;;  %v352_v31 = vrot.slane %v350_v20, 5  ;;  %v339_v35 = vsel %vm1432_vm3, %v334_v17, %v338_v0  ;;  %v1290_v0 = vld [vmem:[%s1565_s1 + $0x18] sm:$0xff]  }
  0x24   : > { %1203 = vmatmul.mubr.msk.bf16.gmra.mrb[4].mxu0 %vm427_vm0, %v1093_v26  ;;  %v751_v36 = vshrl.u32 %v257_v21, 16  ;;  %v754_v37 = vshll.u32 %v257_v21, 16  ;;  %v357_v38 = vrot.slane %v355_v11, 4  ;;  %v360_v41 = vrot.slane %v358_v12, 5 }
  0x25   : > { %1167 = vmatmul.mubr.msk.bf16.vlgmr.msra.gmra.mrb[0].mxu1 %vm427_vm0, %v1059_v27  ;;  %v348_v40 = vrot.slane %v347_v30, 4  ;;  %v364_v42 = vshll.u32 %v254_v32, 16  ;;  %v371_v43 = vrot.slane %v369_v24, 4  ;;  %v374_v47 = vrot.slane %v372_v25, 5  ;;  %1214 = vmatprep.mubr.msk.bf16.mxu0 %vm427_vm0, %v1110_v28 }
  0x26   : > { %1175 = vmatpush3.bf16.msra.mxu1 %v1423_v34  ;;  %v753_v45 = vrot.slane %v751_v36, 4  ;;  %v756_v46 = vrot.slane %v754_v37, 5  ;;  %v378_v48 = vshll.u32 %v256_v33, 16  ;;  %v1111_v49 = vcombine.low %v325_v23, %v339_v35  ;;  %1213 = vmatpush3.bf16.msra.mxu0 %v1291_v39 }
  0x27   : > { %1176 = vmatprep.subr.bf16.mxu1 %v1284_v29  ;;  %v353_v50 = vsel %vm1432_vm3, %v348_v40, %v352_v31  ;;  %v361_v52 = vor.u32 %v360_v41, %v357_v38  ;;  %v366_v53 = vrot.slane %v364_v42, 5  ;;  %v375_v55 = vor.u32 %v374_v47, %v371_v43 }
  0x28   : > { %v1060_v34 = vcombine.low %v339_v35, %v353_v50  ;;  %v380_v56 = vrot.slane %v378_v48, 5  ;;  %v757_v57 = vor.u32 %v756_v46, %v753_v45  ;;  %v760_v59 = vshll.u32 %v258_v54, 16 }
  0x29   : > { %v362_v58 = vrot.slane %v361_v52, 4  ;;  %v376_v61 = vrot.slane %v375_v55, 4  ;;  %v1070_v4 = vcombine.low %v1405_v16, %v1390_v8  ;;  %v1071_v8 = vcombine.low %v1393_v9, %v1396_v10 }
  0x2a   : > { %1177 = vmatpush3.bf16.msra.mxu1 %v1284_v29  ;;  %1170 = vmatprep.mubr.msk.bf16.mxu1 %vm427_vm0, %v1060_v34  ;;  %v758_v62 = vrot.slane %v757_v57, 4  ;;  %v762_v2 = vrot.slane %v760_v59, 5  ;;  %v1072_v16 = vcombine.low %v1411_v22, %v1452_v60  ;;  %v1073_v44 = vcombine.low %v1457_v1, %v1468_v14  ;;  %v1122_v60 = vld [vmem:[%s1566_s2] ss:$0 sm:$0xff] }
  0x2b   : > { %1178 = vmatprep.subr.bf16.mxu1 %v1287_v51  ;;  %v367_v63 = vsel %vm1432_vm3, %v362_v58, %v366_v53  ;;  %v381_v3 = vsel %vm1432_vm3, %v376_v61, %v380_v56 }
  0x2c   : > { %1215 = vmatmul.mubr.msk.bf16.vlgmr.msra.gmra.mrb[0].mxu0 %vm427_vm0, %v1111_v49  ;;  %v1112_v5 = vcombine.low %v353_v50, %v367_v63  ;;  %v1061_v6 = vcombine.low %v367_v63, %v381_v3  ;;  %v763_v7 = vsel %vm1432_vm3, %v758_v62, %v762_v2 }
  0x2d   : > { %v1113_v11 = vcombine.low %v381_v3, %v763_v7 }
  0x2e   : > { %1179 = vmatpush3.bf16.msra.mxu1 %v1287_v51  ;;  %1218 = vmatprep.mubr.msk.bf16.mxu0 %vm427_vm0, %v1112_v5 }
  0x2f   : > { %1171 = vmatmul.mubr.msk.bf16.gmra.mrb[4].mxu1 %vm427_vm0, %v1061_v6  ;;  %1180 = vmatprep.subr.bf16.mxu1 %v1290_v0 }
  0x30   : > { %1182 = vmatprep.mubr.msk.bf16.mxu1 %vm427_vm0, %v1070_v4 }
  0x32   : > { %1181 = vmatpush3.bf16.msra.mxu1 %v1290_v0 }
  0x34   : > { %1219 = vmatmul.mubr.msk.bf16.gmra.mrb[4].mxu0 %vm427_vm0, %v1113_v11 }
  0x37   : > { %1183 = vmatmul.mubr.msk.bf16.vlgmr.msra.gmra.mrb[0].mxu1 %vm427_vm0, %v1071_v8 }
  0x38   : > { %1186 = vmatprep.mubr.msk.bf16.mxu1 %vm427_vm0, %v1072_v16 }
  0x3f   : > { %1187 = vmatmul.mubr.msk.bf16.gmra.mrb[4].mxu1 %vm427_vm0, %v1073_v44 }
  0xff   : > { %v1216_v12 = vpop.f32.mrb[0].mxu0 }
 0x100   : > { %v848_v13 = vpop.f32.mrb[1].mxu0 }
 0x101   : > { %v1217_v15 = vpop.f32.mrb[2].mxu0 }
 0x102   : > { %v851_v17 = vpop.f32.mrb[3].mxu0 }
 0x107   : > { %v1220_v9 = vpop.f32.mrb[4].mxu0 }
 0x108   : > { %v864_v10 = vpop.f32.mrb[5].mxu0 }
 0x109   : > { %v1221_v18 = vpop.f32.mrb[6].mxu0 }
 0x10a   : > { %v1184_v22 = vpop.f32.mrb[0].mxu1  ;;  %v867_v19 = vpop.f32.mrb[7].mxu0 }
 0x10b   : > { %v1222_v20 = vadd.f32 %v1216_v12, %v1184_v22  ;;  %v595_v21 = vpop.f32.mrb[1].mxu1 }
 0x10c   : > { %v1223_v23 = vadd.f32 %v848_v13, %v595_v21  ;;  %v1185_v1 = vpop.f32.mrb[2].mxu1 }
 0x10d   : > { %v896_v14 = vadd.f32 %v1222_v20, %v1122_v60  ;;  %v1224_v24 = vadd.f32 %v1217_v15, %v1185_v1  ;;  %v598_v25 = vpop.f32.mrb[3].mxu1 }
 0x10e   : > { %v894_v26 = vadd.f32 %v1223_v23, %v1122_v60  ;;  %v1225_v27 = vadd.f32 %v851_v17, %v598_v25 }
 0x10f   : > { %v904_v28 = vpack.c.bf16 %v896_v14, %v896_v14  ;;  %v897_v29 = vadd.f32 %v1224_v24, %v1122_v60 }
 0x110   : > { %v902_v30 = vpack.c.bf16 %v894_v26, %v894_v26  ;;  %v895_v31 = vadd.f32 %v1225_v27, %v1122_v60 }
 0x111   : > { %913 = vst.msk [vmem:[%s1537_s7 + $0x8] sm:$0xf] %vm910_vm4, %v904_v28  ;;  %v905_v32 = vpack.c.bf16 %v897_v29, %v897_v29 }
 0x112   : > { %911 = vst.msk [vmem:[%s1537_s7] sm:$0xf] %vm910_vm4, %v902_v30  ;;  %v903_v33 = vpack.c.bf16 %v895_v31, %v895_v31  ;;  %v1188_v35 = vpop.f32.mrb[4].mxu1 }
 0x113   : > { %914 = vst.msk [vmem:[%s1537_s7 + $0xc] sm:$0xf] %vm910_vm4, %v905_v32  ;;  %v1226_v36 = vadd.f32 %v1220_v9, %v1188_v35  ;;  %v611_v37 = vpop.f32.mrb[5].mxu1 }
 0x114   : > { %912 = vst.msk [vmem:[%s1537_s7 + $0x4] sm:$0xf] %vm910_vm4, %v903_v33  ;;  %v1227_v38 = vadd.f32 %v864_v10, %v611_v37  ;;  %v1189_v39 = vpop.f32.mrb[6].mxu1 }
 0x115   : > { %v900_v40 = vadd.f32 %v1226_v36, %v1122_v60  ;;  %v1228_v41 = vadd.f32 %v1221_v18, %v1189_v39  ;;  %v614_v42 = vpop.f32.mrb[7].mxu1 }
 0x116   : > { %v898_v43 = vadd.f32 %v1227_v38, %v1122_v60  ;;  %v1229_v45 = vadd.f32 %v867_v19, %v614_v42 }
 0x117   : > { %v908_v46 = vpack.c.bf16 %v900_v40, %v900_v40  ;;  %v901_v47 = vadd.f32 %v1228_v41, %v1122_v60 }
 0x118   : > { %v906_v48 = vpack.c.bf16 %v898_v43, %v898_v43  ;;  %v899_v49 = vadd.f32 %v1229_v45, %v1122_v60 }
 0x119   : > { %917 = vst.msk [vmem:[%s1537_s7 + $0x18] sm:$0xf] %vm910_vm4, %v908_v46  ;;  %v909_v50 = vpack.c.bf16 %v901_v47, %v901_v47 }
 0x11a   : > { %915 = vst.msk [vmem:[%s1537_s7 + $0x10] sm:$0xf] %vm910_vm4, %v906_v48  ;;  %v907_v51 = vpack.c.bf16 %v899_v49, %v899_v49 }
 0x11b   : > { %918 = vst.msk [vmem:[%s1537_s7 + $0x1c] sm:$0xf] %vm910_vm4, %v909_v50 }
 0x11c   : > { %916 = vst.msk [vmem:[%s1537_s7 + $0x14] sm:$0xf] %vm910_vm4, %v907_v51 }
 0x11d PF: > { %s13_s14 = sadd.s32 1, %s1317_s14   ;;  %s1570_s12 = smov %s1313_s13 }
 0x11e   : > { %p10_p5 = scmp.ge.s32.totalorder %s13_s14, 4   ;;  %s1571_s13 = smov %s1573_s15 }
 0x120   :  { %12 = sbr.rel (!%p10_p5) target bundleno = 2 (0x2), region = 71 }

// kernel: _lambda_.14
= control target key start
LH: loop header
LB: loop body
LE: loop exit
PB: predicated region body
PF: predicated region fallthrough
CT: control target
= control target key end

     0   :  { %s478_s12 = smov 0   ;;  %s480_s13 = smov 0   ;;  %s532_s0 = inlined_call_operand.vmem [shape: bf16[2,8,8,32], index: 0, kind: input, shape index: {}]   ;;  %s533_s1 = inlined_call_operand.vmem [shape: f32[1,32], index: 1, kind: input, shape index: {}]   ;;  %s534_s2 = inlined_call_operand.vmem [shape: f32[1,32], index: 2, kind: input, shape index: {}]   ;;  %s535_s3 = inlined_call_operand.vmem [shape: bf16[2,8,8,32], index: 3, kind: output, shape index: {}]  }
   0x1   :  { %s482_s14 = smov 0  }
   0x2 LB: > { %s25_s15 = sadd.s32 1, %s452_s13  ;;  %p380_p0 = scmp.ge.s32.totalorder %s456_s14, 1  ;;  %s456_s14 = sphi %s482_s14, %s13_s14   ;;  %s452_s13 = sphi %s480_s13, %s537_s13   ;;  %s448_s12 = sphi %s478_s12, %s536_s12  }
   0x3   : > { %p27_p1 = scmp.ge.s32.totalorder %s25_s15, 2  ;;  %p158_p2 = scmp.lt.s32.totalorder %s456_s14, 3 }
   0x5   : > { %s539_s15 = smov (%p27_p1, %s25_s15), 0  ;;  %p159_p3 = pnand %p380_p0, %p158_p2 }
   0x6   : > { %p191_p4 = scmp.lt.s32.totalorder (!%p159_p3), %s448_s12, 1  ;;  %v385_v0 = vld [vmem:[%s533_s1] ss:$0 sm:$0xff] (!%p159_p3)  ;;  %vm280_vm0 = vcmask (!%p159_p3), 257024  }
   0x7   : > { %162 = sbr.rel (%p159_p3) target bundleno = 34 (0x22), region = 32  ;;  %v386_v9 = vld [vmem:[%s534_s2] ss:$0 sm:$0xff] (!%p159_p3) }
   0xe   : > { %s541_s12 = smov (!%p191_p4, %s448_s12), 1 }
   0xf   : > { %s389_s16 = sshll.u32 %s541_s12, 5 }
  0x10   : > { %s198_s19 = scalar_lea.vmem %s532_s0, %s389_s16  ;;  %s208_s26 = scalar_lea.vmem %s535_s3, %s389_s16 }
  0x11   : > { %v392_v1 = vld [vmem:[%s198_s19] sm:$0xff]   ;;  %v407_v2 = vld [vmem:[%s198_s19 + $0x8] sm:$0xff]   ;;  %v408_v3 = vld [vmem:[%s198_s19 + $0x10] sm:$0xff]  }
  0x12   : > { %v393_v4 = vunpack.c.l.bf16 %v392_v1  ;;  %v394_v5 = vunpack.c.h.bf16 %v392_v1  ;;  %v397_v6 = vunpack.c.l.bf16 %v407_v2  ;;  %v398_v7 = vunpack.c.h.bf16 %v407_v2  ;;  %v409_v8 = vld [vmem:[%s198_s19 + $0x18] sm:$0xff]  }
  0x13   : > { %v401_v10 = vunpack.c.l.bf16 %v408_v3  ;;  %v402_v11 = vunpack.c.h.bf16 %v408_v3  ;;  %v405_v12 = vunpack.c.l.bf16 %v409_v8  ;;  %v406_v13 = vunpack.c.h.bf16 %v409_v8 }
  0x14   : > { %v233_v14 = vmul.f32 %v393_v4, %v385_v0  ;;  %v234_v15 = vmul.f32 %v394_v5, %v385_v0  ;;  %v235_v16 = vmul.f32 %v397_v6, %v385_v0  ;;  %v236_v17 = vmul.f32 %v398_v7, %v385_v0 }
  0x15   : > { %v237_v18 = vmul.f32 %v401_v10, %v385_v0  ;;  %v238_v19 = vmul.f32 %v402_v11, %v385_v0  ;;  %v239_v20 = vmul.f32 %v405_v12, %v385_v0  ;;  %v240_v21 = vmul.f32 %v406_v13, %v385_v0 }
  0x16   : > { %v248_v22 = vadd.f32 %v386_v9, %v233_v14  ;;  %v249_v23 = vadd.f32 %v386_v9, %v234_v15  ;;  %v250_v24 = vadd.f32 %v386_v9, %v235_v16  ;;  %v251_v25 = vadd.f32 %v386_v9, %v236_v17 }
  0x17   : > { %v252_v26 = vadd.f32 %v386_v9, %v237_v18  ;;  %v253_v27 = vadd.f32 %v386_v9, %v238_v19  ;;  %v254_v28 = vadd.f32 %v386_v9, %v239_v20  ;;  %v255_v29 = vadd.f32 %v386_v9, %v240_v21 }
  0x18   : > { %v256_v30 = vmul.f32 0.2, %v248_v22  ;;  %v257_v31 = vmul.f32 0.2, %v249_v23  ;;  %v258_v32 = vmul.f32 0.2, %v250_v24 }
  0x19   : > { %v259_v33 = vmul.f32 0.2, %v251_v25  ;;  %v260_v34 = vmul.f32 0.2, %v252_v26  ;;  %v261_v35 = vmul.f32 0.2, %v253_v27 }
  0x1a   : > { %v264_v36 = vmax.f32 %v248_v22, %v256_v30  ;;  %v265_v37 = vmax.f32 %v249_v23, %v257_v31  ;;  %v266_v38 = vmax.f32 %v250_v24, %v258_v32  ;;  %v262_v39 = vmul.f32 0.2, %v254_v28 }
  0x1b   : > { %v267_v40 = vmax.f32 %v251_v25, %v259_v33  ;;  %v268_v41 = vmax.f32 %v252_v26, %v260_v34  ;;  %v269_v42 = vmax.f32 %v253_v27, %v261_v35  ;;  %v263_v43 = vmul.f32 0.2, %v255_v29 }
  0x1c   : > { %v272_v44 = vpack.c.bf16 %v264_v36, %v264_v36  ;;  %v273_v45 = vpack.c.bf16 %v265_v37, %v265_v37  ;;  %v274_v46 = vpack.c.bf16 %v266_v38, %v266_v38  ;;  %v270_v47 = vmax.f32 %v254_v28, %v262_v39 }
  0x1d   : > { %v275_v48 = vpack.c.bf16 %v267_v40, %v267_v40  ;;  %v276_v49 = vpack.c.bf16 %v268_v41, %v268_v41  ;;  %v277_v50 = vpack.c.bf16 %v269_v42, %v269_v42  ;;  %v271_v51 = vmax.f32 %v255_v29, %v263_v43 }
  0x1e   : > { %281 = vst.msk [vmem:[%s208_s26] sm:$0xf] %vm280_vm0, %v272_v44  ;;  %282 = vst.msk [vmem:[%s208_s26 + $0x4] sm:$0xf] %vm280_vm0, %v273_v45  ;;  %v278_v52 = vpack.c.bf16 %v270_v47, %v270_v47 }
  0x1f   : > { %283 = vst.msk [vmem:[%s208_s26 + $0x8] sm:$0xf] %vm280_vm0, %v274_v46  ;;  %284 = vst.msk [vmem:[%s208_s26 + $0xc] sm:$0xf] %vm280_vm0, %v275_v48  ;;  %v279_v53 = vpack.c.bf16 %v271_v51, %v271_v51 }
  0x20   : > { %285 = vst.msk [vmem:[%s208_s26 + $0x10] sm:$0xf] %vm280_vm0, %v276_v49  ;;  %286 = vst.msk [vmem:[%s208_s26 + $0x14] sm:$0xf] %vm280_vm0, %v277_v50 }
  0x21   : > { %287 = vst.msk [vmem:[%s208_s26 + $0x18] sm:$0xf] %vm280_vm0, %v278_v52  ;;  %288 = vst.msk [vmem:[%s208_s26 + $0x1c] sm:$0xf] %vm280_vm0, %v279_v53 }
  0x22 PF: > { %s13_s14 = sadd.s32 1, %s456_s14   ;;  %s536_s12 = smov %s452_s13 }
  0x23   : > { %p10_p5 = scmp.ge.s32.totalorder %s13_s14, 4   ;;  %s537_s13 = smov %s539_s15 }
  0x25   :  { %12 = sbr.rel (!%p10_p5) target bundleno = 2 (0x2), region = 62 }

// kernel: _lambda_.16
= control target key start
LH: loop header
LB: loop body
LE: loop exit
PB: predicated region body
PF: predicated region fallthrough
CT: control target
= control target key end

     0   :  { %s298_s6 = smov 0   ;;  %s300_s7 = smov 0   ;;  %s347_s0 = inlined_call_operand.vmem [shape: bf16[2,4,4,64], index: 0, kind: input, shape index: {}]   ;;  %s348_s1 = inlined_call_operand.vmem [shape: f32[2,64], index: 1, kind: output, shape index: {}]  }
   0x1   :  { %s302_s8 = smov 0  }
   0x2 LB: > { %s23_s9 = sadd.s32 1, %s281_s7  ;;  %p230_p0 = scmp.ge.s32.totalorder %s285_s8, 1  ;;  %s285_s8 = sphi %s302_s8, %s11_s8   ;;  %s281_s7 = sphi %s300_s7, %s350_s7   ;;  %s277_s6 = sphi %s298_s6, %s349_s6  }
   0x3   : > { %p25_p1 = scmp.ge.s32.totalorder %s23_s9, 2  ;;  %p101_p2 = scmp.lt.s32.totalorder %s285_s8, 3 }
   0x5   : > { %s352_s9 = smov (%p25_p1, %s23_s9), 0  ;;  %p102_p3 = pnand %p230_p0, %p101_p2 }
   0x6   : > { %p121_p4 = scmp.lt.s32.totalorder (!%p102_p3), %s277_s6, 1  ;;  %p130_p5 = scmp.eq.s32.totalorder (!%p102_p3), %s277_s6, 0 }
   0x7   : > { %105 = sbr.rel (%p102_p3) target bundleno = 51 (0x33), region = 24 }
   0xe   : > { %s354_s6 = smov (!%p121_p4, %s277_s6), 1  ;;  %135 = sbr.rel (!%p130_p5) target bundleno = 21 (0x15), region = 28 }
   0xf   : > { %s236_s10 = sshll.u32 %s354_s6, 3  ;;  %vm136_vm0 = vcmask (%p130_p5), 517120   ;;  %v287_v0 = vmov (%p130_p5), 0.0  }
  0x10   : > { %s128_s13 = scalar_lea.vmem %s347_s0, %s236_s10  ;;  %137 = vst.msk [vmem:[%s348_s1] sm:$0x3] (%p130_p5), %vm136_vm0, %v287_v0 }
  0x15 PF: > { %v138_v1 = vld [vmem:[%s128_s13] sm:$0x3]  ;;  %v139_v2 = vld [vmem:[%s128_s13 + $0x2] sm:$0x3]  ;;  %v140_v3 = vld [vmem:[%s128_s13 + $0x4] sm:$0x3] }
  0x16   : > { %v141_v4 = vld [vmem:[%s128_s13 + $0x6] sm:$0x3]  ;;  %v142_v5 = vunpack.c.l.bf16 %v138_v1  ;;  %v143_v6 = vunpack.c.l.bf16 %v139_v2  ;;  %v144_v7 = vunpack.c.l.bf16 %v140_v3  ;;  %vm146_vm1 = vcmask 519168  }
  0x17   : > { %v145_v8 = vunpack.c.l.bf16 %v141_v4  ;;  %vm180_vm2 = vcmask 1040384   ;;  %v165_v40 = vld [vmem:[%s348_s1] sm:$0x3]  ;;  %vm183_vm3 = vcmask 517120  }
  0x18   : > { %v147_v9 = vsel %vm146_vm1, %v142_v5, 0.0  ;;  %v148_v10 = vsel %vm146_vm1, %v143_v6, 0.0  ;;  %v150_v11 = vsel %vm146_vm1, %v144_v7, 0.0  ;;  %v154_v12 = vmul.f32 %v142_v5, %v142_v5 }
  0x19   : > { %v149_v13 = vadd.f32 %v148_v10, %v147_v9  ;;  %v155_v14 = vmul.f32 %v143_v6, %v143_v6  ;;  %v156_v15 = vmul.f32 %v144_v7, %v144_v7  ;;  %v152_v16 = vsel %vm146_vm1, %v145_v8, 0.0 }
  0x1a   : > { %v157_v17 = vmul.f32 %v145_v8, %v145_v8  ;;  %v158_v18 = vsel %vm146_vm1, %v154_v12, 0.0 }
  0x1b   : > { %v151_v19 = vadd.f32 %v150_v11, %v149_v13  ;;  %v159_v20 = vsel %vm146_vm1, %v155_v14, 0.0  ;;  %v161_v21 = vsel %vm146_vm1, %v156_v15, 0.0 }
  0x1c   : > { %v160_v22 = vadd.f32 %v159_v20, %v158_v18  ;;  %v163_v24 = vsel %vm146_vm1, %v157_v17, 0.0 }
  0x1d   : > { %v153_v23 = vadd.f32 %v152_v16, %v151_v19 }
  0x1e   : > { %v162_v25 = vadd.f32 %v161_v21, %v160_v22 }
  0x1f   : > { %v166_v26 = vsel %vm146_vm1, %v153_v23, 0.0 }
  0x20   : > { %v164_v27 = vadd.f32 %v163_v24, %v162_v25  ;;  %v167_v28 = vrot.slane %v166_v26, 4 }
  0x22   : > { %v168_v29 = vadd.f32 %v167_v28, %v166_v26  ;;  %v173_v30 = vsel %vm146_vm1, %v164_v27, 0.0 }
  0x23   : > { %v174_v31 = vrot.slane %v173_v30, 4 }
  0x24   : > { %v169_v32 = vrot.slane %v168_v29, 2 }
  0x25   : > { %v175_v33 = vadd.f32 %v174_v31, %v173_v30 }
  0x26   : > { %v170_v34 = vadd.f32 %v169_v32, %v168_v29 }
  0x27   : > { %v176_v35 = vrot.slane %v175_v33, 2 }
  0x28   : > { %v171_v36 = vrot.slane %v170_v34, 1 }
  0x29   : > { %v177_v37 = vadd.f32 %v176_v35, %v175_v33 }
  0x2a   : > { %v172_v38 = vadd.f32 %v171_v36, %v170_v34 }
  0x2b   : > { %v178_v39 = vrot.slane %v177_v37, 1 }
  0x2d   : > { %v179_v41 = vadd.f32 %v178_v39, %v177_v37 }
  0x2f   : > { %v181_v42 = vsel %vm180_vm2, %v172_v38, %v179_v41 }
  0x30   : > { %v182_v43 = vadd.f32 %v181_v42, %v165_v40 }
  0x32   : > { %184 = vst.msk [vmem:[%s348_s1] sm:$0x3] %vm183_vm3, %v182_v43 }
  0x33 PF: > { %s11_s8 = sadd.s32 1, %s285_s8   ;;  %s349_s6 = smov %s281_s7 }
  0x34   : > { %p8_p6 = scmp.ge.s32.totalorder %s11_s8, 4   ;;  %s350_s7 = smov %s352_s9 }
  0x36   :  { %10 = sbr.rel (!%p8_p6) target bundleno = 2 (0x2), region = 54 }

// kernel: mul.6
= control target key start
LH: loop header
LB: loop body
LE: loop exit
PB: predicated region body
PF: predicated region fallthrough
CT: control target
= control target key end

     0   :  { %s34_s0 = inlined_call_operand.vmem [shape: f32[1,64], index: 0, kind: input, shape index: {}]   ;;  %s35_s1 = inlined_call_operand.vmem [shape: f32[1,64], index: 1, kind: input, shape index: {}]   ;;  %s36_s2 = inlined_call_operand.vmem [shape: f32[1,64], index: 2, kind: output, shape index: {}]  }
   0x1   :  { %v3_v0 = vld [vmem:[%s34_s0] sm:$0x1] }
   0x2   :  { %v4_v1 = vld [vmem:[%s35_s1] sm:$0x1] }
   0x3   :  { %v7_v2 = vmul.f32 %v4_v1, %v3_v0 }
   0x5   :  { %9 = vst [vmem:[%s36_s2] sm:$0x1] %v7_v2 }

// kernel: _lambda_.17
= control target key start
LH: loop header
LB: loop body
LE: loop exit
PB: predicated region body
PF: predicated region fallthrough
CT: control target
= control target key end

     0   :  { %s427_s12 = smov 0   ;;  %s429_s13 = smov 0   ;;  %s469_s0 = inlined_call_operand.vmem [shape: bf16[2,4,4,64], index: 0, kind: input, shape index: {}]   ;;  %s470_s1 = inlined_call_operand.vmem [shape: f32[1,64], index: 1, kind: input, shape index: {}]   ;;  %s471_s2 = inlined_call_operand.vmem [shape: f32[1,64], index: 2, kind: input, shape index: {}]   ;;  %s472_s3 = inlined_call_operand.vmem [shape: bf16[2,4,4,64], index: 3, kind: output, shape index: {}]  }
   0x1   :  { %s431_s14 = smov 0  }
   0x2 LB: > { %s25_s15 = sadd.s32 1, %s401_s13  ;;  %p348_p0 = scmp.ge.s32.totalorder %s405_s14, 1  ;;  %s405_s14 = sphi %s431_s14, %s13_s14   ;;  %s401_s13 = sphi %s429_s13, %s474_s13   ;;  %s397_s12 = sphi %s427_s12, %s473_s12  }
   0x3   : > { %p27_p1 = scmp.ge.s32.totalorder %s25_s15, 2  ;;  %p158_p2 = scmp.lt.s32.totalorder %s405_s14, 3 }
   0x5   : > { %s476_s15 = smov (%p27_p1, %s25_s15), 0  ;;  %p159_p3 = pnand %p348_p0, %p158_p2 }
   0x6   : > { %p191_p4 = scmp.lt.s32.totalorder (!%p159_p3), %s397_s12, 1  ;;  %v353_v0 = vld [vmem:[%s470_s1] ss:$0 sm:$0xff] (!%p159_p3)  ;;  %vm252_vm0 = vcmask (!%p159_p3), 517120  }
   0x7   : > { %162 = sbr.rel (%p159_p3) target bundleno = 32 (0x20), region = 32  ;;  %v354_v9 = vld [vmem:[%s471_s2] ss:$0 sm:$0xff] (!%p159_p3) }
   0xe   : > { %s478_s12 = smov (!%p191_p4, %s397_s12), 1 }
   0xf   : > { %s357_s16 = sshll.u32 %s478_s12, 3 }
  0x10   : > { %s198_s19 = scalar_lea.vmem %s469_s0, %s357_s16  ;;  %s208_s26 = scalar_lea.vmem %s472_s3, %s357_s16 }
  0x11   : > { %v210_v1 = vld [vmem:[%s198_s19] sm:$0x3]  ;;  %v211_v2 = vld [vmem:[%s198_s19 + $0x2] sm:$0x3]  ;;  %v212_v3 = vld [vmem:[%s198_s19 + $0x4] sm:$0x3] }
  0x12   : > { %v213_v4 = vld [vmem:[%s198_s19 + $0x6] sm:$0x3]  ;;  %v214_v5 = vunpack.c.l.bf16 %v210_v1  ;;  %v215_v6 = vunpack.c.l.bf16 %v211_v2  ;;  %v216_v7 = vunpack.c.l.bf16 %v212_v3 }
  0x13   : > { %v217_v8 = vunpack.c.l.bf16 %v213_v4 }
  0x14   : > { %v225_v10 = vmul.f32 %v353_v0, %v214_v5  ;;  %v226_v11 = vmul.f32 %v353_v0, %v215_v6  ;;  %v227_v12 = vmul.f32 %v353_v0, %v216_v7 }
  0x15   : > { %v228_v13 = vmul.f32 %v353_v0, %v217_v8 }
  0x16   : > { %v236_v14 = vadd.f32 %v354_v9, %v225_v10  ;;  %v237_v15 = vadd.f32 %v354_v9, %v226_v11  ;;  %v238_v16 = vadd.f32 %v354_v9, %v227_v12 }
  0x17   : > { %v239_v17 = vadd.f32 %v354_v9, %v228_v13 }
  0x18   : > { %v240_v18 = vmul.f32 0.2, %v236_v14  ;;  %v241_v19 = vmul.f32 0.2, %v237_v15  ;;  %v242_v20 = vmul.f32 0.2, %v238_v16 }
  0x19   : > { %v243_v21 = vmul.f32 0.2, %v239_v17 }
  0x1a   : > { %v244_v22 = vmax.f32 %v236_v14, %v240_v18  ;;  %v245_v23 = vmax.f32 %v237_v15, %v241_v19  ;;  %v246_v24 = vmax.f32 %v238_v16, %v242_v20 }
  0x1b   : > { %v247_v25 = vmax.f32 %v239_v17, %v243_v21 }
  0x1c   : > { %v248_v26 = vpack.c.bf16 %v244_v22, %v244_v22  ;;  %v249_v27 = vpack.c.bf16 %v245_v23, %v245_v23  ;;  %v250_v28 = vpack.c.bf16 %v246_v24, %v246_v24 }
  0x1d   : > { %v251_v29 = vpack.c.bf16 %v247_v25, %v247_v25 }
  0x1e   : > { %253 = vst.msk [vmem:[%s208_s26] sm:$0x3] %vm252_vm0, %v248_v26  ;;  %254 = vst.msk [vmem:[%s208_s26 + $0x2] sm:$0x3] %vm252_vm0, %v249_v27 }
  0x1f   : > { %255 = vst.msk [vmem:[%s208_s26 + $0x4] sm:$0x3] %vm252_vm0, %v250_v28  ;;  %256 = vst.msk [vmem:[%s208_s26 + $0x6] sm:$0x3] %vm252_vm0, %v251_v29 }
  0x20 PF: > { %s13_s14 = sadd.s32 1, %s405_s14   ;;  %s473_s12 = smov %s401_s13 }
  0x21   : > { %p10_p5 = scmp.ge.s32.totalorder %s13_s14, 4   ;;  %s474_s13 = smov %s476_s15 }
  0x23   :  { %12 = sbr.rel (!%p10_p5) target bundleno = 2 (0x2), region = 62 }

// kernel: _lambda_.19
= control target key start
LH: loop header
LB: loop body
LE: loop exit
PB: predicated region body
PF: predicated region fallthrough
CT: control target
= control target key end

     0   :  { %s288_s6 = smov 0   ;;  %s290_s7 = smov 0   ;;  %s335_s0 = inlined_call_operand.vmem [shape: bf16[2,3,3,128], index: 0, kind: input, shape index: {}]   ;;  %s336_s1 = inlined_call_operand.vmem [shape: f32[2,128], index: 1, kind: output, shape index: {}]  }
   0x1   :  { %s292_s8 = smov 0  }
   0x2 LB: > { %s23_s9 = sadd.s32 1, %s271_s7  ;;  %p221_p0 = scmp.ge.s32.totalorder %s275_s8, 1  ;;  %s275_s8 = sphi %s292_s8, %s11_s8   ;;  %s271_s7 = sphi %s290_s7, %s338_s7   ;;  %s267_s6 = sphi %s288_s6, %s337_s6  }
   0x3   : > { %p25_p1 = scmp.ge.s32.totalorder %s23_s9, 2  ;;  %p101_p2 = scmp.lt.s32.totalorder %s275_s8, 3 }
   0x5   : > { %s340_s9 = smov (%p25_p1, %s23_s9), 0  ;;  %p102_p3 = pnand %p221_p0, %p101_p2 }
   0x6   : > { %p121_p4 = scmp.lt.s32.totalorder (!%p102_p3), %s267_s6, 1  ;;  %p130_p5 = scmp.eq.s32.totalorder (!%p102_p3), %s267_s6, 0 }
   0x7   : > { %105 = sbr.rel (%p102_p3) target bundleno = 49 (0x31), region = 24 }
   0xe   : > { %s342_s6 = smov (!%p121_p4, %s267_s6), 1  ;;  %135 = sbr.rel (!%p130_p5) target bundleno = 21 (0x15), region = 28 }
   0xf   : > { %s227_s10 = smul.u32 6, %s342_s6  ;;  %v277_v0 = vmov (%p130_p5), 0.0  }
  0x10   : > { %136 = vst [vmem:[%s336_s1] sm:$0x3] (%p130_p5), %v277_v0 }
  0x11   : > { %s128_s13 = scalar_lea.vmem %s335_s0, %s227_s10 }
  0x15 PF: > { %v137_v1 = vld [vmem:[%s128_s13] sm:$0x3]  ;;  %v138_v2 = vld [vmem:[%s128_s13 + $0x2] sm:$0x3]  ;;  %v139_v3 = vld [vmem:[%s128_s13 + $0x4] sm:$0x3] }
  0x16   : > { %v140_v4 = vunpack.c.l.bf16 %v137_v1  ;;  %v141_v5 = vunpack.c.l.bf16 %v138_v2  ;;  %v142_v6 = vunpack.c.l.bf16 %v139_v3  ;;  %vm143_vm0 = vcmask 1042432  }
  0x17   : > { %vm172_vm1 = vcmask 1040384   ;;  %v157_v33 = vld [vmem:[%s336_s1] sm:$0x3] }
  0x18   : > { %v144_v7 = vsel %vm143_vm0, %v140_v4, 0.0  ;;  %v145_v8 = vsel %vm143_vm0, %v141_v5, 0.0  ;;  %v147_v9 = vsel %vm143_vm0, %v142_v6, 0.0  ;;  %v149_v10 = vmul.f32 %v140_v4, %v140_v4 }
  0x19   : > { %v146_v11 = vadd.f32 %v145_v8, %v144_v7  ;;  %v150_v12 = vmul.f32 %v141_v5, %v141_v5  ;;  %v151_v13 = vmul.f32 %v142_v6, %v142_v6 }
  0x1a   : > { %v152_v14 = vsel %vm143_vm0, %v149_v10, 0.0 }
  0x1b   : > { %v148_v15 = vadd.f32 %v147_v9, %v146_v11  ;;  %v153_v16 = vsel %vm143_vm0, %v150_v12, 0.0  ;;  %v155_v17 = vsel %vm143_vm0, %v151_v13, 0.0 }
  0x1c   : > { %v154_v18 = vadd.f32 %v153_v16, %v152_v14 }
  0x1d   : > { %v158_v19 = vsel %vm143_vm0, %v148_v15, 0.0 }
  0x1e   : > { %v156_v20 = vadd.f32 %v155_v17, %v154_v18  ;;  %v159_v21 = vrot.slane %v158_v19, 4 }
  0x20   : > { %v160_v22 = vadd.f32 %v159_v21, %v158_v19  ;;  %v165_v23 = vsel %vm143_vm0, %v156_v20, 0.0 }
  0x21   : > { %v166_v24 = vrot.slane %v165_v23, 4 }
  0x22   : > { %v161_v25 = vrot.slane %v160_v22, 2 }
  0x23   : > { %v167_v26 = vadd.f32 %v166_v24, %v165_v23 }
  0x24   : > { %v162_v27 = vadd.f32 %v161_v25, %v160_v22 }
  0x25   : > { %v168_v28 = vrot.slane %v167_v26, 2 }
  0x26   : > { %v163_v29 = vrot.slane %v162_v27, 1 }
  0x27   : > { %v169_v30 = vadd.f32 %v168_v28, %v167_v26 }
  0x28   : > { %v164_v31 = vadd.f32 %v163_v29, %v162_v27 }
  0x29   : > { %v170_v32 = vrot.slane %v169_v30, 1 }
  0x2b   : > { %v171_v34 = vadd.f32 %v170_v32, %v169_v30 }
  0x2d   : > { %v173_v35 = vsel %vm172_vm1, %v164_v31, %v171_v34 }
  0x2e   : > { %v174_v36 = vadd.f32 %v173_v35, %v157_v33 }
  0x30   : > { %175 = vst [vmem:[%s336_s1] sm:$0x3] %v174_v36 }
  0x31 PF: > { %s11_s8 = sadd.s32 1, %s275_s8   ;;  %s337_s6 = smov %s271_s7 }
  0x32   : > { %p8_p6 = scmp.ge.s32.totalorder %s11_s8, 4   ;;  %s338_s7 = smov %s340_s9 }
  0x34   :  { %10 = sbr.rel (!%p8_p6) target bundleno = 2 (0x2), region = 54 }

// kernel: _lambda_.15
= control target key start
LH: loop header
LB: loop body
LE: loop exit
PB: predicated region body
PF: predicated region fallthrough
CT: control target
= control target key end

     0   :  { %s3156_s12 = smov 0   ;;  %s3158_s13 = smov 0   ;;  %s3781_s0 = inlined_call_operand.vmem [shape: bf16[2,5,5,128], index: 0, kind: input, shape index: {}]   ;;  %s3782_s1 = inlined_call_operand.vmem [shape: bf16[2,2,128,64], index: 1, kind: input, shape index: {}]   ;;  %s3783_s2 = inlined_call_operand.vmem [shape: f32[1,64], index: 2, kind: input, shape index: {}]   ;;  %s3784_s3 = inlined_call_operand.vmem [shape: bf16[2,4,4,64], index: 3, kind: output, shape index: {}]  }
   0x1   :  { %s3160_s14 = smov 0  }
   0x2 LB: > { %s28_s15 = sadd.s32 1, %s3128_s13  ;;  %p2147_p0 = scmp.ge.s32.totalorder %s3132_s14, 1  ;;  %s3132_s14 = sphi %s3160_s14, %s13_s14   ;;  %s3128_s13 = sphi %s3158_s13, %s3786_s13   ;;  %s3124_s12 = sphi %s3156_s12, %s3785_s12  }
   0x3   : > { %p30_p1 = scmp.ge.s32.totalorder %s28_s15, 2  ;;  %p177_p2 = scmp.lt.s32.totalorder %s3132_s14, 3 }
   0x5   : > { %s3788_s15 = smov (%p30_p1, %s28_s15), 0  ;;  %p178_p3 = pnand %p2147_p0, %p177_p2 }
   0x6   : > { %v2977_v0 = vld [vmem:[%s3782_s1 + $0x40] sm:$0xff] (!%p178_p3)   ;;  %v3134_v1 = vmov (!%p178_p3), 0.0   ;;  %v2979_v3 = vld [vmem:[%s3782_s1 + $0x48] sm:$0xff] (!%p178_p3)   ;;  %vm3135_vm0 = vmmov (!%p178_p3), 0   ;;  %p215_p4 = scmp.lt.s32.totalorder (!%p178_p3), %s3124_s12, 1  ;;  %v2981_v5 = vld [vmem:[%s3782_s1 + $0x50] sm:$0xff] (!%p178_p3)  }
   0x7   : > { %181 = sbr.rel (%p178_p3) target bundleno = 484 (0x1e4), region = 32  ;;  %2630 = vmatprep.subr.bf16.mxu0 (!%p178_p3), %v3134_v1  ;;  %2650 = vmatprep.subr.bf16.mxu1 (!%p178_p3), %v3134_v1  ;;  %v2978_v2 = vld [vmem:[%s3782_s1] sm:$0xff] (!%p178_p3)   ;;  %v2980_v4 = vld [vmem:[%s3782_s1 + $0x8] sm:$0xff] (!%p178_p3)   ;;  %v2982_v6 = vld [vmem:[%s3782_s1 + $0x10] sm:$0xff] (!%p178_p3)   ;;  %vm698_vm1 = vcmask (!%p178_p3), 517120  }
   0x8   : > { %2631 = vmatpush3.bf16.msra.mxu0 (!%p178_p3), %v2977_v0  ;;  %2646 = vmatprep.mubr.msk.bf16.mxu0 (!%p178_p3), %vm3135_vm0, %v3134_v1  ;;  %v2983_v7 = vld [vmem:[%s3782_s1 + $0x58] sm:$0xff] (!%p178_p3)   ;;  %v2985_v9 = vld [vmem:[%s3782_s1 + $0x60] sm:$0xff] (!%p178_p3)   ;;  %v2987_v13 = vld [vmem:[%s3782_s1 + $0x68] sm:$0xff] (!%p178_p3)  }
   0x9   : > { %2651 = vmatpush3.bf16.msra.mxu1 (!%p178_p3), %v2978_v2  ;;  %2632 = vmatprep.subr.bf16.mxu0 (!%p178_p3), %v3134_v1  ;;  %v2984_v8 = vld [vmem:[%s3782_s1 + $0x18] sm:$0xff] (!%p178_p3)   ;;  %v2986_v10 = vld [vmem:[%s3782_s1 + $0x20] sm:$0xff] (!%p178_p3)   ;;  %v2988_v14 = vld [vmem:[%s3782_s1 + $0x28] sm:$0xff] (!%p178_p3)  }
   0xa   : > { %2652 = vmatprep.subr.bf16.mxu1 (!%p178_p3), %v3134_v1  ;;  %2666 = vmatprep.mubr.msk.bf16.mxu1 (!%p178_p3), %vm3135_vm0, %v3134_v1  ;;  %v2989_v16 = vld [vmem:[%s3782_s1 + $0x70] sm:$0xff] (!%p178_p3)   ;;  %v2991_v20 = vld [vmem:[%s3782_s1 + $0x78] sm:$0xff] (!%p178_p3)   ;;  %v2994_v23 = vld [vmem:[%s3782_s1 + $0x80] sm:$0xff] (!%p178_p3)  }
   0xb   : > { %v2990_v17 = vld [vmem:[%s3782_s1 + $0x30] sm:$0xff] (!%p178_p3)   ;;  %v2992_v21 = vld [vmem:[%s3782_s1 + $0x38] sm:$0xff] (!%p178_p3)   ;;  %v2995_v24 = vld [vmem:[%s3782_s1 + $0xc0] sm:$0xff] (!%p178_p3)  }
   0xc   : > { %2633 = vmatpush3.bf16.msra.mxu0 (!%p178_p3), %v2979_v3  ;;  %v2996_v25 = vld [vmem:[%s3782_s1 + $0x88] sm:$0xff] (!%p178_p3)   ;;  %v2998_v27 = vld [vmem:[%s3782_s1 + $0x90] sm:$0xff] (!%p178_p3)   ;;  %v3000_v29 = vld [vmem:[%s3782_s1 + $0x98] sm:$0xff] (!%p178_p3)  }
   0xd   : > { %2653 = vmatpush3.bf16.msra.mxu1 (!%p178_p3), %v2980_v4  ;;  %2634 = vmatprep.subr.bf16.mxu0 (!%p178_p3), %v3134_v1  ;;  %v2997_v26 = vld [vmem:[%s3782_s1 + $0xc8] sm:$0xff] (!%p178_p3)   ;;  %v2999_v28 = vld [vmem:[%s3782_s1 + $0xd0] sm:$0xff] (!%p178_p3)   ;;  %v3001_v30 = vld [vmem:[%s3782_s1 + $0xd8] sm:$0xff] (!%p178_p3)  }
   0xe   : > { %s3790_s12 = smov (!%p215_p4, %s3124_s12), 1  ;;  %2654 = vmatprep.subr.bf16.mxu1 %v3134_v1  ;;  %v3002_v31 = vld [vmem:[%s3782_s1 + $0xa0] sm:$0xff]   ;;  %v3004_v34 = vld [vmem:[%s3782_s1 + $0xa8] sm:$0xff]   ;;  %v3006_v37 = vld [vmem:[%s3782_s1 + $0xb0] sm:$0xff]  }
   0xf   : > { %s2950_s28 = smul.u32 20, %s3790_s12  ;;  %v3003_v32 = vld [vmem:[%s3782_s1 + $0xe0] sm:$0xff]   ;;  %v3005_v36 = vld [vmem:[%s3782_s1 + $0xe8] sm:$0xff]   ;;  %v3007_v39 = vld [vmem:[%s3782_s1 + $0xf0] sm:$0xff]   ;;  %s2485_s7 = sshll.u32 %s3790_s12, 3 }
  0x10   : > { %2635 = vmatpush3.bf16.msra.mxu0 %v2981_v5  ;;  %v3008_v40 = vld [vmem:[%s3782_s1 + $0xb8] sm:$0xff]   ;;  %v3011_v45 = vld [vmem:[%s3782_s1 + $0x40] sm:$0xff]   ;;  %v3013_v47 = vld [vmem:[%s3782_s1 + $0x48] sm:$0xff]   ;;  %s3759_s11 = scalar_lea.vmem %s3784_s3, %s2485_s7 }
  0x11   : > { %2655 = vmatpush3.bf16.msra.mxu1 %v2982_v6  ;;  %2636 = vmatprep.subr.bf16.mxu0 %v3134_v1  ;;  %s3216_s8 = scalar_lea.vmem %s3781_s0, %s2950_s28  ;;  %v3009_v43 = vld [vmem:[%s3782_s1 + $0xf8] sm:$0xff]   ;;  %v3012_v46 = vld [vmem:[%s3782_s1] sm:$0xff]   ;;  %v3014_v48 = vld [vmem:[%s3782_s1 + $0x8] sm:$0xff]  }
  0x12   : > { %2656 = vmatprep.subr.bf16.mxu1 %v3134_v1  ;;  %v241_v11 = vld [vmem:[%s3216_s8] sm:$0x7]  ;;  %v3295_v33 = vld [vmem:[%s3216_s8 + $0x4] sm:$0x7]  ;;  %v3015_v49 = vld [vmem:[%s3782_s1 + $0x50] sm:$0xff]  }
  0x13   : > { %v2167_v12 = vcombine.low %v241_v11, %v241_v11  ;;  %v2224_v35 = vcombine.low %v3295_v33, %v3295_v33  ;;  %v3016_v50 = vld [vmem:[%s3782_s1 + $0x10] sm:$0xff]   ;;  %v3017_v51 = vld [vmem:[%s3782_s1 + $0x58] sm:$0xff]   ;;  %v3019_v53 = vld [vmem:[%s3782_s1 + $0x60] sm:$0xff]  }
  0x14   : > { %2637 = vmatpush3.bf16.msra.mxu0 %v2983_v7  ;;  %v3018_v52 = vld [vmem:[%s3782_s1 + $0x18] sm:$0xff]   ;;  %v3020_v54 = vld [vmem:[%s3782_s1 + $0x20] sm:$0xff]   ;;  %v3021_v55 = vld [vmem:[%s3782_s1 + $0x68] sm:$0xff]  }
  0x15   : > { %2657 = vmatpush3.bf16.msra.mxu1 %v2984_v8  ;;  %2638 = vmatprep.subr.bf16.mxu0 %v3134_v1  ;;  %v285_v15 = vshll.u32 %v2167_v12, 16  ;;  %v283_v18 = vshrl.u32 %v2167_v12, 16  ;;  %v595_v38 = vshll.u32 %v2224_v35, 16  ;;  %v593_v41 = vshrl.u32 %v2224_v35, 16  ;;  %v3022_v56 = vld [vmem:[%s3782_s1 + $0x28] sm:$0xff]   ;;  %v3023_v57 = vld [vmem:[%s3782_s1 + $0x70] sm:$0xff]  }
  0x16   : > { %2658 = vmatprep.subr.bf16.mxu1 %v3134_v1  ;;  %v3024_v58 = vld [vmem:[%s3782_s1 + $0x30] sm:$0xff]   ;;  %v3025_v59 = vld [vmem:[%s3782_s1 + $0x78] sm:$0xff]   ;;  %v3027_v61 = vld [vmem:[%s3782_s1 + $0x80] sm:$0xff]  }
  0x17   : > { %v287_v19 = vrot.slane %v285_v15, 1  ;;  %v597_v42 = vrot.slane %v595_v38, 1  ;;  %v3026_v60 = vld [vmem:[%s3782_s1 + $0x38] sm:$0xff]   ;;  %v3028_v62 = vld [vmem:[%s3782_s1 + $0xc0] sm:$0xff]   ;;  %v3029_v63 = vld [vmem:[%s3782_s1 + $0x88] sm:$0xff]  }
  0x18   : > { %2639 = vmatpush3.bf16.msra.mxu0 %v2985_v9  ;;  %v3030_v0 = vld [vmem:[%s3782_s1 + $0xc8] sm:$0xff]   ;;  %v3031_v2 = vld [vmem:[%s3782_s1 + $0x90] sm:$0xff]   ;;  %v3033_v4 = vld [vmem:[%s3782_s1 + $0x98] sm:$0xff]  }
  0x19   : > { %2659 = vmatpush3.bf16.msra.mxu1 %v2986_v10  ;;  %2640 = vmatprep.subr.bf16.mxu0 %v3134_v1  ;;  %v288_v22 = vor.u32 %v287_v19, %v283_v18  ;;  %v598_v44 = vor.u32 %v597_v42, %v593_v41  ;;  %v3032_v3 = vld [vmem:[%s3782_s1 + $0xd0] sm:$0xff]   ;;  %v3034_v5 = vld [vmem:[%s3782_s1 + $0xd8] sm:$0xff]   ;;  %v3035_v6 = vld [vmem:[%s3782_s1 + $0xa0] sm:$0xff]  }
  0x1a   : > { %2660 = vmatprep.subr.bf16.mxu1 %v3134_v1  ;;  %v3036_v7 = vld [vmem:[%s3782_s1 + $0xe0] sm:$0xff]   ;;  %v3438_v8 = vld [vmem:[%s3216_s8 + $0x8] sm:$0x7]  ;;  %v3039_v12 = vld [vmem:[%s3782_s1 + $0xb0] sm:$0xff]  }
  0x1b   : > { %v3037_v9 = vld [vmem:[%s3782_s1 + $0xa8] sm:$0xff]   ;;  %v2306_v10 = vcombine.low %v3438_v8, %v3438_v8  ;;  %v3041_v15 = vld [vmem:[%s3782_s1 + $0xb8] sm:$0xff]   ;;  %v3065_v41 = vld [vmem:[%s3782_s1 + $0xd0] sm:$0xff]  }
  0x1c   : > { %2641 = vmatpush3.bf16.msra.mxu0 %v2987_v13  ;;  %v3042_v18 = vld [vmem:[%s3782_s1 + $0xf8] sm:$0xff]   ;;  %v3062_v38 = vld [vmem:[%s3782_s1 + $0x88] sm:$0xff]  }
  0x1d   : > { %2661 = vmatpush3.bf16.msra.mxu1 %v2988_v14  ;;  %2642 = vmatprep.subr.bf16.mxu0 %v3134_v1  ;;  %v1035_v13 = vshll.u32 %v2306_v10, 16  ;;  %v3040_v14 = vld [vmem:[%s3782_s1 + $0xf0] sm:$0xff]   ;;  %v3059_v35 = vld [vmem:[%s3782_s1 + $0x38] sm:$0xff]  }
  0x1e   : > { %2662 = vmatprep.subr.bf16.mxu1 %v3134_v1  ;;  %v3066_v42 = vld [vmem:[%s3782_s1 + $0x98] sm:$0xff]  }
  0x20   : > { %2643 = vmatpush3.bf16.msra.mxu0 %v2989_v16  ;;  %v1033_v16 = vshrl.u32 %v2306_v10, 16  ;;  %v3092_v10 = vld [vmem:[%s3782_s1 + $0x38] sm:$0xff]  }
  0x21   : > { %2663 = vmatpush3.bf16.msra.mxu1 %v2990_v17  ;;  %2644 = vmatprep.subr.bf16.mxu0 %v3134_v1  ;;  %v1037_v17 = vrot.slane %v1035_v13, 1  ;;  %v3095_v13 = vld [vmem:[%s3782_s1 + $0x88] sm:$0xff]  }
  0x22   : > { %2664 = vmatprep.subr.bf16.mxu1 %v3134_v1 }
  0x23   : > { %v1038_v19 = vor.u32 %v1037_v17, %v1033_v16  ;;  %v3098_v16 = vld [vmem:[%s3782_s1 + $0xd0] sm:$0xff]   ;;  %v3099_v17 = vld [vmem:[%s3782_s1 + $0x98] sm:$0xff]  }
  0x24   : > { %2645 = vmatpush3.bf16.msra.mxu0 %v2991_v20  ;;  %v3044_v20 = vld [vmem:[%s3782_s1 + $0x40] sm:$0xff]  }
  0x25   : > { %2665 = vmatpush3.bf16.msra.mxu1 %v2992_v21  ;;  %2670 = vmatprep.subr.bf16.mxu0 %v3134_v1  ;;  %v3045_v21 = vld [vmem:[%s3782_s1] sm:$0xff]  }
  0x26   : > { %2690 = vmatprep.subr.bf16.mxu1 %v3134_v1 }
  0x27   : > { %2647 = vmatmul.mubr.bf16.vlgmr.msra.gmra.mrb[0].mxu0 %v288_v22  ;;  %v3046_v22 = vld [vmem:[%s3782_s1 + $0x48] sm:$0xff]  }
  0x28   : > { %2667 = vmatmul.mubr.bf16.vlgmr.msra.gmra.mrb[0].mxu1 %v241_v11  ;;  %2671 = vmatpush3.bf16.msra.mxu0 %v2994_v23  ;;  %v3038_v11 = vld [vmem:[%s3782_s1 + $0xe8] sm:$0xff]  }
  0x29   : > { %2691 = vmatpush3.bf16.msra.mxu1 %v2995_v24  ;;  %2672 = vmatprep.subr.bf16.mxu0 %v3134_v1  ;;  %v3047_v23 = vld [vmem:[%s3782_s1 + $0x8] sm:$0xff]   ;;  %v3048_v24 = vld [vmem:[%s3782_s1 + $0x50] sm:$0xff]  }
  0x2a   : > { %2692 = vmatprep.subr.bf16.mxu1 %v3134_v1  ;;  %2686 = vmatprep.mubr.msk.bf16.mxu0 %vm3135_vm0, %v3134_v1 }
  0x2b   : > { %2706 = vmatprep.mubr.msk.bf16.mxu1 %vm3135_vm0, %v3134_v1 }
  0x2c   : > { %2673 = vmatpush3.bf16.msra.mxu0 %v2996_v25  ;;  %v3049_v25 = vld [vmem:[%s3782_s1 + $0x10] sm:$0xff]  }
  0x2d   : > { %2693 = vmatpush3.bf16.msra.mxu1 %v2997_v26  ;;  %2674 = vmatprep.subr.bf16.mxu0 %v3134_v1  ;;  %v3050_v26 = vld [vmem:[%s3782_s1 + $0x58] sm:$0xff]  }
  0x2e   : > { %2694 = vmatprep.subr.bf16.mxu1 %v3134_v1 }
  0x30   : > { %2675 = vmatpush3.bf16.msra.mxu0 %v2998_v27  ;;  %v3051_v27 = vld [vmem:[%s3782_s1 + $0x18] sm:$0xff]  }
  0x31   : > { %2695 = vmatpush3.bf16.msra.mxu1 %v2999_v28  ;;  %2676 = vmatprep.subr.bf16.mxu0 %v3134_v1  ;;  %v3052_v28 = vld [vmem:[%s3782_s1 + $0x60] sm:$0xff]  }
  0x32   : > { %2696 = vmatprep.subr.bf16.mxu1 %v3134_v1 }
  0x34   : > { %2677 = vmatpush3.bf16.msra.mxu0 %v3000_v29  ;;  %v3053_v29 = vld [vmem:[%s3782_s1 + $0x20] sm:$0xff]  }
  0x35   : > { %2697 = vmatpush3.bf16.msra.mxu1 %v3001_v30  ;;  %2678 = vmatprep.subr.bf16.mxu0 %v3134_v1  ;;  %v3054_v30 = vld [vmem:[%s3782_s1 + $0x68] sm:$0xff]  }
  0x36   : > { %2698 = vmatprep.subr.bf16.mxu1 %v3134_v1 }
  0x38   : > { %2679 = vmatpush3.bf16.msra.mxu0 %v3002_v31  ;;  %v3055_v31 = vld [vmem:[%s3782_s1 + $0x28] sm:$0xff]  }
  0x39   : > { %2699 = vmatpush3.bf16.msra.mxu1 %v3003_v32  ;;  %2680 = vmatprep.subr.bf16.mxu0 %v3134_v1  ;;  %v3056_v32 = vld [vmem:[%s3782_s1 + $0x70] sm:$0xff]  }
  0x3a   : > { %2700 = vmatprep.subr.bf16.mxu1 %v3134_v1 }
  0x3c   : > { %2681 = vmatpush3.bf16.msra.mxu0 %v3004_v34  ;;  %v3058_v34 = vld [vmem:[%s3782_s1 + $0x78] sm:$0xff]  }
  0x3d   : > { %2701 = vmatpush3.bf16.msra.mxu1 %v3005_v36  ;;  %2682 = vmatprep.subr.bf16.mxu0 %v3134_v1  ;;  %v3060_v36 = vld [vmem:[%s3782_s1 + $0x80] sm:$0xff]  }
  0x3e   : > { %2702 = vmatprep.subr.bf16.mxu1 %v3134_v1 }
  0x40   : > { %2683 = vmatpush3.bf16.msra.mxu0 %v3006_v37  ;;  %v3061_v37 = vld [vmem:[%s3782_s1 + $0xc0] sm:$0xff]  }
  0x41   : > { %2703 = vmatpush3.bf16.msra.mxu1 %v3007_v39  ;;  %2684 = vmatprep.subr.bf16.mxu0 %v3134_v1  ;;  %v3063_v39 = vld [vmem:[%s3782_s1 + $0xc8] sm:$0xff]  }
  0x42   : > { %2704 = vmatprep.subr.bf16.mxu1 %v3134_v1 }
  0x44   : > { %2685 = vmatpush3.bf16.msra.mxu0 %v3008_v40  ;;  %v3064_v40 = vld [vmem:[%s3782_s1 + $0x90] sm:$0xff]  }
  0x45   : > { %2705 = vmatpush3.bf16.msra.mxu1 %v3009_v43  ;;  %2710 = vmatprep.subr.bf16.mxu0 %v3134_v1  ;;  %v3067_v43 = vld [vmem:[%s3782_s1 + $0xd8] sm:$0xff]  }
  0x46   : > { %2730 = vmatprep.subr.bf16.mxu1 %v3134_v1 }
  0x47   : > { %2687 = vmatmul.mubr.bf16.vlgmr.msra.gmra.mrb[4].mxu0 %v3295_v33 }
  0x48   : > { %2707 = vmatmul.mubr.bf16.vlgmr.msra.gmra.mrb[4].mxu1 %v598_v44  ;;  %2711 = vmatpush3.bf16.msra.mxu0 %v3011_v45  ;;  %v3069_v45 = vld [vmem:[%s3782_s1 + $0xe0] sm:$0xff]  }
  0x49   : > { %2731 = vmatpush3.bf16.msra.mxu1 %v3012_v46  ;;  %2712 = vmatprep.subr.bf16.mxu0 %v3134_v1  ;;  %v3581_v46 = vld [vmem:[%s3216_s8 + $0xc] sm:$0x7] }
  0x4a   : > { %2732 = vmatprep.subr.bf16.mxu1 %v3134_v1  ;;  %2726 = vmatprep.mubr.msk.bf16.mxu0 %vm3135_vm0, %v3134_v1 }
  0x4b   : > { %2746 = vmatprep.mubr.msk.bf16.mxu1 %vm3135_vm0, %v3134_v1 }
  0x4c   : > { %2713 = vmatpush3.bf16.msra.mxu0 %v3013_v47  ;;  %v3070_v47 = vld [vmem:[%s3782_s1 + $0xa8] sm:$0xff]  }
  0x4d   : > { %2733 = vmatpush3.bf16.msra.mxu1 %v3014_v48  ;;  %2714 = vmatprep.subr.bf16.mxu0 %v3134_v1  ;;  %v2389_v48 = vcombine.low %v3581_v46, %v3581_v46 }
  0x4e   : > { %2734 = vmatprep.subr.bf16.mxu1 %v3134_v1 }
  0x50   : > { %2715 = vmatpush3.bf16.msra.mxu0 %v3015_v49  ;;  %v3071_v49 = vld [vmem:[%s3782_s1 + $0xe8] sm:$0xff]  }
  0x51   : > { %2735 = vmatpush3.bf16.msra.mxu1 %v3016_v50  ;;  %2716 = vmatprep.subr.bf16.mxu0 %v3134_v1  ;;  %v3072_v50 = vld [vmem:[%s3782_s1 + $0xb0] sm:$0xff]  }
  0x52   : > { %2736 = vmatprep.subr.bf16.mxu1 %v3134_v1 }
  0x54   : > { %2717 = vmatpush3.bf16.msra.mxu0 %v3017_v51  ;;  %v1475_v51 = vshll.u32 %v2389_v48, 16 }
  0x55   : > { %2737 = vmatpush3.bf16.msra.mxu1 %v3018_v52  ;;  %2718 = vmatprep.subr.bf16.mxu0 %v3134_v1  ;;  %v3073_v52 = vld [vmem:[%s3782_s1 + $0xf0] sm:$0xff]  }
  0x56   : > { %2738 = vmatprep.subr.bf16.mxu1 %v3134_v1 }
  0x58   : > { %2719 = vmatpush3.bf16.msra.mxu0 %v3019_v53  ;;  %v3074_v53 = vld [vmem:[%s3782_s1 + $0xb8] sm:$0xff]  }
  0x59   : > { %2739 = vmatpush3.bf16.msra.mxu1 %v3020_v54  ;;  %2720 = vmatprep.subr.bf16.mxu0 %v3134_v1  ;;  %v1473_v54 = vshrl.u32 %v2389_v48, 16 }
  0x5a   : > { %2740 = vmatprep.subr.bf16.mxu1 %v3134_v1 }
  0x5c   : > { %2721 = vmatpush3.bf16.msra.mxu0 %v3021_v55  ;;  %v1477_v55 = vrot.slane %v1475_v51, 1 }
  0x5d   : > { %2741 = vmatpush3.bf16.msra.mxu1 %v3022_v56  ;;  %2722 = vmatprep.subr.bf16.mxu0 %v3134_v1  ;;  %v3075_v56 = vld [vmem:[%s3782_s1 + $0xf8] sm:$0xff]  }
  0x5e   : > { %2742 = vmatprep.subr.bf16.mxu1 %v3134_v1 }
  0x60   : > { %2723 = vmatpush3.bf16.msra.mxu0 %v3023_v57  ;;  %v1478_v57 = vor.u32 %v1477_v55, %v1473_v54 }
  0x61   : > { %2743 = vmatpush3.bf16.msra.mxu1 %v3024_v58  ;;  %2724 = vmatprep.subr.bf16.mxu0 %v3134_v1  ;;  %v3077_v58 = vld [vmem:[%s3782_s1 + $0x40] sm:$0xff]  }
  0x62   : > { %2744 = vmatprep.subr.bf16.mxu1 %v3134_v1 }
  0x64   : > { %2725 = vmatpush3.bf16.msra.mxu0 %v3025_v59  ;;  %v3078_v59 = vld [vmem:[%s3782_s1] sm:$0xff]  }
  0x65   : > { %2745 = vmatpush3.bf16.msra.mxu1 %v3026_v60  ;;  %2750 = vmatprep.subr.bf16.mxu0 %v3134_v1  ;;  %v3079_v60 = vld [vmem:[%s3782_s1 + $0x48] sm:$0xff]  }
  0x66   : > { %2770 = vmatprep.subr.bf16.mxu1 %v3134_v1 }
  0x67   : > { %2727 = vmatmul.mubr.bf16.vlgmr.msra.gmra.mrb[8].mxu0 %v598_v44  ;;  %v3068_v44 = vld [vmem:[%s3782_s1 + $0xa0] sm:$0xff]  }
  0x68   : > { %2747 = vmatmul.mubr.bf16.vlgmr.msra.gmra.mrb[8].mxu1 %v3295_v33  ;;  %2751 = vmatpush3.bf16.msra.mxu0 %v3027_v61  ;;  %v3057_v33 = vld [vmem:[%s3782_s1 + $0x30] sm:$0xff]   ;;  %v3080_v61 = vld [vmem:[%s3782_s1 + $0x8] sm:$0xff]  }
  0x69   : > { %2771 = vmatpush3.bf16.msra.mxu1 %v3028_v62  ;;  %2752 = vmatprep.subr.bf16.mxu0 %v3134_v1  ;;  %v3081_v62 = vld [vmem:[%s3782_s1 + $0x50] sm:$0xff]  }
  0x6a   : > { %2772 = vmatprep.subr.bf16.mxu1 %v3134_v1  ;;  %2766 = vmatprep.mubr.msk.bf16.mxu0 %vm3135_vm0, %v3134_v1 }
  0x6b   : > { %2786 = vmatprep.mubr.msk.bf16.mxu1 %vm3135_vm0, %v3134_v1 }
  0x6c   : > { %2753 = vmatpush3.bf16.msra.mxu0 %v3029_v63  ;;  %v3082_v63 = vld [vmem:[%s3782_s1 + $0x10] sm:$0xff]  }
  0x6d   : > { %2773 = vmatpush3.bf16.msra.mxu1 %v3030_v0  ;;  %2754 = vmatprep.subr.bf16.mxu0 %v3134_v1  ;;  %v3083_v0 = vld [vmem:[%s3782_s1 + $0x58] sm:$0xff]  }
  0x6e   : > { %2774 = vmatprep.subr.bf16.mxu1 %v3134_v1 }
  0x70   : > { %2755 = vmatpush3.bf16.msra.mxu0 %v3031_v2  ;;  %v3084_v2 = vld [vmem:[%s3782_s1 + $0x18] sm:$0xff]  }
  0x71   : > { %2775 = vmatpush3.bf16.msra.mxu1 %v3032_v3  ;;  %2756 = vmatprep.subr.bf16.mxu0 %v3134_v1  ;;  %v3085_v3 = vld [vmem:[%s3782_s1 + $0x60] sm:$0xff]  }
  0x72   : > { %2776 = vmatprep.subr.bf16.mxu1 %v3134_v1 }
  0x74   : > { %2757 = vmatpush3.bf16.msra.mxu0 %v3033_v4  ;;  %v3086_v4 = vld [vmem:[%s3782_s1 + $0x20] sm:$0xff]  }
  0x75   : > { %2777 = vmatpush3.bf16.msra.mxu1 %v3034_v5  ;;  %2758 = vmatprep.subr.bf16.mxu0 %v3134_v1  ;;  %v3087_v5 = vld [vmem:[%s3782_s1 + $0x68] sm:$0xff]  }
  0x76   : > { %2778 = vmatprep.subr.bf16.mxu1 %v3134_v1 }
  0x78   : > { %2759 = vmatpush3.bf16.msra.mxu0 %v3035_v6  ;;  %v3088_v6 = vld [vmem:[%s3782_s1 + $0x28] sm:$0xff]  }
  0x79   : > { %2779 = vmatpush3.bf16.msra.mxu1 %v3036_v7  ;;  %2760 = vmatprep.subr.bf16.mxu0 %v3134_v1  ;;  %v3089_v7 = vld [vmem:[%s3782_s1 + $0x70] sm:$0xff]  }
  0x7a   : > { %2780 = vmatprep.subr.bf16.mxu1 %v3134_v1 }
  0x7c   : > { %2761 = vmatpush3.bf16.msra.mxu0 %v3037_v9  ;;  %v3091_v9 = vld [vmem:[%s3782_s1 + $0x78] sm:$0xff]  }
  0x7d   : > { %2781 = vmatpush3.bf16.msra.mxu1 %v3038_v11  ;;  %2762 = vmatprep.subr.bf16.mxu0 %v3134_v1  ;;  %v3093_v11 = vld [vmem:[%s3782_s1 + $0x80] sm:$0xff]  }
  0x7e   : > { %2782 = vmatprep.subr.bf16.mxu1 %v3134_v1 }
  0x80   : > { %2763 = vmatpush3.bf16.msra.mxu0 %v3039_v12  ;;  %v3094_v12 = vld [vmem:[%s3782_s1 + $0xc0] sm:$0xff]  }
  0x81   : > { %2783 = vmatpush3.bf16.msra.mxu1 %v3040_v14  ;;  %2764 = vmatprep.subr.bf16.mxu0 %v3134_v1  ;;  %v3096_v14 = vld [vmem:[%s3782_s1 + $0xc8] sm:$0xff]  }
  0x82   : > { %2784 = vmatprep.subr.bf16.mxu1 %v3134_v1 }
  0x84   : > { %2765 = vmatpush3.bf16.msra.mxu0 %v3041_v15  ;;  %v3097_v15 = vld [vmem:[%s3782_s1 + $0x90] sm:$0xff]  }
  0x85   : > { %2785 = vmatpush3.bf16.msra.mxu1 %v3042_v18  ;;  %2790 = vmatprep.subr.bf16.mxu0 %v3134_v1  ;;  %v3100_v18 = vld [vmem:[%s3782_s1 + $0xd8] sm:$0xff]  }
  0x86   : > { %2810 = vmatprep.subr.bf16.mxu1 %v3134_v1 }
  0x87   : > { %2767 = vmatmul.mubr.bf16.vlgmr.msra.gmra.mrb[12].mxu0 %v3438_v8 }
  0x88   : > { %2787 = vmatmul.mubr.bf16.vlgmr.msra.gmra.mrb[12].mxu1 %v1038_v19  ;;  %2791 = vmatpush3.bf16.msra.mxu0 %v3044_v20  ;;  %v3102_v20 = vld [vmem:[%s3782_s1 + $0xe0] sm:$0xff]  }
  0x89   : > { %2811 = vmatpush3.bf16.msra.mxu1 %v3045_v21  ;;  %2792 = vmatprep.subr.bf16.mxu0 %v3134_v1  ;;  %v245_v21 = vld [vmem:[%s3216_s8 + $0x10] sm:$0x7] }
  0x8a   : > { %2812 = vmatprep.subr.bf16.mxu1 %v3134_v1  ;;  %2806 = vmatprep.mubr.msk.bf16.mxu0 %vm3135_vm0, %v3134_v1 }
  0x8b   : > { %2826 = vmatprep.mubr.msk.bf16.mxu1 %vm3135_vm0, %v3134_v1 }
  0x8c   : > { %2793 = vmatpush3.bf16.msra.mxu0 %v3046_v22  ;;  %v3103_v22 = vld [vmem:[%s3782_s1 + $0xa8] sm:$0xff]  }
  0x8d   : > { %2813 = vmatpush3.bf16.msra.mxu1 %v3047_v23  ;;  %2794 = vmatprep.subr.bf16.mxu0 %v3134_v1  ;;  %v2472_v23 = vcombine.low %v245_v21, %v245_v21 }
  0x8e   : > { %2814 = vmatprep.subr.bf16.mxu1 %v3134_v1 }
  0x90   : > { %2795 = vmatpush3.bf16.msra.mxu0 %v3048_v24  ;;  %v3104_v24 = vld [vmem:[%s3782_s1 + $0xe8] sm:$0xff]  }
  0x91   : > { %2815 = vmatpush3.bf16.msra.mxu1 %v3049_v25  ;;  %2796 = vmatprep.subr.bf16.mxu0 %v3134_v1 }
  0x92   : > { %2816 = vmatprep.subr.bf16.mxu1 %v3134_v1 }
  0x94   : > { %2797 = vmatpush3.bf16.msra.mxu0 %v3050_v26 }
  0x95   : > { %2817 = vmatpush3.bf16.msra.mxu1 %v3051_v27  ;;  %2798 = vmatprep.subr.bf16.mxu0 %v3134_v1 }
  0x96   : > { %2818 = vmatprep.subr.bf16.mxu1 %v3134_v1 }
  0x98   : > { %2799 = vmatpush3.bf16.msra.mxu0 %v3052_v28 }
  0x99   : > { %2819 = vmatpush3.bf16.msra.mxu1 %v3053_v29  ;;  %2800 = vmatprep.subr.bf16.mxu0 %v3134_v1 }
  0x9a   : > { %2820 = vmatprep.subr.bf16.mxu1 %v3134_v1 }
  0x9c   : > { %2801 = vmatpush3.bf16.msra.mxu0 %v3054_v30 }
  0x9d   : > { %2821 = vmatpush3.bf16.msra.mxu1 %v3055_v31  ;;  %2802 = vmatprep.subr.bf16.mxu0 %v3134_v1  ;;  %v3105_v31 = vld [vmem:[%s3782_s1 + $0xb0] sm:$0xff]  }
  0x9e   : > { %2822 = vmatprep.subr.bf16.mxu1 %v3134_v1 }
  0xa0   : > { %2803 = vmatpush3.bf16.msra.mxu0 %v3056_v32  ;;  %v1915_v32 = vshll.u32 %v2472_v23, 16 }
  0xa1   : > { %2823 = vmatpush3.bf16.msra.mxu1 %v3057_v33  ;;  %2804 = vmatprep.subr.bf16.mxu0 %v3134_v1 }
  0xa2   : > { %2824 = vmatprep.subr.bf16.mxu1 %v3134_v1 }
  0xa4   : > { %2805 = vmatpush3.bf16.msra.mxu0 %v3058_v34 }
  0xa5   : > { %2825 = vmatpush3.bf16.msra.mxu1 %v3059_v35  ;;  %2830 = vmatprep.subr.bf16.mxu0 %v3134_v1  ;;  %v3106_v35 = vld [vmem:[%s3782_s1 + $0xf0] sm:$0xff]  }
  0xa6   : > { %2850 = vmatprep.subr.bf16.mxu1 %v3134_v1 }
  0xa7   : > { %2807 = vmatmul.mubr.bf16.vlgmr.msra.gmra.mrb[16].mxu0 %v1038_v19  ;;  %v3101_v19 = vld [vmem:[%s3782_s1 + $0xa0] sm:$0xff]  }
  0xa8   : > { %2827 = vmatmul.mubr.bf16.vlgmr.msra.gmra.mrb[16].mxu1 %v3438_v8  ;;  %2831 = vmatpush3.bf16.msra.mxu0 %v3060_v36  ;;  %v3090_v8 = vld [vmem:[%s3782_s1 + $0x30] sm:$0xff]  }
  0xa9   : > { %2851 = vmatpush3.bf16.msra.mxu1 %v3061_v37  ;;  %2832 = vmatprep.subr.bf16.mxu0 %v3134_v1  ;;  %v3107_v37 = vld [vmem:[%s3782_s1 + $0xb8] sm:$0xff]  }
  0xaa   : > { %2852 = vmatprep.subr.bf16.mxu1 %v3134_v1  ;;  %2846 = vmatprep.mubr.msk.bf16.mxu0 %vm3135_vm0, %v3134_v1 }
  0xab   : > { %2866 = vmatprep.mubr.msk.bf16.mxu1 %vm3135_vm0, %v3134_v1 }
  0xac   : > { %2833 = vmatpush3.bf16.msra.mxu0 %v3062_v38  ;;  %v1913_v38 = vshrl.u32 %v2472_v23, 16 }
  0xad   : > { %2853 = vmatpush3.bf16.msra.mxu1 %v3063_v39  ;;  %2834 = vmatprep.subr.bf16.mxu0 %v3134_v1  ;;  %v1917_v39 = vrot.slane %v1915_v32, 1 }
  0xae   : > { %2854 = vmatprep.subr.bf16.mxu1 %v3134_v1 }
  0xb0   : > { %2835 = vmatpush3.bf16.msra.mxu0 %v3064_v40  ;;  %v3108_v40 = vld [vmem:[%s3782_s1 + $0xf8] sm:$0xff]  }
  0xb1   : > { %2855 = vmatpush3.bf16.msra.mxu1 %v3065_v41  ;;  %2836 = vmatprep.subr.bf16.mxu0 %v3134_v1  ;;  %v1918_v41 = vor.u32 %v1917_v39, %v1913_v38 }
  0xb2   : > { %2856 = vmatprep.subr.bf16.mxu1 %v3134_v1 }
  0xb4   : > { %2837 = vmatpush3.bf16.msra.mxu0 %v3066_v42 }
  0xb5   : > { %2857 = vmatpush3.bf16.msra.mxu1 %v3067_v43  ;;  %2838 = vmatprep.subr.bf16.mxu0 %v3134_v1 }
  0xb6   : > { %2858 = vmatprep.subr.bf16.mxu1 %v3134_v1 }
  0xb8   : > { %2839 = vmatpush3.bf16.msra.mxu0 %v3068_v44 }
  0xb9   : > { %2859 = vmatpush3.bf16.msra.mxu1 %v3069_v45  ;;  %2840 = vmatprep.subr.bf16.mxu0 %v3134_v1 }
  0xba   : > { %2860 = vmatprep.subr.bf16.mxu1 %v3134_v1 }
  0xbc   : > { %2841 = vmatpush3.bf16.msra.mxu0 %v3070_v47 }
  0xbd   : > { %2861 = vmatpush3.bf16.msra.mxu1 %v3071_v49  ;;  %2842 = vmatprep.subr.bf16.mxu0 %v3134_v1 }
  0xbe   : > { %2862 = vmatprep.subr.bf16.mxu1 %v3134_v1 }
  0xc0   : > { %2843 = vmatpush3.bf16.msra.mxu0 %v3072_v50 }
  0xc1   : > { %2863 = vmatpush3.bf16.msra.mxu1 %v3073_v52  ;;  %2844 = vmatprep.subr.bf16.mxu0 %v3134_v1 }
  0xc2   : > { %2864 = vmatprep.subr.bf16.mxu1 %v3134_v1 }
  0xc4   : > { %2845 = vmatpush3.bf16.msra.mxu0 %v3074_v53 }
  0xc5   : > { %2865 = vmatpush3.bf16.msra.mxu1 %v3075_v56  ;;  %2870 = vmatprep.subr.bf16.mxu0 %v3134_v1 }
  0xc6   : > { %2890 = vmatprep.subr.bf16.mxu1 %v3134_v1 }
  0xc7   : > { %2847 = vmatmul.mubr.bf16.vlgmr.msra.gmra.mrb[20].mxu0 %v3581_v46 }
  0xc8   : > { %2867 = vmatmul.mubr.bf16.vlgmr.msra.gmra.mrb[20].mxu1 %v1478_v57  ;;  %2871 = vmatpush3.bf16.msra.mxu0 %v3077_v58 }
  0xc9   : > { %2891 = vmatpush3.bf16.msra.mxu1 %v3078_v59  ;;  %2872 = vmatprep.subr.bf16.mxu0 %v3134_v1 }
  0xca   : > { %2892 = vmatprep.subr.bf16.mxu1 %v3134_v1  ;;  %2886 = vmatprep.mubr.msk.bf16.mxu0 %vm3135_vm0, %v3134_v1 }
  0xcb   : > { %2906 = vmatprep.mubr.msk.bf16.mxu1 %vm3135_vm0, %v3134_v1 }
  0xcc   : > { %2873 = vmatpush3.bf16.msra.mxu0 %v3079_v60 }
  0xcd   : > { %2893 = vmatpush3.bf16.msra.mxu1 %v3080_v61  ;;  %2874 = vmatprep.subr.bf16.mxu0 %v3134_v1 }
  0xce   : > { %2894 = vmatprep.subr.bf16.mxu1 %v3134_v1 }
  0xd0   : > { %2875 = vmatpush3.bf16.msra.mxu0 %v3081_v62 }
  0xd1   : > { %2895 = vmatpush3.bf16.msra.mxu1 %v3082_v63  ;;  %2876 = vmatprep.subr.bf16.mxu0 %v3134_v1 }
  0xd2   : > { %2896 = vmatprep.subr.bf16.mxu1 %v3134_v1 }
  0xd4   : > { %2877 = vmatpush3.bf16.msra.mxu0 %v3083_v0 }
  0xd5   : > { %2897 = vmatpush3.bf16.msra.mxu1 %v3084_v2  ;;  %2878 = vmatprep.subr.bf16.mxu0 %v3134_v1 }
  0xd6   : > { %2898 = vmatprep.subr.bf16.mxu1 %v3134_v1 }
  0xd8   : > { %2879 = vmatpush3.bf16.msra.mxu0 %v3085_v3 }
  0xd9   : > { %2899 = vmatpush3.bf16.msra.mxu1 %v3086_v4  ;;  %2880 = vmatprep.subr.bf16.mxu0 %v3134_v1 }
  0xda   : > { %2900 = vmatprep.subr.bf16.mxu1 %v3134_v1 }
  0xdc   : > { %2881 = vmatpush3.bf16.msra.mxu0 %v3087_v5 }
  0xdd   : > { %2901 = vmatpush3.bf16.msra.mxu1 %v3088_v6  ;;  %2882 = vmatprep.subr.bf16.mxu0 %v3134_v1 }
  0xde   : > { %2902 = vmatprep.subr.bf16.mxu1 %v3134_v1 }
  0xe0   : > { %2883 = vmatpush3.bf16.msra.mxu0 %v3089_v7 }
  0xe1   : > { %2903 = vmatpush3.bf16.msra.mxu1 %v3090_v8  ;;  %2884 = vmatprep.subr.bf16.mxu0 %v3134_v1 }
  0xe2   : > { %2904 = vmatprep.subr.bf16.mxu1 %v3134_v1 }
  0xe4   : > { %2885 = vmatpush3.bf16.msra.mxu0 %v3091_v9 }
  0xe5   : > { %2905 = vmatpush3.bf16.msra.mxu1 %v3092_v10  ;;  %2910 = vmatprep.subr.bf16.mxu0 %v3134_v1 }
  0xe6   : > { %2930 = vmatprep.subr.bf16.mxu1 %v3134_v1 }
  0xe7   : > { %2887 = vmatmul.mubr.bf16.vlgmr.msra.gmra.mrb[24].mxu0 %v1478_v57 }
  0xe8   : > { %2907 = vmatmul.mubr.bf16.vlgmr.msra.gmra.mrb[24].mxu1 %v3581_v46  ;;  %2911 = vmatpush3.bf16.msra.mxu0 %v3093_v11  ;;  %v3752_v46 = vld [vmem:[%s3783_s2] ss:$0 sm:$0xff] }
  0xe9   : > { %2931 = vmatpush3.bf16.msra.mxu1 %v3094_v12  ;;  %2912 = vmatprep.subr.bf16.mxu0 %v3134_v1 }
  0xea   : > { %2932 = vmatprep.subr.bf16.mxu1 %v3134_v1  ;;  %2926 = vmatprep.mubr.msk.bf16.mxu0 %vm3135_vm0, %v3134_v1 }
  0xeb   : > { %2946 = vmatprep.mubr.msk.bf16.mxu1 %vm3135_vm0, %v3134_v1 }
  0xec   : > { %2913 = vmatpush3.bf16.msra.mxu0 %v3095_v13 }
  0xed   : > { %2933 = vmatpush3.bf16.msra.mxu1 %v3096_v14  ;;  %2914 = vmatprep.subr.bf16.mxu0 %v3134_v1 }
  0xee   : > { %2934 = vmatprep.subr.bf16.mxu1 %v3134_v1 }
  0xf0   : > { %2915 = vmatpush3.bf16.msra.mxu0 %v3097_v15 }
  0xf1   : > { %2935 = vmatpush3.bf16.msra.mxu1 %v3098_v16  ;;  %2916 = vmatprep.subr.bf16.mxu0 %v3134_v1 }
  0xf2   : > { %2936 = vmatprep.subr.bf16.mxu1 %v3134_v1 }
  0xf4   : > { %2917 = vmatpush3.bf16.msra.mxu0 %v3099_v17 }
  0xf5   : > { %2937 = vmatpush3.bf16.msra.mxu1 %v3100_v18  ;;  %2918 = vmatprep.subr.bf16.mxu0 %v3134_v1 }
  0xf6   : > { %2938 = vmatprep.subr.bf16.mxu1 %v3134_v1 }
  0xf8   : > { %2919 = vmatpush3.bf16.msra.mxu0 %v3101_v19 }
  0xf9   : > { %2939 = vmatpush3.bf16.msra.mxu1 %v3102_v20  ;;  %2920 = vmatprep.subr.bf16.mxu0 %v3134_v1 }
  0xfa   : > { %v372_v25 = vpop.f32.mrb[0].mxu0  ;;  %2940 = vmatprep.subr.bf16.mxu1 %v3134_v1 }
  0xfb   : > { %v460_v26 = vpop.f32.mrb[0].mxu1  ;;  %v2648_v27 = vpop.f32.mrb[1].mxu0 }
  0xfc   : > { %v461_v28 = vadd.f32 %v460_v26, %v372_v25  ;;  %v2668_v29 = vpop.f32.mrb[1].mxu1  ;;  %v375_v30 = vpop.f32.mrb[2].mxu0  ;;  %2921 = vmatpush3.bf16.msra.mxu0 %v3103_v22 }
  0xfd   : > { %v463_v33 = vpop.f32.mrb[2].mxu1  ;;  %2941 = vmatpush3.bf16.msra.mxu1 %v3104_v24  ;;  %v2649_v34 = vpop.f32.mrb[3].mxu0  ;;  %2922 = vmatprep.subr.bf16.mxu0 %v3134_v1 }
  0xfe   : > { %v2669_v36 = vpop.f32.mrb[3].mxu1  ;;  %2942 = vmatprep.subr.bf16.mxu1 %v3134_v1 }
 0x100   : > { %2923 = vmatpush3.bf16.msra.mxu0 %v3105_v31 }
 0x101   : > { %2943 = vmatpush3.bf16.msra.mxu1 %v3106_v35  ;;  %2924 = vmatprep.subr.bf16.mxu0 %v3134_v1 }
 0x102   : > { %2944 = vmatprep.subr.bf16.mxu1 %v3134_v1 }
 0x104   : > { %2925 = vmatpush3.bf16.msra.mxu0 %v3107_v37 }
 0x105   : > { %2945 = vmatpush3.bf16.msra.mxu1 %v3108_v40 }
 0x107   : > { %2927 = vmatmul.mubr.bf16.vlgmr.msra.gmra.mrb[28].mxu0 %v245_v21 }
 0x108   : > { %2947 = vmatmul.mubr.bf16.vlgmr.msra.gmra.mrb[28].mxu1 %v1918_v41 }
 0x11a   : > { %v565_v42 = vpop.f32.mrb[4].mxu0 }
 0x11b   : > { %v571_v43 = vadd.f32 %v565_v42, %v461_v28  ;;  %v682_v44 = vpop.f32.mrb[4].mxu1  ;;  %v2688_v45 = vpop.f32.mrb[5].mxu0 }
 0x11c   : > { %v2708_v47 = vpop.f32.mrb[5].mxu1  ;;  %v568_v48 = vpop.f32.mrb[6].mxu0 }
 0x11d   : > { %v688_v49 = vadd.f32 %v682_v44, %v571_v43  ;;  %v685_v50 = vpop.f32.mrb[6].mxu1  ;;  %v2689_v1 = vpop.f32.mrb[7].mxu0 }
 0x11e   : > { %v2709_v51 = vpop.f32.mrb[7].mxu1 }
 0x11f   : > { %v696_v52 = vadd.f32 %v3752_v46, %v688_v49 }
 0x121   : > { %v697_v53 = vpack.c.bf16 %v696_v52, %v696_v52 }
 0x123   : > { %699 = vst.msk [vmem:[%s3759_s11] sm:$0x3] %vm698_vm1, %v697_v53 }
 0x13a   : > { %v814_v54 = vpop.f32.mrb[8].mxu0 }
 0x13b   : > { %v902_v55 = vpop.f32.mrb[8].mxu1  ;;  %v2728_v56 = vpop.f32.mrb[9].mxu0 }
 0x13c   : > { %v903_v57 = vadd.f32 %v902_v55, %v814_v54  ;;  %v2748_v58 = vpop.f32.mrb[9].mxu1  ;;  %v817_v59 = vpop.f32.mrb[10].mxu0 }
 0x13d   : > { %v905_v60 = vpop.f32.mrb[10].mxu1  ;;  %v2729_v61 = vpop.f32.mrb[11].mxu0 }
 0x13e   : > { %v2749_v62 = vpop.f32.mrb[11].mxu1 }
 0x15a   : > { %v1006_v63 = vpop.f32.mrb[12].mxu0 }
 0x15b   : > { %v1012_v0 = vadd.f32 %v1006_v63, %v903_v57  ;;  %v1122_v2 = vpop.f32.mrb[12].mxu1  ;;  %v2768_v3 = vpop.f32.mrb[13].mxu0 }
 0x15c   : > { %v2788_v4 = vpop.f32.mrb[13].mxu1  ;;  %v1009_v5 = vpop.f32.mrb[14].mxu0 }
 0x15d   : > { %v1128_v6 = vadd.f32 %v1122_v2, %v1012_v0  ;;  %v1125_v7 = vpop.f32.mrb[14].mxu1  ;;  %v2769_v8 = vpop.f32.mrb[15].mxu0 }
 0x15e   : > { %v2789_v9 = vpop.f32.mrb[15].mxu1 }
 0x15f   : > { %v1136_v10 = vadd.f32 %v3752_v46, %v1128_v6 }
 0x161   : > { %v1137_v11 = vpack.c.bf16 %v1136_v10, %v1136_v10 }
 0x163   : > { %2316 = vst.msk [vmem:[%s3759_s11 + $0x2] sm:$0x3] %vm698_vm1, %v1137_v11 }
 0x17a   : > { %v1254_v12 = vpop.f32.mrb[16].mxu0 }
 0x17b   : > { %v1342_v13 = vpop.f32.mrb[16].mxu1  ;;  %v2808_v14 = vpop.f32.mrb[17].mxu0 }
 0x17c   : > { %v1343_v15 = vadd.f32 %v1342_v13, %v1254_v12  ;;  %v2828_v16 = vpop.f32.mrb[17].mxu1  ;;  %v1257_v17 = vpop.f32.mrb[18].mxu0 }
 0x17d   : > { %v1345_v18 = vpop.f32.mrb[18].mxu1  ;;  %v2809_v19 = vpop.f32.mrb[19].mxu0 }
 0x17e   : > { %v2829_v20 = vpop.f32.mrb[19].mxu1 }
 0x19a   : > { %v1446_v21 = vpop.f32.mrb[20].mxu0 }
 0x19b   : > { %v1452_v22 = vadd.f32 %v1446_v21, %v1343_v15  ;;  %v1562_v23 = vpop.f32.mrb[20].mxu1  ;;  %v2848_v24 = vpop.f32.mrb[21].mxu0 }
 0x19c   : > { %v2868_v25 = vpop.f32.mrb[21].mxu1  ;;  %v1449_v26 = vpop.f32.mrb[22].mxu0 }
 0x19d   : > { %v1568_v27 = vadd.f32 %v1562_v23, %v1452_v22  ;;  %v1565_v28 = vpop.f32.mrb[22].mxu1  ;;  %v2849_v29 = vpop.f32.mrb[23].mxu0 }
 0x19e   : > { %v2869_v30 = vpop.f32.mrb[23].mxu1 }
 0x19f   : > { %v1576_v31 = vadd.f32 %v3752_v46, %v1568_v27 }
 0x1a1   : > { %v1577_v32 = vpack.c.bf16 %v1576_v31, %v1576_v31 }
 0x1a3   : > { %2399 = vst.msk [vmem:[%s3759_s11 + $0x4] sm:$0x3] %vm698_vm1, %v1577_v32 }
 0x1ba   : > { %v1694_v33 = vpop.f32.mrb[24].mxu0 }
 0x1bb   : > { %v1782_v34 = vpop.f32.mrb[24].mxu1  ;;  %v2888_v35 = vpop.f32.mrb[25].mxu0 }
 0x1bc   : > { %v1783_v36 = vadd.f32 %v1782_v34, %v1694_v33  ;;  %v2908_v37 = vpop.f32.mrb[25].mxu1  ;;  %v1697_v38 = vpop.f32.mrb[26].mxu0 }
 0x1bd   : > { %v1785_v39 = vpop.f32.mrb[26].mxu1  ;;  %v2889_v40 = vpop.f32.mrb[27].mxu0 }
 0x1be   : > { %v2909_v41 = vpop.f32.mrb[27].mxu1 }
 0x1da   : > { %v1886_v42 = vpop.f32.mrb[28].mxu0 }
 0x1db   : > { %v1892_v43 = vadd.f32 %v1886_v42, %v1783_v36  ;;  %v2002_v44 = vpop.f32.mrb[28].mxu1  ;;  %v2928_v45 = vpop.f32.mrb[29].mxu0 }
 0x1dc   : > { %v2948_v47 = vpop.f32.mrb[29].mxu1  ;;  %v1889_v48 = vpop.f32.mrb[30].mxu0 }
 0x1dd   : > { %v2008_v49 = vadd.f32 %v2002_v44, %v1892_v43  ;;  %v2005_v50 = vpop.f32.mrb[30].mxu1  ;;  %v2929_v1 = vpop.f32.mrb[31].mxu0 }
 0x1de   : > { %v2949_v51 = vpop.f32.mrb[31].mxu1 }
 0x1df   : > { %v2016_v52 = vadd.f32 %v3752_v46, %v2008_v49 }
 0x1e1   : > { %v2017_v53 = vpack.c.bf16 %v2016_v52, %v2016_v52 }
 0x1e3   : > { %2482 = vst.msk [vmem:[%s3759_s11 + $0x6] sm:$0x3] %vm698_vm1, %v2017_v53 }
 0x1e4 PF: > { %s13_s14 = sadd.s32 1, %s3132_s14   ;;  %s3785_s12 = smov %s3128_s13 }
 0x1e5   : > { %p10_p5 = scmp.ge.s32.totalorder %s13_s14, 4   ;;  %s3786_s13 = smov %s3788_s15 }
 0x1e7   :  { %12 = sbr.rel (!%p10_p5) target bundleno = 2 (0x2), region = 74 }

// kernel: mul.11
= control target key start
LH: loop header
LB: loop body
LE: loop exit
PB: predicated region body
PF: predicated region fallthrough
CT: control target
= control target key end

     0   :  { %s34_s0 = inlined_call_operand.vmem [shape: f32[1,128], index: 0, kind: input, shape index: {}]   ;;  %s35_s1 = inlined_call_operand.vmem [shape: f32[1,128], index: 1, kind: input, shape index: {}]   ;;  %s36_s2 = inlined_call_operand.vmem [shape: f32[1,128], index: 2, kind: output, shape index: {}]  }
   0x1   :  { %v3_v0 = vld [vmem:[%s34_s0] sm:$0x1] }
   0x2   :  { %v4_v1 = vld [vmem:[%s35_s1] sm:$0x1] }
   0x3   :  { %v7_v2 = vmul.f32 %v4_v1, %v3_v0 }
   0x5   :  { %9 = vst [vmem:[%s36_s2] sm:$0x1] %v7_v2 }

// kernel: _lambda_.20
= control target key start
LH: loop header
LB: loop body
LE: loop exit
PB: predicated region body
PF: predicated region fallthrough
CT: control target
= control target key end

     0   :  { %s424_s12 = smov 0   ;;  %s426_s13 = smov 0   ;;  %s463_s0 = inlined_call_operand.vmem [shape: bf16[2,3,3,128], index: 0, kind: input, shape index: {}]   ;;  %s464_s1 = inlined_call_operand.vmem [shape: f32[1,128], index: 1, kind: input, shape index: {}]   ;;  %s465_s2 = inlined_call_operand.vmem [shape: f32[1,128], index: 2, kind: input, shape index: {}]   ;;  %s466_s3 = inlined_call_operand.vmem [shape: bf16[2,3,3,128], index: 3, kind: output, shape index: {}]  }
   0x1   :  { %s428_s14 = smov 0  }
   0x2 LB: > { %s25_s15 = sadd.s32 1, %s398_s13  ;;  %p348_p0 = scmp.ge.s32.totalorder %s402_s14, 1  ;;  %s402_s14 = sphi %s428_s14, %s13_s14   ;;  %s398_s13 = sphi %s426_s13, %s468_s13   ;;  %s394_s12 = sphi %s424_s12, %s467_s12  }
   0x3   : > { %p27_p1 = scmp.ge.s32.totalorder %s25_s15, 2  ;;  %p158_p2 = scmp.lt.s32.totalorder %s402_s14, 3 }
   0x5   : > { %s470_s15 = smov (%p27_p1, %s25_s15), 0  ;;  %p159_p3 = pnand %p348_p0, %p158_p2 }
   0x6   : > { %p191_p4 = scmp.lt.s32.totalorder (!%p159_p3), %s394_s12, 1  ;;  %v351_v1 = vld [vmem:[%s464_s1] ss:$0 sm:$0xff] (!%p159_p3)  ;;  %vm245_vm0 = vcmask (!%p159_p3), 1041408   ;;  %vm246_vm1 = vsmask.f32 (!%p159_p3), 1280 }
   0x7   : > { %162 = sbr.rel (%p159_p3) target bundleno = 34 (0x22), region = 32  ;;  %v352_v6 = vld [vmem:[%s465_s2] ss:$0 sm:$0xff] (!%p159_p3)  ;;  %vm247_vm2 = vmand (!%p159_p3), %vm245_vm0, %vm246_vm1 }
   0xe   : > { %s472_s12 = smov (!%p191_p4, %s394_s12), 1 }
   0xf   : > { %s355_s16 = smul.u32 6, %s472_s12 }
  0x11   : > { %s198_s19 = scalar_lea.vmem %s463_s0, %s355_s16  ;;  %s208_s26 = scalar_lea.vmem %s466_s3, %s355_s16 }
  0x12   : > { %v210_v0 = vld [vmem:[%s198_s19] sm:$0x3]  ;;  %v211_v2 = vld [vmem:[%s198_s19 + $0x2] sm:$0x3]  ;;  %v212_v5 = vld [vmem:[%s198_s19 + $0x4] sm:$0x3] }
  0x13   : > { %v213_v3 = vunpack.c.l.bf16 %v210_v0  ;;  %v214_v4 = vunpack.c.l.bf16 %v211_v2  ;;  %v215_v7 = vunpack.c.l.bf16 %v212_v5  ;;  %v248_v19 = vld [vmem:[%s208_s26] sm:$0x3]  ;;  %v251_v20 = vld [vmem:[%s208_s26 + $0x2] sm:$0x3]  ;;  %v254_v24 = vld [vmem:[%s208_s26 + $0x4] sm:$0x3] }
  0x15   : > { %v223_v8 = vmul.f32 %v351_v1, %v213_v3  ;;  %v224_v9 = vmul.f32 %v351_v1, %v214_v4  ;;  %v225_v10 = vmul.f32 %v351_v1, %v215_v7 }
  0x17   : > { %v233_v11 = vadd.f32 %v352_v6, %v223_v8  ;;  %v234_v12 = vadd.f32 %v352_v6, %v224_v9  ;;  %v235_v13 = vadd.f32 %v352_v6, %v225_v10 }
  0x19   : > { %v236_v14 = vmul.f32 0.2, %v233_v11  ;;  %v237_v15 = vmul.f32 0.2, %v234_v12  ;;  %v238_v16 = vmul.f32 0.2, %v235_v13 }
  0x1b   : > { %v239_v17 = vmax.f32 %v233_v11, %v236_v14  ;;  %v240_v18 = vmax.f32 %v234_v12, %v237_v15  ;;  %v241_v21 = vmax.f32 %v235_v13, %v238_v16 }
  0x1d   : > { %v242_v22 = vpack.c.bf16 %v239_v17, %v239_v17  ;;  %v243_v23 = vpack.c.bf16 %v240_v18, %v240_v18  ;;  %v244_v25 = vpack.c.bf16 %v241_v21, %v241_v21 }
  0x1f   : > { %v249_v26 = vsel %vm247_vm2, %v242_v22, %v248_v19  ;;  %v252_v27 = vsel %vm247_vm2, %v243_v23, %v251_v20  ;;  %v255_v28 = vsel %vm247_vm2, %v244_v25, %v254_v24 }
  0x20   : > { %250 = vst [vmem:[%s208_s26] sm:$0x3] %v249_v26  ;;  %253 = vst [vmem:[%s208_s26 + $0x2] sm:$0x3] %v252_v27 }
  0x21   : > { %256 = vst [vmem:[%s208_s26 + $0x4] sm:$0x3] %v255_v28 }
  0x22 PF: > { %s13_s14 = sadd.s32 1, %s402_s14   ;;  %s467_s12 = smov %s398_s13 }
  0x23   : > { %p10_p5 = scmp.ge.s32.totalorder %s13_s14, 4   ;;  %s468_s13 = smov %s470_s15 }
  0x25   :  { %12 = sbr.rel (!%p10_p5) target bundleno = 2 (0x2), region = 62 }

// kernel: _lambda_.18
= control target key start
LH: loop header
LB: loop body
LE: loop exit
PB: predicated region body
PF: predicated region fallthrough
CT: control target
= control target key end

     0   :  { %s5793_s12 = smov 0   ;;  %s5795_s13 = smov 0   ;;  %s6871_s0 = inlined_call_operand.vmem [shape: bf16[2,6,6,64], index: 0, kind: input, shape index: {}]   ;;  %s6872_s1 = inlined_call_operand.vmem [shape: bf16[4,4,64,128], index: 1, kind: input, shape index: {}]   ;;  %s6873_s2 = inlined_call_operand.vmem [shape: f32[1,128], index: 2, kind: input, shape index: {}]   ;;  %s6874_s3 = inlined_call_operand.vmem [shape: bf16[2,3,3,128], index: 3, kind: output, shape index: {}]  }
   0x1   :  { %s5797_s14 = smov 0  }
   0x2 LB: > { %s28_s15 = sadd.s32 1, %s5765_s13  ;;  %p4085_p0 = scmp.ge.s32.totalorder %s5769_s14, 1  ;;  %s5769_s14 = sphi %s5797_s14, %s13_s14   ;;  %s5765_s13 = sphi %s5795_s13, %s6878_s13   ;;  %s5761_s12 = sphi %s5793_s12, %s6877_s12  }
   0x3   : > { %p30_p1 = scmp.ge.s32.totalorder %s28_s15, 2  ;;  %p177_p2 = scmp.lt.s32.totalorder %s5769_s14, 3 }
   0x5   : > { %s6880_s15 = smov (%p30_p1, %s28_s15), 0  ;;  %p178_p3 = pnand %p4085_p0, %p177_p2 }
   0x6   : > { %v5547_v0 = vld [vmem:[%s6872_s1 + $0x20] sm:$0xff] (!%p178_p3)   ;;  %v5771_v1 = vmov (!%p178_p3), 0.0   ;;  %v5549_v3 = vld [vmem:[%s6872_s1 + $0x28] sm:$0xff] (!%p178_p3)   ;;  %vm5772_vm0 = vmmov (!%p178_p3), 0   ;;  %p215_p4 = scmp.lt.s32.totalorder (!%p178_p3), %s5761_s12, 1  ;;  %v5551_v5 = vld [vmem:[%s6872_s1 + $0x30] sm:$0xff] (!%p178_p3)  }
   0x7   : > { %181 = sbr.rel (%p178_p3) target bundleno = 617 (0x269), region = 32  ;;  %4943 = vmatprep.subr.bf16.mxu0 (!%p178_p3), %v5771_v1  ;;  %4955 = vmatprep.subr.bf16.mxu1 (!%p178_p3), %v5771_v1  ;;  %v5548_v2 = vld [vmem:[%s6872_s1] sm:$0xff] (!%p178_p3)   ;;  %v5550_v4 = vld [vmem:[%s6872_s1 + $0x8] sm:$0xff] (!%p178_p3)   ;;  %v5552_v6 = vld [vmem:[%s6872_s1 + $0x10] sm:$0xff] (!%p178_p3)   ;;  %vm298_vm1 = vcmask (!%p178_p3), 523264   ;;  %vm1542_vm2 = vcmask (!%p178_p3), 1041408  }
   0x8   : > { %4944 = vmatpush3.bf16.msra.mxu0 (!%p178_p3), %v5547_v0  ;;  %4951 = vmatprep.mubr.msk.bf16.mxu0 (!%p178_p3), %vm5772_vm0, %v5771_v1  ;;  %v5553_v8 = vld [vmem:[%s6872_s1 + $0x38] sm:$0xff] (!%p178_p3)   ;;  %v5556_v14 = vld [vmem:[%s6872_s1 + $0x40] sm:$0xff] (!%p178_p3)   ;;  %v5558_v17 = vld [vmem:[%s6872_s1 + $0x48] sm:$0xff] (!%p178_p3)   ;;  %vm1543_vm3 = vsmask.f32 (!%p178_p3), 1280 }
   0x9   : > { %4956 = vmatpush3.bf16.msra.mxu1 (!%p178_p3), %v5548_v2  ;;  %4945 = vmatprep.subr.bf16.mxu0 (!%p178_p3), %v5771_v1  ;;  %v5554_v10 = vld [vmem:[%s6872_s1 + $0x18] sm:$0xff] (!%p178_p3)   ;;  %v5557_v15 = vld [vmem:[%s6872_s1 + $0x60] sm:$0xff] (!%p178_p3)   ;;  %v5559_v18 = vld [vmem:[%s6872_s1 + $0x68] sm:$0xff] (!%p178_p3)  }
   0xa   : > { %4957 = vmatprep.subr.bf16.mxu1 (!%p178_p3), %v5771_v1  ;;  %4963 = vmatprep.mubr.msk.bf16.mxu1 (!%p178_p3), %vm5772_vm0, %v5771_v1  ;;  %v5560_v19 = vld [vmem:[%s6872_s1 + $0x50] sm:$0xff] (!%p178_p3)   ;;  %v5562_v23 = vld [vmem:[%s6872_s1 + $0x58] sm:$0xff] (!%p178_p3)   ;;  %v5564_v25 = vld [vmem:[%s6872_s1 + $0x80] sm:$0xff] (!%p178_p3)  }
   0xb   : > { %v5561_v20 = vld [vmem:[%s6872_s1 + $0x70] sm:$0xff] (!%p178_p3)   ;;  %v5563_v24 = vld [vmem:[%s6872_s1 + $0x78] sm:$0xff] (!%p178_p3)   ;;  %v5565_v28 = vld [vmem:[%s6872_s1 + $0xa0] sm:$0xff] (!%p178_p3)  }
   0xc   : > { %4946 = vmatpush3.bf16.msra.mxu0 (!%p178_p3), %v5549_v3  ;;  %v5566_v30 = vld [vmem:[%s6872_s1 + $0x88] sm:$0xff] (!%p178_p3)   ;;  %v5568_v33 = vld [vmem:[%s6872_s1 + $0x90] sm:$0xff] (!%p178_p3)   ;;  %v5570_v36 = vld [vmem:[%s6872_s1 + $0x98] sm:$0xff] (!%p178_p3)  }
   0xd   : > { %4958 = vmatpush3.bf16.msra.mxu1 (!%p178_p3), %v5550_v4  ;;  %4947 = vmatprep.subr.bf16.mxu0 (!%p178_p3), %v5771_v1  ;;  %v5567_v32 = vld [vmem:[%s6872_s1 + $0xa8] sm:$0xff] (!%p178_p3)   ;;  %v5569_v35 = vld [vmem:[%s6872_s1 + $0xb0] sm:$0xff] (!%p178_p3)   ;;  %v5571_v39 = vld [vmem:[%s6872_s1 + $0xb8] sm:$0xff] (!%p178_p3)  }
   0xe   : > { %s6882_s12 = smov (!%p215_p4, %s5761_s12), 1  ;;  %4959 = vmatprep.subr.bf16.mxu1 %v5771_v1  ;;  %v5573_v41 = vld [vmem:[%s6872_s1 + $0xc0] sm:$0xff]   ;;  %v5575_v43 = vld [vmem:[%s6872_s1 + $0xc8] sm:$0xff]   ;;  %v5577_v45 = vld [vmem:[%s6872_s1 + $0xd0] sm:$0xff]  }
   0xf   : > { %s5519_s26 = smul.u32 24, %s6882_s12  ;;  %v5574_v42 = vld [vmem:[%s6872_s1 + $0xe0] sm:$0xff]   ;;  %v5576_v44 = vld [vmem:[%s6872_s1 + $0xe8] sm:$0xff]   ;;  %v5578_v46 = vld [vmem:[%s6872_s1 + $0xf0] sm:$0xff]  }
  0x10   : > { %4948 = vmatpush3.bf16.msra.mxu0 %v5551_v5  ;;  %v5579_v48 = vld [vmem:[%s6872_s1 + $0xd8] sm:$0xff]   ;;  %v5581_v51 = vld [vmem:[%s6872_s1 + $0x100] sm:$0xff]   ;;  %v5583_v56 = vld [vmem:[%s6872_s1 + $0x108] sm:$0xff]   ;;  %s5520_s29 = smul.u32 6, %s6882_s12 }
  0x11   : > { %s5845_s4 = scalar_lea.vmem %s6871_s0, %s5519_s26  ;;  %4960 = vmatpush3.bf16.msra.mxu1 %v5552_v6  ;;  %4949 = vmatprep.subr.bf16.mxu0 %v5771_v1  ;;  %v5580_v50 = vld [vmem:[%s6872_s1 + $0xf8] sm:$0xff]   ;;  %v5582_v54 = vld [vmem:[%s6872_s1 + $0x120] sm:$0xff]   ;;  %v5584_v58 = vld [vmem:[%s6872_s1 + $0x128] sm:$0xff]  }
  0x12   : > { %v241_v7 = vld [vmem:[%s5845_s4] sm:$0x7]  ;;  %4961 = vmatprep.subr.bf16.mxu1 %v5771_v1  ;;  %v5901_v29 = vld [vmem:[%s5845_s4 + $0x4] sm:$0x7]  ;;  %v5993_v55 = vld [vmem:[%s5845_s4 + $0x8] sm:$0x7]  ;;  %s6733_s9 = scalar_lea.vmem %s6874_s3, %s5520_s29 }
  0x13   : > { %v4096_v9 = vcombine.low %v241_v7, %v241_v7  ;;  %v5912_v31 = vcombine.low %v5901_v29, %v5901_v29  ;;  %v4207_v57 = vcombine.low %v5993_v55, %v5993_v55  ;;  %v5585_v59 = vld [vmem:[%s6872_s1 + $0x110] sm:$0xff]   ;;  %v5587_v62 = vld [vmem:[%s6872_s1 + $0x118] sm:$0xff]   ;;  %v5590_v4 = vld [vmem:[%s6872_s1 + $0x140] sm:$0xff]  }
  0x14   : > { %4950 = vmatpush3.bf16.msra.mxu0 %v5553_v8  ;;  %v5586_v61 = vld [vmem:[%s6872_s1 + $0x130] sm:$0xff]   ;;  %v5588_v2 = vld [vmem:[%s6872_s1 + $0x138] sm:$0xff]   ;;  %v5591_v5 = vld [vmem:[%s6872_s1 + $0x160] sm:$0xff]  }
  0x15   : > { %v268_v11 = vshrl.u32 %v4096_v9, 16  ;;  %v270_v12 = vshll.u32 %v4096_v9, 16  ;;  %4962 = vmatpush3.bf16.msra.mxu1 %v5554_v10  ;;  %4967 = vmatprep.subr.bf16.mxu0 %v5771_v1  ;;  %v418_v26 = vrot.slane %v4096_v9, 1  ;;  %v659_v34 = vshll.u32 %v5912_v31, 16  ;;  %v5592_v6 = vld [vmem:[%s6872_s1 + $0x148] sm:$0xff]   ;;  %v5594_v8 = vld [vmem:[%s6872_s1 + $0x150] sm:$0xff]   ;;  %vm6750_vm4 = vmand %vm1542_vm2, %vm1543_vm3 }
  0x16   : > { %4979 = vmatprep.subr.bf16.mxu1 %v5771_v1  ;;  %v657_v37 = vshrl.u32 %v5912_v31, 16  ;;  %v740_v52 = vrot.slane %v5912_v31, 1  ;;  %v981_v60 = vshll.u32 %v4207_v57, 16  ;;  %v979_v63 = vshrl.u32 %v4207_v57, 16  ;;  %v5595_v9 = vld [vmem:[%s6872_s1 + $0x170] sm:$0xff]   ;;  %v5596_v10 = vld [vmem:[%s6872_s1 + $0x158] sm:$0xff]  }
  0x17   : > { %v272_v13 = vrot.slane %v270_v12, 1  ;;  %v496_v21 = vrot.slane %v268_v11, 1  ;;  %v497_v22 = vrot.slane %v270_v12, 2  ;;  %v661_v38 = vrot.slane %v659_v34, 1  ;;  %v5637_v31 = vld [vmem:[%s6872_s1 + $0x98] sm:$0xff]  }
  0x18   : > { %4964 = vmatmul.mubr.msk.bf16.vlgmr.msra.gmra.mrb[0].mxu1 %vm298_vm1, %v241_v7  ;;  %v818_v47 = vrot.slane %v657_v37, 1  ;;  %v819_v49 = vrot.slane %v659_v34, 2  ;;  %v983_v0 = vrot.slane %v981_v60, 1  ;;  %v5593_v7 = vld [vmem:[%s6872_s1 + $0x168] sm:$0xff]   ;;  %v1141_v12 = vrot.slane %v981_v60, 2  ;;  %v5627_v60 = vld [vmem:[%s6872_s1 + $0x50] sm:$0xff]  }
  0x19   : > { %v273_v16 = vor.u32 %v272_v13, %v268_v11  ;;  %4980 = vmatpush3.bf16.msra.mxu1 %v5557_v15  ;;  %4987 = vmatprep.mubr.msk.bf16.mxu1 %vm5772_vm0, %v5771_v1  ;;  %v498_v27 = vor.u32 %v497_v22, %v496_v21  ;;  %v5941_v40 = vor.u32 %v661_v38, %v657_v37  ;;  %v1140_v11 = vrot.slane %v979_v63, 1  ;;  %v5597_v13 = vld [vmem:[%s6872_s1 + $0x178] sm:$0xff]   ;;  %v5601_v21 = vld [vmem:[%s6872_s1 + $0x1a8] sm:$0xff]   ;;  %v5602_v22 = vld [vmem:[%s6872_s1 + $0x190] sm:$0xff]  }
  0x1a   : > { %4981 = vmatprep.subr.bf16.mxu1 %v5771_v1  ;;  %v5987_v53 = vor.u32 %v819_v49, %v818_v47  ;;  %v6032_v3 = vor.u32 %v983_v0, %v979_v63  ;;  %v6077_v15 = vrot.slane %v4207_v57, 1  ;;  %v5609_v34 = vld [vmem:[%s6872_s1 + $0x1c8] sm:$0xff]   ;;  %v5612_v37 = vld [vmem:[%s6872_s1 + $0x1f0] sm:$0xff]   ;;  %v5613_v38 = vld [vmem:[%s6872_s1 + $0x1d8] sm:$0xff]  }
  0x1b   : > { %4952 = vmatmul.mubr.msk.bf16.vlgmr.msra.gmra.mrb[0].mxu0 %vm298_vm1, %v273_v16  ;;  %v6079_v16 = vor.u32 %v1141_v12, %v1140_v11  ;;  %v5617_v47 = vld [vmem:[%s6872_s1 + $0x28] sm:$0xff]   ;;  %v5619_v49 = vld [vmem:[%s6872_s1 + $0x30] sm:$0xff]   ;;  %v5624_v57 = vld [vmem:[%s6872_s1 + $0x60] sm:$0xff]  }
  0x1c   : > { %4968 = vmatpush3.bf16.msra.mxu0 %v5556_v14  ;;  %4975 = vmatprep.mubr.msk.bf16.mxu0 %vm5772_vm0, %v5771_v1  ;;  %v5598_v14 = vld [vmem:[%s6872_s1 + $0x180] sm:$0xff]   ;;  %v5633_v0 = vld [vmem:[%s6872_s1 + $0x88] sm:$0xff]   ;;  %v5646_v11 = vld [vmem:[%s6872_s1 + $0xf8] sm:$0xff]  }
  0x1d   : > { %4969 = vmatprep.subr.bf16.mxu0 %v5771_v1  ;;  %4982 = vmatpush3.bf16.msra.mxu1 %v5559_v18  ;;  %v6085_v18 = vld [vmem:[%s5845_s4 + $0xc] sm:$0x7]  ;;  %v5632_v63 = vld [vmem:[%s6872_s1 + $0xa0] sm:$0xff]  }
  0x1e   : > { %4983 = vmatprep.subr.bf16.mxu1 %v5771_v1  ;;  %v5647_v12 = vld [vmem:[%s6872_s1 + $0x100] sm:$0xff]  }
  0x20   : > { %4970 = vmatpush3.bf16.msra.mxu0 %v5558_v17  ;;  %v5599_v17 = vld [vmem:[%s6872_s1 + $0x1a0] sm:$0xff]  }
  0x21   : > { %4971 = vmatprep.subr.bf16.mxu0 %v5771_v1  ;;  %4984 = vmatpush3.bf16.msra.mxu1 %v5561_v20  ;;  %v4260_v20 = vcombine.low %v6085_v18, %v6085_v18 }
  0x22   : > { %4985 = vmatprep.subr.bf16.mxu1 %v5771_v1 }
  0x24   : > { %4972 = vmatpush3.bf16.msra.mxu0 %v5560_v19  ;;  %v5600_v19 = vld [vmem:[%s6872_s1 + $0x188] sm:$0xff]  }
  0x25   : > { %4973 = vmatprep.subr.bf16.mxu0 %v5771_v1  ;;  %4986 = vmatpush3.bf16.msra.mxu1 %v5563_v24  ;;  %v5603_v24 = vld [vmem:[%s6872_s1 + $0x1b0] sm:$0xff]  }
  0x26   : > { %5003 = vmatprep.subr.bf16.mxu1 %v5771_v1 }
  0x28   : > { %4974 = vmatpush3.bf16.msra.mxu0 %v5562_v23  ;;  %4988 = vmatmul.mubr.msk.bf16.vlgmr.msra.gmra.mrb[4].mxu1 %vm298_vm1, %v498_v27  ;;  %v1303_v23 = vshll.u32 %v4260_v20, 16 }
  0x29   : > { %4991 = vmatprep.subr.bf16.mxu0 %v5771_v1  ;;  %5004 = vmatpush3.bf16.msra.mxu1 %v5565_v28  ;;  %v5605_v28 = vld [vmem:[%s6872_s1 + $0x1b8] sm:$0xff]  }
  0x2a   : > { %5005 = vmatprep.subr.bf16.mxu1 %v5771_v1  ;;  %5011 = vmatprep.mubr.msk.bf16.mxu1 %vm5772_vm0, %v5771_v1  ;;  %v1305_v27 = vrot.slane %v1303_v23, 1 }
  0x2b   : > { %4976 = vmatmul.mubr.msk.bf16.vlgmr.msra.gmra.mrb[4].mxu0 %vm298_vm1, %v418_v26  ;;  %v1301_v26 = vshrl.u32 %v4260_v20, 16 }
  0x2c   : > { %4992 = vmatpush3.bf16.msra.mxu0 %v5564_v25  ;;  %4999 = vmatprep.mubr.msk.bf16.mxu0 %vm5772_vm0, %v5771_v1  ;;  %v5604_v25 = vld [vmem:[%s6872_s1 + $0x198] sm:$0xff]  }
  0x2d   : > { %4993 = vmatprep.subr.bf16.mxu0 %v5771_v1  ;;  %5006 = vmatpush3.bf16.msra.mxu1 %v5567_v32  ;;  %v5607_v32 = vld [vmem:[%s6872_s1 + $0x1c0] sm:$0xff]  }
  0x2e   : > { %5007 = vmatprep.subr.bf16.mxu1 %v5771_v1 }
  0x30   : > { %4994 = vmatpush3.bf16.msra.mxu0 %v5566_v30  ;;  %v6123_v30 = vor.u32 %v1305_v27, %v1301_v26  ;;  %v5660_v27 = vld [vmem:[%s6872_s1 + $0x170] sm:$0xff]  }
  0x31   : > { %4995 = vmatprep.subr.bf16.mxu0 %v5771_v1  ;;  %5008 = vmatpush3.bf16.msra.mxu1 %v5569_v35  ;;  %v5610_v35 = vld [vmem:[%s6872_s1 + $0x1e8] sm:$0xff]  }
  0x32   : > { %5009 = vmatprep.subr.bf16.mxu1 %v5771_v1 }
  0x34   : > { %4996 = vmatpush3.bf16.msra.mxu0 %v5568_v33  ;;  %v5608_v33 = vld [vmem:[%s6872_s1 + $0x1e0] sm:$0xff]  }
  0x35   : > { %4997 = vmatprep.subr.bf16.mxu0 %v5771_v1  ;;  %5010 = vmatpush3.bf16.msra.mxu1 %v5571_v39  ;;  %v1462_v39 = vrot.slane %v1301_v26, 1  ;;  %v5658_v26 = vld [vmem:[%s6872_s1 + $0x168] sm:$0xff]  }
  0x36   : > { %5027 = vmatprep.subr.bf16.mxu1 %v5771_v1 }
  0x38   : > { %4998 = vmatpush3.bf16.msra.mxu0 %v5570_v36  ;;  %5012 = vmatmul.mubr.msk.bf16.vlgmr.msra.gmra.mrb[8].mxu1 %vm298_vm1, %v5941_v40  ;;  %v5611_v36 = vld [vmem:[%s6872_s1 + $0x1d0] sm:$0xff]  }
  0x39   : > { %5015 = vmatprep.subr.bf16.mxu0 %v5771_v1  ;;  %5028 = vmatpush3.bf16.msra.mxu1 %v5574_v42  ;;  %v5614_v42 = vld [vmem:[%s6872_s1 + $0x1f8] sm:$0xff]  }
  0x3a   : > { %5029 = vmatprep.subr.bf16.mxu1 %v5771_v1  ;;  %5035 = vmatprep.mubr.msk.bf16.mxu1 %vm5772_vm0, %v5771_v1 }
  0x3b   : > { %5000 = vmatmul.mubr.msk.bf16.vlgmr.msra.gmra.mrb[8].mxu0 %vm298_vm1, %v5901_v29 }
  0x3c   : > { %5016 = vmatpush3.bf16.msra.mxu0 %v5573_v41  ;;  %5023 = vmatprep.mubr.msk.bf16.mxu0 %vm5772_vm0, %v5771_v1  ;;  %v1463_v41 = vrot.slane %v1303_v23, 2  ;;  %v5655_v23 = vld [vmem:[%s6872_s1 + $0x140] sm:$0xff]  }
  0x3d   : > { %5017 = vmatprep.subr.bf16.mxu0 %v5771_v1  ;;  %5030 = vmatpush3.bf16.msra.mxu1 %v5576_v44  ;;  %v5615_v44 = vld [vmem:[%s6872_s1 + $0x20] sm:$0xff]  }
  0x3e   : > { %5031 = vmatprep.subr.bf16.mxu1 %v5771_v1 }
  0x40   : > { %5018 = vmatpush3.bf16.msra.mxu0 %v5575_v43  ;;  %v6165_v43 = vrot.slane %v4260_v20, 1  ;;  %v5652_v20 = vld [vmem:[%s6872_s1 + $0x130] sm:$0xff]  }
  0x41   : > { %5019 = vmatprep.subr.bf16.mxu0 %v5771_v1  ;;  %5032 = vmatpush3.bf16.msra.mxu1 %v5578_v46  ;;  %v5616_v46 = vld [vmem:[%s6872_s1] sm:$0xff]  }
  0x42   : > { %5033 = vmatprep.subr.bf16.mxu1 %v5771_v1 }
  0x44   : > { %5020 = vmatpush3.bf16.msra.mxu0 %v5577_v45  ;;  %v6170_v45 = vor.u32 %v1463_v41, %v1462_v39 }
  0x45   : > { %5021 = vmatprep.subr.bf16.mxu0 %v5771_v1  ;;  %5034 = vmatpush3.bf16.msra.mxu1 %v5580_v50  ;;  %v5620_v50 = vld [vmem:[%s6872_s1 + $0x10] sm:$0xff]  }
  0x46   : > { %5051 = vmatprep.subr.bf16.mxu1 %v5771_v1 }
  0x48   : > { %5022 = vmatpush3.bf16.msra.mxu0 %v5579_v48  ;;  %5036 = vmatmul.mubr.msk.bf16.vlgmr.msra.gmra.mrb[12].mxu1 %vm298_vm1, %v5987_v53  ;;  %v5618_v48 = vld [vmem:[%s6872_s1 + $0x8] sm:$0xff]  }
  0x49   : > { %5039 = vmatprep.subr.bf16.mxu0 %v5771_v1  ;;  %5052 = vmatpush3.bf16.msra.mxu1 %v5582_v54  ;;  %v5622_v54 = vld [vmem:[%s6872_s1 + $0x18] sm:$0xff]  }
  0x4a   : > { %5053 = vmatprep.subr.bf16.mxu1 %v5771_v1  ;;  %5059 = vmatprep.mubr.msk.bf16.mxu1 %vm5772_vm0, %v5771_v1 }
  0x4b   : > { %5024 = vmatmul.mubr.msk.bf16.vlgmr.msra.gmra.mrb[12].mxu0 %vm298_vm1, %v740_v52 }
  0x4c   : > { %5040 = vmatpush3.bf16.msra.mxu0 %v5581_v51  ;;  %5047 = vmatprep.mubr.msk.bf16.mxu0 %vm5772_vm0, %v5771_v1  ;;  %v5621_v51 = vld [vmem:[%s6872_s1 + $0x38] sm:$0xff]  }
  0x4d   : > { %5041 = vmatprep.subr.bf16.mxu0 %v5771_v1  ;;  %5054 = vmatpush3.bf16.msra.mxu1 %v5584_v58  ;;  %v5625_v58 = vld [vmem:[%s6872_s1 + $0x48] sm:$0xff]  }
  0x4e   : > { %5055 = vmatprep.subr.bf16.mxu1 %v5771_v1 }
  0x50   : > { %5042 = vmatpush3.bf16.msra.mxu0 %v5583_v56  ;;  %v5623_v56 = vld [vmem:[%s6872_s1 + $0x40] sm:$0xff]  }
  0x51   : > { %5043 = vmatprep.subr.bf16.mxu0 %v5771_v1  ;;  %5056 = vmatpush3.bf16.msra.mxu1 %v5586_v61  ;;  %v5628_v61 = vld [vmem:[%s6872_s1 + $0x70] sm:$0xff]  }
  0x52   : > { %5057 = vmatprep.subr.bf16.mxu1 %v5771_v1 }
  0x54   : > { %5044 = vmatpush3.bf16.msra.mxu0 %v5585_v59  ;;  %v5626_v59 = vld [vmem:[%s6872_s1 + $0x68] sm:$0xff]  }
  0x55   : > { %5045 = vmatprep.subr.bf16.mxu0 %v5771_v1  ;;  %5058 = vmatpush3.bf16.msra.mxu1 %v5588_v2  ;;  %v5634_v2 = vld [vmem:[%s6872_s1 + $0xa8] sm:$0xff]  }
  0x56   : > { %5075 = vmatprep.subr.bf16.mxu1 %v5771_v1 }
  0x58   : > { %5046 = vmatpush3.bf16.msra.mxu0 %v5587_v62  ;;  %5060 = vmatmul.mubr.msk.bf16.vlgmr.msra.gmra.mrb[16].mxu1 %vm298_vm1, %v6032_v3  ;;  %v5631_v62 = vld [vmem:[%s6872_s1 + $0x80] sm:$0xff]  }
  0x59   : > { %5063 = vmatprep.subr.bf16.mxu0 %v5771_v1  ;;  %5076 = vmatpush3.bf16.msra.mxu1 %v5591_v5  ;;  %v5636_v5 = vld [vmem:[%s6872_s1 + $0xb0] sm:$0xff]  }
  0x5a   : > { %5077 = vmatprep.subr.bf16.mxu1 %v5771_v1  ;;  %5083 = vmatprep.mubr.msk.bf16.mxu1 %vm5772_vm0, %v5771_v1 }
  0x5b   : > { %5048 = vmatmul.mubr.msk.bf16.vlgmr.msra.gmra.mrb[16].mxu0 %vm298_vm1, %v5993_v55 }
  0x5c   : > { %5064 = vmatpush3.bf16.msra.mxu0 %v5590_v4  ;;  %5071 = vmatprep.mubr.msk.bf16.mxu0 %vm5772_vm0, %v5771_v1  ;;  %v5635_v4 = vld [vmem:[%s6872_s1 + $0x90] sm:$0xff]  }
  0x5d   : > { %5065 = vmatprep.subr.bf16.mxu0 %v5771_v1  ;;  %5078 = vmatpush3.bf16.msra.mxu1 %v5593_v7  ;;  %v5641_v7 = vld [vmem:[%s6872_s1 + $0xc8] sm:$0xff]  }
  0x5e   : > { %5079 = vmatprep.subr.bf16.mxu1 %v5771_v1 }
  0x60   : > { %5066 = vmatpush3.bf16.msra.mxu0 %v5592_v6  ;;  %v5640_v6 = vld [vmem:[%s6872_s1 + $0xe0] sm:$0xff]  }
  0x61   : > { %5067 = vmatprep.subr.bf16.mxu0 %v5771_v1  ;;  %5080 = vmatpush3.bf16.msra.mxu1 %v5595_v9  ;;  %v5644_v9 = vld [vmem:[%s6872_s1 + $0xf0] sm:$0xff]  }
  0x62   : > { %5081 = vmatprep.subr.bf16.mxu1 %v5771_v1 }
  0x64   : > { %5068 = vmatpush3.bf16.msra.mxu0 %v5594_v8  ;;  %v5642_v8 = vld [vmem:[%s6872_s1 + $0xe8] sm:$0xff]  }
  0x65   : > { %5069 = vmatprep.subr.bf16.mxu0 %v5771_v1  ;;  %5082 = vmatpush3.bf16.msra.mxu1 %v5597_v13  ;;  %v5648_v13 = vld [vmem:[%s6872_s1 + $0x120] sm:$0xff]  }
  0x66   : > { %5099 = vmatprep.subr.bf16.mxu1 %v5771_v1 }
  0x68   : > { %5070 = vmatpush3.bf16.msra.mxu0 %v5596_v10  ;;  %5084 = vmatmul.mubr.msk.bf16.vlgmr.msra.gmra.mrb[20].mxu1 %vm298_vm1, %v6079_v16  ;;  %v5645_v10 = vld [vmem:[%s6872_s1 + $0xd8] sm:$0xff]  }
  0x69   : > { %5087 = vmatprep.subr.bf16.mxu0 %v5771_v1  ;;  %5100 = vmatpush3.bf16.msra.mxu1 %v5599_v17  ;;  %v5650_v17 = vld [vmem:[%s6872_s1 + $0x128] sm:$0xff]  }
  0x6a   : > { %5101 = vmatprep.subr.bf16.mxu1 %v5771_v1  ;;  %5107 = vmatprep.mubr.msk.bf16.mxu1 %vm5772_vm0, %v5771_v1 }
  0x6b   : > { %5072 = vmatmul.mubr.msk.bf16.vlgmr.msra.gmra.mrb[20].mxu0 %vm298_vm1, %v6077_v15 }
  0x6c   : > { %5088 = vmatpush3.bf16.msra.mxu0 %v5598_v14  ;;  %5095 = vmatprep.mubr.msk.bf16.mxu0 %vm5772_vm0, %v5771_v1  ;;  %v5649_v14 = vld [vmem:[%s6872_s1 + $0x108] sm:$0xff]  }
  0x6d   : > { %5089 = vmatprep.subr.bf16.mxu0 %v5771_v1  ;;  %5102 = vmatpush3.bf16.msra.mxu1 %v5601_v21  ;;  %v5653_v21 = vld [vmem:[%s6872_s1 + $0x118] sm:$0xff]  }
  0x6e   : > { %5103 = vmatprep.subr.bf16.mxu1 %v5771_v1 }
  0x70   : > { %5090 = vmatpush3.bf16.msra.mxu0 %v5600_v19  ;;  %v5651_v19 = vld [vmem:[%s6872_s1 + $0x110] sm:$0xff]  }
  0x71   : > { %5091 = vmatprep.subr.bf16.mxu0 %v5771_v1  ;;  %5104 = vmatpush3.bf16.msra.mxu1 %v5603_v24  ;;  %v5656_v24 = vld [vmem:[%s6872_s1 + $0x160] sm:$0xff]  }
  0x72   : > { %5105 = vmatprep.subr.bf16.mxu1 %v5771_v1 }
  0x74   : > { %5092 = vmatpush3.bf16.msra.mxu0 %v5602_v22  ;;  %v5654_v22 = vld [vmem:[%s6872_s1 + $0x138] sm:$0xff]  }
  0x75   : > { %5093 = vmatprep.subr.bf16.mxu0 %v5771_v1  ;;  %5106 = vmatpush3.bf16.msra.mxu1 %v5605_v28  ;;  %v5661_v28 = vld [vmem:[%s6872_s1 + $0x158] sm:$0xff]  }
  0x76   : > { %5123 = vmatprep.subr.bf16.mxu1 %v5771_v1 }
  0x78   : > { %5094 = vmatpush3.bf16.msra.mxu0 %v5604_v25  ;;  %5108 = vmatmul.mubr.msk.bf16.vlgmr.msra.gmra.mrb[24].mxu1 %vm298_vm1, %v6123_v30  ;;  %v5657_v25 = vld [vmem:[%s6872_s1 + $0x148] sm:$0xff]  }
  0x79   : > { %5111 = vmatprep.subr.bf16.mxu0 %v5771_v1  ;;  %5124 = vmatpush3.bf16.msra.mxu1 %v5608_v33  ;;  %v5663_v33 = vld [vmem:[%s6872_s1 + $0x180] sm:$0xff]  }
  0x7a   : > { %5125 = vmatprep.subr.bf16.mxu1 %v5771_v1  ;;  %5131 = vmatprep.mubr.msk.bf16.mxu1 %vm5772_vm0, %v5771_v1 }
  0x7b   : > { %5096 = vmatmul.mubr.msk.bf16.vlgmr.msra.gmra.mrb[24].mxu0 %vm298_vm1, %v6085_v18 }
  0x7c   : > { %5112 = vmatpush3.bf16.msra.mxu0 %v5607_v32  ;;  %5119 = vmatprep.mubr.msk.bf16.mxu0 %vm5772_vm0, %v5771_v1  ;;  %v5662_v32 = vld [vmem:[%s6872_s1 + $0x178] sm:$0xff]  }
  0x7d   : > { %5113 = vmatprep.subr.bf16.mxu0 %v5771_v1  ;;  %5126 = vmatpush3.bf16.msra.mxu1 %v5610_v35  ;;  %v6417_v35 = vld [vmem:[%s5845_s4 + $0x10] sm:$0x7] }
  0x7e   : > { %5127 = vmatprep.subr.bf16.mxu1 %v5771_v1 }
  0x80   : > { %5114 = vmatpush3.bf16.msra.mxu0 %v5609_v34  ;;  %v5664_v34 = vld [vmem:[%s6872_s1 + $0x1a0] sm:$0xff]  }
  0x81   : > { %5115 = vmatprep.subr.bf16.mxu0 %v5771_v1  ;;  %5128 = vmatpush3.bf16.msra.mxu1 %v5612_v37  ;;  %v5665_v37 = vld [vmem:[%s6872_s1 + $0x188] sm:$0xff]  }
  0x82   : > { %5129 = vmatprep.subr.bf16.mxu1 %v5771_v1 }
  0x84   : > { %5116 = vmatpush3.bf16.msra.mxu0 %v5611_v36  ;;  %v6427_v36 = vcombine.low %v6417_v35, %v6417_v35 }
  0x85   : > { %5117 = vmatprep.subr.bf16.mxu0 %v5771_v1  ;;  %5130 = vmatpush3.bf16.msra.mxu1 %v5614_v42 }
  0x86   : > { %5147 = vmatprep.subr.bf16.mxu1 %v5771_v1 }
  0x88   : > { %5118 = vmatpush3.bf16.msra.mxu0 %v5613_v38  ;;  %5132 = vmatmul.mubr.msk.bf16.vlgmr.msra.gmra.mrb[28].mxu1 %vm298_vm1, %v6170_v45  ;;  %v5666_v38 = vld [vmem:[%s6872_s1 + $0x1a8] sm:$0xff]  }
  0x89   : > { %5135 = vmatprep.subr.bf16.mxu0 %v5771_v1  ;;  %5148 = vmatpush3.bf16.msra.mxu1 %v5616_v46 }
  0x8a   : > { %5149 = vmatprep.subr.bf16.mxu1 %v5771_v1  ;;  %5155 = vmatprep.mubr.msk.bf16.mxu1 %vm5772_vm0, %v5771_v1 }
  0x8b   : > { %5120 = vmatmul.mubr.msk.bf16.vlgmr.msra.gmra.mrb[28].mxu0 %vm298_vm1, %v6165_v43 }
  0x8c   : > { %5136 = vmatpush3.bf16.msra.mxu0 %v5615_v44  ;;  %5143 = vmatprep.mubr.msk.bf16.mxu0 %vm5772_vm0, %v5771_v1 }
  0x8d   : > { %5137 = vmatprep.subr.bf16.mxu0 %v5771_v1  ;;  %5150 = vmatpush3.bf16.msra.mxu1 %v5618_v48 }
  0x8e   : > { %5151 = vmatprep.subr.bf16.mxu1 %v5771_v1 }
  0x90   : > { %5138 = vmatpush3.bf16.msra.mxu0 %v5617_v47  ;;  %v2512_v47 = vshll.u32 %v6427_v36, 16 }
  0x91   : > { %5139 = vmatprep.subr.bf16.mxu0 %v5771_v1  ;;  %5152 = vmatpush3.bf16.msra.mxu1 %v5620_v50  ;;  %v5667_v50 = vld [vmem:[%s6872_s1 + $0x190] sm:$0xff]  }
  0x92   : > { %5153 = vmatprep.subr.bf16.mxu1 %v5771_v1 }
  0x94   : > { %5140 = vmatpush3.bf16.msra.mxu0 %v5619_v49 }
  0x95   : > { %5141 = vmatprep.subr.bf16.mxu0 %v5771_v1  ;;  %5154 = vmatpush3.bf16.msra.mxu1 %v5622_v54 }
  0x96   : > { %5171 = vmatprep.subr.bf16.mxu1 %v5771_v1 }
  0x98   : > { %5142 = vmatpush3.bf16.msra.mxu0 %v5621_v51  ;;  %5156 = vmatmul.mubr.msk.bf16.vlgmr.msra.gmra.mrb[32].mxu1 %vm298_vm1, %v5901_v29  ;;  %v5629_v29 = vld [vmem:[%s6872_s1 + $0x58] sm:$0xff]   ;;  %v5668_v51 = vld [vmem:[%s6872_s1 + $0x1b0] sm:$0xff]  }
  0x99   : > { %5159 = vmatprep.subr.bf16.mxu0 %v5771_v1  ;;  %5172 = vmatpush3.bf16.msra.mxu1 %v5624_v57  ;;  %v2510_v57 = vshrl.u32 %v6427_v36, 16 }
  0x9a   : > { %5173 = vmatprep.subr.bf16.mxu1 %v5771_v1  ;;  %5179 = vmatprep.mubr.msk.bf16.mxu1 %vm5772_vm0, %v5771_v1 }
  0x9b   : > { %5144 = vmatmul.mubr.msk.bf16.vlgmr.msra.gmra.mrb[32].mxu0 %vm298_vm1, %v5941_v40  ;;  %v5630_v40 = vld [vmem:[%s6872_s1 + $0x78] sm:$0xff]  }
  0x9c   : > { %5160 = vmatpush3.bf16.msra.mxu0 %v5623_v56  ;;  %5167 = vmatprep.mubr.msk.bf16.mxu0 %vm5772_vm0, %v5771_v1 }
  0x9d   : > { %5161 = vmatprep.subr.bf16.mxu0 %v5771_v1  ;;  %5174 = vmatpush3.bf16.msra.mxu1 %v5626_v59  ;;  %v5669_v59 = vld [vmem:[%s6872_s1 + $0x198] sm:$0xff]  }
  0x9e   : > { %5175 = vmatprep.subr.bf16.mxu1 %v5771_v1 }
  0xa0   : > { %5162 = vmatpush3.bf16.msra.mxu0 %v5625_v58  ;;  %v2514_v58 = vrot.slane %v2512_v47, 1 }
  0xa1   : > { %5163 = vmatprep.subr.bf16.mxu0 %v5771_v1  ;;  %5176 = vmatpush3.bf16.msra.mxu1 %v5628_v61 }
  0xa2   : > { %5177 = vmatprep.subr.bf16.mxu1 %v5771_v1  ;;  %v6459_v61 = vor.u32 %v2514_v58, %v2510_v57  ;;  %v5692_v58 = vld [vmem:[%s6872_s1 + $0x50] sm:$0xff]  }
  0xa4   : > { %5164 = vmatpush3.bf16.msra.mxu0 %v5627_v60  ;;  %v5670_v60 = vld [vmem:[%s6872_s1 + $0x1b8] sm:$0xff]  }
  0xa5   : > { %5165 = vmatprep.subr.bf16.mxu0 %v5771_v1  ;;  %5178 = vmatpush3.bf16.msra.mxu1 %v5630_v40  ;;  %v5673_v40 = vld [vmem:[%s6872_s1 + $0x1e0] sm:$0xff]  }
  0xa6   : > { %5195 = vmatprep.subr.bf16.mxu1 %v5771_v1 }
  0xa8   : > { %5166 = vmatpush3.bf16.msra.mxu0 %v5629_v29  ;;  %5180 = vmatmul.mubr.msk.bf16.vlgmr.msra.gmra.mrb[36].mxu1 %vm298_vm1, %v5987_v53  ;;  %v5639_v53 = vld [vmem:[%s6872_s1 + $0xc0] sm:$0xff]  }
  0xa9   : > { %5183 = vmatprep.subr.bf16.mxu0 %v5771_v1  ;;  %5196 = vmatpush3.bf16.msra.mxu1 %v5632_v63  ;;  %v5672_v29 = vld [vmem:[%s6872_s1 + $0x1c0] sm:$0xff]   ;;  %v5675_v63 = vld [vmem:[%s6872_s1 + $0x1e8] sm:$0xff]  }
  0xaa   : > { %5197 = vmatprep.subr.bf16.mxu1 %v5771_v1  ;;  %5203 = vmatprep.mubr.msk.bf16.mxu1 %vm5772_vm0, %v5771_v1 }
  0xab   : > { %5168 = vmatmul.mubr.msk.bf16.vlgmr.msra.gmra.mrb[36].mxu0 %vm298_vm1, %v740_v52  ;;  %v5638_v52 = vld [vmem:[%s6872_s1 + $0xb8] sm:$0xff]  }
  0xac   : > { %5184 = vmatpush3.bf16.msra.mxu0 %v5631_v62  ;;  %5191 = vmatprep.mubr.msk.bf16.mxu0 %vm5772_vm0, %v5771_v1  ;;  %v5674_v62 = vld [vmem:[%s6872_s1 + $0x1c8] sm:$0xff]  }
  0xad   : > { %5185 = vmatprep.subr.bf16.mxu0 %v5771_v1  ;;  %5198 = vmatpush3.bf16.msra.mxu1 %v5634_v2 }
  0xae   : > { %5199 = vmatprep.subr.bf16.mxu1 %v5771_v1 }
  0xb0   : > { %5186 = vmatpush3.bf16.msra.mxu0 %v5633_v0 }
  0xb1   : > { %5187 = vmatprep.subr.bf16.mxu0 %v5771_v1  ;;  %5200 = vmatpush3.bf16.msra.mxu1 %v5636_v5 }
  0xb2   : > { %5201 = vmatprep.subr.bf16.mxu1 %v5771_v1 }
  0xb4   : > { %5188 = vmatpush3.bf16.msra.mxu0 %v5635_v4 }
  0xb5   : > { %5189 = vmatprep.subr.bf16.mxu0 %v5771_v1  ;;  %5202 = vmatpush3.bf16.msra.mxu1 %v5638_v52 }
  0xb6   : > { %5219 = vmatprep.subr.bf16.mxu1 %v5771_v1 }
  0xb8   : > { %5190 = vmatpush3.bf16.msra.mxu0 %v5637_v31  ;;  %5204 = vmatmul.mubr.msk.bf16.vlgmr.msra.gmra.mrb[40].mxu1 %vm298_vm1, %v6032_v3 }
  0xb9   : > { %5207 = vmatprep.subr.bf16.mxu0 %v5771_v1  ;;  %5220 = vmatpush3.bf16.msra.mxu1 %v5640_v6  ;;  %v5676_v6 = vld [vmem:[%s6872_s1 + $0x1d0] sm:$0xff]  }
  0xba   : > { %5221 = vmatprep.subr.bf16.mxu1 %v5771_v1  ;;  %5227 = vmatprep.mubr.msk.bf16.mxu1 %vm5772_vm0, %v5771_v1 }
  0xbb   : > { %5192 = vmatmul.mubr.msk.bf16.vlgmr.msra.gmra.mrb[40].mxu0 %vm298_vm1, %v5993_v55  ;;  %v5643_v55 = vld [vmem:[%s6872_s1 + $0xd0] sm:$0xff]  }
  0xbc   : > { %5208 = vmatpush3.bf16.msra.mxu0 %v5639_v53  ;;  %5215 = vmatprep.mubr.msk.bf16.mxu0 %vm5772_vm0, %v5771_v1 }
  0xbd   : > { %5209 = vmatprep.subr.bf16.mxu0 %v5771_v1  ;;  %5222 = vmatpush3.bf16.msra.mxu1 %v5642_v8 }
  0xbe   : > { %5223 = vmatprep.subr.bf16.mxu1 %v5771_v1 }
  0xc0   : > { %5210 = vmatpush3.bf16.msra.mxu0 %v5641_v7  ;;  %v5677_v7 = vld [vmem:[%s6872_s1 + $0x1f0] sm:$0xff]  }
  0xc1   : > { %5211 = vmatprep.subr.bf16.mxu0 %v5771_v1  ;;  %5224 = vmatpush3.bf16.msra.mxu1 %v5644_v9 }
  0xc2   : > { %5225 = vmatprep.subr.bf16.mxu1 %v5771_v1 }
  0xc4   : > { %5212 = vmatpush3.bf16.msra.mxu0 %v5643_v55 }
  0xc5   : > { %5213 = vmatprep.subr.bf16.mxu0 %v5771_v1  ;;  %5226 = vmatpush3.bf16.msra.mxu1 %v5646_v11  ;;  %v2670_v11 = vrot.slane %v2512_v47, 2  ;;  %v5690_v47 = vld [vmem:[%s6872_s1 + $0x48] sm:$0xff]  }
  0xc6   : > { %5243 = vmatprep.subr.bf16.mxu1 %v5771_v1 }
  0xc8   : > { %5214 = vmatpush3.bf16.msra.mxu0 %v5645_v10  ;;  %5228 = vmatmul.mubr.msk.bf16.vlgmr.msra.gmra.mrb[44].mxu1 %vm298_vm1, %v6079_v16  ;;  %v2669_v10 = vrot.slane %v2510_v57, 1 }
  0xc9   : > { %5231 = vmatprep.subr.bf16.mxu0 %v5771_v1  ;;  %5244 = vmatpush3.bf16.msra.mxu1 %v5648_v13  ;;  %v5679_v13 = vld [vmem:[%s6872_s1 + $0x1f8] sm:$0xff]  }
  0xca   : > { %5245 = vmatprep.subr.bf16.mxu1 %v5771_v1  ;;  %5251 = vmatprep.mubr.msk.bf16.mxu1 %vm5772_vm0, %v5771_v1 }
  0xcb   : > { %5216 = vmatmul.mubr.msk.bf16.vlgmr.msra.gmra.mrb[44].mxu0 %vm298_vm1, %v6077_v15 }
  0xcc   : > { %5232 = vmatpush3.bf16.msra.mxu0 %v5647_v12  ;;  %5239 = vmatprep.mubr.msk.bf16.mxu0 %vm5772_vm0, %v5771_v1  ;;  %v5678_v12 = vld [vmem:[%s6872_s1 + $0x1d8] sm:$0xff]  }
  0xcd   : > { %5233 = vmatprep.subr.bf16.mxu0 %v5771_v1  ;;  %5246 = vmatpush3.bf16.msra.mxu1 %v5650_v17  ;;  %v6502_v17 = vor.u32 %v2670_v11, %v2669_v10 }
  0xce   : > { %5247 = vmatprep.subr.bf16.mxu1 %v5771_v1 }
  0xd0   : > { %5234 = vmatpush3.bf16.msra.mxu0 %v5649_v14  ;;  %v2592_v14 = vrot.slane %v6427_v36, 1 }
  0xd1   : > { %5235 = vmatprep.subr.bf16.mxu0 %v5771_v1  ;;  %5248 = vmatpush3.bf16.msra.mxu1 %v5652_v20  ;;  %v5681_v20 = vld [vmem:[%s6872_s1] sm:$0xff]  }
  0xd2   : > { %5249 = vmatprep.subr.bf16.mxu1 %v5771_v1 }
  0xd4   : > { %5236 = vmatpush3.bf16.msra.mxu0 %v5651_v19  ;;  %v5680_v19 = vld [vmem:[%s6872_s1 + $0x20] sm:$0xff]  }
  0xd5   : > { %5237 = vmatprep.subr.bf16.mxu0 %v5771_v1  ;;  %5250 = vmatpush3.bf16.msra.mxu1 %v5654_v22  ;;  %v5683_v22 = vld [vmem:[%s6872_s1 + $0x8] sm:$0xff]  }
  0xd6   : > { %5267 = vmatprep.subr.bf16.mxu1 %v5771_v1 }
  0xd8   : > { %5238 = vmatpush3.bf16.msra.mxu0 %v5653_v21  ;;  %5252 = vmatmul.mubr.msk.bf16.vlgmr.msra.gmra.mrb[48].mxu1 %vm298_vm1, %v6123_v30  ;;  %v5682_v21 = vld [vmem:[%s6872_s1 + $0x28] sm:$0xff]  }
  0xd9   : > { %5255 = vmatprep.subr.bf16.mxu0 %v5771_v1  ;;  %5268 = vmatpush3.bf16.msra.mxu1 %v5656_v24 }
  0xda   : > { %5269 = vmatprep.subr.bf16.mxu1 %v5771_v1  ;;  %5275 = vmatprep.mubr.msk.bf16.mxu1 %vm5772_vm0, %v5771_v1 }
  0xdb   : > { %5240 = vmatmul.mubr.msk.bf16.vlgmr.msra.gmra.mrb[48].mxu0 %vm298_vm1, %v6085_v18  ;;  %v5659_v18 = vld [vmem:[%s6872_s1 + $0x150] sm:$0xff]  }
  0xdc   : > { %5256 = vmatpush3.bf16.msra.mxu0 %v5655_v23  ;;  %5263 = vmatprep.mubr.msk.bf16.mxu0 %vm5772_vm0, %v5771_v1 }
  0xdd   : > { %5257 = vmatprep.subr.bf16.mxu0 %v5771_v1  ;;  %5270 = vmatpush3.bf16.msra.mxu1 %v5658_v26 }
  0xde   : > { %5271 = vmatprep.subr.bf16.mxu1 %v5771_v1 }
  0xe0   : > { %5258 = vmatpush3.bf16.msra.mxu0 %v5657_v25 }
  0xe1   : > { %5259 = vmatprep.subr.bf16.mxu0 %v5771_v1  ;;  %5272 = vmatpush3.bf16.msra.mxu1 %v5660_v27 }
  0xe2   : > { %5273 = vmatprep.subr.bf16.mxu1 %v5771_v1 }
  0xe4   : > { %5260 = vmatpush3.bf16.msra.mxu0 %v5659_v18 }
  0xe5   : > { %5261 = vmatprep.subr.bf16.mxu0 %v5771_v1  ;;  %5274 = vmatpush3.bf16.msra.mxu1 %v5662_v32  ;;  %v5684_v32 = vld [vmem:[%s6872_s1 + $0x30] sm:$0xff]  }
  0xe6   : > { %5291 = vmatprep.subr.bf16.mxu1 %v5771_v1 }
  0xe8   : > { %5262 = vmatpush3.bf16.msra.mxu0 %v5661_v28  ;;  %5276 = vmatmul.mubr.msk.bf16.vlgmr.msra.gmra.mrb[52].mxu1 %vm298_vm1, %v6170_v45 }
  0xe9   : > { %5279 = vmatprep.subr.bf16.mxu0 %v5771_v1  ;;  %5292 = vmatpush3.bf16.msra.mxu1 %v5664_v34 }
  0xea   : > { %5293 = vmatprep.subr.bf16.mxu1 %v5771_v1  ;;  %5299 = vmatprep.mubr.msk.bf16.mxu1 %vm5772_vm0, %v5771_v1 }
  0xeb   : > { %5264 = vmatmul.mubr.msk.bf16.vlgmr.msra.gmra.mrb[52].mxu0 %vm298_vm1, %v6165_v43  ;;  %v403_v41 = vpop.f32.mrb[0].mxu1 }
  0xec   : > { %5280 = vmatpush3.bf16.msra.mxu0 %v5663_v33  ;;  %5287 = vmatprep.mubr.msk.bf16.mxu0 %vm5772_vm0, %v5771_v1  ;;  %v4965_v46 = vpop.f32.mrb[1].mxu1  ;;  %v5685_v33 = vld [vmem:[%s6872_s1 + $0x10] sm:$0xff]  }
  0xed   : > { %5281 = vmatprep.subr.bf16.mxu0 %v5771_v1  ;;  %v406_v49 = vpop.f32.mrb[2].mxu1  ;;  %5294 = vmatpush3.bf16.msra.mxu1 %v5666_v38  ;;  %v5745_v46 = vld [vmem:[%s5845_s4 + $0x8] sm:$0x7] }
  0xee   : > { %v336_v39 = vpop.f32.mrb[0].mxu0  ;;  %v4966_v56 = vpop.f32.mrb[3].mxu1  ;;  %5295 = vmatprep.subr.bf16.mxu1 %v5771_v1 }
  0xef   : > { %v404_v42 = vadd.f32 %v403_v41, %v336_v39  ;;  %v4953_v44 = vpop.f32.mrb[1].mxu0  ;;  %v5686_v39 = vld [vmem:[%s6872_s1 + $0x38] sm:$0xff]  }
  0xf0   : > { %v339_v48 = vpop.f32.mrb[2].mxu0  ;;  %5282 = vmatpush3.bf16.msra.mxu0 %v5665_v37  ;;  %v5687_v41 = vld [vmem:[%s6872_s1 + $0x18] sm:$0xff]   ;;  %v5689_v44 = vld [vmem:[%s6872_s1 + $0x60] sm:$0xff]  }
  0xf1   : > { %v4954_v54 = vpop.f32.mrb[3].mxu0  ;;  %5283 = vmatprep.subr.bf16.mxu0 %v5771_v1  ;;  %5296 = vmatpush3.bf16.msra.mxu1 %v5668_v51  ;;  %v5691_v48 = vld [vmem:[%s6872_s1 + $0x68] sm:$0xff]  }
  0xf2   : > { %5297 = vmatprep.subr.bf16.mxu1 %v5771_v1 }
  0xf4   : > { %5284 = vmatpush3.bf16.msra.mxu0 %v5667_v50 }
  0xf5   : > { %5285 = vmatprep.subr.bf16.mxu0 %v5771_v1  ;;  %5298 = vmatpush3.bf16.msra.mxu1 %v5670_v60 }
  0xf6   : > { %5315 = vmatprep.subr.bf16.mxu1 %v5771_v1 }
  0xf8   : > { %5286 = vmatpush3.bf16.msra.mxu0 %v5669_v59  ;;  %5300 = vmatmul.mubr.msk.bf16.vlgmr.msra.gmra.mrb[56].mxu1 %vm298_vm1, %v6459_v61  ;;  %v5693_v59 = vld [vmem:[%s6872_s1 + $0x70] sm:$0xff]  }
  0xf9   : > { %5303 = vmatprep.subr.bf16.mxu0 %v5771_v1  ;;  %5316 = vmatpush3.bf16.msra.mxu1 %v5673_v40 }
  0xfa   : > { %5317 = vmatprep.subr.bf16.mxu1 %v5771_v1  ;;  %5323 = vmatprep.mubr.msk.bf16.mxu1 %vm5772_vm0, %v5771_v1 }
  0xfb   : > { %5288 = vmatmul.mubr.msk.bf16.vlgmr.msra.gmra.mrb[56].mxu0 %vm298_vm1, %v6417_v35  ;;  %v560_v2 = vpop.f32.mrb[4].mxu1 }
  0xfc   : > { %5304 = vmatpush3.bf16.msra.mxu0 %v5672_v29  ;;  %5311 = vmatprep.mubr.msk.bf16.mxu0 %vm5772_vm0, %v5771_v1  ;;  %v4989_v31 = vpop.f32.mrb[5].mxu1 }
  0xfd   : > { %5305 = vmatprep.subr.bf16.mxu0 %v5771_v1  ;;  %v563_v53 = vpop.f32.mrb[6].mxu1  ;;  %5318 = vmatpush3.bf16.msra.mxu1 %v5675_v63  ;;  %v5695_v63 = vld [vmem:[%s6872_s1 + $0x78] sm:$0xff]  }
  0xfe   : > { %v480_v0 = vpop.f32.mrb[4].mxu0  ;;  %v4990_v9 = vpop.f32.mrb[7].mxu1  ;;  %5319 = vmatprep.subr.bf16.mxu1 %v5771_v1 }
  0xff   : > { %v486_v4 = vadd.f32 %v480_v0, %v404_v42  ;;  %v4977_v5 = vpop.f32.mrb[5].mxu0  ;;  %v5688_v42 = vld [vmem:[%s6872_s1 + $0x40] sm:$0xff]  }
 0x100   : > { %v483_v52 = vpop.f32.mrb[6].mxu0  ;;  %5306 = vmatpush3.bf16.msra.mxu0 %v5674_v62  ;;  %v5694_v62 = vld [vmem:[%s6872_s1 + $0x58] sm:$0xff]   ;;  %v5696_v0 = vld [vmem:[%s6872_s1 + $0x80] sm:$0xff]   ;;  %v5699_v5 = vld [vmem:[%s6872_s1 + $0xa8] sm:$0xff]  }
 0x101   : > { %v566_v8 = vadd.f32 %v560_v2, %v486_v4  ;;  %v4978_v55 = vpop.f32.mrb[7].mxu0  ;;  %5307 = vmatprep.subr.bf16.mxu0 %v5771_v1  ;;  %5320 = vmatpush3.bf16.msra.mxu1 %v5677_v7  ;;  %v5697_v2 = vld [vmem:[%s6872_s1 + $0xa0] sm:$0xff]   ;;  %v5698_v4 = vld [vmem:[%s6872_s1 + $0x88] sm:$0xff]  }
 0x102   : > { %5321 = vmatprep.subr.bf16.mxu1 %v5771_v1  ;;  %v5701_v55 = vld [vmem:[%s6872_s1 + $0xb0] sm:$0xff]  }
 0x104   : > { %5308 = vmatpush3.bf16.msra.mxu0 %v5676_v6 }
 0x105   : > { %5309 = vmatprep.subr.bf16.mxu0 %v5771_v1  ;;  %5322 = vmatpush3.bf16.msra.mxu1 %v5679_v13  ;;  %v5703_v13 = vld [vmem:[%s6872_s1 + $0xb8] sm:$0xff]  }
 0x106   : > { %5339 = vmatprep.subr.bf16.mxu1 %v5771_v1 }
 0x108   : > { %5310 = vmatpush3.bf16.msra.mxu0 %v5678_v12  ;;  %5324 = vmatmul.mubr.msk.bf16.vlgmr.msra.gmra.mrb[60].mxu1 %vm298_vm1, %v6502_v17  ;;  %v5702_v12 = vld [vmem:[%s6872_s1 + $0x98] sm:$0xff]  }
 0x109   : > { %5327 = vmatprep.subr.bf16.mxu0 %v5771_v1  ;;  %5340 = vmatpush3.bf16.msra.mxu1 %v5681_v20  ;;  %v5705_v20 = vld [vmem:[%s6872_s1 + $0xe0] sm:$0xff]  }
 0x10a   : > { %5341 = vmatprep.subr.bf16.mxu1 %v5771_v1  ;;  %5347 = vmatprep.mubr.msk.bf16.mxu1 %vm5772_vm0, %v5771_v1 }
 0x10b   : > { %5312 = vmatmul.mubr.msk.bf16.vlgmr.msra.gmra.mrb[60].mxu0 %vm298_vm1, %v2592_v14  ;;  %v724_v24 = vpop.f32.mrb[8].mxu1 }
 0x10c   : > { %5328 = vmatpush3.bf16.msra.mxu0 %v5680_v19  ;;  %5335 = vmatprep.mubr.msk.bf16.mxu0 %vm5772_vm0, %v5771_v1  ;;  %v5013_v18 = vpop.f32.mrb[9].mxu1  ;;  %v5704_v19 = vld [vmem:[%s6872_s1 + $0xc0] sm:$0xff]  }
 0x10d   : > { %5329 = vmatprep.subr.bf16.mxu0 %v5771_v1  ;;  %v727_v28 = vpop.f32.mrb[10].mxu1  ;;  %5342 = vmatpush3.bf16.msra.mxu1 %v5683_v22  ;;  %v5706_v22 = vld [vmem:[%s6872_s1 + $0xc8] sm:$0xff]  }
 0x10e   : > { %v637_v23 = vpop.f32.mrb[8].mxu0  ;;  %v5014_v38 = vpop.f32.mrb[11].mxu1  ;;  %5343 = vmatprep.subr.bf16.mxu1 %v5771_v1 }
 0x10f   : > { %v643_v25 = vadd.f32 %v637_v23, %v566_v8  ;;  %v5001_v26 = vpop.f32.mrb[9].mxu0  ;;  %v5700_v8 = vld [vmem:[%s6872_s1 + $0x90] sm:$0xff]   ;;  %v5707_v23 = vld [vmem:[%s6872_s1 + $0xe8] sm:$0xff]  }
 0x110   : > { %v640_v27 = vpop.f32.mrb[10].mxu0  ;;  %5330 = vmatpush3.bf16.msra.mxu0 %v5682_v21  ;;  %v5746_v21 = vld [vmem:[%s5845_s4 + $0xc] sm:$0x7] }
 0x111   : > { %v730_v34 = vadd.f32 %v724_v24, %v643_v25  ;;  %v5002_v37 = vpop.f32.mrb[11].mxu0  ;;  %5331 = vmatprep.subr.bf16.mxu0 %v5771_v1  ;;  %5344 = vmatpush3.bf16.msra.mxu1 %v5685_v33  ;;  %v5709_v33 = vld [vmem:[%s6872_s1 + $0xf0] sm:$0xff]  }
 0x112   : > { %5345 = vmatprep.subr.bf16.mxu1 %v5771_v1 }
 0x114   : > { %5332 = vmatpush3.bf16.msra.mxu0 %v5684_v32  ;;  %v5708_v32 = vld [vmem:[%s6872_s1 + $0xd0] sm:$0xff]  }
 0x115   : > { %5333 = vmatprep.subr.bf16.mxu0 %v5771_v1  ;;  %5346 = vmatpush3.bf16.msra.mxu1 %v5687_v41  ;;  %v5711_v41 = vld [vmem:[%s6872_s1 + $0xf8] sm:$0xff]  }
 0x116   : > { %5363 = vmatprep.subr.bf16.mxu1 %v5771_v1 }
 0x118   : > { %5334 = vmatpush3.bf16.msra.mxu0 %v5686_v39  ;;  %5348 = vmatmul.mubr.msk.bf16.vlgmr.msra.gmra.mrb[64].mxu1 %vm298_vm1, %v5745_v46  ;;  %v5710_v39 = vld [vmem:[%s6872_s1 + $0xd8] sm:$0xff]   ;;  %v5714_v46 = vld [vmem:[%s6872_s1 + $0x108] sm:$0xff]  }
 0x119   : > { %5351 = vmatprep.subr.bf16.mxu0 %v5771_v1  ;;  %5364 = vmatpush3.bf16.msra.mxu1 %v5689_v44  ;;  %v5713_v44 = vld [vmem:[%s6872_s1 + $0x120] sm:$0xff]  }
 0x11a   : > { %5365 = vmatprep.subr.bf16.mxu1 %v5771_v1  ;;  %5371 = vmatprep.mubr.msk.bf16.mxu1 %vm5772_vm0, %v5771_v1 }
 0x11b   : > { %5336 = vmatmul.mubr.msk.bf16.vlgmr.msra.gmra.mrb[64].mxu0 %vm298_vm1, %v6032_v3  ;;  %v882_v50 = vpop.f32.mrb[12].mxu1 }
 0x11c   : > { %5352 = vmatpush3.bf16.msra.mxu0 %v5688_v42  ;;  %5359 = vmatprep.mubr.msk.bf16.mxu0 %vm5772_vm0, %v5771_v1  ;;  %v5037_v54 = vpop.f32.mrb[13].mxu1  ;;  %v5712_v42 = vld [vmem:[%s6872_s1 + $0x100] sm:$0xff]  }
 0x11d   : > { %5353 = vmatprep.subr.bf16.mxu0 %v5771_v1  ;;  %v885_v57 = vpop.f32.mrb[14].mxu1  ;;  %5366 = vmatpush3.bf16.msra.mxu1 %v5691_v48  ;;  %v5716_v54 = vld [vmem:[%s6872_s1 + $0x110] sm:$0xff]  }
 0x11e   : > { %v802_v49 = vpop.f32.mrb[12].mxu0  ;;  %v5038_v40 = vpop.f32.mrb[15].mxu1  ;;  %5367 = vmatprep.subr.bf16.mxu1 %v5771_v1 }
 0x11f   : > { %v808_v3 = vadd.f32 %v802_v49, %v730_v34  ;;  %v5025_v51 = vpop.f32.mrb[13].mxu0  ;;  %v5720_v40 = vld [vmem:[%s6872_s1 + $0x140] sm:$0xff]  }
 0x120   : > { %v805_v56 = vpop.f32.mrb[14].mxu0  ;;  %5354 = vmatpush3.bf16.msra.mxu0 %v5690_v47  ;;  %v5715_v47 = vld [vmem:[%s6872_s1 + $0x128] sm:$0xff]  }
 0x121   : > { %v888_v60 = vadd.f32 %v882_v50, %v808_v3  ;;  %v5026_v29 = vpop.f32.mrb[15].mxu0  ;;  %5355 = vmatprep.subr.bf16.mxu0 %v5771_v1  ;;  %5368 = vmatpush3.bf16.msra.mxu1 %v5693_v59  ;;  %v5717_v56 = vld [vmem:[%s6872_s1 + $0x130] sm:$0xff]  }
 0x122   : > { %5369 = vmatprep.subr.bf16.mxu1 %v5771_v1  ;;  %v5719_v29 = vld [vmem:[%s6872_s1 + $0x138] sm:$0xff]  }
 0x124   : > { %5356 = vmatpush3.bf16.msra.mxu0 %v5692_v58 }
 0x125   : > { %5357 = vmatprep.subr.bf16.mxu0 %v5771_v1  ;;  %5370 = vmatpush3.bf16.msra.mxu1 %v5695_v63  ;;  %v5722_v63 = vld [vmem:[%s6872_s1 + $0x148] sm:$0xff]  }
 0x126   : > { %5387 = vmatprep.subr.bf16.mxu1 %v5771_v1 }
 0x128   : > { %5358 = vmatpush3.bf16.msra.mxu0 %v5694_v62  ;;  %5372 = vmatmul.mubr.msk.bf16.vlgmr.msra.gmra.mrb[68].mxu1 %vm298_vm1, %v6079_v16  ;;  %v5721_v62 = vld [vmem:[%s6872_s1 + $0x160] sm:$0xff]  }
 0x129   : > { %5375 = vmatprep.subr.bf16.mxu0 %v5771_v1  ;;  %5388 = vmatpush3.bf16.msra.mxu1 %v5697_v2 }
 0x12a   : > { %5389 = vmatprep.subr.bf16.mxu1 %v5771_v1  ;;  %5395 = vmatprep.mubr.msk.bf16.mxu1 %vm5772_vm0, %v5771_v1 }
 0x12b   : > { %5360 = vmatmul.mubr.msk.bf16.vlgmr.msra.gmra.mrb[68].mxu0 %vm298_vm1, %v6077_v15  ;;  %v1046_v52 = vpop.f32.mrb[16].mxu1 }
 0x12c   : > { %5376 = vmatpush3.bf16.msra.mxu0 %v5696_v0  ;;  %5383 = vmatprep.mubr.msk.bf16.mxu0 %vm5772_vm0, %v5771_v1  ;;  %v5061_v53 = vpop.f32.mrb[17].mxu1  ;;  %v5723_v0 = vld [vmem:[%s6872_s1 + $0x168] sm:$0xff]  }
 0x12d   : > { %5377 = vmatprep.subr.bf16.mxu0 %v5771_v1  ;;  %v1049_v7 = vpop.f32.mrb[18].mxu1  ;;  %5390 = vmatpush3.bf16.msra.mxu1 %v5699_v5  ;;  %v5725_v53 = vld [vmem:[%s6872_s1 + $0x170] sm:$0xff]  }
 0x12e   : > { %v959_v31 = vpop.f32.mrb[16].mxu0  ;;  %v5062_v11 = vpop.f32.mrb[19].mxu1  ;;  %5391 = vmatprep.subr.bf16.mxu1 %v5771_v1 }
 0x12f   : > { %v965_v15 = vadd.f32 %v959_v31, %v888_v60  ;;  %v5049_v16 = vpop.f32.mrb[17].mxu0  ;;  %v5718_v60 = vld [vmem:[%s6872_s1 + $0x118] sm:$0xff]   ;;  %v6738_v31 = vld [vmem:[%s6873_s2] ss:$0 sm:$0xff] }
 0x130   : > { %v962_v6 = vpop.f32.mrb[18].mxu0  ;;  %5378 = vmatpush3.bf16.msra.mxu0 %v5698_v4  ;;  %v5724_v16 = vld [vmem:[%s6872_s1 + $0x150] sm:$0xff]   ;;  %v5726_v11 = vld [vmem:[%s6872_s1 + $0x158] sm:$0xff]  }
 0x131   : > { %v1052_v9 = vadd.f32 %v1046_v52, %v965_v15  ;;  %v5050_v10 = vpop.f32.mrb[19].mxu0  ;;  %5379 = vmatprep.subr.bf16.mxu0 %v5771_v1  ;;  %5392 = vmatpush3.bf16.msra.mxu1 %v5701_v55 }
 0x132   : > { %5393 = vmatprep.subr.bf16.mxu1 %v5771_v1 }
 0x134   : > { %5380 = vmatpush3.bf16.msra.mxu0 %v5700_v8 }
 0x135   : > { %5381 = vmatprep.subr.bf16.mxu0 %v5771_v1  ;;  %5394 = vmatpush3.bf16.msra.mxu1 %v5703_v13 }
 0x136   : > { %5411 = vmatprep.subr.bf16.mxu1 %v5771_v1 }
 0x138   : > { %5382 = vmatpush3.bf16.msra.mxu0 %v5702_v12  ;;  %5396 = vmatmul.mubr.msk.bf16.vlgmr.msra.gmra.mrb[72].mxu1 %vm298_vm1, %v6123_v30  ;;  %v5727_v12 = vld [vmem:[%s6872_s1 + $0x178] sm:$0xff]  }
 0x139   : > { %5399 = vmatprep.subr.bf16.mxu0 %v5771_v1  ;;  %5412 = vmatpush3.bf16.msra.mxu1 %v5705_v20  ;;  %v5728_v20 = vld [vmem:[%s6872_s1 + $0x180] sm:$0xff]  }
 0x13a   : > { %5413 = vmatprep.subr.bf16.mxu1 %v5771_v1  ;;  %5419 = vmatprep.mubr.msk.bf16.mxu1 %vm5772_vm0, %v5771_v1 }
 0x13b   : > { %5384 = vmatmul.mubr.msk.bf16.vlgmr.msra.gmra.mrb[72].mxu0 %vm298_vm1, %v5746_v21  ;;  %v1204_v25 = vpop.f32.mrb[20].mxu1  ;;  %v5729_v21 = vld [vmem:[%s6872_s1 + $0x1a0] sm:$0xff]  }
 0x13c   : > { %5400 = vmatpush3.bf16.msra.mxu0 %v5704_v19  ;;  %5407 = vmatprep.mubr.msk.bf16.mxu0 %vm5772_vm0, %v5771_v1  ;;  %v5085_v18 = vpop.f32.mrb[21].mxu1 }
 0x13d   : > { %5401 = vmatprep.subr.bf16.mxu0 %v5771_v1  ;;  %v1207_v28 = vpop.f32.mrb[22].mxu1  ;;  %5414 = vmatpush3.bf16.msra.mxu1 %v5707_v23 }
 0x13e   : > { %v1124_v24 = vpop.f32.mrb[20].mxu0  ;;  %v5086_v38 = vpop.f32.mrb[23].mxu1  ;;  %5415 = vmatprep.subr.bf16.mxu1 %v5771_v1 }
 0x13f   : > { %v1130_v30 = vadd.f32 %v1124_v24, %v1052_v9  ;;  %v5073_v26 = vpop.f32.mrb[21].mxu0  ;;  %v1545_v9 = vld [vmem:[%s6733_s9] sm:$0x3]  ;;  %v5730_v24 = vld [vmem:[%s6872_s1 + $0x188] sm:$0xff]  }
 0x140   : > { %v1127_v27 = vpop.f32.mrb[22].mxu0  ;;  %5402 = vmatpush3.bf16.msra.mxu0 %v5706_v22  ;;  %v246_v22 = vld [vmem:[%s5845_s4 + $0x14] sm:$0x7] }
 0x141   : > { %v1210_v34 = vadd.f32 %v1204_v25, %v1130_v30  ;;  %v5074_v37 = vpop.f32.mrb[23].mxu0  ;;  %5403 = vmatprep.subr.bf16.mxu0 %v5771_v1  ;;  %5416 = vmatpush3.bf16.msra.mxu1 %v5709_v33  ;;  %v6779_v23 = vcombine.low %v246_v22, %v246_v22  ;;  %v5731_v25 = vld [vmem:[%s6872_s1 + $0x1a8] sm:$0xff]   ;;  %v5733_v33 = vld [vmem:[%s6872_s1 + $0x1b0] sm:$0xff]  }
 0x142   : > { %5417 = vmatprep.subr.bf16.mxu1 %v5771_v1 }
 0x143   : > { %v3717_v18 = vshll.u32 %v6779_v23, 16  ;;  %v3715_v38 = vshrl.u32 %v6779_v23, 16 }
 0x144   : > { %5404 = vmatpush3.bf16.msra.mxu0 %v5708_v32  ;;  %v5732_v32 = vld [vmem:[%s6872_s1 + $0x190] sm:$0xff]  }
 0x145   : > { %5405 = vmatprep.subr.bf16.mxu0 %v5771_v1  ;;  %5418 = vmatpush3.bf16.msra.mxu1 %v5711_v41  ;;  %v5734_v41 = vld [vmem:[%s6872_s1 + $0x198] sm:$0xff]  }
 0x146   : > { %5435 = vmatprep.subr.bf16.mxu1 %v5771_v1 }
 0x148   : > { %5406 = vmatpush3.bf16.msra.mxu0 %v5710_v39  ;;  %5420 = vmatmul.mubr.msk.bf16.vlgmr.msra.gmra.mrb[76].mxu1 %vm298_vm1, %v6170_v45  ;;  %v3719_v39 = vrot.slane %v3717_v18, 1 }
 0x149   : > { %5423 = vmatprep.subr.bf16.mxu0 %v5771_v1  ;;  %5436 = vmatpush3.bf16.msra.mxu1 %v5713_v44 }
 0x14a   : > { %5437 = vmatprep.subr.bf16.mxu1 %v5771_v1  ;;  %5443 = vmatprep.mubr.msk.bf16.mxu1 %vm5772_vm0, %v5771_v1  ;;  %v3720_v44 = vor.u32 %v3719_v39, %v3715_v38 }
 0x14b   : > { %5408 = vmatmul.mubr.msk.bf16.vlgmr.msra.gmra.mrb[76].mxu0 %vm298_vm1, %v6165_v43  ;;  %v1368_v49 = vpop.f32.mrb[24].mxu1 }
 0x14c   : > { %5424 = vmatpush3.bf16.msra.mxu0 %v5712_v42  ;;  %5431 = vmatprep.mubr.msk.bf16.mxu0 %vm5772_vm0, %v5771_v1  ;;  %v5109_v50 = vpop.f32.mrb[25].mxu1  ;;  %v5735_v42 = vld [vmem:[%s6872_s1 + $0x1b8] sm:$0xff]  }
 0x14d   : > { %5425 = vmatprep.subr.bf16.mxu0 %v5771_v1  ;;  %v1371_v51 = vpop.f32.mrb[26].mxu1  ;;  %5438 = vmatpush3.bf16.msra.mxu1 %v5715_v47  ;;  %v5738_v47 = vld [vmem:[%s6872_s1 + $0x1e0] sm:$0xff]  }
 0x14e   : > { %v1281_v48 = vpop.f32.mrb[24].mxu0  ;;  %v5110_v59 = vpop.f32.mrb[27].mxu1  ;;  %5439 = vmatprep.subr.bf16.mxu1 %v5771_v1 }
 0x14f   : > { %v1287_v43 = vadd.f32 %v1281_v48, %v1210_v34  ;;  %v5097_v45 = vpop.f32.mrb[25].mxu0  ;;  %v5739_v48 = vld [vmem:[%s6872_s1 + $0x1c8] sm:$0xff]  }
 0x150   : > { %v1284_v3 = vpop.f32.mrb[26].mxu0  ;;  %5426 = vmatpush3.bf16.msra.mxu0 %v5714_v46  ;;  %v5737_v46 = vld [vmem:[%s6872_s1 + $0x1c0] sm:$0xff]  }
 0x151   : > { %v1374_v57 = vadd.f32 %v1368_v49, %v1287_v43  ;;  %v5098_v58 = vpop.f32.mrb[27].mxu0  ;;  %5427 = vmatprep.subr.bf16.mxu0 %v5771_v1  ;;  %5440 = vmatpush3.bf16.msra.mxu1 %v5717_v56  ;;  %v5740_v49 = vld [vmem:[%s6872_s1 + $0x1e8] sm:$0xff]  }
 0x152   : > { %5441 = vmatprep.subr.bf16.mxu1 %v5771_v1  ;;  %v5742_v58 = vld [vmem:[%s6872_s1 + $0x1f0] sm:$0xff]  }
 0x154   : > { %5428 = vmatpush3.bf16.msra.mxu0 %v5716_v54 }
 0x155   : > { %5429 = vmatprep.subr.bf16.mxu0 %v5771_v1  ;;  %5442 = vmatpush3.bf16.msra.mxu1 %v5719_v29 }
 0x156   : > { %5459 = vmatprep.subr.bf16.mxu1 %v5771_v1 }
 0x158   : > { %5430 = vmatpush3.bf16.msra.mxu0 %v5718_v60  ;;  %5444 = vmatmul.mubr.msk.bf16.vlgmr.msra.gmra.mrb[80].mxu1 %vm298_vm1, %v6459_v61 }
 0x159   : > { %5447 = vmatprep.subr.bf16.mxu0 %v5771_v1  ;;  %5460 = vmatpush3.bf16.msra.mxu1 %v5721_v62  ;;  %v3875_v62 = vrot.slane %v3717_v18, 2 }
 0x15a   : > { %5461 = vmatprep.subr.bf16.mxu1 %v5771_v1  ;;  %5467 = vmatprep.mubr.msk.bf16.mxu1 %vm5772_vm0, %v5771_v1 }
 0x15b   : > { %5432 = vmatmul.mubr.msk.bf16.vlgmr.msra.gmra.mrb[80].mxu0 %vm298_vm1, %v6417_v35  ;;  %v1526_v35 = vpop.f32.mrb[28].mxu1 }
 0x15c   : > { %5448 = vmatpush3.bf16.msra.mxu0 %v5720_v40  ;;  %5455 = vmatprep.mubr.msk.bf16.mxu0 %vm5772_vm0, %v5771_v1  ;;  %v5133_v5 = vpop.f32.mrb[29].mxu1  ;;  %v3874_v40 = vrot.slane %v3715_v38, 1 }
 0x15d   : > { %5449 = vmatprep.subr.bf16.mxu0 %v5771_v1  ;;  %v1529_v15 = vpop.f32.mrb[30].mxu1  ;;  %5462 = vmatpush3.bf16.msra.mxu1 %v5723_v0  ;;  %v5744_v0 = vld [vmem:[%s6872_s1 + $0x1f8] sm:$0xff]  }
 0x15e   : > { %v1446_v2 = vpop.f32.mrb[28].mxu0  ;;  %v5134_v8 = vpop.f32.mrb[31].mxu1  ;;  %5463 = vmatprep.subr.bf16.mxu1 %v5771_v1 }
 0x15f   : > { %v1452_v61 = vadd.f32 %v1446_v2, %v1374_v57  ;;  %v5121_v4 = vpop.f32.mrb[29].mxu0  ;;  %v5741_v57 = vld [vmem:[%s6872_s1 + $0x1d0] sm:$0xff]   ;;  %v3797_v2 = vrot.slane %v6779_v23, 1 }
 0x160   : > { %v1449_v52 = vpop.f32.mrb[30].mxu0  ;;  %5450 = vmatpush3.bf16.msra.mxu0 %v5722_v63  ;;  %v5743_v63 = vld [vmem:[%s6872_s1 + $0x1d8] sm:$0xff]  }
 0x161   : > { %v1532_v6 = vadd.f32 %v1526_v35, %v1452_v61  ;;  %v5122_v7 = vpop.f32.mrb[31].mxu0  ;;  %5451 = vmatprep.subr.bf16.mxu0 %v5771_v1  ;;  %5464 = vmatpush3.bf16.msra.mxu1 %v5725_v53  ;;  %v3876_v35 = vor.u32 %v3875_v62, %v3874_v40 }
 0x162   : > { %5465 = vmatprep.subr.bf16.mxu1 %v5771_v1 }
 0x163   : > { %v1540_v55 = vadd.f32 %v6738_v31, %v1532_v6 }
 0x164   : > { %5452 = vmatpush3.bf16.msra.mxu0 %v5724_v16 }
 0x165   : > { %v1541_v13 = vpack.c.bf16 %v1540_v55, %v1540_v55  ;;  %5453 = vmatprep.subr.bf16.mxu0 %v5771_v1  ;;  %5466 = vmatpush3.bf16.msra.mxu1 %v5727_v12 }
 0x166   : > { %5483 = vmatprep.subr.bf16.mxu1 %v5771_v1 }
 0x167   : > { %v1546_v19 = vsel %vm6750_vm4, %v1541_v13, %v1545_v9 }
 0x168   : > { %1547 = vst [vmem:[%s6733_s9] sm:$0x3] %v1546_v19  ;;  %5454 = vmatpush3.bf16.msra.mxu0 %v5726_v11  ;;  %5468 = vmatmul.mubr.msk.bf16.vlgmr.msra.gmra.mrb[84].mxu1 %vm298_vm1, %v6502_v17 }
 0x169   : > { %5471 = vmatprep.subr.bf16.mxu0 %v5771_v1  ;;  %5484 = vmatpush3.bf16.msra.mxu1 %v5729_v21 }
 0x16a   : > { %5485 = vmatprep.subr.bf16.mxu1 %v5771_v1  ;;  %5491 = vmatprep.mubr.msk.bf16.mxu1 %vm5772_vm0, %v5771_v1 }
 0x16b   : > { %5456 = vmatmul.mubr.msk.bf16.vlgmr.msra.gmra.mrb[84].mxu0 %vm298_vm1, %v2592_v14  ;;  %v1686_v14 = vpop.f32.mrb[32].mxu1 }
 0x16c   : > { %5472 = vmatpush3.bf16.msra.mxu0 %v5728_v20  ;;  %5479 = vmatprep.mubr.msk.bf16.mxu0 %vm5772_vm0, %v5771_v1  ;;  %v5157_v26 = vpop.f32.mrb[33].mxu1 }
 0x16d   : > { %5473 = vmatprep.subr.bf16.mxu0 %v5771_v1  ;;  %v1689_v28 = vpop.f32.mrb[34].mxu1  ;;  %5486 = vmatpush3.bf16.msra.mxu1 %v5731_v25 }
 0x16e   : > { %v1622_v36 = vpop.f32.mrb[32].mxu0  ;;  %v5158_v37 = vpop.f32.mrb[35].mxu1  ;;  %5487 = vmatprep.subr.bf16.mxu1 %v5771_v1 }
 0x16f   : > { %v1687_v17 = vadd.f32 %v1686_v14, %v1622_v36  ;;  %v5145_v30 = vpop.f32.mrb[33].mxu0 }
 0x170   : > { %v1625_v27 = vpop.f32.mrb[34].mxu0  ;;  %5474 = vmatpush3.bf16.msra.mxu0 %v5730_v24 }
 0x171   : > { %v5146_v34 = vpop.f32.mrb[35].mxu0  ;;  %5475 = vmatprep.subr.bf16.mxu0 %v5771_v1  ;;  %5488 = vmatpush3.bf16.msra.mxu1 %v5733_v33 }
 0x172   : > { %5489 = vmatprep.subr.bf16.mxu1 %v5771_v1 }
 0x174   : > { %5476 = vmatpush3.bf16.msra.mxu0 %v5732_v32 }
 0x175   : > { %5477 = vmatprep.subr.bf16.mxu0 %v5771_v1  ;;  %5490 = vmatpush3.bf16.msra.mxu1 %v5735_v42 }
 0x176   : > { %5507 = vmatprep.subr.bf16.mxu1 %v5771_v1 }
 0x178   : > { %5478 = vmatpush3.bf16.msra.mxu0 %v5734_v41  ;;  %5492 = vmatmul.mubr.msk.bf16.vlgmr.msra.gmra.mrb[88].mxu1 %vm298_vm1, %v3720_v44 }
 0x179   : > { %5495 = vmatprep.subr.bf16.mxu0 %v5771_v1  ;;  %5508 = vmatpush3.bf16.msra.mxu1 %v5738_v47 }
 0x17a   : > { %5509 = vmatprep.subr.bf16.mxu1 %v5771_v1  ;;  %5515 = vmatprep.mubr.msk.bf16.mxu1 %vm5772_vm0, %v5771_v1 }
 0x17b   : > { %5480 = vmatmul.mubr.msk.bf16.vlgmr.msra.gmra.mrb[88].mxu0 %vm298_vm1, %v246_v22  ;;  %v1831_v45 = vpop.f32.mrb[36].mxu1 }
 0x17c   : > { %5496 = vmatpush3.bf16.msra.mxu0 %v5737_v46  ;;  %5503 = vmatprep.mubr.msk.bf16.mxu0 %vm5772_vm0, %v5771_v1  ;;  %v5181_v51 = vpop.f32.mrb[37].mxu1 }
 0x17d   : > { %5497 = vmatprep.subr.bf16.mxu0 %v5771_v1  ;;  %v1834_v56 = vpop.f32.mrb[38].mxu1  ;;  %5510 = vmatpush3.bf16.msra.mxu1 %v5740_v49 }
 0x17e   : > { %v1758_v43 = vpop.f32.mrb[36].mxu0  ;;  %v5182_v29 = vpop.f32.mrb[39].mxu1  ;;  %5511 = vmatprep.subr.bf16.mxu1 %v5771_v1 }
 0x17f   : > { %v1764_v50 = vadd.f32 %v1758_v43, %v1687_v17  ;;  %v5169_v3 = vpop.f32.mrb[37].mxu0 }
 0x180   : > { %v1761_v54 = vpop.f32.mrb[38].mxu0  ;;  %5498 = vmatpush3.bf16.msra.mxu0 %v5739_v48 }
 0x181   : > { %v1837_v59 = vadd.f32 %v1831_v45, %v1764_v50  ;;  %v5170_v60 = vpop.f32.mrb[39].mxu0  ;;  %5499 = vmatprep.subr.bf16.mxu0 %v5771_v1  ;;  %5512 = vmatpush3.bf16.msra.mxu1 %v5742_v58 }
 0x182   : > { %5513 = vmatprep.subr.bf16.mxu1 %v5771_v1 }
 0x184   : > { %5500 = vmatpush3.bf16.msra.mxu0 %v5741_v57 }
 0x185   : > { %5501 = vmatprep.subr.bf16.mxu0 %v5771_v1  ;;  %5514 = vmatpush3.bf16.msra.mxu1 %v5744_v0 }
 0x188   : > { %5502 = vmatpush3.bf16.msra.mxu0 %v5743_v63  ;;  %5516 = vmatmul.mubr.msk.bf16.vlgmr.msra.gmra.mrb[92].mxu1 %vm298_vm1, %v3876_v35  ;;  %v4495_v35 = vld [vmem:[%s6733_s9 + $0x2] sm:$0x3] }
 0x18b   : > { %5504 = vmatmul.mubr.msk.bf16.vlgmr.msra.gmra.mrb[92].mxu0 %vm298_vm1, %v3797_v2  ;;  %v1977_v4 = vpop.f32.mrb[40].mxu1 }
 0x18c   : > { %v5205_v15 = vpop.f32.mrb[41].mxu1 }
 0x18d   : > { %v1980_v53 = vpop.f32.mrb[42].mxu1 }
 0x18e   : > { %v1904_v61 = vpop.f32.mrb[40].mxu0  ;;  %v5206_v8 = vpop.f32.mrb[43].mxu1 }
 0x18f   : > { %v1910_v5 = vadd.f32 %v1904_v61, %v1837_v59  ;;  %v5193_v52 = vpop.f32.mrb[41].mxu0 }
 0x190   : > { %v1907_v16 = vpop.f32.mrb[42].mxu0 }
 0x191   : > { %v1983_v6 = vadd.f32 %v1977_v4, %v1910_v5  ;;  %v5194_v7 = vpop.f32.mrb[43].mxu0 }
 0x19b   : > { %v2123_v55 = vpop.f32.mrb[44].mxu1 }
 0x19c   : > { %v5229_v12 = vpop.f32.mrb[45].mxu1 }
 0x19d   : > { %v2126_v19 = vpop.f32.mrb[46].mxu1 }
 0x19e   : > { %v2050_v1 = vpop.f32.mrb[44].mxu0  ;;  %v5230_v22 = vpop.f32.mrb[47].mxu1 }
 0x19f   : > { %v2056_v9 = vadd.f32 %v2050_v1, %v1983_v6  ;;  %v5217_v11 = vpop.f32.mrb[45].mxu0 }
 0x1a0   : > { %v2053_v13 = vpop.f32.mrb[46].mxu0 }
 0x1a1   : > { %v2129_v20 = vadd.f32 %v2123_v55, %v2056_v9  ;;  %v5218_v21 = vpop.f32.mrb[47].mxu0 }
 0x1ab   : > { %v2269_v24 = vpop.f32.mrb[48].mxu1 }
 0x1ac   : > { %v5253_v14 = vpop.f32.mrb[49].mxu1 }
 0x1ad   : > { %v2272_v30 = vpop.f32.mrb[50].mxu1 }
 0x1ae   : > { %v2196_v23 = vpop.f32.mrb[48].mxu0  ;;  %v5254_v27 = vpop.f32.mrb[51].mxu1 }
 0x1af   : > { %v2202_v25 = vadd.f32 %v2196_v23, %v2129_v20  ;;  %v5241_v36 = vpop.f32.mrb[49].mxu0 }
 0x1b0   : > { %v2199_v17 = vpop.f32.mrb[50].mxu0 }
 0x1b1   : > { %v2275_v26 = vadd.f32 %v2269_v24, %v2202_v25  ;;  %v5242_v18 = vpop.f32.mrb[51].mxu0 }
 0x1bb   : > { %v2415_v32 = vpop.f32.mrb[52].mxu1 }
 0x1bc   : > { %v5277_v37 = vpop.f32.mrb[53].mxu1 }
 0x1bd   : > { %v2418_v39 = vpop.f32.mrb[54].mxu1 }
 0x1be   : > { %v2342_v28 = vpop.f32.mrb[52].mxu0  ;;  %v5278_v44 = vpop.f32.mrb[55].mxu1 }
 0x1bf   : > { %v2348_v33 = vadd.f32 %v2342_v28, %v2275_v26  ;;  %v5265_v34 = vpop.f32.mrb[53].mxu0 }
 0x1c0   : > { %v2345_v38 = vpop.f32.mrb[54].mxu0 }
 0x1c1   : > { %v2421_v41 = vadd.f32 %v2415_v32, %v2348_v33  ;;  %v5266_v42 = vpop.f32.mrb[55].mxu0 }
 0x1cb   : > { %v2577_v47 = vpop.f32.mrb[56].mxu1 }
 0x1cc   : > { %v5301_v43 = vpop.f32.mrb[57].mxu1 }
 0x1cd   : > { %v2580_v50 = vpop.f32.mrb[58].mxu1 }
 0x1ce   : > { %v2491_v46 = vpop.f32.mrb[56].mxu0  ;;  %v5302_v54 = vpop.f32.mrb[59].mxu1 }
 0x1cf   : > { %v2497_v48 = vadd.f32 %v2491_v46, %v2421_v41  ;;  %v5289_v49 = vpop.f32.mrb[57].mxu0 }
 0x1d0   : > { %v2494_v45 = vpop.f32.mrb[58].mxu0 }
 0x1d1   : > { %v2583_v3 = vadd.f32 %v2577_v47, %v2497_v48  ;;  %v5290_v51 = vpop.f32.mrb[59].mxu0 }
 0x1db   : > { %v2733_v57 = vpop.f32.mrb[60].mxu1 }
 0x1dc   : > { %v5325_v60 = vpop.f32.mrb[61].mxu1 }
 0x1dd   : > { %v2736_v40 = vpop.f32.mrb[62].mxu1 }
 0x1de   : > { %v2654_v56 = vpop.f32.mrb[60].mxu0  ;;  %v5326_v0 = vpop.f32.mrb[63].mxu1 }
 0x1df   : > { %v2660_v58 = vadd.f32 %v2654_v56, %v2583_v3  ;;  %v5313_v59 = vpop.f32.mrb[61].mxu0 }
 0x1e0   : > { %v2657_v29 = vpop.f32.mrb[62].mxu0 }
 0x1e1   : > { %v2739_v62 = vadd.f32 %v2733_v57, %v2660_v58  ;;  %v5314_v63 = vpop.f32.mrb[63].mxu0 }
 0x1e3   : > { %v2747_v2 = vadd.f32 %v6738_v31, %v2739_v62 }
 0x1e5   : > { %v2748_v61 = vpack.c.bf16 %v2747_v2, %v2747_v2 }
 0x1e7   : > { %v2751_v4 = vsel %vm6750_vm4, %v2748_v61, %v4495_v35 }
 0x1e8   : > { %4496 = vst [vmem:[%s6733_s9 + $0x2] sm:$0x3] %v2751_v4 }
 0x1eb   : > { %v2891_v52 = vpop.f32.mrb[64].mxu1 }
 0x1ec   : > { %v5349_v53 = vpop.f32.mrb[65].mxu1 }
 0x1ed   : > { %v2894_v7 = vpop.f32.mrb[66].mxu1 }
 0x1ee   : > { %v2827_v5 = vpop.f32.mrb[64].mxu0  ;;  %v5350_v1 = vpop.f32.mrb[67].mxu1 }
 0x1ef   : > { %v2892_v15 = vadd.f32 %v2891_v52, %v2827_v5  ;;  %v5337_v16 = vpop.f32.mrb[65].mxu0 }
 0x1f0   : > { %v2830_v6 = vpop.f32.mrb[66].mxu0 }
 0x1f1   : > { %v5338_v8 = vpop.f32.mrb[67].mxu0 }
 0x1fb   : > { %v3036_v9 = vpop.f32.mrb[68].mxu1 }
 0x1fc   : > { %v5373_v13 = vpop.f32.mrb[69].mxu1 }
 0x1fd   : > { %v3039_v20 = vpop.f32.mrb[70].mxu1 }
 0x1fe   : > { %v2963_v55 = vpop.f32.mrb[68].mxu0  ;;  %v5374_v23 = vpop.f32.mrb[71].mxu1 }
 0x1ff   : > { %v2969_v11 = vadd.f32 %v2963_v55, %v2892_v15  ;;  %v5361_v12 = vpop.f32.mrb[69].mxu0  ;;  %v4699_v23 = vld [vmem:[%s6733_s9 + $0x4] sm:$0x3] }
 0x200   : > { %v2966_v19 = vpop.f32.mrb[70].mxu0 }
 0x201   : > { %v3042_v21 = vadd.f32 %v3036_v9, %v2969_v11  ;;  %v5362_v22 = vpop.f32.mrb[71].mxu0 }
 0x20b   : > { %v3182_v25 = vpop.f32.mrb[72].mxu1 }
 0x20c   : > { %v5397_v17 = vpop.f32.mrb[73].mxu1 }
 0x20d   : > { %v3185_v26 = vpop.f32.mrb[74].mxu1 }
 0x20e   : > { %v3109_v24 = vpop.f32.mrb[72].mxu0  ;;  %v5398_v28 = vpop.f32.mrb[75].mxu1 }
 0x20f   : > { %v3115_v36 = vadd.f32 %v3109_v24, %v3042_v21  ;;  %v5385_v14 = vpop.f32.mrb[73].mxu0 }
 0x210   : > { %v3112_v30 = vpop.f32.mrb[74].mxu0 }
 0x211   : > { %v3188_v18 = vadd.f32 %v3182_v25, %v3115_v36  ;;  %v5386_v27 = vpop.f32.mrb[75].mxu0 }
 0x21b   : > { %v3328_v33 = vpop.f32.mrb[76].mxu1 }
 0x21c   : > { %v5421_v38 = vpop.f32.mrb[77].mxu1 }
 0x21d   : > { %v3331_v41 = vpop.f32.mrb[78].mxu1 }
 0x21e   : > { %v3255_v32 = vpop.f32.mrb[76].mxu0  ;;  %v5422_v46 = vpop.f32.mrb[79].mxu1 }
 0x21f   : > { %v3261_v34 = vadd.f32 %v3255_v32, %v3188_v18  ;;  %v5409_v37 = vpop.f32.mrb[77].mxu0 }
 0x220   : > { %v3258_v39 = vpop.f32.mrb[78].mxu0 }
 0x221   : > { %v3334_v42 = vadd.f32 %v3328_v33, %v3261_v34  ;;  %v5410_v44 = vpop.f32.mrb[79].mxu0 }
 0x22b   : > { %v3474_v48 = vpop.f32.mrb[80].mxu1 }
 0x22c   : > { %v5445_v45 = vpop.f32.mrb[81].mxu1 }
 0x22d   : > { %v3477_v3 = vpop.f32.mrb[82].mxu1 }
 0x22e   : > { %v3401_v47 = vpop.f32.mrb[80].mxu0  ;;  %v5446_v56 = vpop.f32.mrb[83].mxu1 }
 0x22f   : > { %v3407_v49 = vadd.f32 %v3401_v47, %v3334_v42  ;;  %v5433_v43 = vpop.f32.mrb[81].mxu0 }
 0x230   : > { %v3404_v50 = vpop.f32.mrb[82].mxu0 }
 0x231   : > { %v3480_v51 = vadd.f32 %v3474_v48, %v3407_v49  ;;  %v5434_v54 = vpop.f32.mrb[83].mxu0 }
 0x23b   : > { %v3620_v58 = vpop.f32.mrb[84].mxu1 }
 0x23c   : > { %v5469_v29 = vpop.f32.mrb[85].mxu1 }
 0x23d   : > { %v3623_v62 = vpop.f32.mrb[86].mxu1 }
 0x23e   : > { %v3547_v57 = vpop.f32.mrb[84].mxu0  ;;  %v5470_v2 = vpop.f32.mrb[87].mxu1 }
 0x23f   : > { %v3553_v59 = vadd.f32 %v3547_v57, %v3480_v51  ;;  %v5457_v60 = vpop.f32.mrb[85].mxu0 }
 0x240   : > { %v3550_v40 = vpop.f32.mrb[86].mxu0 }
 0x241   : > { %v3626_v63 = vadd.f32 %v3620_v58, %v3553_v59  ;;  %v5458_v0 = vpop.f32.mrb[87].mxu0 }
 0x24b   : > { %v3782_v61 = vpop.f32.mrb[88].mxu1 }
 0x24c   : > { %v5493_v52 = vpop.f32.mrb[89].mxu1 }
 0x24d   : > { %v3785_v16 = vpop.f32.mrb[90].mxu1 }
 0x24e   : > { %v3696_v35 = vpop.f32.mrb[88].mxu0  ;;  %v5494_v7 = vpop.f32.mrb[91].mxu1 }
 0x24f   : > { %v3702_v4 = vadd.f32 %v3696_v35, %v3626_v63  ;;  %v5481_v5 = vpop.f32.mrb[89].mxu0 }
 0x250   : > { %v3699_v15 = vpop.f32.mrb[90].mxu0 }
 0x251   : > { %v3788_v53 = vadd.f32 %v3782_v61, %v3702_v4  ;;  %v5482_v6 = vpop.f32.mrb[91].mxu0 }
 0x25b   : > { %v3938_v1 = vpop.f32.mrb[92].mxu1 }
 0x25c   : > { %v5517_v11 = vpop.f32.mrb[93].mxu1 }
 0x25d   : > { %v3941_v13 = vpop.f32.mrb[94].mxu1 }
 0x25e   : > { %v3859_v8 = vpop.f32.mrb[92].mxu0  ;;  %v5518_v21 = vpop.f32.mrb[95].mxu1 }
 0x25f   : > { %v3865_v55 = vadd.f32 %v3859_v8, %v3788_v53  ;;  %v5505_v9 = vpop.f32.mrb[93].mxu0 }
 0x260   : > { %v3862_v12 = vpop.f32.mrb[94].mxu0 }
 0x261   : > { %v3944_v19 = vadd.f32 %v3938_v1, %v3865_v55  ;;  %v5506_v20 = vpop.f32.mrb[95].mxu0 }
 0x263   : > { %v3952_v22 = vadd.f32 %v6738_v31, %v3944_v19 }
 0x265   : > { %v3953_v24 = vpack.c.bf16 %v3952_v22, %v3952_v22 }
 0x267   : > { %v3956_v25 = vsel %vm6750_vm4, %v3953_v24, %v4699_v23 }
 0x268   : > { %4700 = vst [vmem:[%s6733_s9 + $0x4] sm:$0x3] %v3956_v25 }
 0x269 PF: > { %s13_s14 = sadd.s32 1, %s5769_s14   ;;  %s6877_s12 = smov %s5765_s13 }
 0x26a   : > { %p10_p5 = scmp.ge.s32.totalorder %s13_s14, 4   ;;  %s6878_s13 = smov %s6880_s15 }
 0x26c   :  { %12 = sbr.rel (!%p10_p5) target bundleno = 2 (0x2), region = 85 }

// kernel: _lambda_.21
= control target key start
LH: loop header
LB: loop body
LE: loop exit
PB: predicated region body
PF: predicated region fallthrough
CT: control target
= control target key end

     0   :  { %s5863_s12 = smov 0   ;;  %s5865_s13 = smov 0   ;;  %s7098_s0 = inlined_call_operand.vmem [shape: bf16[2,5,5,128], index: 0, kind: input, shape index: {}]   ;;  %s7099_s1 = inlined_call_operand.vmem [shape: bf16[4,4,128,128], index: 1, kind: input, shape index: {}]   ;;  %s7100_s2 = inlined_call_operand.vmem [shape: f32[1,128], index: 2, kind: input, shape index: {}]   ;;  %s7101_s3 = inlined_call_operand.vmem [shape: f32[2,2,2,128], index: 3, kind: output, shape index: {}]  }
   0x1   :  { %s5867_s14 = smov 0  }
   0x2 LB: > { %s28_s15 = sadd.s32 1, %s5835_s13  ;;  %p3848_p0 = scmp.ge.s32.totalorder %s5839_s14, 1  ;;  %s5839_s14 = sphi %s5867_s14, %s13_s14   ;;  %s5835_s13 = sphi %s5865_s13, %s7103_s13   ;;  %s5831_s12 = sphi %s5863_s12, %s7102_s12  }
   0x3   : > { %p30_p1 = scmp.ge.s32.totalorder %s28_s15, 2  ;;  %p177_p2 = scmp.lt.s32.totalorder %s5839_s14, 3 }
   0x5   : > { %s7105_s15 = smov (%p30_p1, %s28_s15), 0  ;;  %p178_p3 = pnand %p3848_p0, %p177_p2 }
   0x6   : > { %v5554_v0 = vld [vmem:[%s7099_s1 + $0x40] sm:$0xff] (!%p178_p3)   ;;  %v5841_v1 = vmov (!%p178_p3), 0.0   ;;  %v5556_v3 = vld [vmem:[%s7099_s1 + $0x48] sm:$0xff] (!%p178_p3)   ;;  %vm5842_vm0 = vmmov (!%p178_p3), 0   ;;  %p215_p4 = scmp.lt.s32.totalorder (!%p178_p3), %s5831_s12, 1  ;;  %v5558_v5 = vld [vmem:[%s7099_s1 + $0x50] sm:$0xff] (!%p178_p3)  }
   0x7   : > { %181 = sbr.rel (%p178_p3) target bundleno = 738 (0x2e2), region = 32  ;;  %4887 = vmatprep.subr.bf16.mxu0 (!%p178_p3), %v5841_v1  ;;  %4907 = vmatprep.subr.bf16.mxu1 (!%p178_p3), %v5841_v1  ;;  %v5555_v2 = vld [vmem:[%s7099_s1] sm:$0xff] (!%p178_p3)   ;;  %v5557_v4 = vld [vmem:[%s7099_s1 + $0x8] sm:$0xff] (!%p178_p3)   ;;  %v5559_v6 = vld [vmem:[%s7099_s1 + $0x10] sm:$0xff] (!%p178_p3)  }
   0x8   : > { %4888 = vmatpush3.bf16.msra.mxu0 (!%p178_p3), %v5554_v0  ;;  %4903 = vmatprep.mubr.msk.bf16.mxu0 (!%p178_p3), %vm5842_vm0, %v5841_v1  ;;  %v5560_v7 = vld [vmem:[%s7099_s1 + $0x58] sm:$0xff] (!%p178_p3)   ;;  %v5562_v9 = vld [vmem:[%s7099_s1 + $0x60] sm:$0xff] (!%p178_p3)   ;;  %v5564_v13 = vld [vmem:[%s7099_s1 + $0x68] sm:$0xff] (!%p178_p3)  }
   0x9   : > { %4908 = vmatpush3.bf16.msra.mxu1 (!%p178_p3), %v5555_v2  ;;  %4889 = vmatprep.subr.bf16.mxu0 (!%p178_p3), %v5841_v1  ;;  %v5561_v8 = vld [vmem:[%s7099_s1 + $0x18] sm:$0xff] (!%p178_p3)   ;;  %v5563_v10 = vld [vmem:[%s7099_s1 + $0x20] sm:$0xff] (!%p178_p3)   ;;  %v5565_v14 = vld [vmem:[%s7099_s1 + $0x28] sm:$0xff] (!%p178_p3)  }
   0xa   : > { %4909 = vmatprep.subr.bf16.mxu1 (!%p178_p3), %v5841_v1  ;;  %4923 = vmatprep.mubr.msk.bf16.mxu1 (!%p178_p3), %vm5842_vm0, %v5841_v1  ;;  %v5566_v15 = vld [vmem:[%s7099_s1 + $0x70] sm:$0xff] (!%p178_p3)   ;;  %v5568_v20 = vld [vmem:[%s7099_s1 + $0x78] sm:$0xff] (!%p178_p3)   ;;  %v5571_v23 = vld [vmem:[%s7099_s1 + $0x80] sm:$0xff] (!%p178_p3)  }
   0xb   : > { %v5567_v17 = vld [vmem:[%s7099_s1 + $0x30] sm:$0xff] (!%p178_p3)   ;;  %v5569_v21 = vld [vmem:[%s7099_s1 + $0x38] sm:$0xff] (!%p178_p3)   ;;  %v5572_v24 = vld [vmem:[%s7099_s1 + $0xc0] sm:$0xff] (!%p178_p3)  }
   0xc   : > { %4890 = vmatpush3.bf16.msra.mxu0 (!%p178_p3), %v5556_v3  ;;  %v5573_v25 = vld [vmem:[%s7099_s1 + $0x88] sm:$0xff] (!%p178_p3)   ;;  %v5575_v27 = vld [vmem:[%s7099_s1 + $0x90] sm:$0xff] (!%p178_p3)   ;;  %v5577_v29 = vld [vmem:[%s7099_s1 + $0x98] sm:$0xff] (!%p178_p3)  }
   0xd   : > { %4910 = vmatpush3.bf16.msra.mxu1 (!%p178_p3), %v5557_v4  ;;  %4891 = vmatprep.subr.bf16.mxu0 (!%p178_p3), %v5841_v1  ;;  %v5574_v26 = vld [vmem:[%s7099_s1 + $0xc8] sm:$0xff] (!%p178_p3)   ;;  %v5576_v28 = vld [vmem:[%s7099_s1 + $0xd0] sm:$0xff] (!%p178_p3)   ;;  %v5578_v30 = vld [vmem:[%s7099_s1 + $0xd8] sm:$0xff] (!%p178_p3)  }
   0xe   : > { %s7107_s12 = smov (!%p215_p4, %s5831_s12), 1  ;;  %4911 = vmatprep.subr.bf16.mxu1 %v5841_v1  ;;  %v5579_v31 = vld [vmem:[%s7099_s1 + $0xa0] sm:$0xff]   ;;  %v5581_v33 = vld [vmem:[%s7099_s1 + $0xa8] sm:$0xff]   ;;  %v5583_v35 = vld [vmem:[%s7099_s1 + $0xb0] sm:$0xff]  }
   0xf   : > { %s5527_s28 = smul.u32 20, %s7107_s12  ;;  %v5580_v32 = vld [vmem:[%s7099_s1 + $0xe0] sm:$0xff]   ;;  %v5582_v34 = vld [vmem:[%s7099_s1 + $0xe8] sm:$0xff]   ;;  %v5584_v36 = vld [vmem:[%s7099_s1 + $0xf0] sm:$0xff]  }
  0x10   : > { %4892 = vmatpush3.bf16.msra.mxu0 %v5558_v5  ;;  %v5585_v38 = vld [vmem:[%s7099_s1 + $0xb8] sm:$0xff]   ;;  %v5587_v43 = vld [vmem:[%s7099_s1 + $0x100] sm:$0xff]   ;;  %v5589_v45 = vld [vmem:[%s7099_s1 + $0x108] sm:$0xff]  }
  0x11   : > { %4912 = vmatpush3.bf16.msra.mxu1 %v5559_v6  ;;  %4893 = vmatprep.subr.bf16.mxu0 %v5841_v1  ;;  %s5923_s8 = scalar_lea.vmem %s7098_s0, %s5527_s28  ;;  %v5586_v40 = vld [vmem:[%s7099_s1 + $0xf8] sm:$0xff]   ;;  %v5588_v44 = vld [vmem:[%s7099_s1 + $0x140] sm:$0xff]   ;;  %v5590_v46 = vld [vmem:[%s7099_s1 + $0x148] sm:$0xff]  }
  0x12   : > { %4913 = vmatprep.subr.bf16.mxu1 %v5841_v1  ;;  %v241_v11 = vld [vmem:[%s5923_s8] sm:$0x7]  ;;  %v5591_v47 = vld [vmem:[%s7099_s1 + $0x110] sm:$0xff]   ;;  %v5593_v49 = vld [vmem:[%s7099_s1 + $0x118] sm:$0xff]  }
  0x13   : > { %v5934_v12 = vcombine.low %v241_v11, %v241_v11  ;;  %v5592_v48 = vld [vmem:[%s7099_s1 + $0x150] sm:$0xff]   ;;  %v5594_v50 = vld [vmem:[%s7099_s1 + $0x158] sm:$0xff]   ;;  %v5595_v51 = vld [vmem:[%s7099_s1 + $0x120] sm:$0xff]  }
  0x14   : > { %4894 = vmatpush3.bf16.msra.mxu0 %v5560_v7  ;;  %v5596_v52 = vld [vmem:[%s7099_s1 + $0x160] sm:$0xff]   ;;  %v5597_v54 = vld [vmem:[%s7099_s1 + $0x128] sm:$0xff]   ;;  %v5599_v57 = vld [vmem:[%s7099_s1 + $0x130] sm:$0xff]  }
  0x15   : > { %4914 = vmatpush3.bf16.msra.mxu1 %v5561_v8  ;;  %4895 = vmatprep.subr.bf16.mxu0 %v5841_v1  ;;  %v285_v16 = vshll.u32 %v5934_v12, 16  ;;  %v283_v18 = vshrl.u32 %v5934_v12, 16  ;;  %v483_v41 = vrot.slane %v5934_v12, 1  ;;  %v242_v53 = vld [vmem:[%s5923_s8 + $0x4] sm:$0x7]  ;;  %v5598_v56 = vld [vmem:[%s7099_s1 + $0x168] sm:$0xff]  }
  0x16   : > { %4915 = vmatprep.subr.bf16.mxu1 %v5841_v1  ;;  %v6083_v55 = vcombine.low %v242_v53, %v242_v53  ;;  %v5600_v59 = vld [vmem:[%s7099_s1 + $0x170] sm:$0xff]   ;;  %v5601_v60 = vld [vmem:[%s7099_s1 + $0x138] sm:$0xff]   ;;  %v5604_v2 = vld [vmem:[%s7099_s1 + $0x180] sm:$0xff]  }
  0x17   : > { %v287_v19 = vrot.slane %v285_v16, 1  ;;  %v591_v37 = vrot.slane %v283_v18, 1  ;;  %v592_v39 = vrot.slane %v285_v16, 2  ;;  %v5602_v63 = vld [vmem:[%s7099_s1 + $0x178] sm:$0xff]   ;;  %v5605_v3 = vld [vmem:[%s7099_s1 + $0x1c0] sm:$0xff]   ;;  %v5606_v4 = vld [vmem:[%s7099_s1 + $0x188] sm:$0xff]  }
  0x18   : > { %4896 = vmatpush3.bf16.msra.mxu0 %v5562_v9  ;;  %v813_v58 = vshll.u32 %v6083_v55, 16  ;;  %v811_v61 = vshrl.u32 %v6083_v55, 16  ;;  %v5607_v5 = vld [vmem:[%s7099_s1 + $0x1c8] sm:$0xff]   ;;  %v5608_v6 = vld [vmem:[%s7099_s1 + $0x190] sm:$0xff]   ;;  %v5610_v8 = vld [vmem:[%s7099_s1 + $0x198] sm:$0xff]  }
  0x19   : > { %4916 = vmatpush3.bf16.msra.mxu1 %v5563_v10  ;;  %4897 = vmatprep.subr.bf16.mxu0 %v5841_v1  ;;  %v288_v22 = vor.u32 %v287_v19, %v283_v18  ;;  %v593_v42 = vor.u32 %v592_v39, %v591_v37  ;;  %v5609_v7 = vld [vmem:[%s7099_s1 + $0x1d0] sm:$0xff]   ;;  %v5611_v9 = vld [vmem:[%s7099_s1 + $0x1d8] sm:$0xff]   ;;  %v5612_v10 = vld [vmem:[%s7099_s1 + $0x1a0] sm:$0xff]  }
  0x1a   : > { %4917 = vmatprep.subr.bf16.mxu1 %v5841_v1  ;;  %v815_v62 = vrot.slane %v813_v58, 1  ;;  %v5614_v12 = vld [vmem:[%s7099_s1 + $0x1a8] sm:$0xff]   ;;  %v1032_v16 = vrot.slane %v811_v61, 1  ;;  %v1033_v18 = vrot.slane %v813_v58, 2  ;;  %v5619_v19 = vld [vmem:[%s7099_s1 + $0x1f8] sm:$0xff]   ;;  %v5633_v37 = vld [vmem:[%s7099_s1 + $0x270] sm:$0xff]  }
  0x1b   : > { %v5634_v39 = vld [vmem:[%s7099_s1 + $0x238] sm:$0xff]   ;;  %v5650_v58 = vld [vmem:[%s7099_s1 + $0x2f0] sm:$0xff]  }
  0x1c   : > { %4898 = vmatpush3.bf16.msra.mxu0 %v5564_v13  ;;  %v6108_v0 = vor.u32 %v815_v62, %v811_v61  ;;  %v5615_v13 = vld [vmem:[%s7099_s1 + $0x1e8] sm:$0xff]   ;;  %v5652_v61 = vld [vmem:[%s7099_s1 + $0x2f8] sm:$0xff]  }
  0x1d   : > { %4918 = vmatpush3.bf16.msra.mxu1 %v5565_v14  ;;  %4899 = vmatprep.subr.bf16.mxu0 %v5841_v1  ;;  %v5616_v14 = vld [vmem:[%s7099_s1 + $0x1b0] sm:$0xff]  }
  0x1e   : > { %4919 = vmatprep.subr.bf16.mxu1 %v5841_v1 }
  0x20   : > { %4900 = vmatpush3.bf16.msra.mxu0 %v5566_v15  ;;  %v5617_v15 = vld [vmem:[%s7099_s1 + $0x1f0] sm:$0xff]  }
  0x21   : > { %4920 = vmatpush3.bf16.msra.mxu1 %v5567_v17  ;;  %4901 = vmatprep.subr.bf16.mxu0 %v5841_v1  ;;  %v5618_v17 = vld [vmem:[%s7099_s1 + $0x1b8] sm:$0xff]  }
  0x22   : > { %4921 = vmatprep.subr.bf16.mxu1 %v5841_v1 }
  0x24   : > { %4902 = vmatpush3.bf16.msra.mxu0 %v5568_v20  ;;  %v924_v20 = vrot.slane %v6083_v55, 1  ;;  %v5722_v55 = vld [vmem:[%s7099_s1 + $0x110] sm:$0xff]  }
  0x25   : > { %4922 = vmatpush3.bf16.msra.mxu1 %v5569_v21  ;;  %4927 = vmatprep.subr.bf16.mxu0 %v5841_v1  ;;  %v6180_v21 = vor.u32 %v1033_v18, %v1032_v16  ;;  %v5666_v18 = vld [vmem:[%s7099_s1 + $0x370] sm:$0xff]  }
  0x26   : > { %4947 = vmatprep.subr.bf16.mxu1 %v5841_v1 }
  0x27   : > { %4904 = vmatmul.mubr.bf16.vlgmr.msra.gmra.mrb[0].mxu0 %v288_v22  ;;  %v5620_v22 = vld [vmem:[%s7099_s1 + $0x200] sm:$0xff]  }
  0x28   : > { %4924 = vmatmul.mubr.bf16.vlgmr.msra.gmra.mrb[0].mxu1 %v241_v11  ;;  %4928 = vmatpush3.bf16.msra.mxu0 %v5571_v23  ;;  %v5613_v11 = vld [vmem:[%s7099_s1 + $0x1e0] sm:$0xff]  }
  0x29   : > { %4948 = vmatpush3.bf16.msra.mxu1 %v5572_v24  ;;  %4929 = vmatprep.subr.bf16.mxu0 %v5841_v1  ;;  %v5621_v23 = vld [vmem:[%s7099_s1 + $0x240] sm:$0xff]   ;;  %v5622_v24 = vld [vmem:[%s7099_s1 + $0x208] sm:$0xff]  }
  0x2a   : > { %4949 = vmatprep.subr.bf16.mxu1 %v5841_v1  ;;  %4943 = vmatprep.mubr.msk.bf16.mxu0 %vm5842_vm0, %v5841_v1 }
  0x2b   : > { %4963 = vmatprep.mubr.msk.bf16.mxu1 %vm5842_vm0, %v5841_v1 }
  0x2c   : > { %4930 = vmatpush3.bf16.msra.mxu0 %v5573_v25  ;;  %v5623_v25 = vld [vmem:[%s7099_s1 + $0x248] sm:$0xff]  }
  0x2d   : > { %4950 = vmatpush3.bf16.msra.mxu1 %v5574_v26  ;;  %4931 = vmatprep.subr.bf16.mxu0 %v5841_v1  ;;  %v5624_v26 = vld [vmem:[%s7099_s1 + $0x210] sm:$0xff]  }
  0x2e   : > { %4951 = vmatprep.subr.bf16.mxu1 %v5841_v1 }
  0x30   : > { %4932 = vmatpush3.bf16.msra.mxu0 %v5575_v27  ;;  %v5625_v27 = vld [vmem:[%s7099_s1 + $0x250] sm:$0xff]  }
  0x31   : > { %4952 = vmatpush3.bf16.msra.mxu1 %v5576_v28  ;;  %4933 = vmatprep.subr.bf16.mxu0 %v5841_v1  ;;  %v5626_v28 = vld [vmem:[%s7099_s1 + $0x218] sm:$0xff]  }
  0x32   : > { %4953 = vmatprep.subr.bf16.mxu1 %v5841_v1 }
  0x34   : > { %4934 = vmatpush3.bf16.msra.mxu0 %v5577_v29  ;;  %v5627_v29 = vld [vmem:[%s7099_s1 + $0x258] sm:$0xff]  }
  0x35   : > { %4954 = vmatpush3.bf16.msra.mxu1 %v5578_v30  ;;  %4935 = vmatprep.subr.bf16.mxu0 %v5841_v1  ;;  %v5628_v30 = vld [vmem:[%s7099_s1 + $0x220] sm:$0xff]  }
  0x36   : > { %4955 = vmatprep.subr.bf16.mxu1 %v5841_v1 }
  0x38   : > { %4936 = vmatpush3.bf16.msra.mxu0 %v5579_v31  ;;  %v5629_v31 = vld [vmem:[%s7099_s1 + $0x260] sm:$0xff]  }
  0x39   : > { %4956 = vmatpush3.bf16.msra.mxu1 %v5580_v32  ;;  %4937 = vmatprep.subr.bf16.mxu0 %v5841_v1  ;;  %v243_v32 = vld [vmem:[%s5923_s8 + $0x8] sm:$0x7] }
  0x3a   : > { %4957 = vmatprep.subr.bf16.mxu1 %v5841_v1 }
  0x3c   : > { %4938 = vmatpush3.bf16.msra.mxu0 %v5581_v33  ;;  %v5630_v33 = vld [vmem:[%s7099_s1 + $0x228] sm:$0xff]  }
  0x3d   : > { %4958 = vmatpush3.bf16.msra.mxu1 %v5582_v34  ;;  %4939 = vmatprep.subr.bf16.mxu0 %v5841_v1  ;;  %v5631_v34 = vld [vmem:[%s7099_s1 + $0x268] sm:$0xff]  }
  0x3e   : > { %4959 = vmatprep.subr.bf16.mxu1 %v5841_v1 }
  0x40   : > { %4940 = vmatpush3.bf16.msra.mxu0 %v5583_v35  ;;  %v6236_v35 = vcombine.low %v243_v32, %v243_v32 }
  0x41   : > { %4960 = vmatpush3.bf16.msra.mxu1 %v5584_v36  ;;  %4941 = vmatprep.subr.bf16.mxu0 %v5841_v1  ;;  %v5632_v36 = vld [vmem:[%s7099_s1 + $0x230] sm:$0xff]  }
  0x42   : > { %4961 = vmatprep.subr.bf16.mxu1 %v5841_v1 }
  0x44   : > { %4942 = vmatpush3.bf16.msra.mxu0 %v5585_v38  ;;  %v1254_v38 = vshll.u32 %v6236_v35, 16 }
  0x45   : > { %4962 = vmatpush3.bf16.msra.mxu1 %v5586_v40  ;;  %4967 = vmatprep.subr.bf16.mxu0 %v5841_v1  ;;  %v5635_v40 = vld [vmem:[%s7099_s1 + $0x278] sm:$0xff]  }
  0x46   : > { %4987 = vmatprep.subr.bf16.mxu1 %v5841_v1  ;;  %v1474_v62 = vrot.slane %v1254_v38, 2 }
  0x47   : > { %4944 = vmatmul.mubr.bf16.vlgmr.msra.gmra.mrb[4].mxu0 %v483_v41  ;;  %v1252_v41 = vshrl.u32 %v6236_v35, 16 }
  0x48   : > { %4964 = vmatmul.mubr.bf16.vlgmr.msra.gmra.mrb[4].mxu1 %v593_v42  ;;  %4968 = vmatpush3.bf16.msra.mxu0 %v5587_v43  ;;  %v1256_v42 = vrot.slane %v1254_v38, 1  ;;  %v5637_v43 = vld [vmem:[%s7099_s1 + $0x280] sm:$0xff]   ;;  %v5680_v38 = vld [vmem:[%s7099_s1 + $0x3a8] sm:$0xff]  }
  0x49   : > { %4988 = vmatpush3.bf16.msra.mxu1 %v5588_v44  ;;  %4969 = vmatprep.subr.bf16.mxu0 %v5841_v1  ;;  %v5638_v44 = vld [vmem:[%s7099_s1 + $0x2c0] sm:$0xff]  }
  0x4a   : > { %4989 = vmatprep.subr.bf16.mxu1 %v5841_v1  ;;  %4983 = vmatprep.mubr.msk.bf16.mxu0 %vm5842_vm0, %v5841_v1 }
  0x4b   : > { %5003 = vmatprep.mubr.msk.bf16.mxu1 %vm5842_vm0, %v5841_v1 }
  0x4c   : > { %4970 = vmatpush3.bf16.msra.mxu0 %v5589_v45  ;;  %v6264_v45 = vor.u32 %v1256_v42, %v1252_v41 }
  0x4d   : > { %4990 = vmatpush3.bf16.msra.mxu1 %v5590_v46  ;;  %4971 = vmatprep.subr.bf16.mxu0 %v5841_v1  ;;  %v5639_v46 = vld [vmem:[%s7099_s1 + $0x288] sm:$0xff]  }
  0x4e   : > { %4991 = vmatprep.subr.bf16.mxu1 %v5841_v1 }
  0x50   : > { %4972 = vmatpush3.bf16.msra.mxu0 %v5591_v47  ;;  %v5640_v47 = vld [vmem:[%s7099_s1 + $0x2c8] sm:$0xff]  }
  0x51   : > { %4992 = vmatpush3.bf16.msra.mxu1 %v5592_v48  ;;  %4973 = vmatprep.subr.bf16.mxu0 %v5841_v1  ;;  %v5641_v48 = vld [vmem:[%s7099_s1 + $0x290] sm:$0xff]  }
  0x52   : > { %4993 = vmatprep.subr.bf16.mxu1 %v5841_v1 }
  0x54   : > { %4974 = vmatpush3.bf16.msra.mxu0 %v5593_v49  ;;  %v5642_v49 = vld [vmem:[%s7099_s1 + $0x2d0] sm:$0xff]  }
  0x55   : > { %4994 = vmatpush3.bf16.msra.mxu1 %v5594_v50  ;;  %4975 = vmatprep.subr.bf16.mxu0 %v5841_v1  ;;  %v5643_v50 = vld [vmem:[%s7099_s1 + $0x298] sm:$0xff]  }
  0x56   : > { %4995 = vmatprep.subr.bf16.mxu1 %v5841_v1 }
  0x58   : > { %4976 = vmatpush3.bf16.msra.mxu0 %v5595_v51  ;;  %v5644_v51 = vld [vmem:[%s7099_s1 + $0x2d8] sm:$0xff]  }
  0x59   : > { %4996 = vmatpush3.bf16.msra.mxu1 %v5596_v52  ;;  %4977 = vmatprep.subr.bf16.mxu0 %v5841_v1  ;;  %v5645_v52 = vld [vmem:[%s7099_s1 + $0x2a0] sm:$0xff]  }
  0x5a   : > { %4997 = vmatprep.subr.bf16.mxu1 %v5841_v1 }
  0x5c   : > { %4978 = vmatpush3.bf16.msra.mxu0 %v5597_v54  ;;  %v5647_v54 = vld [vmem:[%s7099_s1 + $0x2a8] sm:$0xff]  }
  0x5d   : > { %4998 = vmatpush3.bf16.msra.mxu1 %v5598_v56  ;;  %4979 = vmatprep.subr.bf16.mxu0 %v5841_v1  ;;  %v5648_v56 = vld [vmem:[%s7099_s1 + $0x2e8] sm:$0xff]  }
  0x5e   : > { %4999 = vmatprep.subr.bf16.mxu1 %v5841_v1 }
  0x60   : > { %4980 = vmatpush3.bf16.msra.mxu0 %v5599_v57  ;;  %v5649_v57 = vld [vmem:[%s7099_s1 + $0x2b0] sm:$0xff]  }
  0x61   : > { %5000 = vmatpush3.bf16.msra.mxu1 %v5600_v59  ;;  %4981 = vmatprep.subr.bf16.mxu0 %v5841_v1  ;;  %v5651_v59 = vld [vmem:[%s7099_s1 + $0x2b8] sm:$0xff]  }
  0x62   : > { %5001 = vmatprep.subr.bf16.mxu1 %v5841_v1 }
  0x64   : > { %4982 = vmatpush3.bf16.msra.mxu0 %v5601_v60  ;;  %v1473_v60 = vrot.slane %v1252_v41, 1 }
  0x65   : > { %5002 = vmatpush3.bf16.msra.mxu1 %v5602_v63  ;;  %5007 = vmatprep.subr.bf16.mxu0 %v5841_v1  ;;  %v5653_v63 = vld [vmem:[%s7099_s1 + $0x300] sm:$0xff]  }
  0x66   : > { %5027 = vmatprep.subr.bf16.mxu1 %v5841_v1 }
  0x67   : > { %4984 = vmatmul.mubr.bf16.vlgmr.msra.gmra.mrb[8].mxu0 %v242_v53  ;;  %v5646_v53 = vld [vmem:[%s7099_s1 + $0x2e0] sm:$0xff]  }
  0x68   : > { %5004 = vmatmul.mubr.bf16.vlgmr.msra.gmra.mrb[8].mxu1 %v6108_v0  ;;  %5008 = vmatpush3.bf16.msra.mxu0 %v5604_v2  ;;  %v1365_v2 = vrot.slane %v6236_v35, 1  ;;  %v5754_v35 = vld [vmem:[%s7099_s1 + $0x210] sm:$0xff]  }
  0x69   : > { %5028 = vmatpush3.bf16.msra.mxu1 %v5605_v3  ;;  %5009 = vmatprep.subr.bf16.mxu0 %v5841_v1  ;;  %v5654_v3 = vld [vmem:[%s7099_s1 + $0x340] sm:$0xff]  }
  0x6a   : > { %5029 = vmatprep.subr.bf16.mxu1 %v5841_v1  ;;  %5023 = vmatprep.mubr.msk.bf16.mxu0 %vm5842_vm0, %v5841_v1 }
  0x6b   : > { %5043 = vmatprep.mubr.msk.bf16.mxu1 %vm5842_vm0, %v5841_v1 }
  0x6c   : > { %5010 = vmatpush3.bf16.msra.mxu0 %v5606_v4  ;;  %v6336_v4 = vor.u32 %v1474_v62, %v1473_v60  ;;  %v5687_v60 = vld [vmem:[%s7099_s1] sm:$0xff]   ;;  %v5689_v62 = vld [vmem:[%s7099_s1 + $0x8] sm:$0xff]  }
  0x6d   : > { %5030 = vmatpush3.bf16.msra.mxu1 %v5607_v5  ;;  %5011 = vmatprep.subr.bf16.mxu0 %v5841_v1  ;;  %v5655_v5 = vld [vmem:[%s7099_s1 + $0x308] sm:$0xff]  }
  0x6e   : > { %5031 = vmatprep.subr.bf16.mxu1 %v5841_v1 }
  0x70   : > { %5012 = vmatpush3.bf16.msra.mxu0 %v5608_v6  ;;  %v5656_v6 = vld [vmem:[%s7099_s1 + $0x348] sm:$0xff]  }
  0x71   : > { %5032 = vmatpush3.bf16.msra.mxu1 %v5609_v7  ;;  %5013 = vmatprep.subr.bf16.mxu0 %v5841_v1  ;;  %v5657_v7 = vld [vmem:[%s7099_s1 + $0x310] sm:$0xff]  }
  0x72   : > { %5033 = vmatprep.subr.bf16.mxu1 %v5841_v1 }
  0x74   : > { %5014 = vmatpush3.bf16.msra.mxu0 %v5610_v8  ;;  %v5658_v8 = vld [vmem:[%s7099_s1 + $0x350] sm:$0xff]  }
  0x75   : > { %5034 = vmatpush3.bf16.msra.mxu1 %v5611_v9  ;;  %5015 = vmatprep.subr.bf16.mxu0 %v5841_v1  ;;  %v5659_v9 = vld [vmem:[%s7099_s1 + $0x318] sm:$0xff]  }
  0x76   : > { %5035 = vmatprep.subr.bf16.mxu1 %v5841_v1 }
  0x78   : > { %5016 = vmatpush3.bf16.msra.mxu0 %v5612_v10  ;;  %v5660_v10 = vld [vmem:[%s7099_s1 + $0x358] sm:$0xff]  }
  0x79   : > { %5036 = vmatpush3.bf16.msra.mxu1 %v5613_v11  ;;  %5017 = vmatprep.subr.bf16.mxu0 %v5841_v1  ;;  %v5661_v11 = vld [vmem:[%s7099_s1 + $0x320] sm:$0xff]  }
  0x7a   : > { %5037 = vmatprep.subr.bf16.mxu1 %v5841_v1 }
  0x7c   : > { %5018 = vmatpush3.bf16.msra.mxu0 %v5614_v12  ;;  %v5662_v12 = vld [vmem:[%s7099_s1 + $0x360] sm:$0xff]  }
  0x7d   : > { %5038 = vmatpush3.bf16.msra.mxu1 %v5615_v13  ;;  %5019 = vmatprep.subr.bf16.mxu0 %v5841_v1  ;;  %v6378_v13 = vld [vmem:[%s5923_s8 + $0xc] sm:$0x7] }
  0x7e   : > { %5039 = vmatprep.subr.bf16.mxu1 %v5841_v1  ;;  %v6390_v16 = vcombine.low %v6378_v13, %v6378_v13 }
  0x80   : > { %5020 = vmatpush3.bf16.msra.mxu0 %v5616_v14  ;;  %v5663_v14 = vld [vmem:[%s7099_s1 + $0x328] sm:$0xff]  }
  0x81   : > { %5040 = vmatpush3.bf16.msra.mxu1 %v5617_v15  ;;  %5021 = vmatprep.subr.bf16.mxu0 %v5841_v1  ;;  %v5664_v15 = vld [vmem:[%s7099_s1 + $0x368] sm:$0xff]  }
  0x82   : > { %5041 = vmatprep.subr.bf16.mxu1 %v5841_v1 }
  0x84   : > { %5022 = vmatpush3.bf16.msra.mxu0 %v5618_v17  ;;  %v5665_v17 = vld [vmem:[%s7099_s1 + $0x330] sm:$0xff]  }
  0x85   : > { %5042 = vmatpush3.bf16.msra.mxu1 %v5619_v19  ;;  %5047 = vmatprep.subr.bf16.mxu0 %v5841_v1  ;;  %v1695_v19 = vshll.u32 %v6390_v16, 16 }
  0x86   : > { %5067 = vmatprep.subr.bf16.mxu1 %v5841_v1 }
  0x87   : > { %5024 = vmatmul.mubr.bf16.vlgmr.msra.gmra.mrb[12].mxu0 %v924_v20 }
  0x88   : > { %5044 = vmatmul.mubr.bf16.vlgmr.msra.gmra.mrb[12].mxu1 %v6180_v21  ;;  %5048 = vmatpush3.bf16.msra.mxu0 %v5620_v22  ;;  %v5667_v22 = vld [vmem:[%s7099_s1 + $0x338] sm:$0xff]  }
  0x89   : > { %5068 = vmatpush3.bf16.msra.mxu1 %v5621_v23  ;;  %5049 = vmatprep.subr.bf16.mxu0 %v5841_v1  ;;  %v5668_v23 = vld [vmem:[%s7099_s1 + $0x378] sm:$0xff]  }
  0x8a   : > { %5069 = vmatprep.subr.bf16.mxu1 %v5841_v1  ;;  %5063 = vmatprep.mubr.msk.bf16.mxu0 %vm5842_vm0, %v5841_v1 }
  0x8b   : > { %5083 = vmatprep.mubr.msk.bf16.mxu1 %vm5842_vm0, %v5841_v1 }
  0x8c   : > { %5050 = vmatpush3.bf16.msra.mxu0 %v5622_v24  ;;  %v1693_v24 = vshrl.u32 %v6390_v16, 16 }
  0x8d   : > { %5070 = vmatpush3.bf16.msra.mxu1 %v5623_v25  ;;  %5051 = vmatprep.subr.bf16.mxu0 %v5841_v1  ;;  %v1697_v25 = vrot.slane %v1695_v19, 1 }
  0x8e   : > { %5071 = vmatprep.subr.bf16.mxu1 %v5841_v1 }
  0x90   : > { %5052 = vmatpush3.bf16.msra.mxu0 %v5624_v26  ;;  %v5670_v26 = vld [vmem:[%s7099_s1 + $0x380] sm:$0xff]  }
  0x91   : > { %5072 = vmatpush3.bf16.msra.mxu1 %v5625_v27  ;;  %5053 = vmatprep.subr.bf16.mxu0 %v5841_v1  ;;  %v5671_v27 = vld [vmem:[%s7099_s1 + $0x3c0] sm:$0xff]  }
  0x92   : > { %5073 = vmatprep.subr.bf16.mxu1 %v5841_v1 }
  0x94   : > { %5054 = vmatpush3.bf16.msra.mxu0 %v5626_v28  ;;  %v6422_v28 = vor.u32 %v1697_v25, %v1693_v24  ;;  %v5699_v25 = vld [vmem:[%s7099_s1 + $0x30] sm:$0xff]  }
  0x95   : > { %5074 = vmatpush3.bf16.msra.mxu1 %v5627_v29  ;;  %5055 = vmatprep.subr.bf16.mxu0 %v5841_v1  ;;  %v5672_v29 = vld [vmem:[%s7099_s1 + $0x388] sm:$0xff]  }
  0x96   : > { %5075 = vmatprep.subr.bf16.mxu1 %v5841_v1 }
  0x98   : > { %5056 = vmatpush3.bf16.msra.mxu0 %v5628_v30  ;;  %v5673_v30 = vld [vmem:[%s7099_s1 + $0x3c8] sm:$0xff]  }
  0x99   : > { %5076 = vmatpush3.bf16.msra.mxu1 %v5629_v31  ;;  %5057 = vmatprep.subr.bf16.mxu0 %v5841_v1  ;;  %v5674_v31 = vld [vmem:[%s7099_s1 + $0x390] sm:$0xff]  }
  0x9a   : > { %5077 = vmatprep.subr.bf16.mxu1 %v5841_v1 }
  0x9c   : > { %5058 = vmatpush3.bf16.msra.mxu0 %v5630_v33  ;;  %v5676_v33 = vld [vmem:[%s7099_s1 + $0x398] sm:$0xff]  }
  0x9d   : > { %5078 = vmatpush3.bf16.msra.mxu1 %v5631_v34  ;;  %5059 = vmatprep.subr.bf16.mxu0 %v5841_v1  ;;  %v5677_v34 = vld [vmem:[%s7099_s1 + $0x3d8] sm:$0xff]  }
  0x9e   : > { %5079 = vmatprep.subr.bf16.mxu1 %v5841_v1 }
  0xa0   : > { %5060 = vmatpush3.bf16.msra.mxu0 %v5632_v36  ;;  %v5678_v36 = vld [vmem:[%s7099_s1 + $0x3a0] sm:$0xff]  }
  0xa1   : > { %5080 = vmatpush3.bf16.msra.mxu1 %v5633_v37  ;;  %5061 = vmatprep.subr.bf16.mxu0 %v5841_v1  ;;  %v5679_v37 = vld [vmem:[%s7099_s1 + $0x3e0] sm:$0xff]  }
  0xa2   : > { %5081 = vmatprep.subr.bf16.mxu1 %v5841_v1 }
  0xa4   : > { %5062 = vmatpush3.bf16.msra.mxu0 %v5634_v39  ;;  %v5681_v39 = vld [vmem:[%s7099_s1 + $0x3e8] sm:$0xff]  }
  0xa5   : > { %5082 = vmatpush3.bf16.msra.mxu1 %v5635_v40  ;;  %5087 = vmatprep.subr.bf16.mxu0 %v5841_v1 }
  0xa6   : > { %5107 = vmatprep.subr.bf16.mxu1 %v5841_v1 }
  0xa7   : > { %5064 = vmatmul.mubr.bf16.vlgmr.msra.gmra.mrb[16].mxu0 %v243_v32  ;;  %v5675_v32 = vld [vmem:[%s7099_s1 + $0x3d0] sm:$0xff]  }
  0xa8   : > { %5084 = vmatmul.mubr.bf16.vlgmr.msra.gmra.mrb[16].mxu1 %v6264_v45  ;;  %5088 = vmatpush3.bf16.msra.mxu0 %v5637_v43 }
  0xa9   : > { %5108 = vmatpush3.bf16.msra.mxu1 %v5638_v44  ;;  %5089 = vmatprep.subr.bf16.mxu0 %v5841_v1 }
  0xaa   : > { %5109 = vmatprep.subr.bf16.mxu1 %v5841_v1  ;;  %5103 = vmatprep.mubr.msk.bf16.mxu0 %vm5842_vm0, %v5841_v1 }
  0xab   : > { %5123 = vmatprep.mubr.msk.bf16.mxu1 %vm5842_vm0, %v5841_v1 }
  0xac   : > { %5090 = vmatpush3.bf16.msra.mxu0 %v5639_v46 }
  0xad   : > { %5110 = vmatpush3.bf16.msra.mxu1 %v5640_v47  ;;  %5091 = vmatprep.subr.bf16.mxu0 %v5841_v1  ;;  %v5682_v47 = vld [vmem:[%s7099_s1 + $0x3b0] sm:$0xff]  }
  0xae   : > { %5111 = vmatprep.subr.bf16.mxu1 %v5841_v1 }
  0xb0   : > { %5092 = vmatpush3.bf16.msra.mxu0 %v5641_v48 }
  0xb1   : > { %5112 = vmatpush3.bf16.msra.mxu1 %v5642_v49  ;;  %5093 = vmatprep.subr.bf16.mxu0 %v5841_v1 }
  0xb2   : > { %5113 = vmatprep.subr.bf16.mxu1 %v5841_v1 }
  0xb4   : > { %5094 = vmatpush3.bf16.msra.mxu0 %v5643_v50  ;;  %v5683_v50 = vld [vmem:[%s7099_s1 + $0x3f0] sm:$0xff]  }
  0xb5   : > { %5114 = vmatpush3.bf16.msra.mxu1 %v5644_v51  ;;  %5095 = vmatprep.subr.bf16.mxu0 %v5841_v1 }
  0xb6   : > { %5115 = vmatprep.subr.bf16.mxu1 %v5841_v1 }
  0xb8   : > { %5096 = vmatpush3.bf16.msra.mxu0 %v5645_v52  ;;  %v5684_v52 = vld [vmem:[%s7099_s1 + $0x3b8] sm:$0xff]  }
  0xb9   : > { %5116 = vmatpush3.bf16.msra.mxu1 %v5646_v53  ;;  %5097 = vmatprep.subr.bf16.mxu0 %v5841_v1  ;;  %v1914_v53 = vrot.slane %v1693_v24, 1 }
  0xba   : > { %5117 = vmatprep.subr.bf16.mxu1 %v5841_v1 }
  0xbc   : > { %5098 = vmatpush3.bf16.msra.mxu0 %v5647_v54  ;;  %v1915_v54 = vrot.slane %v1695_v19, 2  ;;  %v5698_v19 = vld [vmem:[%s7099_s1 + $0x70] sm:$0xff]  }
  0xbd   : > { %5118 = vmatpush3.bf16.msra.mxu1 %v5648_v56  ;;  %5099 = vmatprep.subr.bf16.mxu0 %v5841_v1  ;;  %v5685_v56 = vld [vmem:[%s7099_s1 + $0x3f8] sm:$0xff]  }
  0xbe   : > { %5119 = vmatprep.subr.bf16.mxu1 %v5841_v1 }
  0xc0   : > { %5100 = vmatpush3.bf16.msra.mxu0 %v5649_v57  ;;  %v1806_v57 = vrot.slane %v6390_v16, 1  ;;  %v5786_v16 = vld [vmem:[%s7099_s1 + $0x310] sm:$0xff]  }
  0xc1   : > { %5120 = vmatpush3.bf16.msra.mxu1 %v5650_v58  ;;  %5101 = vmatprep.subr.bf16.mxu0 %v5841_v1  ;;  %v6495_v58 = vor.u32 %v1915_v54, %v1914_v53  ;;  %v5715_v54 = vld [vmem:[%s7099_s1 + $0xf0] sm:$0xff]  }
  0xc2   : > { %5121 = vmatprep.subr.bf16.mxu1 %v5841_v1 }
  0xc4   : > { %5102 = vmatpush3.bf16.msra.mxu0 %v5651_v59  ;;  %v5686_v59 = vld [vmem:[%s7099_s1 + $0x40] sm:$0xff]  }
  0xc5   : > { %5122 = vmatpush3.bf16.msra.mxu1 %v5652_v61  ;;  %5127 = vmatprep.subr.bf16.mxu0 %v5841_v1  ;;  %v5688_v61 = vld [vmem:[%s7099_s1 + $0x48] sm:$0xff]  }
  0xc6   : > { %5147 = vmatprep.subr.bf16.mxu1 %v5841_v1 }
  0xc7   : > { %5104 = vmatmul.mubr.bf16.vlgmr.msra.gmra.mrb[20].mxu0 %v1365_v2 }
  0xc8   : > { %5124 = vmatmul.mubr.bf16.vlgmr.msra.gmra.mrb[20].mxu1 %v6336_v4  ;;  %5128 = vmatpush3.bf16.msra.mxu0 %v5653_v63  ;;  %v5690_v63 = vld [vmem:[%s7099_s1 + $0x50] sm:$0xff]  }
  0xc9   : > { %5148 = vmatpush3.bf16.msra.mxu1 %v5654_v3  ;;  %5129 = vmatprep.subr.bf16.mxu0 %v5841_v1  ;;  %v5691_v3 = vld [vmem:[%s7099_s1 + $0x10] sm:$0xff]  }
  0xca   : > { %5149 = vmatprep.subr.bf16.mxu1 %v5841_v1  ;;  %5143 = vmatprep.mubr.msk.bf16.mxu0 %vm5842_vm0, %v5841_v1 }
  0xcb   : > { %5163 = vmatprep.mubr.msk.bf16.mxu1 %vm5842_vm0, %v5841_v1 }
  0xcc   : > { %5130 = vmatpush3.bf16.msra.mxu0 %v5655_v5  ;;  %v5692_v5 = vld [vmem:[%s7099_s1 + $0x58] sm:$0xff]  }
  0xcd   : > { %5150 = vmatpush3.bf16.msra.mxu1 %v5656_v6  ;;  %5131 = vmatprep.subr.bf16.mxu0 %v5841_v1  ;;  %v5693_v6 = vld [vmem:[%s7099_s1 + $0x18] sm:$0xff]  }
  0xce   : > { %5151 = vmatprep.subr.bf16.mxu1 %v5841_v1 }
  0xd0   : > { %5132 = vmatpush3.bf16.msra.mxu0 %v5657_v7  ;;  %v5694_v7 = vld [vmem:[%s7099_s1 + $0x60] sm:$0xff]  }
  0xd1   : > { %5152 = vmatpush3.bf16.msra.mxu1 %v5658_v8  ;;  %5133 = vmatprep.subr.bf16.mxu0 %v5841_v1  ;;  %v5695_v8 = vld [vmem:[%s7099_s1 + $0x20] sm:$0xff]  }
  0xd2   : > { %5153 = vmatprep.subr.bf16.mxu1 %v5841_v1 }
  0xd4   : > { %5134 = vmatpush3.bf16.msra.mxu0 %v5659_v9  ;;  %v5696_v9 = vld [vmem:[%s7099_s1 + $0x68] sm:$0xff]  }
  0xd5   : > { %5154 = vmatpush3.bf16.msra.mxu1 %v5660_v10  ;;  %5135 = vmatprep.subr.bf16.mxu0 %v5841_v1  ;;  %v5697_v10 = vld [vmem:[%s7099_s1 + $0x28] sm:$0xff]  }
  0xd6   : > { %5155 = vmatprep.subr.bf16.mxu1 %v5841_v1 }
  0xd8   : > { %5136 = vmatpush3.bf16.msra.mxu0 %v5661_v11 }
  0xd9   : > { %5156 = vmatpush3.bf16.msra.mxu1 %v5662_v12  ;;  %5137 = vmatprep.subr.bf16.mxu0 %v5841_v1 }
  0xda   : > { %5157 = vmatprep.subr.bf16.mxu1 %v5841_v1 }
  0xdc   : > { %5138 = vmatpush3.bf16.msra.mxu0 %v5663_v14 }
  0xdd   : > { %5158 = vmatpush3.bf16.msra.mxu1 %v5664_v15  ;;  %5139 = vmatprep.subr.bf16.mxu0 %v5841_v1 }
  0xde   : > { %5159 = vmatprep.subr.bf16.mxu1 %v5841_v1 }
  0xe0   : > { %5140 = vmatpush3.bf16.msra.mxu0 %v5665_v17 }
  0xe1   : > { %5160 = vmatpush3.bf16.msra.mxu1 %v5666_v18  ;;  %5141 = vmatprep.subr.bf16.mxu0 %v5841_v1 }
  0xe2   : > { %5161 = vmatprep.subr.bf16.mxu1 %v5841_v1 }
  0xe4   : > { %5142 = vmatpush3.bf16.msra.mxu0 %v5667_v22 }
  0xe5   : > { %5162 = vmatpush3.bf16.msra.mxu1 %v5668_v23  ;;  %5167 = vmatprep.subr.bf16.mxu0 %v5841_v1 }
  0xe6   : > { %5187 = vmatprep.subr.bf16.mxu1 %v5841_v1 }
  0xe7   : > { %5144 = vmatmul.mubr.bf16.vlgmr.msra.gmra.mrb[24].mxu0 %v6378_v13 }
  0xe8   : > { %5164 = vmatmul.mubr.bf16.vlgmr.msra.gmra.mrb[24].mxu1 %v6422_v28  ;;  %5168 = vmatpush3.bf16.msra.mxu0 %v5670_v26 }
  0xe9   : > { %5188 = vmatpush3.bf16.msra.mxu1 %v5671_v27  ;;  %5169 = vmatprep.subr.bf16.mxu0 %v5841_v1  ;;  %v5700_v27 = vld [vmem:[%s7099_s1 + $0x78] sm:$0xff]  }
  0xea   : > { %5189 = vmatprep.subr.bf16.mxu1 %v5841_v1  ;;  %5183 = vmatprep.mubr.msk.bf16.mxu0 %vm5842_vm0, %v5841_v1 }
  0xeb   : > { %5203 = vmatprep.mubr.msk.bf16.mxu1 %vm5842_vm0, %v5841_v1 }
  0xec   : > { %5170 = vmatpush3.bf16.msra.mxu0 %v5672_v29  ;;  %v5701_v29 = vld [vmem:[%s7099_s1 + $0x38] sm:$0xff]  }
  0xed   : > { %5190 = vmatpush3.bf16.msra.mxu1 %v5673_v30  ;;  %5171 = vmatprep.subr.bf16.mxu0 %v5841_v1  ;;  %v5702_v30 = vld [vmem:[%s7099_s1 + $0x80] sm:$0xff]  }
  0xee   : > { %5191 = vmatprep.subr.bf16.mxu1 %v5841_v1 }
  0xf0   : > { %5172 = vmatpush3.bf16.msra.mxu0 %v5674_v31  ;;  %v5703_v31 = vld [vmem:[%s7099_s1 + $0xc0] sm:$0xff]  }
  0xf1   : > { %5192 = vmatpush3.bf16.msra.mxu1 %v5675_v32  ;;  %5173 = vmatprep.subr.bf16.mxu0 %v5841_v1  ;;  %v5815_v32 = vld [vmem:[%s5923_s8 + $0x4] sm:$0x7] }
  0xf2   : > { %5193 = vmatprep.subr.bf16.mxu1 %v5841_v1 }
  0xf4   : > { %5174 = vmatpush3.bf16.msra.mxu0 %v5676_v33  ;;  %v5704_v33 = vld [vmem:[%s7099_s1 + $0x88] sm:$0xff]  }
  0xf5   : > { %5194 = vmatpush3.bf16.msra.mxu1 %v5677_v34  ;;  %5175 = vmatprep.subr.bf16.mxu0 %v5841_v1  ;;  %v5705_v34 = vld [vmem:[%s7099_s1 + $0xc8] sm:$0xff]  }
  0xf6   : > { %5195 = vmatprep.subr.bf16.mxu1 %v5841_v1 }
  0xf8   : > { %5176 = vmatpush3.bf16.msra.mxu0 %v5678_v36  ;;  %v5707_v36 = vld [vmem:[%s7099_s1 + $0xd0] sm:$0xff]  }
  0xf9   : > { %5196 = vmatpush3.bf16.msra.mxu1 %v5679_v37  ;;  %5177 = vmatprep.subr.bf16.mxu0 %v5841_v1  ;;  %v5708_v37 = vld [vmem:[%s7099_s1 + $0x98] sm:$0xff]  }
  0xfa   : > { %v372_v40 = vpop.f32.mrb[0].mxu0  ;;  %5197 = vmatprep.subr.bf16.mxu1 %v5841_v1 }
  0xfb   : > { %v460_v41 = vpop.f32.mrb[0].mxu1  ;;  %v4905_v42 = vpop.f32.mrb[1].mxu0 }
  0xfc   : > { %v6472_v43 = vadd.f32 %v460_v41, %v372_v40  ;;  %v4925_v44 = vpop.f32.mrb[1].mxu1  ;;  %v375_v46 = vpop.f32.mrb[2].mxu0  ;;  %5178 = vmatpush3.bf16.msra.mxu0 %v5680_v38  ;;  %v5709_v38 = vld [vmem:[%s7099_s1 + $0xd8] sm:$0xff]   ;;  %v5711_v40 = vld [vmem:[%s7099_s1 + $0xe0] sm:$0xff]   ;;  %v5712_v41 = vld [vmem:[%s7099_s1 + $0xa8] sm:$0xff]  }
  0xfd   : > { %v463_v48 = vpop.f32.mrb[2].mxu1  ;;  %5198 = vmatpush3.bf16.msra.mxu1 %v5681_v39  ;;  %v4906_v49 = vpop.f32.mrb[3].mxu0  ;;  %5179 = vmatprep.subr.bf16.mxu0 %v5841_v1  ;;  %v5710_v39 = vld [vmem:[%s7099_s1 + $0xa0] sm:$0xff]   ;;  %v5713_v42 = vld [vmem:[%s7099_s1 + $0xe8] sm:$0xff]  }
  0xfe   : > { %v4926_v51 = vpop.f32.mrb[3].mxu1  ;;  %5199 = vmatprep.subr.bf16.mxu1 %v5841_v1 }
 0x100   : > { %5180 = vmatpush3.bf16.msra.mxu0 %v5682_v47 }
 0x101   : > { %5200 = vmatpush3.bf16.msra.mxu1 %v5683_v50  ;;  %5181 = vmatprep.subr.bf16.mxu0 %v5841_v1  ;;  %v5714_v50 = vld [vmem:[%s7099_s1 + $0xb0] sm:$0xff]  }
 0x102   : > { %5201 = vmatprep.subr.bf16.mxu1 %v5841_v1 }
 0x104   : > { %5182 = vmatpush3.bf16.msra.mxu0 %v5684_v52 }
 0x105   : > { %5202 = vmatpush3.bf16.msra.mxu1 %v5685_v56  ;;  %5207 = vmatprep.subr.bf16.mxu0 %v5841_v1 }
 0x106   : > { %5227 = vmatprep.subr.bf16.mxu1 %v5841_v1 }
 0x107   : > { %5184 = vmatmul.mubr.bf16.vlgmr.msra.gmra.mrb[28].mxu0 %v1806_v57 }
 0x108   : > { %5204 = vmatmul.mubr.bf16.vlgmr.msra.gmra.mrb[28].mxu1 %v6495_v58  ;;  %5208 = vmatpush3.bf16.msra.mxu0 %v5686_v59  ;;  %v5716_v59 = vld [vmem:[%s7099_s1 + $0xb8] sm:$0xff]  }
 0x109   : > { %5228 = vmatpush3.bf16.msra.mxu1 %v5687_v60  ;;  %5209 = vmatprep.subr.bf16.mxu0 %v5841_v1  ;;  %v5717_v60 = vld [vmem:[%s7099_s1 + $0xf8] sm:$0xff]  }
 0x10a   : > { %5229 = vmatprep.subr.bf16.mxu1 %v5841_v1  ;;  %5223 = vmatprep.mubr.msk.bf16.mxu0 %vm5842_vm0, %v5841_v1 }
 0x10b   : > { %5243 = vmatprep.mubr.msk.bf16.mxu1 %vm5842_vm0, %v5841_v1 }
 0x10c   : > { %5210 = vmatpush3.bf16.msra.mxu0 %v5688_v61  ;;  %v5718_v61 = vld [vmem:[%s7099_s1 + $0x100] sm:$0xff]  }
 0x10d   : > { %5230 = vmatpush3.bf16.msra.mxu1 %v5689_v62  ;;  %5211 = vmatprep.subr.bf16.mxu0 %v5841_v1  ;;  %v5719_v62 = vld [vmem:[%s7099_s1 + $0x140] sm:$0xff]  }
 0x10e   : > { %5231 = vmatprep.subr.bf16.mxu1 %v5841_v1 }
 0x110   : > { %5212 = vmatpush3.bf16.msra.mxu0 %v5690_v63  ;;  %v5720_v63 = vld [vmem:[%s7099_s1 + $0x108] sm:$0xff]  }
 0x111   : > { %5232 = vmatpush3.bf16.msra.mxu1 %v5691_v3  ;;  %5213 = vmatprep.subr.bf16.mxu0 %v5841_v1  ;;  %v5721_v3 = vld [vmem:[%s7099_s1 + $0x148] sm:$0xff]  }
 0x112   : > { %5233 = vmatprep.subr.bf16.mxu1 %v5841_v1 }
 0x114   : > { %5214 = vmatpush3.bf16.msra.mxu0 %v5692_v5  ;;  %v5725_v5 = vld [vmem:[%s7099_s1 + $0x158] sm:$0xff]  }
 0x115   : > { %5234 = vmatpush3.bf16.msra.mxu1 %v5693_v6  ;;  %5215 = vmatprep.subr.bf16.mxu0 %v5841_v1  ;;  %v5726_v6 = vld [vmem:[%s7099_s1 + $0x120] sm:$0xff]  }
 0x116   : > { %5235 = vmatprep.subr.bf16.mxu1 %v5841_v1 }
 0x118   : > { %5216 = vmatpush3.bf16.msra.mxu0 %v5694_v7  ;;  %v5727_v7 = vld [vmem:[%s7099_s1 + $0x160] sm:$0xff]  }
 0x119   : > { %5236 = vmatpush3.bf16.msra.mxu1 %v5695_v8  ;;  %5217 = vmatprep.subr.bf16.mxu0 %v5841_v1  ;;  %v5728_v8 = vld [vmem:[%s7099_s1 + $0x128] sm:$0xff]  }
 0x11a   : > { %v567_v11 = vpop.f32.mrb[4].mxu0  ;;  %5237 = vmatprep.subr.bf16.mxu1 %v5841_v1 }
 0x11b   : > { %v573_v12 = vadd.f32 %v567_v11, %v6472_v43  ;;  %v677_v14 = vpop.f32.mrb[4].mxu1  ;;  %v4945_v15 = vpop.f32.mrb[5].mxu0 }
 0x11c   : > { %v4965_v17 = vpop.f32.mrb[5].mxu1  ;;  %v570_v18 = vpop.f32.mrb[6].mxu0  ;;  %5218 = vmatpush3.bf16.msra.mxu0 %v5696_v9  ;;  %v5729_v9 = vld [vmem:[%s7099_s1 + $0x168] sm:$0xff]  }
 0x11d   : > { %v683_v22 = vadd.f32 %v677_v14, %v573_v12  ;;  %v680_v23 = vpop.f32.mrb[6].mxu1  ;;  %5238 = vmatpush3.bf16.msra.mxu1 %v5697_v10  ;;  %v4946_v24 = vpop.f32.mrb[7].mxu0  ;;  %5219 = vmatprep.subr.bf16.mxu0 %v5841_v1  ;;  %v5730_v18 = vld [vmem:[%s7099_s1 + $0x130] sm:$0xff]  }
 0x11e   : > { %v4966_v26 = vpop.f32.mrb[7].mxu1  ;;  %5239 = vmatprep.subr.bf16.mxu1 %v5841_v1  ;;  %v5731_v24 = vld [vmem:[%s7099_s1 + $0x170] sm:$0xff]  }
 0x11f   : > { %v5732_v26 = vld [vmem:[%s7099_s1 + $0x138] sm:$0xff]  }
 0x120   : > { %5220 = vmatpush3.bf16.msra.mxu0 %v5698_v19 }
 0x121   : > { %5240 = vmatpush3.bf16.msra.mxu1 %v5699_v25  ;;  %5221 = vmatprep.subr.bf16.mxu0 %v5841_v1 }
 0x122   : > { %5241 = vmatprep.subr.bf16.mxu1 %v5841_v1 }
 0x124   : > { %5222 = vmatpush3.bf16.msra.mxu0 %v5700_v27  ;;  %v5733_v27 = vld [vmem:[%s7099_s1 + $0x178] sm:$0xff]  }
 0x125   : > { %5242 = vmatpush3.bf16.msra.mxu1 %v5701_v29  ;;  %5247 = vmatprep.subr.bf16.mxu0 %v5841_v1  ;;  %v5734_v29 = vld [vmem:[%s7099_s1 + $0x180] sm:$0xff]  }
 0x126   : > { %5267 = vmatprep.subr.bf16.mxu1 %v5841_v1 }
 0x127   : > { %5224 = vmatmul.mubr.bf16.vlgmr.msra.gmra.mrb[32].mxu0 %v6108_v0  ;;  %v5706_v0 = vld [vmem:[%s7099_s1 + $0x90] sm:$0xff]  }
 0x128   : > { %5244 = vmatmul.mubr.bf16.vlgmr.msra.gmra.mrb[32].mxu1 %v5815_v32  ;;  %5248 = vmatpush3.bf16.msra.mxu0 %v5702_v30  ;;  %v5735_v30 = vld [vmem:[%s7099_s1 + $0x1c0] sm:$0xff]   ;;  %v5736_v32 = vld [vmem:[%s7099_s1 + $0x188] sm:$0xff]  }
 0x129   : > { %5268 = vmatpush3.bf16.msra.mxu1 %v5703_v31  ;;  %5249 = vmatprep.subr.bf16.mxu0 %v5841_v1  ;;  %v5816_v31 = vld [vmem:[%s5923_s8 + $0x8] sm:$0x7] }
 0x12a   : > { %5269 = vmatprep.subr.bf16.mxu1 %v5841_v1  ;;  %5263 = vmatprep.mubr.msk.bf16.mxu0 %vm5842_vm0, %v5841_v1 }
 0x12b   : > { %5283 = vmatprep.mubr.msk.bf16.mxu1 %vm5842_vm0, %v5841_v1 }
 0x12c   : > { %5250 = vmatpush3.bf16.msra.mxu0 %v5704_v33  ;;  %v5737_v33 = vld [vmem:[%s7099_s1 + $0x1c8] sm:$0xff]  }
 0x12d   : > { %5270 = vmatpush3.bf16.msra.mxu1 %v5705_v34  ;;  %5251 = vmatprep.subr.bf16.mxu0 %v5841_v1  ;;  %v5739_v34 = vld [vmem:[%s7099_s1 + $0x1d0] sm:$0xff]  }
 0x12e   : > { %5271 = vmatprep.subr.bf16.mxu1 %v5841_v1 }
 0x130   : > { %5252 = vmatpush3.bf16.msra.mxu0 %v5706_v0  ;;  %v5740_v0 = vld [vmem:[%s7099_s1 + $0x198] sm:$0xff]  }
 0x131   : > { %5272 = vmatpush3.bf16.msra.mxu1 %v5707_v36  ;;  %5253 = vmatprep.subr.bf16.mxu0 %v5841_v1  ;;  %v5741_v36 = vld [vmem:[%s7099_s1 + $0x1d8] sm:$0xff]  }
 0x132   : > { %5273 = vmatprep.subr.bf16.mxu1 %v5841_v1 }
 0x134   : > { %5254 = vmatpush3.bf16.msra.mxu0 %v5708_v37  ;;  %v5742_v37 = vld [vmem:[%s7099_s1 + $0x1a0] sm:$0xff]  }
 0x135   : > { %5274 = vmatpush3.bf16.msra.mxu1 %v5709_v38  ;;  %5255 = vmatprep.subr.bf16.mxu0 %v5841_v1  ;;  %v5743_v38 = vld [vmem:[%s7099_s1 + $0x1e0] sm:$0xff]  }
 0x136   : > { %5275 = vmatprep.subr.bf16.mxu1 %v5841_v1 }
 0x138   : > { %5256 = vmatpush3.bf16.msra.mxu0 %v5710_v39  ;;  %v5744_v39 = vld [vmem:[%s7099_s1 + $0x1a8] sm:$0xff]  }
 0x139   : > { %5276 = vmatpush3.bf16.msra.mxu1 %v5711_v40  ;;  %5257 = vmatprep.subr.bf16.mxu0 %v5841_v1  ;;  %v5745_v40 = vld [vmem:[%s7099_s1 + $0x1e8] sm:$0xff]  }
 0x13a   : > { %v783_v43 = vpop.f32.mrb[8].mxu0  ;;  %5277 = vmatprep.subr.bf16.mxu1 %v5841_v1 }
 0x13b   : > { %v789_v44 = vadd.f32 %v783_v43, %v683_v22  ;;  %v900_v46 = vpop.f32.mrb[8].mxu1  ;;  %v4985_v47 = vpop.f32.mrb[9].mxu0 }
 0x13c   : > { %v5005_v48 = vpop.f32.mrb[9].mxu1  ;;  %v786_v49 = vpop.f32.mrb[10].mxu0  ;;  %5258 = vmatpush3.bf16.msra.mxu0 %v5712_v41 }
 0x13d   : > { %v906_v51 = vadd.f32 %v900_v46, %v789_v44  ;;  %v903_v52 = vpop.f32.mrb[10].mxu1  ;;  %5278 = vmatpush3.bf16.msra.mxu1 %v5713_v42  ;;  %v4986_v53 = vpop.f32.mrb[11].mxu0  ;;  %5259 = vmatprep.subr.bf16.mxu0 %v5841_v1  ;;  %v5746_v48 = vld [vmem:[%s7099_s1 + $0x1b0] sm:$0xff]  }
 0x13e   : > { %v5006_v56 = vpop.f32.mrb[11].mxu1  ;;  %5279 = vmatprep.subr.bf16.mxu1 %v5841_v1  ;;  %v5747_v52 = vld [vmem:[%s7099_s1 + $0x1f0] sm:$0xff]  }
 0x13f   : > { %v5749_v56 = vld [vmem:[%s7099_s1 + $0x1f8] sm:$0xff]  }
 0x140   : > { %5260 = vmatpush3.bf16.msra.mxu0 %v5714_v50 }
 0x141   : > { %5280 = vmatpush3.bf16.msra.mxu1 %v5715_v54  ;;  %5261 = vmatprep.subr.bf16.mxu0 %v5841_v1  ;;  %v5748_v54 = vld [vmem:[%s7099_s1 + $0x1b8] sm:$0xff]  }
 0x142   : > { %5281 = vmatprep.subr.bf16.mxu1 %v5841_v1 }
 0x144   : > { %5262 = vmatpush3.bf16.msra.mxu0 %v5716_v59  ;;  %v5750_v59 = vld [vmem:[%s7099_s1 + $0x200] sm:$0xff]  }
 0x145   : > { %5282 = vmatpush3.bf16.msra.mxu1 %v5717_v60  ;;  %5287 = vmatprep.subr.bf16.mxu0 %v5841_v1  ;;  %v5751_v60 = vld [vmem:[%s7099_s1 + $0x240] sm:$0xff]  }
 0x146   : > { %5307 = vmatprep.subr.bf16.mxu1 %v5841_v1 }
 0x147   : > { %5264 = vmatmul.mubr.bf16.vlgmr.msra.gmra.mrb[36].mxu0 %v924_v20  ;;  %v5723_v20 = vld [vmem:[%s7099_s1 + $0x150] sm:$0xff]  }
 0x148   : > { %5284 = vmatmul.mubr.bf16.vlgmr.msra.gmra.mrb[36].mxu1 %v6180_v21  ;;  %5288 = vmatpush3.bf16.msra.mxu0 %v5718_v61  ;;  %v5724_v21 = vld [vmem:[%s7099_s1 + $0x118] sm:$0xff]   ;;  %v5752_v61 = vld [vmem:[%s7099_s1 + $0x208] sm:$0xff]  }
 0x149   : > { %5308 = vmatpush3.bf16.msra.mxu1 %v5719_v62  ;;  %5289 = vmatprep.subr.bf16.mxu0 %v5841_v1  ;;  %v5753_v62 = vld [vmem:[%s7099_s1 + $0x248] sm:$0xff]  }
 0x14a   : > { %5309 = vmatprep.subr.bf16.mxu1 %v5841_v1  ;;  %5303 = vmatprep.mubr.msk.bf16.mxu0 %vm5842_vm0, %v5841_v1 }
 0x14b   : > { %5323 = vmatprep.mubr.msk.bf16.mxu1 %vm5842_vm0, %v5841_v1 }
 0x14c   : > { %5290 = vmatpush3.bf16.msra.mxu0 %v5720_v63  ;;  %v5757_v63 = vld [vmem:[%s7099_s1 + $0x258] sm:$0xff]  }
 0x14d   : > { %5310 = vmatpush3.bf16.msra.mxu1 %v5721_v3  ;;  %5291 = vmatprep.subr.bf16.mxu0 %v5841_v1  ;;  %v5758_v3 = vld [vmem:[%s7099_s1 + $0x220] sm:$0xff]  }
 0x14e   : > { %5311 = vmatprep.subr.bf16.mxu1 %v5841_v1 }
 0x150   : > { %5292 = vmatpush3.bf16.msra.mxu0 %v5722_v55  ;;  %v5759_v55 = vld [vmem:[%s7099_s1 + $0x260] sm:$0xff]  }
 0x151   : > { %5312 = vmatpush3.bf16.msra.mxu1 %v5723_v20  ;;  %5293 = vmatprep.subr.bf16.mxu0 %v5841_v1  ;;  %v5760_v20 = vld [vmem:[%s7099_s1 + $0x228] sm:$0xff]  }
 0x152   : > { %5313 = vmatprep.subr.bf16.mxu1 %v5841_v1 }
 0x154   : > { %5294 = vmatpush3.bf16.msra.mxu0 %v5724_v21  ;;  %v5761_v21 = vld [vmem:[%s7099_s1 + $0x268] sm:$0xff]  }
 0x155   : > { %5314 = vmatpush3.bf16.msra.mxu1 %v5725_v5  ;;  %5295 = vmatprep.subr.bf16.mxu0 %v5841_v1 }
 0x156   : > { %5315 = vmatprep.subr.bf16.mxu1 %v5841_v1 }
 0x158   : > { %5296 = vmatpush3.bf16.msra.mxu0 %v5726_v6 }
 0x159   : > { %5316 = vmatpush3.bf16.msra.mxu1 %v5727_v7  ;;  %5297 = vmatprep.subr.bf16.mxu0 %v5841_v1 }
 0x15a   : > { %v1008_v10 = vpop.f32.mrb[12].mxu0  ;;  %5317 = vmatprep.subr.bf16.mxu1 %v5841_v1 }
 0x15b   : > { %v1014_v11 = vadd.f32 %v1008_v10, %v906_v51  ;;  %v1118_v12 = vpop.f32.mrb[12].mxu1  ;;  %v5025_v14 = vpop.f32.mrb[13].mxu0 }
 0x15c   : > { %v5045_v15 = vpop.f32.mrb[13].mxu1  ;;  %v1011_v17 = vpop.f32.mrb[14].mxu0  ;;  %5298 = vmatpush3.bf16.msra.mxu0 %v5728_v8 }
 0x15d   : > { %v1124_v19 = vadd.f32 %v1118_v12, %v1014_v11  ;;  %v1121_v22 = vpop.f32.mrb[14].mxu1  ;;  %5318 = vmatpush3.bf16.msra.mxu1 %v5729_v9  ;;  %v5026_v23 = vpop.f32.mrb[15].mxu0  ;;  %5299 = vmatprep.subr.bf16.mxu0 %v5841_v1  ;;  %v5762_v11 = vld [vmem:[%s7099_s1 + $0x230] sm:$0xff]  }
 0x15e   : > { %v5046_v25 = vpop.f32.mrb[15].mxu1  ;;  %5319 = vmatprep.subr.bf16.mxu1 %v5841_v1  ;;  %v5763_v17 = vld [vmem:[%s7099_s1 + $0x270] sm:$0xff]   ;;  %v5765_v22 = vld [vmem:[%s7099_s1 + $0x278] sm:$0xff]   ;;  %v5766_v23 = vld [vmem:[%s7099_s1 + $0x280] sm:$0xff]  }
 0x15f   : > { %v5768_v25 = vld [vmem:[%s7099_s1 + $0x288] sm:$0xff]  }
 0x160   : > { %5300 = vmatpush3.bf16.msra.mxu0 %v5730_v18 }
 0x161   : > { %5320 = vmatpush3.bf16.msra.mxu1 %v5731_v24  ;;  %5301 = vmatprep.subr.bf16.mxu0 %v5841_v1  ;;  %v5767_v24 = vld [vmem:[%s7099_s1 + $0x2c0] sm:$0xff]  }
 0x162   : > { %5321 = vmatprep.subr.bf16.mxu1 %v5841_v1 }
 0x164   : > { %5302 = vmatpush3.bf16.msra.mxu0 %v5732_v26  ;;  %v5769_v26 = vld [vmem:[%s7099_s1 + $0x2c8] sm:$0xff]  }
 0x165   : > { %5322 = vmatpush3.bf16.msra.mxu1 %v5733_v27  ;;  %5327 = vmatprep.subr.bf16.mxu0 %v5841_v1  ;;  %v5772_v27 = vld [vmem:[%s7099_s1 + $0x298] sm:$0xff]  }
 0x166   : > { %5347 = vmatprep.subr.bf16.mxu1 %v5841_v1 }
 0x167   : > { %5304 = vmatmul.mubr.bf16.vlgmr.msra.gmra.mrb[40].mxu0 %v5816_v31  ;;  %v5775_v31 = vld [vmem:[%s7099_s1 + $0x2e0] sm:$0xff]  }
 0x168   : > { %5324 = vmatmul.mubr.bf16.vlgmr.msra.gmra.mrb[40].mxu1 %v6264_v45  ;;  %5328 = vmatpush3.bf16.msra.mxu0 %v5734_v29  ;;  %v5738_v45 = vld [vmem:[%s7099_s1 + $0x190] sm:$0xff]   ;;  %v5773_v29 = vld [vmem:[%s7099_s1 + $0x2d8] sm:$0xff]  }
 0x169   : > { %5348 = vmatpush3.bf16.msra.mxu1 %v5735_v30  ;;  %5329 = vmatprep.subr.bf16.mxu0 %v5841_v1  ;;  %v5774_v30 = vld [vmem:[%s7099_s1 + $0x2a0] sm:$0xff]  }
 0x16a   : > { %5349 = vmatprep.subr.bf16.mxu1 %v5841_v1  ;;  %5343 = vmatprep.mubr.msk.bf16.mxu0 %vm5842_vm0, %v5841_v1 }
 0x16b   : > { %5363 = vmatprep.mubr.msk.bf16.mxu1 %vm5842_vm0, %v5841_v1 }
 0x16c   : > { %5330 = vmatpush3.bf16.msra.mxu0 %v5736_v32  ;;  %v5776_v32 = vld [vmem:[%s7099_s1 + $0x2a8] sm:$0xff]  }
 0x16d   : > { %5350 = vmatpush3.bf16.msra.mxu1 %v5737_v33  ;;  %5331 = vmatprep.subr.bf16.mxu0 %v5841_v1  ;;  %v5777_v33 = vld [vmem:[%s7099_s1 + $0x2e8] sm:$0xff]  }
 0x16e   : > { %5351 = vmatprep.subr.bf16.mxu1 %v5841_v1 }
 0x170   : > { %5332 = vmatpush3.bf16.msra.mxu0 %v5738_v45 }
 0x171   : > { %5352 = vmatpush3.bf16.msra.mxu1 %v5739_v34  ;;  %5333 = vmatprep.subr.bf16.mxu0 %v5841_v1 }
 0x172   : > { %5353 = vmatprep.subr.bf16.mxu1 %v5841_v1 }
 0x174   : > { %5334 = vmatpush3.bf16.msra.mxu0 %v5740_v0 }
 0x175   : > { %5354 = vmatpush3.bf16.msra.mxu1 %v5741_v36  ;;  %5335 = vmatprep.subr.bf16.mxu0 %v5841_v1 }
 0x176   : > { %5355 = vmatprep.subr.bf16.mxu1 %v5841_v1 }
 0x178   : > { %5336 = vmatpush3.bf16.msra.mxu0 %v5742_v37 }
 0x179   : > { %5356 = vmatpush3.bf16.msra.mxu1 %v5743_v38  ;;  %5337 = vmatprep.subr.bf16.mxu0 %v5841_v1 }
 0x17a   : > { %v1224_v41 = vpop.f32.mrb[16].mxu0  ;;  %5357 = vmatprep.subr.bf16.mxu1 %v5841_v1 }
 0x17b   : > { %v1230_v42 = vadd.f32 %v1224_v41, %v1124_v19  ;;  %v1341_v43 = vpop.f32.mrb[16].mxu1  ;;  %v5065_v44 = vpop.f32.mrb[17].mxu0  ;;  %v5764_v19 = vld [vmem:[%s7099_s1 + $0x238] sm:$0xff]  }
 0x17c   : > { %v5085_v46 = vpop.f32.mrb[17].mxu1  ;;  %v1227_v47 = vpop.f32.mrb[18].mxu0  ;;  %5338 = vmatpush3.bf16.msra.mxu0 %v5744_v39  ;;  %v5778_v39 = vld [vmem:[%s7099_s1 + $0x2b0] sm:$0xff]  }
 0x17d   : > { %v1347_v49 = vadd.f32 %v1341_v43, %v1230_v42  ;;  %v1344_v50 = vpop.f32.mrb[18].mxu1  ;;  %5358 = vmatpush3.bf16.msra.mxu1 %v5745_v40  ;;  %v5066_v51 = vpop.f32.mrb[19].mxu0  ;;  %5339 = vmatprep.subr.bf16.mxu0 %v5841_v1  ;;  %v5779_v43 = vld [vmem:[%s7099_s1 + $0x2f0] sm:$0xff]   ;;  %v5780_v46 = vld [vmem:[%s7099_s1 + $0x2b8] sm:$0xff]  }
 0x17e   : > { %v5086_v53 = vpop.f32.mrb[19].mxu1  ;;  %5359 = vmatprep.subr.bf16.mxu1 %v5841_v1  ;;  %v5781_v47 = vld [vmem:[%s7099_s1 + $0x2f8] sm:$0xff]   ;;  %v5784_v50 = vld [vmem:[%s7099_s1 + $0x308] sm:$0xff]  }
 0x17f   : > { %v5785_v51 = vld [vmem:[%s7099_s1 + $0x348] sm:$0xff]   ;;  %v5790_v53 = vld [vmem:[%s7099_s1 + $0x320] sm:$0xff]  }
 0x180   : > { %5340 = vmatpush3.bf16.msra.mxu0 %v5746_v48  ;;  %v5782_v48 = vld [vmem:[%s7099_s1 + $0x300] sm:$0xff]  }
 0x181   : > { %5360 = vmatpush3.bf16.msra.mxu1 %v5747_v52  ;;  %5341 = vmatprep.subr.bf16.mxu0 %v5841_v1  ;;  %v5789_v52 = vld [vmem:[%s7099_s1 + $0x358] sm:$0xff]  }
 0x182   : > { %5361 = vmatprep.subr.bf16.mxu1 %v5841_v1 }
 0x184   : > { %5342 = vmatpush3.bf16.msra.mxu0 %v5748_v54  ;;  %v5791_v54 = vld [vmem:[%s7099_s1 + $0x360] sm:$0xff]  }
 0x185   : > { %5362 = vmatpush3.bf16.msra.mxu1 %v5749_v56  ;;  %5367 = vmatprep.subr.bf16.mxu0 %v5841_v1  ;;  %v245_v56 = vld [vmem:[%s5923_s8 + $0x10] sm:$0x7]  ;;  %s4598_s8 = sshll.u32 %s7107_s12, 2 }
 0x186   : > { %5387 = vmatprep.subr.bf16.mxu1 %v5841_v1  ;;  %s6996_s10 = scalar_lea.vmem %s7101_s3, %s4598_s8 }
 0x187   : > { %5344 = vmatmul.mubr.bf16.vlgmr.msra.gmra.mrb[44].mxu0 %v1365_v2  ;;  %v5755_v2 = vld [vmem:[%s7099_s1 + $0x250] sm:$0xff]  }
 0x188   : > { %5364 = vmatmul.mubr.bf16.vlgmr.msra.gmra.mrb[44].mxu1 %v6336_v4  ;;  %5368 = vmatpush3.bf16.msra.mxu0 %v5750_v59  ;;  %v5756_v4 = vld [vmem:[%s7099_s1 + $0x218] sm:$0xff]   ;;  %v5792_v59 = vld [vmem:[%s7099_s1 + $0x328] sm:$0xff]  }
 0x189   : > { %5388 = vmatpush3.bf16.msra.mxu1 %v5751_v60  ;;  %5369 = vmatprep.subr.bf16.mxu0 %v5841_v1  ;;  %v6972_v60 = vcombine.low %v245_v56, %v245_v56 }
 0x18a   : > { %5389 = vmatprep.subr.bf16.mxu1 %v5841_v1  ;;  %5383 = vmatprep.mubr.msk.bf16.mxu0 %vm5842_vm0, %v5841_v1 }
 0x18b   : > { %5403 = vmatprep.mubr.msk.bf16.mxu1 %vm5842_vm0, %v5841_v1 }
 0x18c   : > { %5370 = vmatpush3.bf16.msra.mxu0 %v5752_v61  ;;  %v5793_v61 = vld [vmem:[%s7099_s1 + $0x368] sm:$0xff]  }
 0x18d   : > { %5390 = vmatpush3.bf16.msra.mxu1 %v5753_v62  ;;  %5371 = vmatprep.subr.bf16.mxu0 %v5841_v1 }
 0x18e   : > { %5391 = vmatprep.subr.bf16.mxu1 %v5841_v1 }
 0x190   : > { %5372 = vmatpush3.bf16.msra.mxu0 %v5754_v35 }
 0x191   : > { %5392 = vmatpush3.bf16.msra.mxu1 %v5755_v2  ;;  %5373 = vmatprep.subr.bf16.mxu0 %v5841_v1 }
 0x192   : > { %5393 = vmatprep.subr.bf16.mxu1 %v5841_v1 }
 0x194   : > { %5374 = vmatpush3.bf16.msra.mxu0 %v5756_v4 }
 0x195   : > { %5394 = vmatpush3.bf16.msra.mxu1 %v5757_v63  ;;  %5375 = vmatprep.subr.bf16.mxu0 %v5841_v1  ;;  %v6983_v63 = vld [vmem:[%s7100_s2] ss:$0 sm:$0xff] }
 0x196   : > { %5395 = vmatprep.subr.bf16.mxu1 %v5841_v1 }
 0x198   : > { %5376 = vmatpush3.bf16.msra.mxu0 %v5758_v3 }
 0x199   : > { %5396 = vmatpush3.bf16.msra.mxu1 %v5759_v55  ;;  %5377 = vmatprep.subr.bf16.mxu0 %v5841_v1 }
 0x19a   : > { %v1449_v5 = vpop.f32.mrb[20].mxu0  ;;  %5397 = vmatprep.subr.bf16.mxu1 %v5841_v1 }
 0x19b   : > { %v1455_v6 = vadd.f32 %v1449_v5, %v1347_v49  ;;  %v1559_v7 = vpop.f32.mrb[20].mxu1  ;;  %v5105_v8 = vpop.f32.mrb[21].mxu0  ;;  %v5783_v49 = vld [vmem:[%s7099_s1 + $0x340] sm:$0xff]  }
 0x19c   : > { %v5125_v9 = vpop.f32.mrb[21].mxu1  ;;  %v1452_v10 = vpop.f32.mrb[22].mxu0  ;;  %5378 = vmatpush3.bf16.msra.mxu0 %v5760_v20  ;;  %v5794_v20 = vld [vmem:[%s7099_s1 + $0x330] sm:$0xff]  }
 0x19d   : > { %v1565_v12 = vadd.f32 %v1559_v7, %v1455_v6  ;;  %v1562_v14 = vpop.f32.mrb[22].mxu1  ;;  %5398 = vmatpush3.bf16.msra.mxu1 %v5761_v21  ;;  %v5106_v15 = vpop.f32.mrb[23].mxu0  ;;  %5379 = vmatprep.subr.bf16.mxu0 %v5841_v1  ;;  %v3401_v21 = vshll.u32 %v6972_v60, 16  ;;  %v5795_v8 = vld [vmem:[%s7099_s1 + $0x370] sm:$0xff]  }
 0x19e   : > { %v5126_v18 = vpop.f32.mrb[23].mxu1  ;;  %5399 = vmatprep.subr.bf16.mxu1 %v5841_v1  ;;  %v5797_v15 = vld [vmem:[%s7099_s1 + $0x378] sm:$0xff]  }
 0x19f   : > { %v3403_v14 = vrot.slane %v3401_v21, 1  ;;  %v5799_v18 = vld [vmem:[%s7099_s1 + $0x380] sm:$0xff]  }
 0x1a0   : > { %5380 = vmatpush3.bf16.msra.mxu0 %v5762_v11  ;;  %v5796_v11 = vld [vmem:[%s7099_s1 + $0x338] sm:$0xff]  }
 0x1a1   : > { %5400 = vmatpush3.bf16.msra.mxu1 %v5763_v17  ;;  %5381 = vmatprep.subr.bf16.mxu0 %v5841_v1 }
 0x1a2   : > { %5401 = vmatprep.subr.bf16.mxu1 %v5841_v1 }
 0x1a4   : > { %5382 = vmatpush3.bf16.msra.mxu0 %v5764_v19  ;;  %v5800_v19 = vld [vmem:[%s7099_s1 + $0x3c0] sm:$0xff]  }
 0x1a5   : > { %5402 = vmatpush3.bf16.msra.mxu1 %v5765_v22  ;;  %5407 = vmatprep.subr.bf16.mxu0 %v5841_v1  ;;  %v5801_v22 = vld [vmem:[%s7099_s1 + $0x388] sm:$0xff]  }
 0x1a6   : > { %5427 = vmatprep.subr.bf16.mxu1 %v5841_v1 }
 0x1a7   : > { %5384 = vmatmul.mubr.bf16.vlgmr.msra.gmra.mrb[48].mxu0 %v6378_v13  ;;  %v5770_v13 = vld [vmem:[%s7099_s1 + $0x290] sm:$0xff]  }
 0x1a8   : > { %5404 = vmatmul.mubr.bf16.vlgmr.msra.gmra.mrb[48].mxu1 %v6422_v28  ;;  %5408 = vmatpush3.bf16.msra.mxu0 %v5766_v23  ;;  %v5771_v28 = vld [vmem:[%s7099_s1 + $0x2d0] sm:$0xff]   ;;  %v5802_v23 = vld [vmem:[%s7099_s1 + $0x3c8] sm:$0xff]  }
 0x1a9   : > { %5428 = vmatpush3.bf16.msra.mxu1 %v5767_v24  ;;  %5409 = vmatprep.subr.bf16.mxu0 %v5841_v1  ;;  %v5803_v24 = vld [vmem:[%s7099_s1 + $0x390] sm:$0xff]  }
 0x1aa   : > { %5429 = vmatprep.subr.bf16.mxu1 %v5841_v1  ;;  %5423 = vmatprep.mubr.msk.bf16.mxu0 %vm5842_vm0, %v5841_v1 }
 0x1ab   : > { %5443 = vmatprep.mubr.msk.bf16.mxu1 %vm5842_vm0, %v5841_v1 }
 0x1ac   : > { %5410 = vmatpush3.bf16.msra.mxu0 %v5768_v25  ;;  %v5804_v25 = vld [vmem:[%s7099_s1 + $0x3d0] sm:$0xff]  }
 0x1ad   : > { %5430 = vmatpush3.bf16.msra.mxu1 %v5769_v26  ;;  %5411 = vmatprep.subr.bf16.mxu0 %v5841_v1  ;;  %v5805_v26 = vld [vmem:[%s7099_s1 + $0x398] sm:$0xff]  }
 0x1ae   : > { %5431 = vmatprep.subr.bf16.mxu1 %v5841_v1 }
 0x1b0   : > { %5412 = vmatpush3.bf16.msra.mxu0 %v5770_v13  ;;  %v5806_v13 = vld [vmem:[%s7099_s1 + $0x3d8] sm:$0xff]  }
 0x1b1   : > { %5432 = vmatpush3.bf16.msra.mxu1 %v5771_v28  ;;  %5413 = vmatprep.subr.bf16.mxu0 %v5841_v1  ;;  %v5807_v28 = vld [vmem:[%s7099_s1 + $0x3a0] sm:$0xff]  }
 0x1b2   : > { %5433 = vmatprep.subr.bf16.mxu1 %v5841_v1 }
 0x1b4   : > { %5414 = vmatpush3.bf16.msra.mxu0 %v5772_v27  ;;  %v5808_v27 = vld [vmem:[%s7099_s1 + $0x3e0] sm:$0xff]  }
 0x1b5   : > { %5434 = vmatpush3.bf16.msra.mxu1 %v5773_v29  ;;  %5415 = vmatprep.subr.bf16.mxu0 %v5841_v1  ;;  %v5809_v29 = vld [vmem:[%s7099_s1 + $0x3a8] sm:$0xff]  }
 0x1b6   : > { %5435 = vmatprep.subr.bf16.mxu1 %v5841_v1 }
 0x1b8   : > { %5416 = vmatpush3.bf16.msra.mxu0 %v5774_v30  ;;  %v5810_v30 = vld [vmem:[%s7099_s1 + $0x3e8] sm:$0xff]  }
 0x1b9   : > { %5436 = vmatpush3.bf16.msra.mxu1 %v5775_v31  ;;  %5417 = vmatprep.subr.bf16.mxu0 %v5841_v1 }
 0x1ba   : > { %v1665_v45 = vpop.f32.mrb[24].mxu0  ;;  %5437 = vmatprep.subr.bf16.mxu1 %v5841_v1 }
 0x1bb   : > { %v1671_v34 = vadd.f32 %v1665_v45, %v1565_v12  ;;  %v1782_v0 = vpop.f32.mrb[24].mxu1  ;;  %v5145_v36 = vpop.f32.mrb[25].mxu0  ;;  %v3399_v12 = vshrl.u32 %v6972_v60, 16 }
 0x1bc   : > { %v5165_v37 = vpop.f32.mrb[25].mxu1  ;;  %v1668_v38 = vpop.f32.mrb[26].mxu0  ;;  %5418 = vmatpush3.bf16.msra.mxu0 %v5776_v32  ;;  %v5811_v36 = vld [vmem:[%s7099_s1 + $0x3b0] sm:$0xff]  }
 0x1bd   : > { %v1788_v40 = vadd.f32 %v1782_v0, %v1671_v34  ;;  %v1785_v41 = vpop.f32.mrb[26].mxu1  ;;  %5438 = vmatpush3.bf16.msra.mxu1 %v5777_v33  ;;  %v5146_v42 = vpop.f32.mrb[27].mxu0  ;;  %5419 = vmatprep.subr.bf16.mxu0 %v5841_v1  ;;  %v3404_v17 = vor.u32 %v3403_v14, %v3399_v12 }
 0x1be   : > { %v5166_v44 = vpop.f32.mrb[27].mxu1  ;;  %5439 = vmatprep.subr.bf16.mxu1 %v5841_v1  ;;  %v5813_v41 = vld [vmem:[%s7099_s1 + $0x3b8] sm:$0xff]   ;;  %v3618_v42 = vrot.slane %v3399_v12, 1 }
 0x1bf   : > { %v5814_v44 = vld [vmem:[%s7099_s1 + $0x3f8] sm:$0xff]  }
 0x1c0   : > { %5420 = vmatpush3.bf16.msra.mxu0 %v5778_v39  ;;  %v5812_v39 = vld [vmem:[%s7099_s1 + $0x3f0] sm:$0xff]  }
 0x1c1   : > { %5440 = vmatpush3.bf16.msra.mxu1 %v5779_v43  ;;  %5421 = vmatprep.subr.bf16.mxu0 %v5841_v1  ;;  %v3619_v43 = vrot.slane %v3401_v21, 2 }
 0x1c2   : > { %5441 = vmatprep.subr.bf16.mxu1 %v5841_v1 }
 0x1c4   : > { %5422 = vmatpush3.bf16.msra.mxu0 %v5780_v46  ;;  %v3511_v46 = vrot.slane %v6972_v60, 1 }
 0x1c5   : > { %5442 = vmatpush3.bf16.msra.mxu1 %v5781_v47  ;;  %5447 = vmatprep.subr.bf16.mxu0 %v5841_v1  ;;  %v3620_v47 = vor.u32 %v3619_v43, %v3618_v42 }
 0x1c6   : > { %5467 = vmatprep.subr.bf16.mxu1 %v5841_v1 }
 0x1c7   : > { %5424 = vmatmul.mubr.bf16.vlgmr.msra.gmra.mrb[52].mxu0 %v1806_v57  ;;  %v5787_v57 = vld [vmem:[%s7099_s1 + $0x350] sm:$0xff]  }
 0x1c8   : > { %5444 = vmatmul.mubr.bf16.vlgmr.msra.gmra.mrb[52].mxu1 %v6495_v58  ;;  %5448 = vmatpush3.bf16.msra.mxu0 %v5782_v48  ;;  %v5788_v58 = vld [vmem:[%s7099_s1 + $0x318] sm:$0xff]  }
 0x1c9   : > { %5468 = vmatpush3.bf16.msra.mxu1 %v5783_v49  ;;  %5449 = vmatprep.subr.bf16.mxu0 %v5841_v1 }
 0x1ca   : > { %5469 = vmatprep.subr.bf16.mxu1 %v5841_v1  ;;  %5463 = vmatprep.mubr.msk.bf16.mxu0 %vm5842_vm0, %v5841_v1 }
 0x1cb   : > { %5483 = vmatprep.mubr.msk.bf16.mxu1 %vm5842_vm0, %v5841_v1 }
 0x1cc   : > { %5450 = vmatpush3.bf16.msra.mxu0 %v5784_v50 }
 0x1cd   : > { %5470 = vmatpush3.bf16.msra.mxu1 %v5785_v51  ;;  %5451 = vmatprep.subr.bf16.mxu0 %v5841_v1 }
 0x1ce   : > { %5471 = vmatprep.subr.bf16.mxu1 %v5841_v1 }
 0x1d0   : > { %5452 = vmatpush3.bf16.msra.mxu0 %v5786_v16 }
 0x1d1   : > { %5472 = vmatpush3.bf16.msra.mxu1 %v5787_v57  ;;  %5453 = vmatprep.subr.bf16.mxu0 %v5841_v1 }
 0x1d2   : > { %5473 = vmatprep.subr.bf16.mxu1 %v5841_v1 }
 0x1d4   : > { %5454 = vmatpush3.bf16.msra.mxu0 %v5788_v58 }
 0x1d5   : > { %5474 = vmatpush3.bf16.msra.mxu1 %v5789_v52  ;;  %5455 = vmatprep.subr.bf16.mxu0 %v5841_v1 }
 0x1d6   : > { %5475 = vmatprep.subr.bf16.mxu1 %v5841_v1 }
 0x1d8   : > { %5456 = vmatpush3.bf16.msra.mxu0 %v5790_v53 }
 0x1d9   : > { %5476 = vmatpush3.bf16.msra.mxu1 %v5791_v54  ;;  %5457 = vmatprep.subr.bf16.mxu0 %v5841_v1 }
 0x1da   : > { %v1890_v62 = vpop.f32.mrb[28].mxu0  ;;  %5477 = vmatprep.subr.bf16.mxu1 %v5841_v1 }
 0x1db   : > { %v1896_v35 = vadd.f32 %v1890_v62, %v1788_v40  ;;  %v2000_v2 = vpop.f32.mrb[28].mxu1  ;;  %v5185_v4 = vpop.f32.mrb[29].mxu0 }
 0x1dc   : > { %v5205_v3 = vpop.f32.mrb[29].mxu1  ;;  %v1893_v55 = vpop.f32.mrb[30].mxu0  ;;  %5458 = vmatpush3.bf16.msra.mxu0 %v5792_v59 }
 0x1dd   : > { %v2006_v5 = vadd.f32 %v2000_v2, %v1896_v35  ;;  %v2003_v6 = vpop.f32.mrb[30].mxu1  ;;  %5478 = vmatpush3.bf16.msra.mxu1 %v5793_v61  ;;  %v5186_v7 = vpop.f32.mrb[31].mxu0  ;;  %5459 = vmatprep.subr.bf16.mxu0 %v5841_v1 }
 0x1de   : > { %v5206_v9 = vpop.f32.mrb[31].mxu1  ;;  %5479 = vmatprep.subr.bf16.mxu1 %v5841_v1 }
 0x1df   : > { %v2014_v10 = vadd.f32 %v6983_v63, %v2006_v5 }
 0x1e0   : > { %5460 = vmatpush3.bf16.msra.mxu0 %v5794_v20 }
 0x1e1   : > { %2015 = vst [vmem:[%s6996_s10] sm:$0x3] %v2014_v10  ;;  %5480 = vmatpush3.bf16.msra.mxu1 %v5795_v8  ;;  %5461 = vmatprep.subr.bf16.mxu0 %v5841_v1 }
 0x1e2   : > { %5481 = vmatprep.subr.bf16.mxu1 %v5841_v1 }
 0x1e4   : > { %5462 = vmatpush3.bf16.msra.mxu0 %v5796_v11 }
 0x1e5   : > { %5482 = vmatpush3.bf16.msra.mxu1 %v5797_v15  ;;  %5487 = vmatprep.subr.bf16.mxu0 %v5841_v1 }
 0x1e6   : > { %5507 = vmatprep.subr.bf16.mxu1 %v5841_v1 }
 0x1e7   : > { %5464 = vmatmul.mubr.bf16.vlgmr.msra.gmra.mrb[56].mxu0 %v245_v56 }
 0x1e8   : > { %5484 = vmatmul.mubr.bf16.vlgmr.msra.gmra.mrb[56].mxu1 %v3404_v17  ;;  %5488 = vmatpush3.bf16.msra.mxu0 %v5799_v18 }
 0x1e9   : > { %5508 = vmatpush3.bf16.msra.mxu1 %v5800_v19  ;;  %5489 = vmatprep.subr.bf16.mxu0 %v5841_v1 }
 0x1ea   : > { %5509 = vmatprep.subr.bf16.mxu1 %v5841_v1  ;;  %5503 = vmatprep.mubr.msk.bf16.mxu0 %vm5842_vm0, %v5841_v1 }
 0x1eb   : > { %5523 = vmatprep.mubr.msk.bf16.mxu1 %vm5842_vm0, %v5841_v1 }
 0x1ec   : > { %5490 = vmatpush3.bf16.msra.mxu0 %v5801_v22 }
 0x1ed   : > { %5510 = vmatpush3.bf16.msra.mxu1 %v5802_v23  ;;  %5491 = vmatprep.subr.bf16.mxu0 %v5841_v1 }
 0x1ee   : > { %5511 = vmatprep.subr.bf16.mxu1 %v5841_v1 }
 0x1f0   : > { %5492 = vmatpush3.bf16.msra.mxu0 %v5803_v24 }
 0x1f1   : > { %5512 = vmatpush3.bf16.msra.mxu1 %v5804_v25  ;;  %5493 = vmatprep.subr.bf16.mxu0 %v5841_v1 }
 0x1f2   : > { %5513 = vmatprep.subr.bf16.mxu1 %v5841_v1 }
 0x1f4   : > { %5494 = vmatpush3.bf16.msra.mxu0 %v5805_v26 }
 0x1f5   : > { %5514 = vmatpush3.bf16.msra.mxu1 %v5806_v13  ;;  %5495 = vmatprep.subr.bf16.mxu0 %v5841_v1 }
 0x1f6   : > { %5515 = vmatprep.subr.bf16.mxu1 %v5841_v1 }
 0x1f8   : > { %5496 = vmatpush3.bf16.msra.mxu0 %v5807_v28 }
 0x1f9   : > { %5516 = vmatpush3.bf16.msra.mxu1 %v5808_v27  ;;  %5497 = vmatprep.subr.bf16.mxu0 %v5841_v1 }
 0x1fa   : > { %v2130_v31 = vpop.f32.mrb[32].mxu0  ;;  %5517 = vmatprep.subr.bf16.mxu1 %v5841_v1 }
 0x1fb   : > { %v2218_v32 = vpop.f32.mrb[32].mxu1  ;;  %v5225_v33 = vpop.f32.mrb[33].mxu0 }
 0x1fc   : > { %v2219_v45 = vadd.f32 %v2218_v32, %v2130_v31  ;;  %v5245_v34 = vpop.f32.mrb[33].mxu1  ;;  %v2133_v0 = vpop.f32.mrb[34].mxu0  ;;  %5498 = vmatpush3.bf16.msra.mxu0 %v5809_v29 }
 0x1fd   : > { %v2221_v37 = vpop.f32.mrb[34].mxu1  ;;  %5518 = vmatpush3.bf16.msra.mxu1 %v5810_v30  ;;  %v5226_v38 = vpop.f32.mrb[35].mxu0  ;;  %5499 = vmatprep.subr.bf16.mxu0 %v5841_v1 }
 0x1fe   : > { %v5246_v40 = vpop.f32.mrb[35].mxu1  ;;  %5519 = vmatprep.subr.bf16.mxu1 %v5841_v1 }
 0x200   : > { %5500 = vmatpush3.bf16.msra.mxu0 %v5811_v36 }
 0x201   : > { %5520 = vmatpush3.bf16.msra.mxu1 %v5812_v39  ;;  %5501 = vmatprep.subr.bf16.mxu0 %v5841_v1 }
 0x202   : > { %5521 = vmatprep.subr.bf16.mxu1 %v5841_v1 }
 0x204   : > { %5502 = vmatpush3.bf16.msra.mxu0 %v5813_v41 }
 0x205   : > { %5522 = vmatpush3.bf16.msra.mxu1 %v5814_v44 }
 0x207   : > { %5504 = vmatmul.mubr.bf16.vlgmr.msra.gmra.mrb[60].mxu0 %v3511_v46 }
 0x208   : > { %5524 = vmatmul.mubr.bf16.vlgmr.msra.gmra.mrb[60].mxu1 %v3620_v47 }
 0x21a   : > { %v2322_v48 = vpop.f32.mrb[36].mxu0 }
 0x21b   : > { %v2328_v49 = vadd.f32 %v2322_v48, %v2219_v45  ;;  %v2427_v50 = vpop.f32.mrb[36].mxu1  ;;  %v5265_v51 = vpop.f32.mrb[37].mxu0 }
 0x21c   : > { %v5285_v16 = vpop.f32.mrb[37].mxu1  ;;  %v2325_v57 = vpop.f32.mrb[38].mxu0 }
 0x21d   : > { %v2433_v58 = vadd.f32 %v2427_v50, %v2328_v49  ;;  %v2430_v52 = vpop.f32.mrb[38].mxu1  ;;  %v5266_v53 = vpop.f32.mrb[39].mxu0 }
 0x21e   : > { %v5286_v54 = vpop.f32.mrb[39].mxu1 }
 0x23a   : > { %v2532_v56 = vpop.f32.mrb[40].mxu0 }
 0x23b   : > { %v2538_v59 = vadd.f32 %v2532_v56, %v2433_v58  ;;  %v2637_v1 = vpop.f32.mrb[40].mxu1  ;;  %v5305_v61 = vpop.f32.mrb[41].mxu0 }
 0x23c   : > { %v5325_v60 = vpop.f32.mrb[41].mxu1  ;;  %v2535_v62 = vpop.f32.mrb[42].mxu0 }
 0x23d   : > { %v2643_v35 = vadd.f32 %v2637_v1, %v2538_v59  ;;  %v2640_v2 = vpop.f32.mrb[42].mxu1  ;;  %v5306_v4 = vpop.f32.mrb[43].mxu0 }
 0x23e   : > { %v5326_v3 = vpop.f32.mrb[43].mxu1 }
 0x25a   : > { %v2742_v55 = vpop.f32.mrb[44].mxu0 }
 0x25b   : > { %v2748_v20 = vadd.f32 %v2742_v55, %v2643_v35  ;;  %v2847_v21 = vpop.f32.mrb[44].mxu1  ;;  %v5345_v5 = vpop.f32.mrb[45].mxu0 }
 0x25c   : > { %v5365_v6 = vpop.f32.mrb[45].mxu1  ;;  %v2745_v7 = vpop.f32.mrb[46].mxu0 }
 0x25d   : > { %v2853_v8 = vadd.f32 %v2847_v21, %v2748_v20  ;;  %v2850_v9 = vpop.f32.mrb[46].mxu1  ;;  %v5346_v10 = vpop.f32.mrb[47].mxu0 }
 0x25e   : > { %v5366_v11 = vpop.f32.mrb[47].mxu1 }
 0x27a   : > { %v2952_v12 = vpop.f32.mrb[48].mxu0 }
 0x27b   : > { %v2958_v14 = vadd.f32 %v2952_v12, %v2853_v8  ;;  %v3057_v15 = vpop.f32.mrb[48].mxu1  ;;  %v5385_v17 = vpop.f32.mrb[49].mxu0 }
 0x27c   : > { %v5405_v18 = vpop.f32.mrb[49].mxu1  ;;  %v2955_v19 = vpop.f32.mrb[50].mxu0 }
 0x27d   : > { %v3063_v22 = vadd.f32 %v3057_v15, %v2958_v14  ;;  %v3060_v23 = vpop.f32.mrb[50].mxu1  ;;  %v5386_v24 = vpop.f32.mrb[51].mxu0 }
 0x27e   : > { %v5406_v25 = vpop.f32.mrb[51].mxu1 }
 0x29a   : > { %v3162_v26 = vpop.f32.mrb[52].mxu0 }
 0x29b   : > { %v3168_v13 = vadd.f32 %v3162_v26, %v3063_v22  ;;  %v3267_v28 = vpop.f32.mrb[52].mxu1  ;;  %v5425_v27 = vpop.f32.mrb[53].mxu0 }
 0x29c   : > { %v5445_v29 = vpop.f32.mrb[53].mxu1  ;;  %v3165_v30 = vpop.f32.mrb[54].mxu0 }
 0x29d   : > { %v3273_v31 = vadd.f32 %v3267_v28, %v3168_v13  ;;  %v3270_v32 = vpop.f32.mrb[54].mxu1  ;;  %v5426_v33 = vpop.f32.mrb[55].mxu0 }
 0x29e   : > { %v5446_v45 = vpop.f32.mrb[55].mxu1 }
 0x2ba   : > { %v3372_v34 = vpop.f32.mrb[56].mxu0 }
 0x2bb   : > { %v3378_v0 = vadd.f32 %v3372_v34, %v3273_v31  ;;  %v3488_v36 = vpop.f32.mrb[56].mxu1  ;;  %v5465_v37 = vpop.f32.mrb[57].mxu0 }
 0x2bc   : > { %v5485_v38 = vpop.f32.mrb[57].mxu1  ;;  %v3375_v39 = vpop.f32.mrb[58].mxu0 }
 0x2bd   : > { %v3494_v40 = vadd.f32 %v3488_v36, %v3378_v0  ;;  %v3491_v41 = vpop.f32.mrb[58].mxu1  ;;  %v5466_v42 = vpop.f32.mrb[59].mxu0 }
 0x2be   : > { %v5486_v43 = vpop.f32.mrb[59].mxu1 }
 0x2da   : > { %v3595_v44 = vpop.f32.mrb[60].mxu0 }
 0x2db   : > { %v3601_v46 = vadd.f32 %v3595_v44, %v3494_v40  ;;  %v3704_v47 = vpop.f32.mrb[60].mxu1  ;;  %v5505_v48 = vpop.f32.mrb[61].mxu0 }
 0x2dc   : > { %v5525_v49 = vpop.f32.mrb[61].mxu1  ;;  %v3598_v50 = vpop.f32.mrb[62].mxu0 }
 0x2dd   : > { %v3710_v51 = vadd.f32 %v3704_v47, %v3601_v46  ;;  %v3707_v16 = vpop.f32.mrb[62].mxu1  ;;  %v5506_v57 = vpop.f32.mrb[63].mxu0 }
 0x2de   : > { %v5526_v58 = vpop.f32.mrb[63].mxu1 }
 0x2df   : > { %v3718_v52 = vadd.f32 %v6983_v63, %v3710_v51 }
 0x2e1   : > { %4595 = vst [vmem:[%s6996_s10 + $0x2] sm:$0x3] %v3718_v52 }
 0x2e2 PF: > { %s13_s14 = sadd.s32 1, %s5839_s14   ;;  %s7102_s12 = smov %s5835_s13 }
 0x2e3   : > { %p10_p5 = scmp.ge.s32.totalorder %s13_s14, 4   ;;  %s7103_s13 = smov %s7105_s15 }
 0x2e5   :  { %12 = sbr.rel (!%p10_p5) target bundleno = 2 (0x2), region = 84 }

</bundles_post_ra>
